<compile_context>
chip_gen: v6e
topology: v6e:2x2x1
jax: 0.10.0
libtpu: 0.0.40
codegen_flags: <defaults>
</compile_context>

<pallas_src>
import functools

import numpy as np

import jax
import jax.numpy as jnp
from jax.experimental import pallas as pl
from jax.experimental.pallas import tpu as pltpu


# -----------------------------------------------------------------------------
# Geometry of the spatially-flattened, zero-padded activation slab.
#
# Per image the slab rows are
#   [0, G)           : zero guard (contains the top SAME-padding row)
#   [G, G + H*Wp)    : computed block, one row per padded (h', w') position
#                      with h' in [1, H], w' in [0, Wp),  Wp = W + 2
#   [G + H*Wp, R1)   : zero guard (contains the bottom SAME-padding row)
# G, GB >= Wp + 1 so every 3x3 tap row-shift (at most Wp + 1) stays inside the
# image's own region; G and R1 are multiples of 8 so interior stores are
# sublane-aligned.  Lanes of a slab are the channels.
# -----------------------------------------------------------------------------
def _geometry(H, W):
    wp = W + 2
    g = ((wp + 1 + 7) // 8) * 8            # top guard rows (8-aligned)
    body = H * wp                          # computed rows per image
    r1 = ((g + body + g + 7) // 8) * 8     # per-image slab rows (8-aligned)
    gb = r1 - g - body                     # bottom guard rows (>= g >= wp+1)
    return wp, g, gb, body, r1


# -----------------------------------------------------------------------------
# Fused kernel: conv1 + ReLU + conv2 + ReLU + conv_out, one image block / step.
# -----------------------------------------------------------------------------
def _fused_regression_kernel(x_ref, w1_ref, b1_ref, w2_ref, b2_ref,
                             wo_ref, bo_ref, mask_ref, o_ref,
                             a1_ref, a2_ref, *, G, GB, WP, M):
    """x_ref : (b_blk*R1, Cin_pad) f32   padded input slab (host-built zeros halo)
       w*_ref: (9, Cin_l, Cout_l)        per-tap weights (t = dy*3 + dx)
       b*_ref: (1, Cout_l) f32           bias
       mask  : (M, 1) f32                1 on real output rows, 0 on padding /
                                         inter-image guard rows
       o_ref : (b_blk*R1, Cout) f32      output slab (valid rows sliced by wrapper)
       a1_ref: (b_blk*R1, F) bf16        relu(conv1), conv2's MXU operand
       a2_ref: (b_blk*R1, F) f32         relu(conv2), head input kept in f32
    """
    F = a1_ref.shape[1]
    Cout = o_ref.shape[1]

    # Halo-only zeroing: just the guard rows (interiors are overwritten below).
    a1_ref[0:G, :] = jnp.zeros((G, F), a1_ref.dtype)
    a1_ref[G + M:G + M + GB, :] = jnp.zeros((GB, F), a1_ref.dtype)
    a2_ref[0:G, :] = jnp.zeros((G, F), a2_ref.dtype)
    a2_ref[G + M:G + M + GB, :] = jnp.zeros((GB, F), a2_ref.dtype)

    valid = mask_ref[...] != 0.0                      # (M, 1), lane-broadcast

    def conv3x3(src_ref, w_ref, b_ref, relu, masked):
        cout = w_ref.shape[2]
        acc = jnp.zeros((M, cout), jnp.float32)
        for dy in range(3):
            for dx in range(3):
                s = (dy - 1) * WP + (dx - 1)          # static row shift
                acc = acc + jnp.dot(src_ref[G + s:G + s + M, :],
                                    w_ref[dy * 3 + dx],
                                    preferred_element_type=jnp.float32)
        acc = acc + b_ref[...]
        if relu:
            acc = jnp.maximum(acc, 0.0)
        if masked:
            # Zero the left/right SAME-padding rows (and inter-image guards)
            # so they act as genuine zero padding for the next conv.
            acc = jnp.where(valid, acc, 0.0)
        return acc

    # conv1 -> ReLU   (f32 x f32, tiny K = Cin)
    a1 = conv3x3(x_ref, w1_ref, b1_ref, relu=True, masked=True)
    a1_ref[G:G + M, :] = a1.astype(a1_ref.dtype)      # aligned, full-width store

    # conv2 -> ReLU   (bf16 x bf16 on the MXU - the dominant F x F matmuls)
    a2 = conv3x3(a1_ref, w2_ref, b2_ref, relu=True, masked=True)
    a2_ref[G:G + M, :] = a2                           # head input stays f32

    # conv_out (no ReLU); garbage rows are discarded by the wrapper slice.
    out = conv3x3(a2_ref, wo_ref, bo_ref, relu=False, masked=False)
    o_ref[0:G, :] = jnp.zeros((G, Cout), o_ref.dtype)
    o_ref[G:G + M, :] = out.astype(o_ref.dtype)
    o_ref[G + M:G + M + GB, :] = jnp.zeros((GB, Cout), o_ref.dtype)


# -----------------------------------------------------------------------------
# Helpers: grid-invariant (single-buffered) specs, validity mask, weight pack.
# -----------------------------------------------------------------------------
def _const_spec(shape):
    """BlockSpec for a grid-invariant operand: full-array block, fetched once;
    single-buffered (pipeline_mode=Buffered(1)) to halve its VMEM footprint."""
    ndim = len(shape)
    index_map = lambda n: (0,) * ndim
    try:
        return pl.BlockSpec(shape, index_map,
                            pipeline_mode=pl.Buffered(buffer_count=1))
    except (TypeError, AttributeError):   # older JAX without pipeline_mode
        return pl.BlockSpec(shape, index_map)


def _build_mask(b_blk, r1, g, gb, H, W, wp):
    """(M, 1) f32: 1 on rows that are real (h, w) output positions."""
    m = b_blk * r1 - g - gb
    rows = np.arange(m) + g              # stacked-slab row index
    p = rows % r1                        # row within the image's region
    q = p - g
    w_of_row = q % wp
    valid = (q >= 0) & (q < H * wp) & (w_of_row >= 1) & (w_of_row <= W)
    return jnp.asarray(valid.astype(np.float32).reshape(m, 1))


def pack_params(params):
    """HWIO (3,3,Cin,Cout) -> per-tap (9,Cin,Cout) weights + (1,Cout) biases.

    O(9*Cin*Cout) weight memory (vs the banded O(W^2*Cin*Cout) of the previous
    version, which cannot fit v7x VMEM at feature_size=256).  conv1's K dim is
    zero-padded up to a sublane multiple; conv2 weights are bf16 MXU operands.
    """
    def taps(w, k_pad, dtype):
        kh, kw, cin, cout = w.shape
        t = w.reshape(kh * kw, cin, cout)
        if k_pad:
            t = jnp.pad(t, ((0, 0), (0, k_pad), (0, 0)))
        return t.astype(dtype)

    cin = params["w1"].shape[2]
    k_pad1 = (-cin) % 8
    return {
        "w1": taps(params["w1"], k_pad1, jnp.float32),
        "w2": taps(params["w2"], 0, jnp.bfloat16),
        "wo": taps(params["wo"], 0, jnp.float32),
        "b1": params["b1"].reshape(1, -1).astype(jnp.float32),
        "b2": params["b2"].reshape(1, -1).astype(jnp.float32),
        "bo": params["bo"].reshape(1, -1).astype(jnp.float32),
    }


# -----------------------------------------------------------------------------
# Forward pass wrapper.
# -----------------------------------------------------------------------------
@functools.partial(jax.jit, static_argnames=("b_blk",))
def regression_model_forward(x_nchw, packed, *, b_blk=1):
    """Semantics of RegressionModel.forward on an NCHW input."""
    N, Cin, H, W = x_nchw.shape
    F = packed["b1"].shape[-1]
    Cout = packed["bo"].shape[-1]          # num_anchor_points * 2
    A = Cout // 2
    cin_pad = packed["w1"].shape[1]
    assert N % b_blk == 0 and cin_pad >= Cin

    WP, G, GB, BODY, R1 = _geometry(H, W)
    steps = N // b_blk
    rows_per_step = b_blk * R1
    M = rows_per_step - G - GB             # rows computed per grid step

    # Layout plumbing (cheap XLA ops): NCHW -> zero-padded, spatially-flattened
    # slab (N*R1, Cin_pad); rows = (image, padded h, padded w), lanes = channels.
    x = jnp.transpose(x_nchw, (0, 2, 3, 1))                     # NHWC
    x = jnp.pad(x, ((0, 0), (1, 1), (1, 1), (0, 0)))            # spatial SAME pad
    x = x.reshape(N, (H + 2) * WP, Cin)
    x = jnp.pad(x, ((0, 0), (G - WP, GB - WP), (0, 0)))         # guard rows
    x = x.reshape(N * R1, Cin)
    if cin_pad > Cin:
        x = jnp.pad(x, ((0, 0), (0, cin_pad - Cin)))            # K pad for conv1
    x = x.astype(jnp.float32)

    mvalid = _build_mask(b_blk, R1, G, GB, H, W, WP)            # (M, 1) const

    kern = functools.partial(_fused_regression_kernel,
                             G=G, GB=GB, WP=WP, M=M)

    # Advisory cost: actual per-tap MXU work (no banded over-count), weights
    # counted once (grid-invariant), activations never touch HBM.
    param_bytes = sum(int(v.size) * v.dtype.itemsize for v in packed.values())
    flops = 2 * steps * M * 9 * (cin_pad * F + F * F + F * Cout)
    bytes_accessed = int(x.size * 4 + N * R1 * Cout * 4
                         + param_bytes + mvalid.size * 4)

    # Explicit VMEM budget: double-buffered x/out blocks, single-buffered
    # weights/bias/mask, two activation slabs, plus compiler headroom.
    vmem_est = (2 * rows_per_step * cin_pad * 4
                + 2 * rows_per_step * Cout * 4
                + rows_per_step * F * (2 + 4)
                + param_bytes + mvalid.size * 4)
    vmem_limit = int(min(100 * 1024 * 1024,
                         max(2 * vmem_est + (4 << 20), 16 << 20)))

    out = pl.pallas_call(
        kern,
        out_shape=jax.ShapeDtypeStruct((N * R1, Cout), jnp.float32),
        grid=(steps,),
        in_specs=[
            pl.BlockSpec((rows_per_step, cin_pad), lambda n: (n, 0)),
            _const_spec((9, cin_pad, F)),
            _const_spec((1, F)),
            _const_spec((9, F, F)),
            _const_spec((1, F)),
            _const_spec((9, F, Cout)),
            _const_spec((1, Cout)),
            _const_spec((M, 1)),
        ],
        out_specs=pl.BlockSpec((rows_per_step, Cout), lambda n: (n, 0)),
        scratch_shapes=[
            pltpu.VMEM((rows_per_step, F), jnp.bfloat16),   # a1 (conv2 operand)
            pltpu.VMEM((rows_per_step, F), jnp.float32),    # a2 (head input)
        ],
        compiler_params=pltpu.CompilerParams(
            dimension_semantics=("parallel",),
            vmem_limit_bytes=vmem_limit),
        cost_estimate=pl.CostEstimate(flops=flops, transcendentals=0,
                                      bytes_accessed=bytes_accessed),
    )(x, packed["w1"], packed["b1"], packed["w2"], packed["b2"],
      packed["wo"], packed["bo"], mvalid)

    # Slice the valid (h, w) rows; matches permute(0,2,3,1).view(N, -1, 2).
    out = out.reshape(N, R1, Cout)[:, G:G + H * WP, :]
    out = out.reshape(N, H, WP, Cout)[:, :, 1:W + 1, :]
    return out.reshape(N, H * W * A, 2)


# -----------------------------------------------------------------------------
# Parameter init (HWIO layout) and pure-JAX reference.
# -----------------------------------------------------------------------------
def init_params(key, num_features_in, num_anchor_points=4, feature_size=32):
    """Deterministic synthetic parameter init (HWIO weight layout)."""
    ks = jax.random.split(key, 10)

    def winit(k, cin, cout):
        return (jax.random.normal(k, (3, 3, cin, cout), jnp.float32)
                * (1.0 / jnp.sqrt(9.0 * cin)))

    def binit(k, cout):
        return jax.random.normal(k, (cout,), jnp.float32) * 0.01

    cout_final = num_anchor_points * 2
    return {
        "w1": winit(ks[0], num_features_in, feature_size), "b1": binit(ks[1], feature_size),
        "w2": winit(ks[2], feature_size, feature_size),    "b2": binit(ks[3], feature_size),
        # conv3 / conv4: present in __init__ but unused by forward()
        "w3": winit(ks[4], feature_size, feature_size),    "b3": binit(ks[5], feature_size),
        "w4": winit(ks[6], feature_size, feature_size),    "b4": binit(ks[7], feature_size),
        "wo": winit(ks[8], feature_size, cout_final),      "bo": binit(ks[9], cout_final),
    }


def _reference_forward(x_nchw, params):
    """Pure-JAX reference (lax conv, f32) for correctness checking."""
    x = jnp.transpose(x_nchw, (0, 2, 3, 1))

    def conv(x, w, b, relu):
        y = jax.lax.conv_general_dilated(
            x, w, window_strides=(1, 1), padding="SAME",
            dimension_numbers=("NHWC", "HWIO", "NHWC")) + b
        return jnp.maximum(y, 0.0) if relu else y

    out = conv(x,   params["w1"], params["b1"], True)
    out = conv(out, params["w2"], params["b2"], True)
    out = conv(out, params["wo"], params["bo"], False)
    return out.reshape(out.shape[0], -1, 2)


if __name__ == "__main__":
    key = jax.random.PRNGKey(0)
    k_x, k_p = jax.random.split(key)

    N, C_in, H, W = 2, 4, 16, 16
    num_anchor_points = 4
    feature_size = 32  # small stand-in for the default 256

    x = jax.random.normal(k_x, (N, C_in, H, W), jnp.float32)  # NCHW, like PyTorch
    params = init_params(k_p, C_in, num_anchor_points, feature_size)
    packed = pack_params(params)

    ref = _reference_forward(x, params)
    expected_shape = (N, H * W * num_anchor_points, 2)

    # b_blk=1: grid has N parallel steps (keeps both v7x TensorCores busy);
    # each per-tap matmul already has M = H*(W+2) = 288 rows.
    out = jax.block_until_ready(regression_model_forward(x, packed, b_blk=1))
    assert out.shape == expected_shape, (out.shape, expected_shape)
    err = float(jnp.max(jnp.abs(out - ref)))
    # a1 is the only bf16 round-trip (f32 accumulation everywhere).
    assert jnp.allclose(out, ref, atol=5e-2, rtol=5e-2), \
        f"b_blk=1 mismatch vs reference (max abs err {err})"

    # b_blk=2: batch fold -- both images stacked into one M=624-row slab.
    out2 = jax.block_until_ready(regression_model_forward(x, packed, b_blk=2))
    assert out2.shape == expected_shape, (out2.shape, expected_shape)
    err2 = float(jnp.max(jnp.abs(out2 - ref)))
    assert jnp.allclose(out2, ref, atol=5e-2, rtol=5e-2), \
        f"b_blk=2 mismatch vs reference (max abs err {err2})"

    print("KERNEL_OK")
</pallas_src>

<mosaic_0001>
module attributes {stable_mosaic.version = 11 : i64} {
  func.func @_fused_regression_kernel(%arg0: i32, %arg1: memref<336x8xf32, #tpu.memory_space<vmem>>, %arg2: memref<9x8x32xf32, #tpu.memory_space<vmem>>, %arg3: memref<1x32xf32, #tpu.memory_space<vmem>>, %arg4: memref<9x32x32xbf16, #tpu.memory_space<vmem>>, %arg5: memref<1x32xf32, #tpu.memory_space<vmem>>, %arg6: memref<9x32x8xf32, #tpu.memory_space<vmem>>, %arg7: memref<1x8xf32, #tpu.memory_space<vmem>>, %arg8: memref<288x1xf32, #tpu.memory_space<vmem>>, %arg9: memref<336x8xf32, #tpu.memory_space<vmem>>, %arg10: memref<336x32xbf16, #tpu.memory_space<vmem>>, %arg11: memref<336x32xf32, #tpu.memory_space<vmem>>) attributes {dimension_semantics = [#tpu.dimension_semantics<parallel>], iteration_bounds = array<i64: 2>, scalar_prefetch = 0 : i64, scratch_operands = 2 : i64, tpu.core_type = #tpu.core_type<tc>, window_params = [{transform_indices = @transform_0, window_bounds = array<i64: 336, 8>}, {pipeline_mode = #tpu.pipeline_mode<synchronous>, transform_indices = @transform_1, window_bounds = array<i64: 9, 8, 32>}, {pipeline_mode = #tpu.pipeline_mode<synchronous>, transform_indices = @transform_2, window_bounds = array<i64: 1, 32>}, {pipeline_mode = #tpu.pipeline_mode<synchronous>, transform_indices = @transform_3, window_bounds = array<i64: 9, 32, 32>}, {pipeline_mode = #tpu.pipeline_mode<synchronous>, transform_indices = @transform_4, window_bounds = array<i64: 1, 32>}, {pipeline_mode = #tpu.pipeline_mode<synchronous>, transform_indices = @transform_5, window_bounds = array<i64: 9, 32, 8>}, {pipeline_mode = #tpu.pipeline_mode<synchronous>, transform_indices = @transform_6, window_bounds = array<i64: 1, 8>}, {pipeline_mode = #tpu.pipeline_mode<synchronous>, transform_indices = @transform_7, window_bounds = array<i64: 288, 1>}, {transform_indices = @transform_8, window_bounds = array<i64: 336, 8>}]} {
    %cst = arith.constant 0.000000e+00 : bf16
    %0 = vector.broadcast %cst : bf16 to vector<24x32xbf16>
    %c0 = arith.constant 0 : index
    %c0_0 = arith.constant 0 : index
    %1 = vector.load %arg10[%c0, %c0_0] : memref<336x32xbf16, #tpu.memory_space<vmem>>, vector<24x32xbf16>
    tpu.vector_store %arg10[%c0, %c0_0], %0 {strides = array<i32>} : memref<336x32xbf16, #tpu.memory_space<vmem>>, vector<24x32xbf16>,
    %cst_1 = arith.constant 0.000000e+00 : bf16
    %2 = vector.broadcast %cst_1 : bf16 to vector<24x32xbf16>
    %c312 = arith.constant 312 : index
    %c0_2 = arith.constant 0 : index
    %3 = vector.load %arg10[%c312, %c0_2] : memref<336x32xbf16, #tpu.memory_space<vmem>>, vector<24x32xbf16>
    tpu.vector_store %arg10[%c312, %c0_2], %2 {strides = array<i32>} : memref<336x32xbf16, #tpu.memory_space<vmem>>, vector<24x32xbf16>,
    %cst_3 = arith.constant 0.000000e+00 : f32
    %4 = vector.broadcast %cst_3 : f32 to vector<24x32xf32>
    %c0_4 = arith.constant 0 : index
    %c0_5 = arith.constant 0 : index
    %5 = vector.load %arg11[%c0_4, %c0_5] : memref<336x32xf32, #tpu.memory_space<vmem>>, vector<24x32xf32>
    tpu.vector_store %arg11[%c0_4, %c0_5], %4 {strides = array<i32>} : memref<336x32xf32, #tpu.memory_space<vmem>>, vector<24x32xf32>,
    %cst_6 = arith.constant 0.000000e+00 : f32
    %6 = vector.broadcast %cst_6 : f32 to vector<24x32xf32>
    %c312_7 = arith.constant 312 : index
    %c0_8 = arith.constant 0 : index
    %7 = vector.load %arg11[%c312_7, %c0_8] : memref<336x32xf32, #tpu.memory_space<vmem>>, vector<24x32xf32>
    tpu.vector_store %arg11[%c312_7, %c0_8], %6 {strides = array<i32>} : memref<336x32xf32, #tpu.memory_space<vmem>>, vector<24x32xf32>,
    %c0_9 = arith.constant 0 : index
    %c0_10 = arith.constant 0 : index
    %8 = vector.load %arg8[%c0_9, %c0_10] : memref<288x1xf32, #tpu.memory_space<vmem>>, vector<288x1xf32>
    %cst_11 = arith.constant 0.000000e+00 : f32
    %9 = vector.broadcast %cst_11 : f32 to vector<288x1xf32>
    %10 = arith.cmpf one, %8, %9 : vector<288x1xf32>
    %cst_12 = arith.constant 0.000000e+00 : f32
    %11 = vector.broadcast %cst_12 : f32 to vector<288x32xf32>
    %c5 = arith.constant 5 : index
    %c0_13 = arith.constant 0 : index
    %12 = vector.load %arg1[%c5, %c0_13] : memref<336x8xf32, #tpu.memory_space<vmem>>, vector<288x8xf32>
    %c0_14 = arith.constant 0 : index
    %c0_15 = arith.constant 0 : index
    %c0_16 = arith.constant 0 : index
    %13 = vector.load %arg2[%c0_14, %c0_15, %c0_16] : memref<9x8x32xf32, #tpu.memory_space<vmem>>, vector<1x8x32xf32>
    %14 = vector.shape_cast %13 : vector<1x8x32xf32> to vector<8x32xf32>
    %cst_17 = arith.constant dense<0.000000e+00> : vector<288x32xf32>
    %15 = tpu.matmul %12, %14, %cst_17 {dimension_numbers = #tpu.dot_dimension_numbers<[1], [0], [0], [1], [0, 0, 1, 1], [], []>} : vector<288x8xf32>, vector<8x32xf32>, vector<288x32xf32> -> vector<288x32xf32>
    %16 = arith.addf %11, %15 : vector<288x32xf32>
    %c6 = arith.constant 6 : index
    %c0_18 = arith.constant 0 : index
    %17 = vector.load %arg1[%c6, %c0_18] : memref<336x8xf32, #tpu.memory_space<vmem>>, vector<288x8xf32>
    %c1 = arith.constant 1 : index
    %c0_19 = arith.constant 0 : index
    %c0_20 = arith.constant 0 : index
    %18 = vector.load %arg2[%c1, %c0_19, %c0_20] : memref<9x8x32xf32, #tpu.memory_space<vmem>>, vector<1x8x32xf32>
    %19 = vector.shape_cast %18 : vector<1x8x32xf32> to vector<8x32xf32>
    %cst_21 = arith.constant dense<0.000000e+00> : vector<288x32xf32>
    %20 = tpu.matmul %17, %19, %cst_21 {dimension_numbers = #tpu.dot_dimension_numbers<[1], [0], [0], [1], [0, 0, 1, 1], [], []>} : vector<288x8xf32>, vector<8x32xf32>, vector<288x32xf32> -> vector<288x32xf32>
    %21 = arith.addf %16, %20 : vector<288x32xf32>
    %c7 = arith.constant 7 : index
    %c0_22 = arith.constant 0 : index
    %22 = vector.load %arg1[%c7, %c0_22] : memref<336x8xf32, #tpu.memory_space<vmem>>, vector<288x8xf32>
    %c2 = arith.constant 2 : index
    %c0_23 = arith.constant 0 : index
    %c0_24 = arith.constant 0 : index
    %23 = vector.load %arg2[%c2, %c0_23, %c0_24] : memref<9x8x32xf32, #tpu.memory_space<vmem>>, vector<1x8x32xf32>
    %24 = vector.shape_cast %23 : vector<1x8x32xf32> to vector<8x32xf32>
    %cst_25 = arith.constant dense<0.000000e+00> : vector<288x32xf32>
    %25 = tpu.matmul %22, %24, %cst_25 {dimension_numbers = #tpu.dot_dimension_numbers<[1], [0], [0], [1], [0, 0, 1, 1], [], []>} : vector<288x8xf32>, vector<8x32xf32>, vector<288x32xf32> -> vector<288x32xf32>
    %26 = arith.addf %21, %25 : vector<288x32xf32>
    %c23 = arith.constant 23 : index
    %c0_26 = arith.constant 0 : index
    %27 = vector.load %arg1[%c23, %c0_26] : memref<336x8xf32, #tpu.memory_space<vmem>>, vector<288x8xf32>
    %c3 = arith.constant 3 : index
    %c0_27 = arith.constant 0 : index
    %c0_28 = arith.constant 0 : index
    %28 = vector.load %arg2[%c3, %c0_27, %c0_28] : memref<9x8x32xf32, #tpu.memory_space<vmem>>, vector<1x8x32xf32>
    %29 = vector.shape_cast %28 : vector<1x8x32xf32> to vector<8x32xf32>
    %cst_29 = arith.constant dense<0.000000e+00> : vector<288x32xf32>
    %30 = tpu.matmul %27, %29, %cst_29 {dimension_numbers = #tpu.dot_dimension_numbers<[1], [0], [0], [1], [0, 0, 1, 1], [], []>} : vector<288x8xf32>, vector<8x32xf32>, vector<288x32xf32> -> vector<288x32xf32>
    %31 = arith.addf %26, %30 : vector<288x32xf32>
    %c24 = arith.constant 24 : index
    %c0_30 = arith.constant 0 : index
    %32 = vector.load %arg1[%c24, %c0_30] : memref<336x8xf32, #tpu.memory_space<vmem>>, vector<288x8xf32>
    %c4 = arith.constant 4 : index
    %c0_31 = arith.constant 0 : index
    %c0_32 = arith.constant 0 : index
    %33 = vector.load %arg2[%c4, %c0_31, %c0_32] : memref<9x8x32xf32, #tpu.memory_space<vmem>>, vector<1x8x32xf32>
    %34 = vector.shape_cast %33 : vector<1x8x32xf32> to vector<8x32xf32>
    %cst_33 = arith.constant dense<0.000000e+00> : vector<288x32xf32>
    %35 = tpu.matmul %32, %34, %cst_33 {dimension_numbers = #tpu.dot_dimension_numbers<[1], [0], [0], [1], [0, 0, 1, 1], [], []>} : vector<288x8xf32>, vector<8x32xf32>, vector<288x32xf32> -> vector<288x32xf32>
    %36 = arith.addf %31, %35 : vector<288x32xf32>
    %c25 = arith.constant 25 : index
    %c0_34 = arith.constant 0 : index
    %37 = vector.load %arg1[%c25, %c0_34] : memref<336x8xf32, #tpu.memory_space<vmem>>, vector<288x8xf32>
    %c5_35 = arith.constant 5 : index
    %c0_36 = arith.constant 0 : index
    %c0_37 = arith.constant 0 : index
    %38 = vector.load %arg2[%c5_35, %c0_36, %c0_37] : memref<9x8x32xf32, #tpu.memory_space<vmem>>, vector<1x8x32xf32>
    %39 = vector.shape_cast %38 : vector<1x8x32xf32> to vector<8x32xf32>
    %cst_38 = arith.constant dense<0.000000e+00> : vector<288x32xf32>
    %40 = tpu.matmul %37, %39, %cst_38 {dimension_numbers = #tpu.dot_dimension_numbers<[1], [0], [0], [1], [0, 0, 1, 1], [], []>} : vector<288x8xf32>, vector<8x32xf32>, vector<288x32xf32> -> vector<288x32xf32>
    %41 = arith.addf %36, %40 : vector<288x32xf32>
    %c41 = arith.constant 41 : index
    %c0_39 = arith.constant 0 : index
    %42 = vector.load %arg1[%c41, %c0_39] : memref<336x8xf32, #tpu.memory_space<vmem>>, vector<288x8xf32>
    %c6_40 = arith.constant 6 : index
    %c0_41 = arith.constant 0 : index
    %c0_42 = arith.constant 0 : index
    %43 = vector.load %arg2[%c6_40, %c0_41, %c0_42] : memref<9x8x32xf32, #tpu.memory_space<vmem>>, vector<1x8x32xf32>
    %44 = vector.shape_cast %43 : vector<1x8x32xf32> to vector<8x32xf32>
    %cst_43 = arith.constant dense<0.000000e+00> : vector<288x32xf32>
    %45 = tpu.matmul %42, %44, %cst_43 {dimension_numbers = #tpu.dot_dimension_numbers<[1], [0], [0], [1], [0, 0, 1, 1], [], []>} : vector<288x8xf32>, vector<8x32xf32>, vector<288x32xf32> -> vector<288x32xf32>
    %46 = arith.addf %41, %45 : vector<288x32xf32>
    %c42 = arith.constant 42 : index
    %c0_44 = arith.constant 0 : index
    %47 = vector.load %arg1[%c42, %c0_44] : memref<336x8xf32, #tpu.memory_space<vmem>>, vector<288x8xf32>
    %c7_45 = arith.constant 7 : index
    %c0_46 = arith.constant 0 : index
    %c0_47 = arith.constant 0 : index
    %48 = vector.load %arg2[%c7_45, %c0_46, %c0_47] : memref<9x8x32xf32, #tpu.memory_space<vmem>>, vector<1x8x32xf32>
    %49 = vector.shape_cast %48 : vector<1x8x32xf32> to vector<8x32xf32>
    %cst_48 = arith.constant dense<0.000000e+00> : vector<288x32xf32>
    %50 = tpu.matmul %47, %49, %cst_48 {dimension_numbers = #tpu.dot_dimension_numbers<[1], [0], [0], [1], [0, 0, 1, 1], [], []>} : vector<288x8xf32>, vector<8x32xf32>, vector<288x32xf32> -> vector<288x32xf32>
    %51 = arith.addf %46, %50 : vector<288x32xf32>
    %c43 = arith.constant 43 : index
    %c0_49 = arith.constant 0 : index
    %52 = vector.load %arg1[%c43, %c0_49] : memref<336x8xf32, #tpu.memory_space<vmem>>, vector<288x8xf32>
    %c8 = arith.constant 8 : index
    %c0_50 = arith.constant 0 : index
    %c0_51 = arith.constant 0 : index
    %53 = vector.load %arg2[%c8, %c0_50, %c0_51] : memref<9x8x32xf32, #tpu.memory_space<vmem>>, vector<1x8x32xf32>
    %54 = vector.shape_cast %53 : vector<1x8x32xf32> to vector<8x32xf32>
    %cst_52 = arith.constant dense<0.000000e+00> : vector<288x32xf32>
    %55 = tpu.matmul %52, %54, %cst_52 {dimension_numbers = #tpu.dot_dimension_numbers<[1], [0], [0], [1], [0, 0, 1, 1], [], []>} : vector<288x8xf32>, vector<8x32xf32>, vector<288x32xf32> -> vector<288x32xf32>
    %56 = arith.addf %51, %55 : vector<288x32xf32>
    %c0_53 = arith.constant 0 : index
    %c0_54 = arith.constant 0 : index
    %57 = vector.load %arg3[%c0_53, %c0_54] : memref<1x32xf32, #tpu.memory_space<vmem>>, vector<1x32xf32>
    %58 = vector.broadcast %57 : vector<1x32xf32> to vector<288x32xf32>
    %59 = arith.addf %56, %58 : vector<288x32xf32>
    %cst_55 = arith.constant 0.000000e+00 : f32
    %60 = vector.broadcast %cst_55 : f32 to vector<288x32xf32>
    %61 = arith.maximumf %59, %60 : vector<288x32xf32>
    %cst_56 = arith.constant 0.000000e+00 : f32
    %62 = vector.shape_cast %10 : vector<288x1xi1> to vector<288x1xi1>
    %63 = vector.broadcast %62 : vector<288x1xi1> to vector<288x32xi1>
    %64 = vector.broadcast %cst_56 : f32 to vector<288x32xf32>
    %65 = arith.select %63, %61, %64 : vector<288x32xi1>, vector<288x32xf32>
    %66 = arith.truncf %65 : vector<288x32xf32> to vector<288x32xbf16>
    %c24_57 = arith.constant 24 : index
    %c0_58 = arith.constant 0 : index
    %67 = vector.load %arg10[%c24_57, %c0_58] : memref<336x32xbf16, #tpu.memory_space<vmem>>, vector<288x32xbf16>
    tpu.vector_store %arg10[%c24_57, %c0_58], %66 {strides = array<i32>} : memref<336x32xbf16, #tpu.memory_space<vmem>>, vector<288x32xbf16>,
    %cst_59 = arith.constant 0.000000e+00 : f32
    %68 = vector.broadcast %cst_59 : f32 to vector<288x32xf32>
    %c5_60 = arith.constant 5 : index
    %c0_61 = arith.constant 0 : index
    %69 = vector.load %arg10[%c5_60, %c0_61] : memref<336x32xbf16, #tpu.memory_space<vmem>>, vector<288x32xbf16>
    %c0_62 = arith.constant 0 : index
    %c0_63 = arith.constant 0 : index
    %c0_64 = arith.constant 0 : index
    %70 = vector.load %arg4[%c0_62, %c0_63, %c0_64] : memref<9x32x32xbf16, #tpu.memory_space<vmem>>, vector<1x32x32xbf16>
    %71 = vector.shape_cast %70 : vector<1x32x32xbf16> to vector<32x32xbf16>
    %cst_65 = arith.constant dense<0.000000e+00> : vector<288x32xf32>
    %72 = tpu.matmul %69, %71, %cst_65 {dimension_numbers = #tpu.dot_dimension_numbers<[1], [0], [0], [1], [0, 0, 1, 1], [], []>} : vector<288x32xbf16>, vector<32x32xbf16>, vector<288x32xf32> -> vector<288x32xf32>
    %73 = arith.addf %68, %72 : vector<288x32xf32>
    %c6_66 = arith.constant 6 : index
    %c0_67 = arith.constant 0 : index
    %74 = vector.load %arg10[%c6_66, %c0_67] : memref<336x32xbf16, #tpu.memory_space<vmem>>, vector<288x32xbf16>
    %c1_68 = arith.constant 1 : index
    %c0_69 = arith.constant 0 : index
    %c0_70 = arith.constant 0 : index
    %75 = vector.load %arg4[%c1_68, %c0_69, %c0_70] : memref<9x32x32xbf16, #tpu.memory_space<vmem>>, vector<1x32x32xbf16>
    %76 = vector.shape_cast %75 : vector<1x32x32xbf16> to vector<32x32xbf16>
    %cst_71 = arith.constant dense<0.000000e+00> : vector<288x32xf32>
    %77 = tpu.matmul %74, %76, %cst_71 {dimension_numbers = #tpu.dot_dimension_numbers<[1], [0], [0], [1], [0, 0, 1, 1], [], []>} : vector<288x32xbf16>, vector<32x32xbf16>, vector<288x32xf32> -> vector<288x32xf32>
    %78 = arith.addf %73, %77 : vector<288x32xf32>
    %c7_72 = arith.constant 7 : index
    %c0_73 = arith.constant 0 : index
    %79 = vector.load %arg10[%c7_72, %c0_73] : memref<336x32xbf16, #tpu.memory_space<vmem>>, vector<288x32xbf16>
    %c2_74 = arith.constant 2 : index
    %c0_75 = arith.constant 0 : index
    %c0_76 = arith.constant 0 : index
    %80 = vector.load %arg4[%c2_74, %c0_75, %c0_76] : memref<9x32x32xbf16, #tpu.memory_space<vmem>>, vector<1x32x32xbf16>
    %81 = vector.shape_cast %80 : vector<1x32x32xbf16> to vector<32x32xbf16>
    %cst_77 = arith.constant dense<0.000000e+00> : vector<288x32xf32>
    %82 = tpu.matmul %79, %81, %cst_77 {dimension_numbers = #tpu.dot_dimension_numbers<[1], [0], [0], [1], [0, 0, 1, 1], [], []>} : vector<288x32xbf16>, vector<32x32xbf16>, vector<288x32xf32> -> vector<288x32xf32>
    %83 = arith.addf %78, %82 : vector<288x32xf32>
    %c23_78 = arith.constant 23 : index
    %c0_79 = arith.constant 0 : index
    %84 = vector.load %arg10[%c23_78, %c0_79] : memref<336x32xbf16, #tpu.memory_space<vmem>>, vector<288x32xbf16>
    %c3_80 = arith.constant 3 : index
    %c0_81 = arith.constant 0 : index
    %c0_82 = arith.constant 0 : index
    %85 = vector.load %arg4[%c3_80, %c0_81, %c0_82] : memref<9x32x32xbf16, #tpu.memory_space<vmem>>, vector<1x32x32xbf16>
    %86 = vector.shape_cast %85 : vector<1x32x32xbf16> to vector<32x32xbf16>
    %cst_83 = arith.constant dense<0.000000e+00> : vector<288x32xf32>
    %87 = tpu.matmul %84, %86, %cst_83 {dimension_numbers = #tpu.dot_dimension_numbers<[1], [0], [0], [1], [0, 0, 1, 1], [], []>} : vector<288x32xbf16>, vector<32x32xbf16>, vector<288x32xf32> -> vector<288x32xf32>
    %88 = arith.addf %83, %87 : vector<288x32xf32>
    %c24_84 = arith.constant 24 : index
    %c0_85 = arith.constant 0 : index
    %89 = vector.load %arg10[%c24_84, %c0_85] : memref<336x32xbf16, #tpu.memory_space<vmem>>, vector<288x32xbf16>
    %c4_86 = arith.constant 4 : index
    %c0_87 = arith.constant 0 : index
    %c0_88 = arith.constant 0 : index
    %90 = vector.load %arg4[%c4_86, %c0_87, %c0_88] : memref<9x32x32xbf16, #tpu.memory_space<vmem>>, vector<1x32x32xbf16>
    %91 = vector.shape_cast %90 : vector<1x32x32xbf16> to vector<32x32xbf16>
    %cst_89 = arith.constant dense<0.000000e+00> : vector<288x32xf32>
    %92 = tpu.matmul %89, %91, %cst_89 {dimension_numbers = #tpu.dot_dimension_numbers<[1], [0], [0], [1], [0, 0, 1, 1], [], []>} : vector<288x32xbf16>, vector<32x32xbf16>, vector<288x32xf32> -> vector<288x32xf32>
    %93 = arith.addf %88, %92 : vector<288x32xf32>
    %c25_90 = arith.constant 25 : index
    %c0_91 = arith.constant 0 : index
    %94 = vector.load %arg10[%c25_90, %c0_91] : memref<336x32xbf16, #tpu.memory_space<vmem>>, vector<288x32xbf16>
    %c5_92 = arith.constant 5 : index
    %c0_93 = arith.constant 0 : index
    %c0_94 = arith.constant 0 : index
    %95 = vector.load %arg4[%c5_92, %c0_93, %c0_94] : memref<9x32x32xbf16, #tpu.memory_space<vmem>>, vector<1x32x32xbf16>
    %96 = vector.shape_cast %95 : vector<1x32x32xbf16> to vector<32x32xbf16>
    %cst_95 = arith.constant dense<0.000000e+00> : vector<288x32xf32>
    %97 = tpu.matmul %94, %96, %cst_95 {dimension_numbers = #tpu.dot_dimension_numbers<[1], [0], [0], [1], [0, 0, 1, 1], [], []>} : vector<288x32xbf16>, vector<32x32xbf16>, vector<288x32xf32> -> vector<288x32xf32>
    %98 = arith.addf %93, %97 : vector<288x32xf32>
    %c41_96 = arith.constant 41 : index
    %c0_97 = arith.constant 0 : index
    %99 = vector.load %arg10[%c41_96, %c0_97] : memref<336x32xbf16, #tpu.memory_space<vmem>>, vector<288x32xbf16>
    %c6_98 = arith.constant 6 : index
    %c0_99 = arith.constant 0 : index
    %c0_100 = arith.constant 0 : index
    %100 = vector.load %arg4[%c6_98, %c0_99, %c0_100] : memref<9x32x32xbf16, #tpu.memory_space<vmem>>, vector<1x32x32xbf16>
    %101 = vector.shape_cast %100 : vector<1x32x32xbf16> to vector<32x32xbf16>
    %cst_101 = arith.constant dense<0.000000e+00> : vector<288x32xf32>
    %102 = tpu.matmul %99, %101, %cst_101 {dimension_numbers = #tpu.dot_dimension_numbers<[1], [0], [0], [1], [0, 0, 1, 1], [], []>} : vector<288x32xbf16>, vector<32x32xbf16>, vector<288x32xf32> -> vector<288x32xf32>
    %103 = arith.addf %98, %102 : vector<288x32xf32>
    %c42_102 = arith.constant 42 : index
    %c0_103 = arith.constant 0 : index
    %104 = vector.load %arg10[%c42_102, %c0_103] : memref<336x32xbf16, #tpu.memory_space<vmem>>, vector<288x32xbf16>
    %c7_104 = arith.constant 7 : index
    %c0_105 = arith.constant 0 : index
    %c0_106 = arith.constant 0 : index
    %105 = vector.load %arg4[%c7_104, %c0_105, %c0_106] : memref<9x32x32xbf16, #tpu.memory_space<vmem>>, vector<1x32x32xbf16>
    %106 = vector.shape_cast %105 : vector<1x32x32xbf16> to vector<32x32xbf16>
    %cst_107 = arith.constant dense<0.000000e+00> : vector<288x32xf32>
    %107 = tpu.matmul %104, %106, %cst_107 {dimension_numbers = #tpu.dot_dimension_numbers<[1], [0], [0], [1], [0, 0, 1, 1], [], []>} : vector<288x32xbf16>, vector<32x32xbf16>, vector<288x32xf32> -> vector<288x32xf32>
    %108 = arith.addf %103, %107 : vector<288x32xf32>
    %c43_108 = arith.constant 43 : index
    %c0_109 = arith.constant 0 : index
    %109 = vector.load %arg10[%c43_108, %c0_109] : memref<336x32xbf16, #tpu.memory_space<vmem>>, vector<288x32xbf16>
    %c8_110 = arith.constant 8 : index
    %c0_111 = arith.constant 0 : index
    %c0_112 = arith.constant 0 : index
    %110 = vector.load %arg4[%c8_110, %c0_111, %c0_112] : memref<9x32x32xbf16, #tpu.memory_space<vmem>>, vector<1x32x32xbf16>
    %111 = vector.shape_cast %110 : vector<1x32x32xbf16> to vector<32x32xbf16>
    %cst_113 = arith.constant dense<0.000000e+00> : vector<288x32xf32>
    %112 = tpu.matmul %109, %111, %cst_113 {dimension_numbers = #tpu.dot_dimension_numbers<[1], [0], [0], [1], [0, 0, 1, 1], [], []>} : vector<288x32xbf16>, vector<32x32xbf16>, vector<288x32xf32> -> vector<288x32xf32>
    %113 = arith.addf %108, %112 : vector<288x32xf32>
    %c0_114 = arith.constant 0 : index
    %c0_115 = arith.constant 0 : index
    %114 = vector.load %arg5[%c0_114, %c0_115] : memref<1x32xf32, #tpu.memory_space<vmem>>, vector<1x32xf32>
    %115 = vector.broadcast %114 : vector<1x32xf32> to vector<288x32xf32>
    %116 = arith.addf %113, %115 : vector<288x32xf32>
    %cst_116 = arith.constant 0.000000e+00 : f32
    %117 = vector.broadcast %cst_116 : f32 to vector<288x32xf32>
    %118 = arith.maximumf %116, %117 : vector<288x32xf32>
    %cst_117 = arith.constant 0.000000e+00 : f32
    %119 = vector.shape_cast %10 : vector<288x1xi1> to vector<288x1xi1>
    %120 = vector.broadcast %119 : vector<288x1xi1> to vector<288x32xi1>
    %121 = vector.broadcast %cst_117 : f32 to vector<288x32xf32>
    %122 = arith.select %120, %118, %121 : vector<288x32xi1>, vector<288x32xf32>
    %c24_118 = arith.constant 24 : index
    %c0_119 = arith.constant 0 : index
    %123 = vector.load %arg11[%c24_118, %c0_119] : memref<336x32xf32, #tpu.memory_space<vmem>>, vector<288x32xf32>
    tpu.vector_store %arg11[%c24_118, %c0_119], %122 {strides = array<i32>} : memref<336x32xf32, #tpu.memory_space<vmem>>, vector<288x32xf32>,
    %cst_120 = arith.constant 0.000000e+00 : f32
    %124 = vector.broadcast %cst_120 : f32 to vector<288x8xf32>
    %c5_121 = arith.constant 5 : index
    %c0_122 = arith.constant 0 : index
    %125 = vector.load %arg11[%c5_121, %c0_122] : memref<336x32xf32, #tpu.memory_space<vmem>>, vector<288x32xf32>
    %c0_123 = arith.constant 0 : index
    %c0_124 = arith.constant 0 : index
    %c0_125 = arith.constant 0 : index
    %126 = vector.load %arg6[%c0_123, %c0_124, %c0_125] : memref<9x32x8xf32, #tpu.memory_space<vmem>>, vector<1x32x8xf32>
    %127 = vector.shape_cast %126 : vector<1x32x8xf32> to vector<32x8xf32>
    %cst_126 = arith.constant dense<0.000000e+00> : vector<288x8xf32>
    %128 = tpu.matmul %125, %127, %cst_126 {dimension_numbers = #tpu.dot_dimension_numbers<[1], [0], [0], [1], [0, 0, 1, 1], [], []>} : vector<288x32xf32>, vector<32x8xf32>, vector<288x8xf32> -> vector<288x8xf32>
    %129 = arith.addf %124, %128 : vector<288x8xf32>
    %c6_127 = arith.constant 6 : index
    %c0_128 = arith.constant 0 : index
    %130 = vector.load %arg11[%c6_127, %c0_128] : memref<336x32xf32, #tpu.memory_space<vmem>>, vector<288x32xf32>
    %c1_129 = arith.constant 1 : index
    %c0_130 = arith.constant 0 : index
    %c0_131 = arith.constant 0 : index
    %131 = vector.load %arg6[%c1_129, %c0_130, %c0_131] : memref<9x32x8xf32, #tpu.memory_space<vmem>>, vector<1x32x8xf32>
    %132 = vector.shape_cast %131 : vector<1x32x8xf32> to vector<32x8xf32>
    %cst_132 = arith.constant dense<0.000000e+00> : vector<288x8xf32>
    %133 = tpu.matmul %130, %132, %cst_132 {dimension_numbers = #tpu.dot_dimension_numbers<[1], [0], [0], [1], [0, 0, 1, 1], [], []>} : vector<288x32xf32>, vector<32x8xf32>, vector<288x8xf32> -> vector<288x8xf32>
    %134 = arith.addf %129, %133 : vector<288x8xf32>
    %c7_133 = arith.constant 7 : index
    %c0_134 = arith.constant 0 : index
    %135 = vector.load %arg11[%c7_133, %c0_134] : memref<336x32xf32, #tpu.memory_space<vmem>>, vector<288x32xf32>
    %c2_135 = arith.constant 2 : index
    %c0_136 = arith.constant 0 : index
    %c0_137 = arith.constant 0 : index
    %136 = vector.load %arg6[%c2_135, %c0_136, %c0_137] : memref<9x32x8xf32, #tpu.memory_space<vmem>>, vector<1x32x8xf32>
    %137 = vector.shape_cast %136 : vector<1x32x8xf32> to vector<32x8xf32>
    %cst_138 = arith.constant dense<0.000000e+00> : vector<288x8xf32>
    %138 = tpu.matmul %135, %137, %cst_138 {dimension_numbers = #tpu.dot_dimension_numbers<[1], [0], [0], [1], [0, 0, 1, 1], [], []>} : vector<288x32xf32>, vector<32x8xf32>, vector<288x8xf32> -> vector<288x8xf32>
    %139 = arith.addf %134, %138 : vector<288x8xf32>
    %c23_139 = arith.constant 23 : index
    %c0_140 = arith.constant 0 : index
    %140 = vector.load %arg11[%c23_139, %c0_140] : memref<336x32xf32, #tpu.memory_space<vmem>>, vector<288x32xf32>
    %c3_141 = arith.constant 3 : index
    %c0_142 = arith.constant 0 : index
    %c0_143 = arith.constant 0 : index
    %141 = vector.load %arg6[%c3_141, %c0_142, %c0_143] : memref<9x32x8xf32, #tpu.memory_space<vmem>>, vector<1x32x8xf32>
    %142 = vector.shape_cast %141 : vector<1x32x8xf32> to vector<32x8xf32>
    %cst_144 = arith.constant dense<0.000000e+00> : vector<288x8xf32>
    %143 = tpu.matmul %140, %142, %cst_144 {dimension_numbers = #tpu.dot_dimension_numbers<[1], [0], [0], [1], [0, 0, 1, 1], [], []>} : vector<288x32xf32>, vector<32x8xf32>, vector<288x8xf32> -> vector<288x8xf32>
    %144 = arith.addf %139, %143 : vector<288x8xf32>
    %c24_145 = arith.constant 24 : index
    %c0_146 = arith.constant 0 : index
    %145 = vector.load %arg11[%c24_145, %c0_146] : memref<336x32xf32, #tpu.memory_space<vmem>>, vector<288x32xf32>
    %c4_147 = arith.constant 4 : index
    %c0_148 = arith.constant 0 : index
    %c0_149 = arith.constant 0 : index
    %146 = vector.load %arg6[%c4_147, %c0_148, %c0_149] : memref<9x32x8xf32, #tpu.memory_space<vmem>>, vector<1x32x8xf32>
    %147 = vector.shape_cast %146 : vector<1x32x8xf32> to vector<32x8xf32>
    %cst_150 = arith.constant dense<0.000000e+00> : vector<288x8xf32>
    %148 = tpu.matmul %145, %147, %cst_150 {dimension_numbers = #tpu.dot_dimension_numbers<[1], [0], [0], [1], [0, 0, 1, 1], [], []>} : vector<288x32xf32>, vector<32x8xf32>, vector<288x8xf32> -> vector<288x8xf32>
    %149 = arith.addf %144, %148 : vector<288x8xf32>
    %c25_151 = arith.constant 25 : index
    %c0_152 = arith.constant 0 : index
    %150 = vector.load %arg11[%c25_151, %c0_152] : memref<336x32xf32, #tpu.memory_space<vmem>>, vector<288x32xf32>
    %c5_153 = arith.constant 5 : index
    %c0_154 = arith.constant 0 : index
    %c0_155 = arith.constant 0 : index
    %151 = vector.load %arg6[%c5_153, %c0_154, %c0_155] : memref<9x32x8xf32, #tpu.memory_space<vmem>>, vector<1x32x8xf32>
    %152 = vector.shape_cast %151 : vector<1x32x8xf32> to vector<32x8xf32>
    %cst_156 = arith.constant dense<0.000000e+00> : vector<288x8xf32>
    %153 = tpu.matmul %150, %152, %cst_156 {dimension_numbers = #tpu.dot_dimension_numbers<[1], [0], [0], [1], [0, 0, 1, 1], [], []>} : vector<288x32xf32>, vector<32x8xf32>, vector<288x8xf32> -> vector<288x8xf32>
    %154 = arith.addf %149, %153 : vector<288x8xf32>
    %c41_157 = arith.constant 41 : index
    %c0_158 = arith.constant 0 : index
    %155 = vector.load %arg11[%c41_157, %c0_158] : memref<336x32xf32, #tpu.memory_space<vmem>>, vector<288x32xf32>
    %c6_159 = arith.constant 6 : index
    %c0_160 = arith.constant 0 : index
    %c0_161 = arith.constant 0 : index
    %156 = vector.load %arg6[%c6_159, %c0_160, %c0_161] : memref<9x32x8xf32, #tpu.memory_space<vmem>>, vector<1x32x8xf32>
    %157 = vector.shape_cast %156 : vector<1x32x8xf32> to vector<32x8xf32>
    %cst_162 = arith.constant dense<0.000000e+00> : vector<288x8xf32>
    %158 = tpu.matmul %155, %157, %cst_162 {dimension_numbers = #tpu.dot_dimension_numbers<[1], [0], [0], [1], [0, 0, 1, 1], [], []>} : vector<288x32xf32>, vector<32x8xf32>, vector<288x8xf32> -> vector<288x8xf32>
    %159 = arith.addf %154, %158 : vector<288x8xf32>
    %c42_163 = arith.constant 42 : index
    %c0_164 = arith.constant 0 : index
    %160 = vector.load %arg11[%c42_163, %c0_164] : memref<336x32xf32, #tpu.memory_space<vmem>>, vector<288x32xf32>
    %c7_165 = arith.constant 7 : index
    %c0_166 = arith.constant 0 : index
    %c0_167 = arith.constant 0 : index
    %161 = vector.load %arg6[%c7_165, %c0_166, %c0_167] : memref<9x32x8xf32, #tpu.memory_space<vmem>>, vector<1x32x8xf32>
    %162 = vector.shape_cast %161 : vector<1x32x8xf32> to vector<32x8xf32>
    %cst_168 = arith.constant dense<0.000000e+00> : vector<288x8xf32>
    %163 = tpu.matmul %160, %162, %cst_168 {dimension_numbers = #tpu.dot_dimension_numbers<[1], [0], [0], [1], [0, 0, 1, 1], [], []>} : vector<288x32xf32>, vector<32x8xf32>, vector<288x8xf32> -> vector<288x8xf32>
    %164 = arith.addf %159, %163 : vector<288x8xf32>
    %c43_169 = arith.constant 43 : index
    %c0_170 = arith.constant 0 : index
    %165 = vector.load %arg11[%c43_169, %c0_170] : memref<336x32xf32, #tpu.memory_space<vmem>>, vector<288x32xf32>
    %c8_171 = arith.constant 8 : index
    %c0_172 = arith.constant 0 : index
    %c0_173 = arith.constant 0 : index
    %166 = vector.load %arg6[%c8_171, %c0_172, %c0_173] : memref<9x32x8xf32, #tpu.memory_space<vmem>>, vector<1x32x8xf32>
    %167 = vector.shape_cast %166 : vector<1x32x8xf32> to vector<32x8xf32>
    %cst_174 = arith.constant dense<0.000000e+00> : vector<288x8xf32>
    %168 = tpu.matmul %165, %167, %cst_174 {dimension_numbers = #tpu.dot_dimension_numbers<[1], [0], [0], [1], [0, 0, 1, 1], [], []>} : vector<288x32xf32>, vector<32x8xf32>, vector<288x8xf32> -> vector<288x8xf32>
    %169 = arith.addf %164, %168 : vector<288x8xf32>
    %c0_175 = arith.constant 0 : index
    %c0_176 = arith.constant 0 : index
    %170 = vector.load %arg7[%c0_175, %c0_176] : memref<1x8xf32, #tpu.memory_space<vmem>>, vector<1x8xf32>
    %171 = vector.broadcast %170 : vector<1x8xf32> to vector<288x8xf32>
    %172 = arith.addf %169, %171 : vector<288x8xf32>
    %cst_177 = arith.constant 0.000000e+00 : f32
    %173 = vector.broadcast %cst_177 : f32 to vector<24x8xf32>
    %c0_178 = arith.constant 0 : index
    %c0_179 = arith.constant 0 : index
    %174 = vector.load %arg9[%c0_178, %c0_179] : memref<336x8xf32, #tpu.memory_space<vmem>>, vector<24x8xf32>
    tpu.vector_store %arg9[%c0_178, %c0_179], %173 {strides = array<i32>} : memref<336x8xf32, #tpu.memory_space<vmem>>, vector<24x8xf32>,
    %c24_180 = arith.constant 24 : index
    %c0_181 = arith.constant 0 : index
    %175 = vector.load %arg9[%c24_180, %c0_181] : memref<336x8xf32, #tpu.memory_space<vmem>>, vector<288x8xf32>
    tpu.vector_store %arg9[%c24_180, %c0_181], %172 {strides = array<i32>} : memref<336x8xf32, #tpu.memory_space<vmem>>, vector<288x8xf32>,
    %cst_182 = arith.constant 0.000000e+00 : f32
    %176 = vector.broadcast %cst_182 : f32 to vector<24x8xf32>
    %c312_183 = arith.constant 312 : index
    %c0_184 = arith.constant 0 : index
    %177 = vector.load %arg9[%c312_183, %c0_184] : memref<336x8xf32, #tpu.memory_space<vmem>>, vector<24x8xf32>
    tpu.vector_store %arg9[%c312_183, %c0_184], %176 {strides = array<i32>} : memref<336x8xf32, #tpu.memory_space<vmem>>, vector<24x8xf32>,
    return
  }
  func.func @transform_0(%arg0: i32) -> (i32, i32) {
    %c0_i32 = arith.constant 0 : i32
    %c0_i32_0 = arith.constant 0 : i32
    return %arg0, %c0_i32 : i32, i32
  }
  func.func @transform_1(%arg0: i32) -> (i32, i32, i32) {
    %c0_i32 = arith.constant 0 : i32
    %c0_i32_0 = arith.constant 0 : i32
    %c0_i32_1 = arith.constant 0 : i32
    %c0_i32_2 = arith.constant 0 : i32
    return %c0_i32, %c0_i32_0, %c0_i32_1 : i32, i32, i32
  }
  func.func @transform_2(%arg0: i32) -> (i32, i32) {
    %c0_i32 = arith.constant 0 : i32
    %c0_i32_0 = arith.constant 0 : i32
    %c0_i32_1 = arith.constant 0 : i32
    return %c0_i32, %c0_i32_0 : i32, i32
  }
  func.func @transform_3(%arg0: i32) -> (i32, i32, i32) {
    %c0_i32 = arith.constant 0 : i32
    %c0_i32_0 = arith.constant 0 : i32
    %c0_i32_1 = arith.constant 0 : i32
    %c0_i32_2 = arith.constant 0 : i32
    return %c0_i32, %c0_i32_0, %c0_i32_1 : i32, i32, i32
  }
  func.func @transform_4(%arg0: i32) -> (i32, i32) {
    %c0_i32 = arith.constant 0 : i32
    %c0_i32_0 = arith.constant 0 : i32
    %c0_i32_1 = arith.constant 0 : i32
    return %c0_i32, %c0_i32_0 : i32, i32
  }
  func.func @transform_5(%arg0: i32) -> (i32, i32, i32) {
    %c0_i32 = arith.constant 0 : i32
    %c0_i32_0 = arith.constant 0 : i32
    %c0_i32_1 = arith.constant 0 : i32
    %c0_i32_2 = arith.constant 0 : i32
    return %c0_i32, %c0_i32_0, %c0_i32_1 : i32, i32, i32
  }
  func.func @transform_6(%arg0: i32) -> (i32, i32) {
    %c0_i32 = arith.constant 0 : i32
    %c0_i32_0 = arith.constant 0 : i32
    %c0_i32_1 = arith.constant 0 : i32
    return %c0_i32, %c0_i32_0 : i32, i32
  }
  func.func @transform_7(%arg0: i32) -> (i32, i32) {
    %c0_i32 = arith.constant 0 : i32
    %c0_i32_0 = arith.constant 0 : i32
    %c0_i32_1 = arith.constant 0 : i32
    return %c0_i32, %c0_i32_0 : i32, i32
  }
  func.func @transform_8(%arg0: i32) -> (i32, i32) {
    %c0_i32 = arith.constant 0 : i32
    %c0_i32_0 = arith.constant 0 : i32
    return %arg0, %c0_i32 : i32, i32
  }
}

</mosaic_0001>

<bundles_post_ra>
// kernel: regression_model_forward.1
= control target key start
LH: loop header
LB: loop body
LE: loop exit
PB: predicated region body
PF: predicated region fallthrough
CT: control target
= control target key end

     0   :  { %s16218_s27 = smov 0   ;;  %s21174_s0 = inlined_call_operand.vmem [shape: f32[672,8], index: 0, kind: input, shape index: {}]   ;;  %s21175_s1 = inlined_call_operand.vmem [shape: f32[9,8,32], index: 1, kind: input, shape index: {}]   ;;  %s21176_s2 = inlined_call_operand.vmem [shape: f32[1,32], index: 2, kind: input, shape index: {}]   ;;  %s21177_s3 = inlined_call_operand.vmem [shape: bf16[9,32,32], index: 3, kind: input, shape index: {}]   ;;  %s21178_s4 = inlined_call_operand.vmem [shape: f32[1,32], index: 4, kind: input, shape index: {}]   ;;  %s21179_s5 = inlined_call_operand.vmem [shape: f32[9,32,8], index: 5, kind: input, shape index: {}]   ;;  %s21180_s6 = inlined_call_operand.vmem [shape: f32[1,8], index: 6, kind: input, shape index: {}]   ;;  %s21181_s7 = inlined_call_operand.vmem [shape: f32[288,1], index: 7, kind: input, shape index: {}]   ;;  %s21182_s8 = inlined_call_operand.vmem [shape: f32[672,8], index: 8, kind: output, shape index: {}]  }
   0x1 LB: > { %s12654_s28 = sadd.s32 4294967295, %s16169_s27   ;;  %p12658_p0 = scmp.ge.s32.totalorder %s16169_s27, 1  ;;  %s16169_s27 = sphi %s16218_s27, %s18_s27  }
   0x2   : > { %p263_p1 = scmp.lt.s32.totalorder %s16169_s27, 3 }
   0x4   : > { %p264_p2 = pnand %p12658_p0, %p263_p1 }
   0x6   : > { %267 = sbr.rel (%p264_p2) target bundleno = 1571 (0x623), region = 52 }
   0xb   : > { %v12661_v0 = vld [vmem:[%s21175_s1 + $0x8] sm:$0xff]  ;;  %s297_s9 = smul.u32 42, %s12654_s28  ;;  %v432_v1 = vld [vmem:[%s21175_s1] sm:$0xff]  ;;  %v12734_v2 = vld [vmem:[%s21175_s1 + $0x10] sm:$0xff]  ;;  %vm471_vm0 = vcmask 64512  }
   0xc   : > { %16031 = vmatprep.subr.mxu1 %v12661_v0  ;;  %14609 = vmatprep.subr.mxu0 %v12661_v0  ;;  %v16258_v9 = vld [vmem:[%s21175_s1 + $0x18] sm:$0xff]  ;;  %v16263_v10 = vld [vmem:[%s21175_s1 + $0x20] sm:$0xff]  ;;  %v16344_v47 = vld [vmem:[%s21175_s1 + $0x28] sm:$0xff] }
   0xd   : > { %16032 = vmatpush3.msra.mxu1 %v12661_v0  ;;  %14610 = vmatpush3.msra.mxu0 %v12661_v0  ;;  %p298_p3 = scmp.lt.s32.totalorder %s297_s9, 83  ;;  %v16349_v48 = vld [vmem:[%s21175_s1 + $0x30] sm:$0xff] }
   0xe   : > { %14665 = vmatprep.subr.mxu1 %v432_v1  ;;  %14721 = vmatprep.subr.mxu0 %v12734_v2 }
   0xf   : > { %s21758_s9 = smov (!%p298_p3, %s297_s9), 83 }
  0x10   : > { %s12659_s14 = sshll.u32 %s21758_s9, 3 }
  0x11   : > { %s16243_s17 = scalar_lea.vmem %s21174_s0, %s12659_s14  ;;  %s19454_s13 = scalar_lea.vmem %s21182_s8, %s12659_s14 }
  0x12   : > { %v433_v3 = vld [vmem:[%s16243_s17 + $0x6] sm:$0xff]  ;;  %v451_v4 = vld [vmem:[%s16243_s17 + $0x96] sm:$0xff]  ;;  %v434_v5 = vld [vmem:[%s16243_s17 + $0xe] sm:$0xff] }
  0x13   : > { %14611 = vmatprep.mubr.msk.f32.mxu0 %vm471_vm0, %v433_v3  ;;  %14638 = vmatprep.mubr.msk.f32.mxu1 %vm471_vm0, %v451_v4  ;;  %v452_v6 = vld [vmem:[%s16243_s17 + $0x9e] sm:$0xff]  ;;  %v435_v7 = vld [vmem:[%s16243_s17 + $0x16] sm:$0xff]  ;;  %v453_v8 = vld [vmem:[%s16243_s17 + $0xa6] sm:$0xff] }
  0x14   : > { %14612 = vmatmul.mubr.msk.f32.vlgmr.msra.gmra.mxu0 %vm471_vm0, %v434_v5  ;;  %14639 = vmatmul.mubr.msk.f32.vlgmr.msra.gmra.mxu1 %vm471_vm0, %v452_v6  ;;  %v436_v11 = vld [vmem:[%s16243_s17 + $0x1e] sm:$0xff]  ;;  %v454_v12 = vld [vmem:[%s16243_s17 + $0xae] sm:$0xff]  ;;  %v437_v13 = vld [vmem:[%s16243_s17 + $0x26] sm:$0xff] }
  0x15   : > { %14666 = vmatpush3.msra.mxu1 %v432_v1  ;;  %14722 = vmatpush3.msra.mxu0 %v12734_v2  ;;  %v455_v14 = vld [vmem:[%s16243_s17 + $0xb6] sm:$0xff]  ;;  %v438_v15 = vld [vmem:[%s16243_s17 + $0x2e] sm:$0xff]  ;;  %v456_v16 = vld [vmem:[%s16243_s17 + $0xbe] sm:$0xff] }
  0x16   : > { %14614 = vmatprep.mubr.msk.f32.mxu0 %vm471_vm0, %v435_v7  ;;  %14641 = vmatprep.mubr.msk.f32.mxu1 %vm471_vm0, %v453_v8  ;;  %v439_v17 = vld [vmem:[%s16243_s17 + $0x36] sm:$0xff]  ;;  %v457_v18 = vld [vmem:[%s16243_s17 + $0xc6] sm:$0xff]  ;;  %v440_v19 = vld [vmem:[%s16243_s17 + $0x3e] sm:$0xff] }
  0x17   : > { %14777 = vmatprep.subr.mxu1 %v16258_v9  ;;  %14833 = vmatprep.subr.mxu0 %v16263_v10  ;;  %v458_v20 = vld [vmem:[%s16243_s17 + $0xce] sm:$0xff]  ;;  %v441_v21 = vld [vmem:[%s16243_s17 + $0x46] sm:$0xff]  ;;  %v459_v22 = vld [vmem:[%s16243_s17 + $0xd6] sm:$0xff] }
  0x18   : > { %14615 = vmatmul.mubr.msk.f32.gmra.mxu0 %vm471_vm0, %v436_v11  ;;  %14642 = vmatmul.mubr.msk.f32.gmra.mxu1 %vm471_vm0, %v454_v12  ;;  %v442_v23 = vld [vmem:[%s16243_s17 + $0x4e] sm:$0xff]  ;;  %v460_v24 = vld [vmem:[%s16243_s17 + $0xde] sm:$0xff]  ;;  %v443_v25 = vld [vmem:[%s16243_s17 + $0x56] sm:$0xff] }
  0x19   : > { %14617 = vmatprep.mubr.msk.f32.mxu0 %vm471_vm0, %v437_v13  ;;  %14644 = vmatprep.mubr.msk.f32.mxu1 %vm471_vm0, %v455_v14  ;;  %v461_v26 = vld [vmem:[%s16243_s17 + $0xe6] sm:$0xff]  ;;  %v444_v27 = vld [vmem:[%s16243_s17 + $0x5e] sm:$0xff]  ;;  %v462_v28 = vld [vmem:[%s16243_s17 + $0xee] sm:$0xff] }
  0x1a   : > { %v445_v29 = vld [vmem:[%s16243_s17 + $0x66] sm:$0xff]  ;;  %v463_v30 = vld [vmem:[%s16243_s17 + $0xf6] sm:$0xff]  ;;  %v446_v31 = vld [vmem:[%s16243_s17 + $0x6e] sm:$0xff] }
  0x1b   : > { %v464_v32 = vld [vmem:[%s16243_s17 + $0xfe] sm:$0xff]  ;;  %v447_v33 = vld [vmem:[%s16243_s17 + $0x76] sm:$0xff]  ;;  %v465_v34 = vld [vmem:[%s16243_s17 + $0x106] sm:$0xff] }
  0x1c   : > { %14618 = vmatmul.mubr.msk.f32.gmra.mxu0 %vm471_vm0, %v438_v15  ;;  %14645 = vmatmul.mubr.msk.f32.gmra.mxu1 %vm471_vm0, %v456_v16  ;;  %v448_v35 = vld [vmem:[%s16243_s17 + $0x7e] sm:$0xff]  ;;  %v466_v36 = vld [vmem:[%s16243_s17 + $0x10e] sm:$0xff]  ;;  %v449_v37 = vld [vmem:[%s16243_s17 + $0x86] sm:$0xff] }
  0x1d   : > { %14620 = vmatprep.mubr.msk.f32.mxu0 %vm471_vm0, %v439_v17  ;;  %14647 = vmatprep.mubr.msk.f32.mxu1 %vm471_vm0, %v457_v18  ;;  %v467_v38 = vld [vmem:[%s16243_s17 + $0x116] sm:$0xff]  ;;  %v450_v39 = vld [vmem:[%s16243_s17 + $0x8e] sm:$0xff]  ;;  %v468_v40 = vld [vmem:[%s16243_s17 + $0x11e] sm:$0xff] }
  0x1e   : > { %v396_v41 = vld [vmem:[%s16243_s17 + $0x5] sm:$0xff]  ;;  %v397_v43 = vld [vmem:[%s16243_s17 + $0xd] sm:$0xff]  ;;  %v398_v45 = vld [vmem:[%s16243_s17 + $0x15] sm:$0xff] }
  0x1f   : > { %v1178_v42 = vld [vmem:[%s16243_s17 + $0x7] sm:$0xff]  ;;  %v1179_v44 = vld [vmem:[%s16243_s17 + $0xf] sm:$0xff]  ;;  %v16337_v46 = vld [vmem:[%s16243_s17 + $0x17] sm:$0xff] }
  0x20   : > { %14621 = vmatmul.mubr.msk.f32.gmra.mxu0 %vm471_vm0, %v440_v19  ;;  %14648 = vmatmul.mubr.msk.f32.gmra.mxu1 %vm471_vm0, %v458_v20  ;;  %v399_v49 = vld [vmem:[%s16243_s17 + $0x1d] sm:$0xff]  ;;  %v400_v51 = vld [vmem:[%s16243_s17 + $0x25] sm:$0xff]  ;;  %v401_v53 = vld [vmem:[%s16243_s17 + $0x2d] sm:$0xff] }
  0x21   : > { %14623 = vmatprep.mubr.msk.f32.mxu0 %vm471_vm0, %v441_v21  ;;  %14650 = vmatprep.mubr.msk.f32.mxu1 %vm471_vm0, %v459_v22  ;;  %v16355_v50 = vld [vmem:[%s16243_s17 + $0x1f] sm:$0xff]  ;;  %v16362_v52 = vld [vmem:[%s16243_s17 + $0x27] sm:$0xff]  ;;  %v16374_v54 = vld [vmem:[%s16243_s17 + $0x2f] sm:$0xff] }
  0x22   : > { %v402_v55 = vld [vmem:[%s16243_s17 + $0x35] sm:$0xff]  ;;  %v403_v57 = vld [vmem:[%s16243_s17 + $0x3d] sm:$0xff]  ;;  %v404_v59 = vld [vmem:[%s16243_s17 + $0x45] sm:$0xff] }
  0x23   : > { %v16378_v56 = vld [vmem:[%s16243_s17 + $0x37] sm:$0xff]  ;;  %v16388_v58 = vld [vmem:[%s16243_s17 + $0x3f] sm:$0xff]  ;;  %v16392_v60 = vld [vmem:[%s16243_s17 + $0x47] sm:$0xff] }
  0x24   : > { %14624 = vmatmul.mubr.msk.f32.gmra.mxu0 %vm471_vm0, %v442_v23  ;;  %14651 = vmatmul.mubr.msk.f32.gmra.mxu1 %vm471_vm0, %v460_v24  ;;  %v405_v61 = vld [vmem:[%s16243_s17 + $0x4d] sm:$0xff]  ;;  %v406_v63 = vld [vmem:[%s16243_s17 + $0x55] sm:$0xff]  ;;  %v407_v1 = vld [vmem:[%s16243_s17 + $0x5d] sm:$0xff] }
  0x25   : > { %14626 = vmatprep.mubr.msk.f32.mxu0 %vm471_vm0, %v443_v25  ;;  %14653 = vmatprep.mubr.msk.f32.mxu1 %vm471_vm0, %v461_v26  ;;  %v16402_v62 = vld [vmem:[%s16243_s17 + $0x4f] sm:$0xff]  ;;  %v16406_v0 = vld [vmem:[%s16243_s17 + $0x57] sm:$0xff]  ;;  %v16410_v2 = vld [vmem:[%s16243_s17 + $0x5f] sm:$0xff] }
  0x26   : > { %v408_v3 = vld [vmem:[%s16243_s17 + $0x65] sm:$0xff]  ;;  %v409_v5 = vld [vmem:[%s16243_s17 + $0x6d] sm:$0xff]  ;;  %v410_v7 = vld [vmem:[%s16243_s17 + $0x75] sm:$0xff] }
  0x27   : > { %v16420_v4 = vld [vmem:[%s16243_s17 + $0x67] sm:$0xff]  ;;  %v16430_v6 = vld [vmem:[%s16243_s17 + $0x6f] sm:$0xff]  ;;  %v16434_v8 = vld [vmem:[%s16243_s17 + $0x77] sm:$0xff] }
  0x28   : > { %14627 = vmatmul.mubr.msk.f32.gmra.mxu0 %vm471_vm0, %v444_v27  ;;  %14654 = vmatmul.mubr.msk.f32.gmra.mxu1 %vm471_vm0, %v462_v28  ;;  %v412_v11 = vld [vmem:[%s16243_s17 + $0x85] sm:$0xff]  ;;  %v413_v13 = vld [vmem:[%s16243_s17 + $0x8d] sm:$0xff]  ;;  %v414_v15 = vld [vmem:[%s16243_s17 + $0x95] sm:$0xff] }
  0x29   : > { %14629 = vmatprep.mubr.msk.f32.mxu0 %vm471_vm0, %v445_v29  ;;  %14656 = vmatprep.mubr.msk.f32.mxu1 %vm471_vm0, %v463_v30  ;;  %v16448_v12 = vld [vmem:[%s16243_s17 + $0x87] sm:$0xff]  ;;  %v16458_v14 = vld [vmem:[%s16243_s17 + $0x8f] sm:$0xff]  ;;  %v16462_v16 = vld [vmem:[%s16243_s17 + $0x97] sm:$0xff] }
  0x2a   : > { %v415_v17 = vld [vmem:[%s16243_s17 + $0x9d] sm:$0xff]  ;;  %v416_v19 = vld [vmem:[%s16243_s17 + $0xa5] sm:$0xff]  ;;  %v417_v21 = vld [vmem:[%s16243_s17 + $0xad] sm:$0xff] }
  0x2b   : > { %v16472_v18 = vld [vmem:[%s16243_s17 + $0x9f] sm:$0xff]  ;;  %v16476_v20 = vld [vmem:[%s16243_s17 + $0xa7] sm:$0xff]  ;;  %v16486_v22 = vld [vmem:[%s16243_s17 + $0xaf] sm:$0xff] }
  0x2c   : > { %14630 = vmatmul.mubr.msk.f32.gmra.mxu0 %vm471_vm0, %v446_v31  ;;  %14657 = vmatmul.mubr.msk.f32.gmra.mxu1 %vm471_vm0, %v464_v32  ;;  %v418_v23 = vld [vmem:[%s16243_s17 + $0xb5] sm:$0xff]  ;;  %v419_v25 = vld [vmem:[%s16243_s17 + $0xbd] sm:$0xff]  ;;  %v420_v27 = vld [vmem:[%s16243_s17 + $0xc5] sm:$0xff] }
  0x2d   : > { %14632 = vmatprep.mubr.msk.f32.mxu0 %vm471_vm0, %v447_v33  ;;  %14659 = vmatprep.mubr.msk.f32.mxu1 %vm471_vm0, %v465_v34  ;;  %v16490_v24 = vld [vmem:[%s16243_s17 + $0xb7] sm:$0xff]  ;;  %v16500_v26 = vld [vmem:[%s16243_s17 + $0xbf] sm:$0xff]  ;;  %v16504_v28 = vld [vmem:[%s16243_s17 + $0xc7] sm:$0xff] }
  0x2e   : > { %v421_v29 = vld [vmem:[%s16243_s17 + $0xcd] sm:$0xff]  ;;  %v422_v31 = vld [vmem:[%s16243_s17 + $0xd5] sm:$0xff]  ;;  %v423_v33 = vld [vmem:[%s16243_s17 + $0xdd] sm:$0xff] }
  0x2f   : > { %v16514_v30 = vld [vmem:[%s16243_s17 + $0xcf] sm:$0xff]  ;;  %v16518_v32 = vld [vmem:[%s16243_s17 + $0xd7] sm:$0xff]  ;;  %v16528_v34 = vld [vmem:[%s16243_s17 + $0xdf] sm:$0xff] }
  0x30   : > { %14633 = vmatmul.mubr.msk.f32.gmra.mxu0 %vm471_vm0, %v448_v35  ;;  %14660 = vmatmul.mubr.msk.f32.gmra.mxu1 %vm471_vm0, %v466_v36  ;;  %v424_v35 = vld [vmem:[%s16243_s17 + $0xe5] sm:$0xff] }
  0x31   : > { %14635 = vmatprep.mubr.msk.f32.mxu0 %vm471_vm0, %v449_v37  ;;  %14662 = vmatprep.mubr.msk.f32.mxu1 %vm471_vm0, %v467_v38  ;;  %v16532_v36 = vld [vmem:[%s16243_s17 + $0xe7] sm:$0xff]  ;;  %v16542_v38 = vld [vmem:[%s16243_s17 + $0xef] sm:$0xff] }
  0x32   : > { %v425_v37 = vld [vmem:[%s16243_s17 + $0xed] sm:$0xff] }
  0x34   : > { %14636 = vmatmul.mubr.msk.f32.gmra.mxu0 %vm471_vm0, %v450_v39  ;;  %14663 = vmatmul.mubr.msk.f32.gmra.mxu1 %vm471_vm0, %v468_v40  ;;  %v426_v39 = vld [vmem:[%s16243_s17 + $0xf5] sm:$0xff] }
  0x35   : > { %14667 = vmatprep.mubr.msk.f32.mxu1 %vm471_vm0, %v396_v41  ;;  %14723 = vmatprep.mubr.msk.f32.mxu0 %vm471_vm0, %v1178_v42  ;;  %v16546_v40 = vld [vmem:[%s16243_s17 + $0xf7] sm:$0xff]  ;;  %v16556_v42 = vld [vmem:[%s16243_s17 + $0xff] sm:$0xff] }
  0x36   : > { %v427_v41 = vld [vmem:[%s16243_s17 + $0xfd] sm:$0xff] }
  0x38   : > { %14668 = vmatmul.mubr.msk.f32.vlgmr.msra.gmra.mxu1 %vm471_vm0, %v397_v43  ;;  %14724 = vmatmul.mubr.msk.f32.vlgmr.msra.gmra.mxu0 %vm471_vm0, %v1179_v44  ;;  %v428_v43 = vld [vmem:[%s16243_s17 + $0x105] sm:$0xff] }
  0x39   : > { %14778 = vmatpush3.msra.mxu1 %v16258_v9  ;;  %14834 = vmatpush3.msra.mxu0 %v16263_v10  ;;  %v411_v9 = vld [vmem:[%s16243_s17 + $0x7d] sm:$0xff]  ;;  %v16560_v44 = vld [vmem:[%s16243_s17 + $0x107] sm:$0xff] }
  0x3a   : > { %14670 = vmatprep.mubr.msk.f32.mxu1 %vm471_vm0, %v398_v45  ;;  %14726 = vmatprep.mubr.msk.f32.mxu0 %vm471_vm0, %v16337_v46  ;;  %v16444_v10 = vld [vmem:[%s16243_s17 + $0x7f] sm:$0xff]  ;;  %v429_v45 = vld [vmem:[%s16243_s17 + $0x10d] sm:$0xff] }
  0x3b   : > { %14889 = vmatprep.subr.mxu1 %v16344_v47  ;;  %14945 = vmatprep.subr.mxu0 %v16349_v48 }
  0x3c   : > { %14671 = vmatmul.mubr.msk.f32.gmra.mxu1 %vm471_vm0, %v399_v49  ;;  %14727 = vmatmul.mubr.msk.f32.gmra.mxu0 %vm471_vm0, %v16355_v50  ;;  %v16570_v49 = vld [vmem:[%s16243_s17 + $0x10f] sm:$0xff] }
  0x3d   : > { %14673 = vmatprep.mubr.msk.f32.mxu1 %vm471_vm0, %v400_v51  ;;  %14729 = vmatprep.mubr.msk.f32.mxu0 %vm471_vm0, %v16362_v52  ;;  %v430_v51 = vld [vmem:[%s16243_s17 + $0x115] sm:$0xff] }
  0x40   : > { %14674 = vmatmul.mubr.msk.f32.gmra.mxu1 %vm471_vm0, %v401_v53  ;;  %14730 = vmatmul.mubr.msk.f32.gmra.mxu0 %vm471_vm0, %v16374_v54  ;;  %v16574_v53 = vld [vmem:[%s16243_s17 + $0x117] sm:$0xff] }
  0x41   : > { %14676 = vmatprep.mubr.msk.f32.mxu1 %vm471_vm0, %v402_v55  ;;  %14732 = vmatprep.mubr.msk.f32.mxu0 %vm471_vm0, %v16378_v56  ;;  %v431_v55 = vld [vmem:[%s16243_s17 + $0x11d] sm:$0xff] }
  0x44   : > { %14677 = vmatmul.mubr.msk.f32.gmra.mxu1 %vm471_vm0, %v403_v57  ;;  %14733 = vmatmul.mubr.msk.f32.gmra.mxu0 %vm471_vm0, %v16388_v58  ;;  %v16584_v57 = vld [vmem:[%s16243_s17 + $0x11f] sm:$0xff] }
  0x45   : > { %14679 = vmatprep.mubr.msk.f32.mxu1 %vm471_vm0, %v404_v59  ;;  %14735 = vmatprep.mubr.msk.f32.mxu0 %vm471_vm0, %v16392_v60  ;;  %v2032_v59 = vld [vmem:[%s16243_s17 + $0x18] sm:$0xff] }
  0x48   : > { %14680 = vmatmul.mubr.msk.f32.gmra.mxu1 %vm471_vm0, %v405_v61  ;;  %14736 = vmatmul.mubr.msk.f32.gmra.mxu0 %vm471_vm0, %v16402_v62  ;;  %v2033_v61 = vld [vmem:[%s16243_s17 + $0x20] sm:$0xff] }
  0x49   : > { %14682 = vmatprep.mubr.msk.f32.mxu1 %vm471_vm0, %v406_v63  ;;  %14738 = vmatprep.mubr.msk.f32.mxu0 %vm471_vm0, %v16406_v0  ;;  %v2034_v63 = vld [vmem:[%s16243_s17 + $0x28] sm:$0xff] }
  0x4c   : > { %14683 = vmatmul.mubr.msk.f32.gmra.mxu1 %vm471_vm0, %v407_v1  ;;  %14739 = vmatmul.mubr.msk.f32.gmra.mxu0 %vm471_vm0, %v16410_v2  ;;  %v16601_v1 = vld [vmem:[%s21175_s1 + $0x38] sm:$0xff] }
  0x4d   : > { %14685 = vmatprep.mubr.msk.f32.mxu1 %vm471_vm0, %v408_v3  ;;  %14741 = vmatprep.mubr.msk.f32.mxu0 %vm471_vm0, %v16420_v4  ;;  %v2035_v3 = vld [vmem:[%s16243_s17 + $0x30] sm:$0xff] }
  0x50   : > { %14686 = vmatmul.mubr.msk.f32.gmra.mxu1 %vm471_vm0, %v409_v5  ;;  %14742 = vmatmul.mubr.msk.f32.gmra.mxu0 %vm471_vm0, %v16430_v6  ;;  %v2047_v5 = vld [vmem:[%s16243_s17 + $0x90] sm:$0xff] }
  0x51   : > { %14688 = vmatprep.mubr.msk.f32.mxu1 %vm471_vm0, %v410_v7  ;;  %14744 = vmatprep.mubr.msk.f32.mxu0 %vm471_vm0, %v16434_v8 }
  0x54   : > { %14689 = vmatmul.mubr.msk.f32.gmra.mxu1 %vm471_vm0, %v411_v9  ;;  %14745 = vmatmul.mubr.msk.f32.gmra.mxu0 %vm471_vm0, %v16444_v10  ;;  %v326_v9 = vld [vmem:[%s21181_s7 + $0x10] sm:$0xff] }
  0x55   : > { %14691 = vmatprep.mubr.msk.f32.mxu1 %vm471_vm0, %v412_v11  ;;  %14747 = vmatprep.mubr.msk.f32.mxu0 %vm471_vm0, %v16448_v12  ;;  %vm362_vm2 = vcmp.ne.f32.partialorder %v326_v9, 0.0  ;;  %v2049_v11 = vld [vmem:[%s16243_s17 + $0xa0] sm:$0xff] }
  0x56   : > { %v2459_v9 = vld [vmem:[%s16243_s17 + $0x19] sm:$0xff] }
  0x58   : > { %14692 = vmatmul.mubr.msk.f32.gmra.mxu1 %vm471_vm0, %v413_v13  ;;  %14748 = vmatmul.mubr.msk.f32.gmra.mxu0 %vm471_vm0, %v16458_v14  ;;  %v2050_v13 = vld [vmem:[%s16243_s17 + $0xa8] sm:$0xff] }
  0x59   : > { %14694 = vmatprep.mubr.msk.f32.mxu1 %vm471_vm0, %v414_v15  ;;  %14750 = vmatprep.mubr.msk.f32.mxu0 %vm471_vm0, %v16462_v16  ;;  %v327_v15 = vld [vmem:[%s21181_s7 + $0x18] sm:$0xff] }
  0x5a   : > { %vm363_vm4 = vcmp.ne.f32.partialorder %v327_v15, 0.0 }
  0x5c   : > { %14695 = vmatmul.mubr.msk.f32.gmra.mxu1 %vm471_vm0, %v415_v17  ;;  %14751 = vmatmul.mubr.msk.f32.gmra.mxu0 %vm471_vm0, %v16472_v18  ;;  %v2051_v17 = vld [vmem:[%s16243_s17 + $0xb0] sm:$0xff] }
  0x5d   : > { %14697 = vmatprep.mubr.msk.f32.mxu1 %vm471_vm0, %v416_v19  ;;  %14753 = vmatprep.mubr.msk.f32.mxu0 %vm471_vm0, %v16476_v20 }
  0x60   : > { %14698 = vmatmul.mubr.msk.f32.gmra.mxu1 %vm471_vm0, %v417_v21  ;;  %14754 = vmatmul.mubr.msk.f32.gmra.mxu0 %vm471_vm0, %v16486_v22  ;;  %v2052_v21 = vld [vmem:[%s16243_s17 + $0xb8] sm:$0xff] }
  0x61   : > { %14700 = vmatprep.mubr.msk.f32.mxu1 %vm471_vm0, %v418_v23  ;;  %14756 = vmatprep.mubr.msk.f32.mxu0 %vm471_vm0, %v16490_v24  ;;  %v329_v23 = vld [vmem:[%s21181_s7 + $0x28] sm:$0xff] }
  0x62   : > { %vm365_vm6 = vcmp.ne.f32.partialorder %v329_v23, 0.0 }
  0x64   : > { %14701 = vmatmul.mubr.msk.f32.gmra.mxu1 %vm471_vm0, %v419_v25  ;;  %14757 = vmatmul.mubr.msk.f32.gmra.mxu0 %vm471_vm0, %v16500_v26  ;;  %v2053_v25 = vld [vmem:[%s16243_s17 + $0xc0] sm:$0xff] }
  0x65   : > { %14703 = vmatprep.mubr.msk.f32.mxu1 %vm471_vm0, %v420_v27  ;;  %14759 = vmatprep.mubr.msk.f32.mxu0 %vm471_vm0, %v16504_v28 }
  0x68   : > { %14704 = vmatmul.mubr.msk.f32.gmra.mxu1 %vm471_vm0, %v421_v29  ;;  %14760 = vmatmul.mubr.msk.f32.gmra.mxu0 %vm471_vm0, %v16514_v30  ;;  %v2054_v29 = vld [vmem:[%s16243_s17 + $0xc8] sm:$0xff] }
  0x69   : > { %14706 = vmatprep.mubr.msk.f32.mxu1 %vm471_vm0, %v422_v31  ;;  %14762 = vmatprep.mubr.msk.f32.mxu0 %vm471_vm0, %v16518_v32  ;;  %v331_v31 = vld [vmem:[%s21181_s7 + $0x38] sm:$0xff] }
  0x6a   : > { %vm367_vm8 = vcmp.ne.f32.partialorder %v331_v31, 0.0 }
  0x6c   : > { %14707 = vmatmul.mubr.msk.f32.gmra.mxu1 %vm471_vm0, %v423_v33  ;;  %14763 = vmatmul.mubr.msk.f32.gmra.mxu0 %vm471_vm0, %v16528_v34  ;;  %v2055_v33 = vld [vmem:[%s16243_s17 + $0xd0] sm:$0xff] }
  0x6d   : > { %14709 = vmatprep.mubr.msk.f32.mxu1 %vm471_vm0, %v424_v35  ;;  %14765 = vmatprep.mubr.msk.f32.mxu0 %vm471_vm0, %v16532_v36 }
  0x70   : > { %14710 = vmatmul.mubr.msk.f32.gmra.mxu1 %vm471_vm0, %v425_v37  ;;  %14766 = vmatmul.mubr.msk.f32.gmra.mxu0 %vm471_vm0, %v16542_v38  ;;  %v2056_v37 = vld [vmem:[%s16243_s17 + $0xd8] sm:$0xff] }
  0x71   : > { %14712 = vmatprep.mubr.msk.f32.mxu1 %vm471_vm0, %v426_v39  ;;  %14768 = vmatprep.mubr.msk.f32.mxu0 %vm471_vm0, %v16546_v40  ;;  %v333_v39 = vld [vmem:[%s21181_s7 + $0x48] sm:$0xff] }
  0x72   : > { %vm369_vm10 = vcmp.ne.f32.partialorder %v333_v39, 0.0  ;;  %v2894_v39 = vld [vmem:[%s16243_s17 + $0x69] sm:$0xff] }
  0x74   : > { %14713 = vmatmul.mubr.msk.f32.gmra.mxu1 %vm471_vm0, %v427_v41  ;;  %14769 = vmatmul.mubr.msk.f32.gmra.mxu0 %vm471_vm0, %v16556_v42  ;;  %v2057_v41 = vld [vmem:[%s16243_s17 + $0xe0] sm:$0xff] }
  0x75   : > { %14715 = vmatprep.mubr.msk.f32.mxu1 %vm471_vm0, %v428_v43  ;;  %14771 = vmatprep.mubr.msk.f32.mxu0 %vm471_vm0, %v16560_v44 }
  0x78   : > { %14716 = vmatmul.mubr.msk.f32.gmra.mxu1 %vm471_vm0, %v429_v45  ;;  %14772 = vmatmul.mubr.msk.f32.gmra.mxu0 %vm471_vm0, %v16570_v49  ;;  %v2058_v45 = vld [vmem:[%s16243_s17 + $0xe8] sm:$0xff] }
  0x79   : > { %14718 = vmatprep.mubr.msk.f32.mxu1 %vm471_vm0, %v430_v51  ;;  %14774 = vmatprep.mubr.msk.f32.mxu0 %vm471_vm0, %v16574_v53  ;;  %v335_v51 = vld [vmem:[%s21181_s7 + $0x58] sm:$0xff] }
  0x7a   : > { %vm371_vm12 = vcmp.ne.f32.partialorder %v335_v51, 0.0 }
  0x7c   : > { %14719 = vmatmul.mubr.msk.f32.gmra.mxu1 %vm471_vm0, %v431_v55  ;;  %14775 = vmatmul.mubr.msk.f32.gmra.mxu0 %vm471_vm0, %v16584_v57  ;;  %v2059_v55 = vld [vmem:[%s16243_s17 + $0xf0] sm:$0xff] }
  0x7d   : > { %14779 = vmatprep.mubr.msk.f32.mxu1 %vm471_vm0, %v16337_v46  ;;  %14835 = vmatprep.mubr.msk.f32.mxu0 %vm471_vm0, %v2032_v59  ;;  %v16606_v46 = vld [vmem:[%s21175_s1 + $0x40] sm:$0xff] }
  0x80   : > { %14780 = vmatmul.mubr.msk.f32.vlgmr.msra.gmra.mxu1 %vm471_vm0, %v16355_v50  ;;  %14836 = vmatmul.mubr.msk.f32.vlgmr.msra.gmra.mxu0 %vm471_vm0, %v2033_v61  ;;  %v2036_v50 = vld [vmem:[%s16243_s17 + $0x38] sm:$0xff] }
  0x81   : > { %14890 = vmatpush3.msra.mxu1 %v16344_v47  ;;  %14946 = vmatpush3.msra.mxu0 %v16349_v48  ;;  %v2037_v47 = vld [vmem:[%s16243_s17 + $0x40] sm:$0xff]  ;;  %v2038_v48 = vld [vmem:[%s16243_s17 + $0x48] sm:$0xff]  ;;  %v2060_v61 = vld [vmem:[%s16243_s17 + $0xf8] sm:$0xff] }
  0x82   : > { %14782 = vmatprep.mubr.msk.f32.mxu1 %vm471_vm0, %v16362_v52  ;;  %14838 = vmatprep.mubr.msk.f32.mxu0 %vm471_vm0, %v2034_v63  ;;  %v2039_v52 = vld [vmem:[%s16243_s17 + $0x50] sm:$0xff]  ;;  %v337_v63 = vld [vmem:[%s21181_s7 + $0x68] sm:$0xff] }
  0x83   : > { %15001 = vmatprep.subr.mxu1 %v16601_v1  ;;  %15057 = vmatprep.subr.mxu0 %v16606_v46  ;;  %vm373_vm14 = vcmp.ne.f32.partialorder %v337_v63, 0.0  ;;  %v356_v63 = vld [vmem:[%s21181_s7 + $0x100] sm:$0xff] }
  0x84   : > { %14783 = vmatmul.mubr.msk.f32.gmra.mxu1 %vm471_vm0, %v16374_v54  ;;  %14839 = vmatmul.mubr.msk.f32.gmra.mxu0 %vm471_vm0, %v2035_v3  ;;  %v2040_v54 = vld [vmem:[%s16243_s17 + $0x58] sm:$0xff]  ;;  %v2061_v3 = vld [vmem:[%s16243_s17 + $0x100] sm:$0xff] }
  0x85   : > { %14785 = vmatprep.mubr.msk.f32.mxu1 %vm471_vm0, %v16378_v56  ;;  %14841 = vmatprep.mubr.msk.f32.mxu0 %vm471_vm0, %v2036_v50  ;;  %v2041_v56 = vld [vmem:[%s16243_s17 + $0x60] sm:$0xff] }
  0x88   : > { %14786 = vmatmul.mubr.msk.f32.gmra.mxu1 %vm471_vm0, %v16388_v58  ;;  %14842 = vmatmul.mubr.msk.f32.gmra.mxu0 %vm471_vm0, %v2037_v47  ;;  %v2042_v58 = vld [vmem:[%s16243_s17 + $0x68] sm:$0xff] }
  0x89   : > { %14788 = vmatprep.mubr.msk.f32.mxu1 %vm471_vm0, %v16392_v60  ;;  %14844 = vmatprep.mubr.msk.f32.mxu0 %vm471_vm0, %v2038_v48  ;;  %v2043_v60 = vld [vmem:[%s16243_s17 + $0x70] sm:$0xff]  ;;  %v2062_v47 = vld [vmem:[%s16243_s17 + $0x108] sm:$0xff]  ;;  %v339_v48 = vld [vmem:[%s21181_s7 + $0x78] sm:$0xff] }
  0x8c   : > { %14789 = vmatmul.mubr.msk.f32.gmra.mxu1 %vm471_vm0, %v16402_v62  ;;  %14845 = vmatmul.mubr.msk.f32.gmra.mxu0 %vm471_vm0, %v2039_v52  ;;  %v2044_v62 = vld [vmem:[%s16243_s17 + $0x78] sm:$0xff]  ;;  %v2063_v52 = vld [vmem:[%s16243_s17 + $0x110] sm:$0xff] }
  0x8d   : > { %14791 = vmatprep.mubr.msk.f32.mxu1 %vm471_vm0, %v16406_v0  ;;  %14847 = vmatprep.mubr.msk.f32.mxu0 %vm471_vm0, %v2040_v54  ;;  %v2045_v0 = vld [vmem:[%s16243_s17 + $0x80] sm:$0xff] }
  0x90   : > { %14792 = vmatmul.mubr.msk.f32.gmra.mxu1 %vm471_vm0, %v16410_v2  ;;  %14848 = vmatmul.mubr.msk.f32.gmra.mxu0 %vm471_vm0, %v2041_v56  ;;  %v2046_v2 = vld [vmem:[%s16243_s17 + $0x88] sm:$0xff] }
  0x91   : > { %14794 = vmatprep.mubr.msk.f32.mxu1 %vm471_vm0, %v16420_v4  ;;  %14850 = vmatprep.mubr.msk.f32.mxu0 %vm471_vm0, %v2042_v58  ;;  %v324_v4 = vld [vmem:[%s21181_s7] sm:$0xff]  ;;  %v341_v58 = vld [vmem:[%s21181_s7 + $0x88] sm:$0xff] }
  0x92   : > { %vm360_vm1 = vcmp.ne.f32.partialorder %v324_v4, 0.0  ;;  %v344_v4 = vld [vmem:[%s21181_s7 + $0xa0] sm:$0xff] }
  0x94   : > { %14795 = vmatmul.mubr.msk.f32.gmra.mxu1 %vm471_vm0, %v16430_v6  ;;  %14851 = vmatmul.mubr.msk.f32.gmra.mxu0 %vm471_vm0, %v2043_v60  ;;  %v16171_v6 = vmov 0   ;;  %v2065_v60 = vld [vmem:[%s16243_s17 + $0x120] sm:$0xff] }
  0x95   : > { %14797 = vmatprep.mubr.msk.f32.mxu1 %vm471_vm0, %v16434_v8  ;;  %14853 = vmatprep.mubr.msk.f32.mxu0 %vm471_vm0, %v2044_v62  ;;  %v4246_v7 = vsel %vm360_vm1, 1, %v16171_v6  ;;  %v2048_v8 = vld [vmem:[%s16243_s17 + $0x98] sm:$0xff]  ;;  %v4249_v19 = vsel %vm363_vm4, 1, %v16171_v6  ;;  %v4251_v27 = vsel %vm365_vm6, 1, %v16171_v6  ;;  %v4253_v35 = vsel %vm367_vm8, 1, %v16171_v6 }
  0x96   : > { %16043 = vset.pattern.permute.xlu0 %v16171_v6  ;;  %16044 = vset.pattern.permute.xlu1 %v16171_v6  ;;  %v4255_v43 = vsel %vm369_vm10, 1, %v16171_v6  ;;  %v4257_v59 = vsel %vm371_vm12, 1, %v16171_v6  ;;  %v4259_v50 = vsel %vm373_vm14, 1, %v16171_v6  ;;  %vm375_vm1 = vcmp.ne.f32.partialorder %v339_v48, 0.0 }
  0x97   : > { %4283 = vperm.xlu0 %16043, %v4246_v7   ;;  %v4261_v54 = vsel %vm375_vm1, 1, %v16171_v6  ;;  %v2067_v7 = vld [vmem:[%s16243_s17 + $0x130] sm:$0xff]  ;;  %vm380_vm6 = vcmp.ne.f32.partialorder %v344_v4, 0.0 }
  0x98   : > { %14798 = vmatmul.mubr.msk.f32.gmra.mxu1 %vm471_vm0, %v16444_v10  ;;  %14854 = vmatmul.mubr.msk.f32.gmra.mxu0 %vm471_vm0, %v2045_v0  ;;  %v325_v10 = vld [vmem:[%s21181_s7 + $0x8] sm:$0xff] }
  0x99   : > { %14800 = vmatprep.mubr.msk.f32.mxu1 %vm471_vm0, %v16448_v12  ;;  %14856 = vmatprep.mubr.msk.f32.mxu0 %vm471_vm0, %v2046_v2  ;;  %v4248_v12 = vsel %vm362_vm2, 1, %v16171_v6  ;;  %vm361_vm3 = vcmp.ne.f32.partialorder %v325_v10, 0.0  ;;  %v1639_v0 = vld [vmem:[%s16243_s17 + $0x127] sm:$0xff]  ;;  %v4266_v10 = vsel %vm380_vm6, 1, %v16171_v6 }
  0x9a   : > { %4289 = vperm.xlu1 %16044, %v4248_v12   ;;  %v346_v12 = vld [vmem:[%s21181_s7 + $0xb0] sm:$0xff] }
  0x9b   : > { %vm382_vm8 = vcmp.ne.f32.partialorder %v346_v12, 0.0 }
  0x9c   : > { %14801 = vmatmul.mubr.msk.f32.gmra.mxu1 %vm471_vm0, %v16458_v14  ;;  %14857 = vmatmul.mubr.msk.f32.gmra.mxu0 %vm471_vm0, %v2047_v5  ;;  %v4247_v14 = vsel %vm361_vm3, 1, %v16171_v6  ;;  %vm377_vm3 = vcmp.ne.f32.partialorder %v341_v58, 0.0  ;;  %v1640_v5 = vld [vmem:[%s16243_s17 + $0x12f] sm:$0xff] }
  0x9d   : > { %14803 = vmatprep.mubr.msk.f32.mxu1 %vm471_vm0, %v16462_v16  ;;  %14859 = vmatprep.mubr.msk.f32.mxu0 %vm471_vm0, %v2048_v8  ;;  %v328_v16 = vld [vmem:[%s21181_s7 + $0x20] sm:$0xff]  ;;  %v4263_v62 = vsel %vm377_vm3, 1, %v16171_v6  ;;  %vm392_vm3 = vcmp.ne.f32.partialorder %v356_v63, 0.0 }
  0x9e   : > { %4286 = vperm.xlu0 %16043, %v4247_v14   ;;  %vm364_vm5 = vcmp.ne.f32.partialorder %v328_v16, 0.0  ;;  %4292 = vperm.xlu1 %16044, %v4249_v19   ;;  %v2887_v14 = vld [vmem:[%s16243_s17 + $0x31] sm:$0xff]  ;;  %v4268_v16 = vsel %vm382_vm8, 1, %v16171_v6 }
  0x9f   : > { %v347_v19 = vld [vmem:[%s21181_s7 + $0xb8] sm:$0xff] }
  0xa0   : > { %14804 = vmatmul.mubr.msk.f32.gmra.mxu1 %vm471_vm0, %v16472_v18  ;;  %14860 = vmatmul.mubr.msk.f32.gmra.mxu0 %vm471_vm0, %v2049_v11  ;;  %v4250_v18 = vsel %vm364_vm5, 1, %v16171_v6  ;;  %v345_v11 = vld [vmem:[%s21181_s7 + $0xa8] sm:$0xff] }
  0xa1   : > { %14806 = vmatprep.mubr.msk.f32.mxu1 %vm471_vm0, %v16476_v20  ;;  %14862 = vmatprep.mubr.msk.f32.mxu0 %vm471_vm0, %v2050_v13  ;;  %v330_v20 = vld [vmem:[%s21181_s7 + $0x30] sm:$0xff]  ;;  %v2460_v13 = vld [vmem:[%s16243_s17 + $0x21] sm:$0xff] }
  0xa2   : > { %4295 = vperm.xlu0 %16043, %v4250_v18   ;;  %vm366_vm7 = vcmp.ne.f32.partialorder %v330_v20, 0.0  ;;  %4298 = vperm.xlu1 %16044, %v4251_v27   ;;  %v2889_v18 = vld [vmem:[%s16243_s17 + $0x41] sm:$0xff]  ;;  %v2890_v20 = vld [vmem:[%s16243_s17 + $0x49] sm:$0xff]  ;;  %v2891_v27 = vld [vmem:[%s16243_s17 + $0x51] sm:$0xff] }
  0xa4   : > { %14807 = vmatmul.mubr.msk.f32.gmra.mxu1 %vm471_vm0, %v16486_v22  ;;  %14863 = vmatmul.mubr.msk.f32.gmra.mxu0 %vm471_vm0, %v2051_v17  ;;  %v4252_v22 = vsel %vm366_vm7, 1, %v16171_v6  ;;  %vm381_vm7 = vcmp.ne.f32.partialorder %v345_v11, 0.0  ;;  %v2888_v17 = vld [vmem:[%s16243_s17 + $0x39] sm:$0xff] }
  0xa5   : > { %14809 = vmatprep.mubr.msk.f32.mxu1 %vm471_vm0, %v16490_v24  ;;  %14865 = vmatprep.mubr.msk.f32.mxu0 %vm471_vm0, %v2052_v21  ;;  %v332_v24 = vld [vmem:[%s21181_s7 + $0x40] sm:$0xff]  ;;  %v4267_v15 = vsel %vm381_vm7, 1, %v16171_v6  ;;  %vm310_vm7 = vcmask 257024  }
  0xa6   : > { %4301 = vperm.xlu0 %16043, %v4252_v22   ;;  %vm368_vm9 = vcmp.ne.f32.partialorder %v332_v24, 0.0  ;;  %4304 = vperm.xlu1 %16044, %v4253_v35   ;;  %v348_v21 = vld [vmem:[%s21181_s7 + $0xc0] sm:$0xff]  ;;  %v351_v24 = vld [vmem:[%s21181_s7 + $0xd8] sm:$0xff]  ;;  %311 = vst.msk [vmem:[#allocation2] sm:$0xf] %vm310_vm7, %v16171_v6 }
  0xa7   : > { %vm384_vm10 = vcmp.ne.f32.partialorder %v348_v21, 0.0  ;;  %v2892_v22 = vld [vmem:[%s16243_s17 + $0x59] sm:$0xff]  ;;  %v2893_v35 = vld [vmem:[%s16243_s17 + $0x61] sm:$0xff]  ;;  %312 = vst.msk [vmem:[#allocation2 + $0x4] sm:$0xf] %vm310_vm7, %v16171_v6 }
  0xa8   : > { %14810 = vmatmul.mubr.msk.f32.gmra.mxu1 %vm471_vm0, %v16500_v26  ;;  %14866 = vmatmul.mubr.msk.f32.gmra.mxu0 %vm471_vm0, %v2053_v25  ;;  %v4254_v26 = vsel %vm368_vm9, 1, %v16171_v6  ;;  %vm383_vm9 = vcmp.ne.f32.partialorder %v347_v19, 0.0  ;;  %v4270_v25 = vsel %vm384_vm10, 1, %v16171_v6  ;;  %v2905_v21 = vld [vmem:[%s16243_s17 + $0xc1] sm:$0xff]  ;;  %313 = vst.msk [vmem:[#allocation2 + $0x8] sm:$0xf] %vm310_vm7, %v16171_v6 }
  0xa9   : > { %14812 = vmatprep.mubr.msk.f32.mxu1 %vm471_vm0, %v16504_v28  ;;  %14868 = vmatprep.mubr.msk.f32.mxu0 %vm471_vm0, %v2054_v29  ;;  %v334_v28 = vld [vmem:[%s21181_s7 + $0x50] sm:$0xff]  ;;  %v4269_v23 = vsel %vm383_vm9, 1, %v16171_v6  ;;  %314 = vst.msk [vmem:[#allocation2 + $0x9c] sm:$0xf] %vm310_vm7, %v16171_v6  ;;  %315 = vst.msk [vmem:[#allocation2 + $0xa0] sm:$0xf] %vm310_vm7, %v16171_v6 }
  0xaa   : > { %4307 = vperm.xlu0 %16043, %v4254_v26   ;;  %vm370_vm11 = vcmp.ne.f32.partialorder %v334_v28, 0.0  ;;  %4310 = vperm.xlu1 %16044, %v4255_v43   ;;  %v353_v28 = vld [vmem:[%s21181_s7 + $0xe8] sm:$0xff]  ;;  %316 = vst.msk [vmem:[#allocation2 + $0xa4] sm:$0xf] %vm310_vm7, %v16171_v6 }
  0xac   : > { %14813 = vmatmul.mubr.msk.f32.gmra.mxu1 %vm471_vm0, %v16514_v30  ;;  %14869 = vmatmul.mubr.msk.f32.gmra.mxu0 %vm471_vm0, %v2055_v33  ;;  %v4256_v30 = vsel %vm370_vm11, 1, %v16171_v6  ;;  %v352_v33 = vld [vmem:[%s21181_s7 + $0xe0] sm:$0xff] }
  0xad   : > { %14815 = vmatprep.mubr.msk.f32.mxu1 %vm471_vm0, %v16518_v32  ;;  %14871 = vmatprep.mubr.msk.f32.mxu0 %vm471_vm0, %v2056_v37  ;;  %v336_v32 = vld [vmem:[%s21181_s7 + $0x60] sm:$0xff]  ;;  %vm388_vm14 = vcmp.ne.f32.partialorder %v352_v33, 0.0 }
  0xae   : > { %4313 = vperm.xlu0 %16043, %v4256_v30   ;;  %vm372_vm13 = vcmp.ne.f32.partialorder %v336_v32, 0.0  ;;  %4316 = vperm.xlu1 %16044, %v4257_v59   ;;  %v4274_v26 = vsel %vm388_vm14, 1, %v16171_v6  ;;  %v2895_v30 = vld [vmem:[%s16243_s17 + $0x71] sm:$0xff]  ;;  %v2909_v33 = vld [vmem:[%s16243_s17 + $0xe1] sm:$0xff] }
  0xb0   : > { %14816 = vmatmul.mubr.msk.f32.gmra.mxu1 %vm471_vm0, %v16528_v34  ;;  %14872 = vmatmul.mubr.msk.f32.gmra.mxu0 %vm471_vm0, %v2057_v41  ;;  %v4258_v34 = vsel %vm372_vm13, 1, %v16171_v6  ;;  %vm387_vm13 = vcmp.ne.f32.partialorder %v351_v24, 0.0  ;;  %v354_v41 = vld [vmem:[%s21181_s7 + $0xf0] sm:$0xff] }
  0xb1   : > { %14818 = vmatprep.mubr.msk.f32.mxu1 %vm471_vm0, %v16532_v36  ;;  %14874 = vmatprep.mubr.msk.f32.mxu0 %vm471_vm0, %v2058_v45  ;;  %v338_v36 = vld [vmem:[%s21181_s7 + $0x70] sm:$0xff]  ;;  %v4273_v37 = vsel %vm387_vm13, 1, %v16171_v6  ;;  %vm390_vm1 = vcmp.ne.f32.partialorder %v354_v41, 0.0 }
  0xb2   : > { %4319 = vperm.xlu0 %16043, %v4258_v34   ;;  %vm374_vm15 = vcmp.ne.f32.partialorder %v338_v36, 0.0  ;;  %4322 = vperm.xlu1 %16044, %v4259_v50   ;;  %v4276_v32 = vsel %vm390_vm1, 1, %v16171_v6  ;;  %v355_v34 = vld [vmem:[%s21181_s7 + $0xf8] sm:$0xff]  ;;  %v2897_v50 = vld [vmem:[%s16243_s17 + $0x81] sm:$0xff]  ;;  %vm4782_vm1 = vcmask 1044480  }
  0xb3   : > { %v2911_v41 = vld [vmem:[%s16243_s17 + $0xf1] sm:$0xff] }
  0xb4   : > { %14819 = vmatmul.mubr.msk.f32.gmra.mxu1 %vm471_vm0, %v16542_v38  ;;  %14875 = vmatmul.mubr.msk.f32.gmra.mxu0 %vm471_vm0, %v2059_v55  ;;  %v4260_v38 = vsel %vm374_vm15, 1, %v16171_v6  ;;  %vm389_vm15 = vcmp.ne.f32.partialorder %v353_v28, 0.0 }
  0xb5   : > { %14821 = vmatprep.mubr.msk.f32.mxu1 %vm471_vm0, %v16546_v40  ;;  %14877 = vmatprep.mubr.msk.f32.mxu0 %vm471_vm0, %v2060_v61  ;;  %v340_v40 = vld [vmem:[%s21181_s7 + $0x80] sm:$0xff]  ;;  %v4275_v51 = vsel %vm389_vm15, 1, %v16171_v6 }
  0xb6   : > { %4325 = vperm.xlu0 %16043, %v4260_v38   ;;  %vm376_vm2 = vcmp.ne.f32.partialorder %v340_v40, 0.0  ;;  %4328 = vperm.xlu1 %16044, %v4261_v54   ;;  %v2896_v61 = vld [vmem:[%s16243_s17 + $0x79] sm:$0xff]  ;;  %v4278_v38 = vsel %vm392_vm3, 1, %v16171_v6  ;;  %v357_v54 = vld [vmem:[%s21181_s7 + $0x108] sm:$0xff] }
  0xb7   : > { %v4262_v56 = vsel %vm376_vm2, 1, %v16171_v6  ;;  %vm391_vm2 = vcmp.ne.f32.partialorder %v355_v34, 0.0 }
  0xb8   : > { %14822 = vmatmul.mubr.msk.f32.gmra.mxu1 %vm471_vm0, %v16556_v42  ;;  %14878 = vmatmul.mubr.msk.f32.gmra.mxu0 %vm471_vm0, %v2061_v3  ;;  %v2064_v42 = vld [vmem:[%s16243_s17 + $0x118] sm:$0xff] }
  0xb9   : > { %14824 = vmatprep.mubr.msk.f32.mxu1 %vm471_vm0, %v16560_v44  ;;  %14880 = vmatprep.mubr.msk.f32.mxu0 %vm471_vm0, %v2062_v47  ;;  %v342_v44 = vld [vmem:[%s21181_s7 + $0x90] sm:$0xff]  ;;  %v4277_v47 = vsel %vm391_vm2, 1, %v16171_v6  ;;  %vm317_vm2 = vcmask 261120  }
  0xba   : > { %4331 = vperm.xlu0 %16043, %v4262_v56   ;;  %vm378_vm4 = vcmp.ne.f32.partialorder %v342_v44, 0.0  ;;  %4334 = vperm.xlu1 %16044, %v4263_v62   ;;  %v2899_v44 = vld [vmem:[%s16243_s17 + $0x91] sm:$0xff] }
  0xbb   : > { %v4264_v2 = vsel %vm378_vm4, 1, %v16171_v6  ;;  %vm393_vm4 = vcmp.ne.f32.partialorder %v357_v54, 0.0 }
  0xbc   : > { %14825 = vmatmul.mubr.msk.f32.gmra.mxu1 %vm471_vm0, %v16570_v49  ;;  %14881 = vmatmul.mubr.msk.f32.gmra.mxu0 %vm471_vm0, %v2063_v52  ;;  %v2066_v49 = vld [vmem:[%s16243_s17 + $0x128] sm:$0xff] }
  0xbd   : > { %14827 = vmatprep.mubr.msk.f32.mxu1 %vm471_vm0, %v16574_v53  ;;  %14883 = vmatprep.mubr.msk.f32.mxu0 %vm471_vm0, %v2064_v42  ;;  %v343_v53 = vld [vmem:[%s21181_s7 + $0x98] sm:$0xff]  ;;  %v2898_v52 = vld [vmem:[%s16243_s17 + $0x89] sm:$0xff] }
  0xbe   : > { %4337 = vperm.xlu0 %16043, %v4264_v2   ;;  %vm379_vm5 = vcmp.ne.f32.partialorder %v343_v53, 0.0  ;;  %v358_v42 = vld [vmem:[%s21181_s7 + $0x110] sm:$0xff]  ;;  %v2900_v2 = vld [vmem:[%s16243_s17 + $0x99] sm:$0xff] }
  0xbf   : > { %v4265_v8 = vsel %vm379_vm5, 1, %v16171_v6  ;;  %vm394_vm5 = vcmp.ne.f32.partialorder %v358_v42, 0.0  ;;  %v359_v53 = vld [vmem:[%s21181_s7 + $0x118] sm:$0xff] }
  0xc0   : > { %14828 = vmatmul.mubr.msk.f32.gmra.mxu1 %vm471_vm0, %v16584_v57  ;;  %14884 = vmatmul.mubr.msk.f32.gmra.mxu0 %vm471_vm0, %v2065_v60  ;;  %v2886_v57 = vld [vmem:[%s16243_s17 + $0x29] sm:$0xff]  ;;  %v4279_v60 = vsel %vm393_vm4, 1, %v16171_v6  ;;  %v4280_v62 = vsel %vm394_vm5, 1, %v16171_v6  ;;  %vm395_vm6 = vcmp.ne.f32.partialorder %v359_v53, 0.0 }
  0xc1   : > { %14830 = vmatprep.mubr.msk.f32.mxu1 %vm471_vm0, %v1639_v0  ;;  %14886 = vmatprep.mubr.msk.f32.mxu0 %vm471_vm0, %v2066_v49 }
  0xc2   : > { %4340 = vperm.xlu1 %16044, %v4265_v8   ;;  %4343 = vperm.xlu0 %16043, %v4266_v10   ;;  %v4281_v8 = vsel %vm395_vm6, 1, %v16171_v6  ;;  %v2902_v10 = vld [vmem:[%s16243_s17 + $0xa9] sm:$0xff] }
  0xc4   : > { %14831 = vmatmul.mubr.msk.f32.gmra.mxu1 %vm471_vm0, %v1640_v5  ;;  %14887 = vmatmul.mubr.msk.f32.gmra.mxu0 %vm471_vm0, %v2067_v7  ;;  %v2901_v7 = vld [vmem:[%s16243_s17 + $0xa1] sm:$0xff] }
  0xc5   : > { %14891 = vmatprep.mubr.msk.f32.mxu1 %vm471_vm0, %v2459_v9  ;;  %14947 = vmatprep.mubr.msk.f32.mxu0 %vm471_vm0, %v2886_v57 }
  0xc6   : > { %4346 = vperm.xlu1 %16044, %v4267_v15   ;;  %4349 = vperm.xlu0 %16043, %v4268_v16   ;;  %v2904_v16 = vld [vmem:[%s16243_s17 + $0xb9] sm:$0xff] }
  0xc8   : > { %14892 = vmatmul.mubr.msk.f32.vlgmr.msra.gmra.mxu1 %vm471_vm0, %v2460_v13  ;;  %14948 = vmatmul.mubr.msk.f32.vlgmr.msra.gmra.mxu0 %vm471_vm0, %v2887_v14  ;;  %v2903_v13 = vld [vmem:[%s16243_s17 + $0xb1] sm:$0xff] }
  0xc9   : > { %15002 = vmatpush3.msra.mxu1 %v16601_v1  ;;  %15058 = vmatpush3.msra.mxu0 %v16606_v46  ;;  %v349_v1 = vld [vmem:[%s21181_s7 + $0xc8] sm:$0xff]  ;;  %v350_v46 = vld [vmem:[%s21181_s7 + $0xd0] sm:$0xff] }
  0xca   : > { %14894 = vmatprep.mubr.msk.f32.mxu1 %vm471_vm0, %v2886_v57  ;;  %14950 = vmatprep.mubr.msk.f32.mxu0 %vm471_vm0, %v2888_v17  ;;  %vm385_vm11 = vcmp.ne.f32.partialorder %v349_v1, 0.0  ;;  %vm386_vm12 = vcmp.ne.f32.partialorder %v350_v46, 0.0  ;;  %v2907_v46 = vld [vmem:[%s16243_s17 + $0xd1] sm:$0xff] }
  0xcb   : > { %4352 = vperm.xlu1 %16044, %v4269_v23   ;;  %4355 = vperm.xlu0 %16043, %v4270_v25   ;;  %v4271_v29 = vsel %vm385_vm11, 1, %v16171_v6  ;;  %v4272_v31 = vsel %vm386_vm12, 1, %v16171_v6 }
  0xcc   : > { %14895 = vmatmul.mubr.msk.f32.gmra.mxu1 %vm471_vm0, %v2887_v14  ;;  %14951 = vmatmul.mubr.msk.f32.gmra.mxu0 %vm471_vm0, %v2889_v18 }
  0xcd   : > { %14897 = vmatprep.mubr.msk.f32.mxu1 %vm471_vm0, %v2888_v17  ;;  %14953 = vmatprep.mubr.msk.f32.mxu0 %vm471_vm0, %v2890_v20 }
  0xcf   : > { %4358 = vperm.xlu1 %16044, %v4271_v29   ;;  %4361 = vperm.xlu0 %16043, %v4272_v31  }
  0xd0   : > { %14898 = vmatmul.mubr.msk.f32.gmra.mxu1 %vm471_vm0, %v2889_v18  ;;  %14954 = vmatmul.mubr.msk.f32.gmra.mxu0 %vm471_vm0, %v2891_v27 }
  0xd1   : > { %14900 = vmatprep.mubr.msk.f32.mxu1 %vm471_vm0, %v2890_v20  ;;  %14956 = vmatprep.mubr.msk.f32.mxu0 %vm471_vm0, %v2892_v22  ;;  %v2906_v20 = vld [vmem:[%s16243_s17 + $0xc9] sm:$0xff] }
  0xd3   : > { %4364 = vperm.xlu1 %16044, %v4273_v37   ;;  %4367 = vperm.xlu0 %16043, %v4274_v26   ;;  %v2910_v26 = vld [vmem:[%s16243_s17 + $0xe9] sm:$0xff] }
  0xd4   : > { %v16898_v43 = vpop.f32.mrf.mxu0  ;;  %v16900_v45 = vpop.f32.mrf.mxu1  ;;  %14901 = vmatmul.mubr.msk.f32.gmra.mxu1 %vm471_vm0, %v2891_v27  ;;  %14957 = vmatmul.mubr.msk.f32.gmra.mxu0 %vm471_vm0, %v2893_v35 }
  0xd5   : > { %14903 = vmatprep.mubr.msk.f32.mxu1 %vm471_vm0, %v2892_v22  ;;  %14959 = vmatprep.mubr.msk.f32.mxu0 %vm471_vm0, %v2894_v39  ;;  %v2908_v22 = vld [vmem:[%s16243_s17 + $0xd9] sm:$0xff] }
  0xd6   : > { %v16909_v55 = vpop.f32.mrf.mxu0  ;;  %v16911_v59 = vpop.f32.mrf.mxu1 }
  0xd7   : > { %4370 = vperm.xlu1 %16044, %v4275_v51   ;;  %4373 = vperm.xlu0 %16043, %v4276_v32   ;;  %v2912_v32 = vld [vmem:[%s16243_s17 + $0xf9] sm:$0xff] }
  0xd8   : > { %v16920_v36 = vpop.f32.mrf.mxu0  ;;  %v16922_v3 = vpop.f32.mrf.mxu1  ;;  %14904 = vmatmul.mubr.msk.f32.gmra.mxu1 %vm471_vm0, %v2893_v35  ;;  %14960 = vmatmul.mubr.msk.f32.gmra.mxu0 %vm471_vm0, %v2895_v30 }
  0xd9   : > { %14906 = vmatprep.mubr.msk.f32.mxu1 %vm471_vm0, %v2894_v39  ;;  %14962 = vmatprep.mubr.msk.f32.mxu0 %vm471_vm0, %v2896_v61 }
  0xda   : > { %v16931_v48 = vpop.f32.mrf.mxu0  ;;  %v16933_v40 = vpop.f32.mrf.mxu1 }
  0xdb   : > { %4376 = vperm.xlu1 %16044, %v4277_v47   ;;  %4379 = vperm.xlu0 %16043, %v4278_v38  }
  0xdc   : > { %v16942_v56 = vpop.f32.mrf.mxu0  ;;  %v16944_v58 = vpop.f32.mrf.mxu1  ;;  %14907 = vmatmul.mubr.msk.f32.gmra.mxu1 %vm471_vm0, %v2895_v30  ;;  %14963 = vmatmul.mubr.msk.f32.gmra.mxu0 %vm471_vm0, %v2897_v50 }
  0xdd   : > { %14909 = vmatprep.mubr.msk.f32.mxu1 %vm471_vm0, %v2896_v61  ;;  %14965 = vmatprep.mubr.msk.f32.mxu0 %vm471_vm0, %v2898_v52 }
  0xde   : > { %v16953_v0 = vpop.f32.mrf.mxu0  ;;  %v16955_v49 = vpop.f32.mrf.mxu1 }
  0xdf   : > { %4382 = vperm.xlu1 %16044, %v4279_v60   ;;  %4385 = vperm.xlu0 %16043, %v4280_v62  }
  0xe0   : > { %v16961_v4 = vpop.f32.mrf.mxu0  ;;  %v16963_v5 = vpop.f32.mrf.mxu1  ;;  %14910 = vmatmul.mubr.msk.f32.gmra.mxu1 %vm471_vm0, %v2897_v50  ;;  %14966 = vmatmul.mubr.msk.f32.gmra.mxu0 %vm471_vm0, %v2899_v44  ;;  %v2913_v50 = vld [vmem:[%s16243_s17 + $0x101] sm:$0xff] }
  0xe1   : > { %14912 = vmatprep.mubr.msk.f32.mxu1 %vm471_vm0, %v2898_v52  ;;  %14968 = vmatprep.mubr.msk.f32.mxu0 %vm471_vm0, %v2900_v2  ;;  %v2914_v52 = vld [vmem:[%s16243_s17 + $0x109] sm:$0xff] }
  0xe2   : > { %v16971_v9 = vpop.f32.mrf.mxu0  ;;  %v16973_v57 = vpop.f32.mrf.mxu1 }
  0xe3   : > { %4388 = vperm.xlu1 %16044, %v4281_v8  }
  0xe4   : > { %v16976_v11 = vpop.f32.mrf.mxu0  ;;  %v16978_v12 = vpop.f32.mrf.mxu1  ;;  %14913 = vmatmul.mubr.msk.f32.gmra.mxu1 %vm471_vm0, %v2899_v44  ;;  %14969 = vmatmul.mubr.msk.f32.gmra.mxu0 %vm471_vm0, %v2901_v7 }
  0xe5   : > { %14915 = vmatprep.mubr.msk.f32.mxu1 %vm471_vm0, %v2900_v2  ;;  %14971 = vmatprep.mubr.msk.f32.mxu0 %vm471_vm0, %v2902_v10  ;;  %v2915_v2 = vld [vmem:[%s16243_s17 + $0x111] sm:$0xff] }
  0xe6   : > { %v16985_v14 = vpop.f32.mrf.mxu0  ;;  %v16987_v15 = vpop.f32.mrf.mxu1 }
  0xe8   : > { %v16990_v17 = vpop.f32.mrf.mxu0  ;;  %v16992_v19 = vpop.f32.mrf.mxu1  ;;  %14916 = vmatmul.mubr.msk.f32.gmra.mxu1 %vm471_vm0, %v2901_v7  ;;  %14972 = vmatmul.mubr.msk.f32.gmra.mxu0 %vm471_vm0, %v2903_v13 }
  0xe9   : > { %14918 = vmatprep.mubr.msk.f32.mxu1 %vm471_vm0, %v2902_v10  ;;  %14974 = vmatprep.mubr.msk.f32.mxu0 %vm471_vm0, %v2904_v16 }
  0xea   : > { %v16999_v18 = vpop.f32.mrf.mxu0  ;;  %v17001_v23 = vpop.f32.mrf.mxu1 }
  0xec   : > { %v17004_v25 = vpop.f32.mrf.mxu0  ;;  %v17006_v1 = vpop.f32.mrf.mxu1  ;;  %14919 = vmatmul.mubr.msk.f32.gmra.mxu1 %vm471_vm0, %v2903_v13  ;;  %14975 = vmatmul.mubr.msk.f32.gmra.mxu0 %vm471_vm0, %v2905_v21 }
  0xed   : > { %14921 = vmatprep.mubr.msk.f32.mxu1 %vm471_vm0, %v2904_v16  ;;  %14977 = vmatprep.mubr.msk.f32.mxu0 %vm471_vm0, %v2906_v20 }
  0xee   : > { %v17013_v27 = vpop.f32.mrf.mxu0  ;;  %v17015_v29 = vpop.f32.mrf.mxu1 }
  0xf0   : > { %v17018_v31 = vpop.f32.mrf.mxu0  ;;  %v17020_v24 = vpop.f32.mrf.mxu1  ;;  %14922 = vmatmul.mubr.msk.f32.gmra.mxu1 %vm471_vm0, %v2905_v21  ;;  %14978 = vmatmul.mubr.msk.f32.gmra.mxu0 %vm471_vm0, %v2907_v46 }
  0xf1   : > { %14924 = vmatprep.mubr.msk.f32.mxu1 %vm471_vm0, %v2906_v20  ;;  %14980 = vmatprep.mubr.msk.f32.mxu0 %vm471_vm0, %v2908_v22  ;;  %v2917_v20 = vld [vmem:[%s16243_s17 + $0x121] sm:$0xff] }
  0xf2   : > { %v17027_v35 = vpop.f32.mrf.mxu0  ;;  %v17029_v37 = vpop.f32.mrf.mxu1 }
  0xf4   : > { %v17032_v39 = vpop.f32.mrf.mxu0  ;;  %v17034_v28 = vpop.f32.mrf.mxu1  ;;  %14925 = vmatmul.mubr.msk.f32.gmra.mxu1 %vm471_vm0, %v2907_v46  ;;  %14981 = vmatmul.mubr.msk.f32.gmra.mxu0 %vm471_vm0, %v2909_v33 }
  0xf5   : > { %14927 = vmatprep.mubr.msk.f32.mxu1 %vm471_vm0, %v2908_v22  ;;  %14983 = vmatprep.mubr.msk.f32.mxu0 %vm471_vm0, %v2910_v26 }
  0xf6   : > { %v17041_v30 = vpop.f32.mrf.mxu0  ;;  %v17043_v51 = vpop.f32.mrf.mxu1 }
  0xf8   : > { %v14669_v61 = vpop.f32.mrf.mxu1  ;;  %v14725_v34 = vpop.f32.mrf.mxu0  ;;  %14928 = vmatmul.mubr.msk.f32.gmra.mxu1 %vm471_vm0, %v2909_v33  ;;  %14984 = vmatmul.mubr.msk.f32.gmra.mxu0 %vm471_vm0, %v2911_v41 }
  0xf9   : > { %v1005_v63 = vadd.f32 %v14669_v61, %v16898_v43  ;;  %14930 = vmatprep.mubr.msk.f32.mxu1 %vm471_vm0, %v2910_v26  ;;  %14986 = vmatprep.mubr.msk.f32.mxu0 %vm471_vm0, %v2912_v32 }
  0xfa   : > { %v999_v47 = vpop.f32.mrf.mxu1  ;;  %v1390_v38 = vpop.f32.mrf.mxu0 }
  0xfb   : > { %v17053_v54 = vadd.f32 %v14725_v34, %v1005_v63  ;;  %v1000_v42 = vadd.f32 %v999_v47, %v16909_v55  ;;  %v2916_v55 = vld [vmem:[%s16243_s17 + $0x119] sm:$0xff]  ;;  %v2919_v34 = vld [vmem:[%s16243_s17 + $0x131] sm:$0xff] }
  0xfc   : > { %v14672_v44 = vpop.f32.mrf.mxu1  ;;  %v14728_v60 = vpop.f32.mrf.mxu0  ;;  %14931 = vmatmul.mubr.msk.f32.gmra.mxu1 %vm471_vm0, %v2911_v41  ;;  %14987 = vmatmul.mubr.msk.f32.gmra.mxu0 %vm471_vm0, %v2913_v50 }
  0xfd   : > { %v17058_v43 = vadd.f32 %v1390_v38, %v1000_v42  ;;  %v1015_v62 = vadd.f32 %v14672_v44, %v16920_v36  ;;  %14933 = vmatprep.mubr.msk.f32.mxu1 %vm471_vm0, %v2912_v32  ;;  %14989 = vmatprep.mubr.msk.f32.mxu0 %vm471_vm0, %v2914_v52 }
  0xfe   : > { %v1009_v53 = vpop.f32.mrf.mxu1  ;;  %v1400_v7 = vpop.f32.mrf.mxu0 }
  0xff   : > { %v17065_v8 = vadd.f32 %v14728_v60, %v1015_v62  ;;  %v1010_v10 = vadd.f32 %v1009_v53, %v16931_v48  ;;  %v2918_v48 = vld [vmem:[%s16243_s17 + $0x129] sm:$0xff]  ;;  %v2921_v60 = vld [vmem:[%s16243_s17 + $0x141] sm:$0xff] }
 0x100   : > { %v14675_v13 = vpop.f32.mrf.mxu1  ;;  %v14731_v16 = vpop.f32.mrf.mxu0  ;;  %14934 = vmatmul.mubr.msk.f32.gmra.mxu1 %vm471_vm0, %v2913_v50  ;;  %14990 = vmatmul.mubr.msk.f32.gmra.mxu0 %vm471_vm0, %v2915_v2  ;;  %v3740_v53 = vld [vmem:[%s16243_s17 + $0x2b] sm:$0xff] }
 0x101   : > { %v17070_v36 = vadd.f32 %v1400_v7, %v1010_v10  ;;  %v1025_v21 = vadd.f32 %v14675_v13, %v16942_v56  ;;  %14936 = vmatprep.mubr.msk.f32.mxu1 %vm471_vm0, %v2914_v52  ;;  %14992 = vmatprep.mubr.msk.f32.mxu0 %vm471_vm0, %v2916_v55 }
 0x102   : > { %v1019_v46 = vpop.f32.mrf.mxu1  ;;  %v1410_v22 = vpop.f32.mrf.mxu0 }
 0x103   : > { %v17077_v33 = vadd.f32 %v14731_v16, %v1025_v21  ;;  %v1020_v26 = vadd.f32 %v1019_v46, %v16953_v0  ;;  %v2920_v0 = vld [vmem:[%s16243_s17 + $0x139] sm:$0xff] }
 0x104   : > { %v14678_v41 = vpop.f32.mrf.mxu1  ;;  %v14734_v32 = vpop.f32.mrf.mxu0  ;;  %14937 = vmatmul.mubr.msk.f32.gmra.mxu1 %vm471_vm0, %v2915_v2  ;;  %14993 = vmatmul.mubr.msk.f32.gmra.mxu0 %vm471_vm0, %v2917_v20  ;;  %v3314_v21 = vld [vmem:[%s16243_s17 + $0x32] sm:$0xff] }
 0x105   : > { %v17082_v56 = vadd.f32 %v1410_v22, %v1020_v26  ;;  %v1035_v61 = vadd.f32 %v14678_v41, %v16961_v4  ;;  %14939 = vmatprep.mubr.msk.f32.mxu1 %vm471_vm0, %v2916_v55  ;;  %14995 = vmatprep.mubr.msk.f32.mxu0 %vm471_vm0, %v2918_v48  ;;  %v3315_v22 = vld [vmem:[%s16243_s17 + $0x3a] sm:$0xff] }
 0x106   : > { %v1029_v63 = vpop.f32.mrf.mxu1  ;;  %v1420_v50 = vpop.f32.mrf.mxu0 }
 0x107   : > { %v17089_v47 = vadd.f32 %v14734_v32, %v1035_v61  ;;  %v1030_v38 = vadd.f32 %v1029_v63, %v16971_v9  ;;  %v3313_v9 = vld [vmem:[%s16243_s17 + $0x2a] sm:$0xff]  ;;  %v3316_v63 = vld [vmem:[%s16243_s17 + $0x42] sm:$0xff] }
 0x108   : > { %v14681_v52 = vpop.f32.mrf.mxu1  ;;  %v14737_v42 = vpop.f32.mrf.mxu0  ;;  %14940 = vmatmul.mubr.msk.f32.gmra.mxu1 %vm471_vm0, %v2917_v20  ;;  %14996 = vmatmul.mubr.msk.f32.gmra.mxu0 %vm471_vm0, %v2919_v34  ;;  %v3741_v20 = vld [vmem:[%s16243_s17 + $0x33] sm:$0xff] }
 0x109   : > { %v17094_v4 = vadd.f32 %v1420_v50, %v1030_v38  ;;  %v1045_v44 = vadd.f32 %v14681_v52, %v16976_v11  ;;  %14942 = vmatprep.mubr.msk.f32.mxu1 %vm471_vm0, %v2918_v48  ;;  %14998 = vmatprep.mubr.msk.f32.mxu0 %vm471_vm0, %v2920_v0  ;;  %v3742_v48 = vld [vmem:[%s16243_s17 + $0x3b] sm:$0xff]  ;;  %v3743_v50 = vld [vmem:[%s16243_s17 + $0x43] sm:$0xff]  ;;  %v3744_v52 = vld [vmem:[%s16243_s17 + $0x4b] sm:$0xff] }
 0x10a   : > { %v1039_v62 = vpop.f32.mrf.mxu1  ;;  %v1430_v2 = vpop.f32.mrf.mxu0  ;;  %v3317_v38 = vld [vmem:[%s16243_s17 + $0x4a] sm:$0xff] }
 0x10b   : > { %v17102_v7 = vadd.f32 %v14737_v42, %v1045_v44  ;;  %v1040_v55 = vadd.f32 %v1039_v62, %v16985_v14 }
 0x10c   : > { %v14684_v10 = vpop.f32.mrf.mxu1  ;;  %v14740_v13 = vpop.f32.mrf.mxu0  ;;  %14943 = vmatmul.mubr.msk.f32.gmra.mxu1 %vm471_vm0, %v2919_v34  ;;  %14999 = vmatmul.mubr.msk.f32.gmra.mxu0 %vm471_vm0, %v2921_v60 }
 0x10d   : > { %v17107_v11 = vadd.f32 %v1430_v2, %v1040_v55  ;;  %v1055_v16 = vadd.f32 %v14684_v10, %v16990_v17  ;;  %15003 = vmatprep.mubr.msk.f32.mxu1 %vm471_vm0, %v3313_v9  ;;  %15059 = vmatprep.mubr.msk.f32.mxu0 %vm471_vm0, %v3740_v53  ;;  %v3318_v9 = vld [vmem:[%s16243_s17 + $0x52] sm:$0xff]  ;;  %v3319_v10 = vld [vmem:[%s16243_s17 + $0x5a] sm:$0xff] }
 0x10e   : > { %v1049_v46 = vpop.f32.mrf.mxu1  ;;  %v1440_v14 = vpop.f32.mrf.mxu0  ;;  %v3745_v53 = vld [vmem:[%s16243_s17 + $0x53] sm:$0xff] }
 0x10f   : > { %v17116_v26 = vadd.f32 %v14740_v13, %v1055_v16  ;;  %v1050_v41 = vadd.f32 %v1049_v46, %v16999_v18  ;;  %v3746_v13 = vld [vmem:[%s16243_s17 + $0x5b] sm:$0xff] }
 0x110   : > { %v14687_v32 = vpop.f32.mrf.mxu1  ;;  %v14743_v17 = vpop.f32.mrf.mxu0  ;;  %15004 = vmatmul.mubr.msk.f32.vlgmr.msra.gmra.mxu1 %vm471_vm0, %v3314_v21  ;;  %15060 = vmatmul.mubr.msk.f32.vlgmr.msra.gmra.mxu0 %vm471_vm0, %v3741_v20 }
 0x111   : > { %v17121_v61 = vadd.f32 %v1440_v14, %v1050_v41  ;;  %v1065_v34 = vadd.f32 %v14687_v32, %v17004_v25  ;;  %15006 = vmatprep.mubr.msk.f32.mxu1 %vm471_vm0, %v3315_v22  ;;  %15062 = vmatprep.mubr.msk.f32.mxu0 %vm471_vm0, %v3742_v48  ;;  %v3320_v22 = vld [vmem:[%s16243_s17 + $0x62] sm:$0xff]  ;;  %v3321_v32 = vld [vmem:[%s16243_s17 + $0x6a] sm:$0xff] }
 0x112   : > { %v1059_v0 = vpop.f32.mrf.mxu1  ;;  %v1450_v18 = vpop.f32.mrf.mxu0  ;;  %v3747_v48 = vld [vmem:[%s16243_s17 + $0x63] sm:$0xff] }
 0x113   : > { %v17130_v42 = vadd.f32 %v14743_v17, %v1065_v34  ;;  %v1060_v44 = vadd.f32 %v1059_v0, %v17013_v27  ;;  %v3748_v17 = vld [vmem:[%s16243_s17 + $0x6b] sm:$0xff] }
 0x114   : > { %v14690_v60 = vpop.f32.mrf.mxu1  ;;  %v14746_v25 = vpop.f32.mrf.mxu0  ;;  %15007 = vmatmul.mubr.msk.f32.gmra.mxu1 %vm471_vm0, %v3316_v63  ;;  %15063 = vmatmul.mubr.msk.f32.gmra.mxu0 %vm471_vm0, %v3743_v50 }
 0x115   : > { %v17135_v62 = vadd.f32 %v1450_v18, %v1060_v44  ;;  %v1075_v2 = vadd.f32 %v14690_v60, %v17018_v31  ;;  %15009 = vmatprep.mubr.msk.f32.mxu1 %vm471_vm0, %v3317_v38  ;;  %15065 = vmatprep.mubr.msk.f32.mxu0 %vm471_vm0, %v3744_v52  ;;  %v3322_v38 = vld [vmem:[%s16243_s17 + $0x72] sm:$0xff]  ;;  %v3323_v60 = vld [vmem:[%s16243_s17 + $0x7a] sm:$0xff] }
 0x116   : > { %v1069_v55 = vpop.f32.mrf.mxu1  ;;  %v1460_v27 = vpop.f32.mrf.mxu0  ;;  %v3749_v52 = vld [vmem:[%s16243_s17 + $0x73] sm:$0xff] }
 0x117   : > { %v17144_v16 = vadd.f32 %v14746_v25, %v1075_v2  ;;  %v1070_v21 = vadd.f32 %v1069_v55, %v17027_v35  ;;  %v3750_v25 = vld [vmem:[%s16243_s17 + $0x7b] sm:$0xff] }
 0x118   : > { %v14693_v20 = vpop.f32.mrf.mxu1  ;;  %v14749_v31 = vpop.f32.mrf.mxu0  ;;  %15010 = vmatmul.mubr.msk.f32.gmra.mxu1 %vm471_vm0, %v3318_v9  ;;  %15066 = vmatmul.mubr.msk.f32.gmra.mxu0 %vm471_vm0, %v3745_v53 }
 0x119   : > { %v17149_v46 = vadd.f32 %v1460_v27, %v1070_v21  ;;  %v1085_v14 = vadd.f32 %v14693_v20, %v17032_v39  ;;  %15012 = vmatprep.mubr.msk.f32.mxu1 %vm471_vm0, %v3319_v10  ;;  %15068 = vmatprep.mubr.msk.f32.mxu0 %vm471_vm0, %v3746_v13  ;;  %v3324_v10 = vld [vmem:[%s16243_s17 + $0x82] sm:$0xff]  ;;  %v3325_v20 = vld [vmem:[%s16243_s17 + $0x8a] sm:$0xff] }
 0x11a   : > { %v1079_v41 = vpop.f32.mrf.mxu1  ;;  %v1470_v35 = vpop.f32.mrf.mxu0  ;;  %v3751_v13 = vld [vmem:[%s16243_s17 + $0x83] sm:$0xff] }
 0x11b   : > { %v17158_v34 = vadd.f32 %v14749_v31, %v1085_v14  ;;  %v1080_v63 = vadd.f32 %v1079_v41, %v17041_v30  ;;  %v3752_v31 = vld [vmem:[%s16243_s17 + $0x8b] sm:$0xff] }
 0x11c   : > { %v14696_v50 = vpop.f32.mrf.mxu1  ;;  %v14752_v39 = vpop.f32.mrf.mxu0  ;;  %15013 = vmatmul.mubr.msk.f32.gmra.mxu1 %vm471_vm0, %v3320_v22  ;;  %15069 = vmatmul.mubr.msk.f32.gmra.mxu0 %vm471_vm0, %v3747_v48 }
 0x11d   : > { %v17163_v0 = vadd.f32 %v1470_v35, %v1080_v63  ;;  %v1095_v18 = vadd.f32 %v14696_v50, %v16900_v45  ;;  %15015 = vmatprep.mubr.msk.f32.mxu1 %vm471_vm0, %v3321_v32  ;;  %15071 = vmatprep.mubr.msk.f32.mxu0 %vm471_vm0, %v3748_v17  ;;  %v3326_v32 = vld [vmem:[%s16243_s17 + $0x92] sm:$0xff]  ;;  %v3327_v50 = vld [vmem:[%s16243_s17 + $0x9a] sm:$0xff] }
 0x11e   : > { %v1089_v44 = vpop.f32.mrf.mxu1  ;;  %v1480_v30 = vpop.f32.mrf.mxu0  ;;  %v3753_v17 = vld [vmem:[%s16243_s17 + $0x93] sm:$0xff] }
 0x11f   : > { %v17172_v2 = vadd.f32 %v14752_v39, %v1095_v18  ;;  %v1090_v9 = vadd.f32 %v1089_v44, %v16911_v59  ;;  %v3754_v39 = vld [vmem:[%s16243_s17 + $0x9b] sm:$0xff] }
 0x120   : > { %v14699_v53 = vpop.f32.mrf.mxu1  ;;  %v14755_v45 = vpop.f32.mrf.mxu0  ;;  %15016 = vmatmul.mubr.msk.f32.gmra.mxu1 %vm471_vm0, %v3322_v38  ;;  %15072 = vmatmul.mubr.msk.f32.gmra.mxu0 %vm471_vm0, %v3749_v52 }
 0x121   : > { %v17177_v55 = vadd.f32 %v1480_v30, %v1090_v9  ;;  %v1105_v27 = vadd.f32 %v14699_v53, %v16922_v3  ;;  %15018 = vmatprep.mubr.msk.f32.mxu1 %vm471_vm0, %v3323_v60  ;;  %15074 = vmatprep.mubr.msk.f32.mxu0 %vm471_vm0, %v3750_v25  ;;  %v3328_v60 = vld [vmem:[%s16243_s17 + $0xa2] sm:$0xff] }
 0x122   : > { %v1099_v21 = vpop.f32.mrf.mxu1  ;;  %v1490_v59 = vpop.f32.mrf.mxu0  ;;  %v3755_v25 = vld [vmem:[%s16243_s17 + $0xa3] sm:$0xff] }
 0x123   : > { %v17186_v14 = vadd.f32 %v14755_v45, %v1105_v27  ;;  %v1100_v22 = vadd.f32 %v1099_v21, %v16933_v40  ;;  %v3329_v45 = vld [vmem:[%s16243_s17 + $0xaa] sm:$0xff] }
 0x124   : > { %v14702_v48 = vpop.f32.mrf.mxu1  ;;  %v14758_v3 = vpop.f32.mrf.mxu0  ;;  %15019 = vmatmul.mubr.msk.f32.gmra.mxu1 %vm471_vm0, %v3324_v10  ;;  %15075 = vmatmul.mubr.msk.f32.gmra.mxu0 %vm471_vm0, %v3751_v13  ;;  %v3756_v27 = vld [vmem:[%s16243_s17 + $0xab] sm:$0xff] }
 0x125   : > { %v17191_v41 = vadd.f32 %v1490_v59, %v1100_v22  ;;  %v1115_v35 = vadd.f32 %v14702_v48, %v16944_v58  ;;  %15021 = vmatprep.mubr.msk.f32.mxu1 %vm471_vm0, %v3325_v20  ;;  %15077 = vmatprep.mubr.msk.f32.mxu0 %vm471_vm0, %v3752_v31  ;;  %v3330_v31 = vld [vmem:[%s16243_s17 + $0xb2] sm:$0xff] }
 0x126   : > { %v1109_v63 = vpop.f32.mrf.mxu1  ;;  %v1500_v40 = vpop.f32.mrf.mxu0  ;;  %v3757_v22 = vld [vmem:[%s16243_s17 + $0xb3] sm:$0xff] }
 0x127   : > { %v17200_v18 = vadd.f32 %v14758_v3, %v1115_v35  ;;  %v1110_v38 = vadd.f32 %v1109_v63, %v16955_v49  ;;  %v16045_v49 = vld [vmem:[%s21177_s3 + $0x18] sm:$0xff]  }
 0x128   : > { %v14705_v52 = vpop.f32.mrf.mxu1  ;;  %v14761_v58 = vpop.f32.mrf.mxu0  ;;  %15022 = vmatmul.mubr.msk.f32.gmra.mxu1 %vm471_vm0, %v3326_v32  ;;  %15078 = vmatmul.mubr.msk.f32.gmra.mxu0 %vm471_vm0, %v3753_v17  ;;  %v3331_v3 = vld [vmem:[%s16243_s17 + $0xba] sm:$0xff] }
 0x129   : > { %v17205_v44 = vadd.f32 %v1500_v40, %v1110_v38  ;;  %v1125_v30 = vadd.f32 %v14705_v52, %v16963_v5  ;;  %15024 = vmatprep.mubr.msk.f32.mxu1 %vm471_vm0, %v3327_v50  ;;  %15080 = vmatprep.mubr.msk.f32.mxu0 %vm471_vm0, %v3754_v39  ;;  %v3758_v35 = vld [vmem:[%s16243_s17 + $0xbb] sm:$0xff]  ;;  %v3759_v38 = vld [vmem:[%s16243_s17 + $0xc3] sm:$0xff] }
 0x12a   : > { %v1119_v9 = vpop.f32.mrf.mxu1  ;;  %v1510_v53 = vpop.f32.mrf.mxu0  ;;  %15113 = vmatprep.subr.bf16.mxu1 %v16045_v49  ;;  %v3332_v39 = vld [vmem:[%s16243_s17 + $0xc2] sm:$0xff] }
 0x12b   : > { %v17217_v10 = vadd.f32 %v14761_v58, %v1125_v30  ;;  %v1120_v5 = vadd.f32 %v1119_v9, %v16973_v57  ;;  %15114 = vmatpush3.bf16.msra.mxu1 %v16045_v49  ;;  %v3333_v58 = vld [vmem:[%s16243_s17 + $0xca] sm:$0xff] }
 0x12c   : > { %v14708_v13 = vpop.f32.mrf.mxu1  ;;  %v14764_v21 = vpop.f32.mrf.mxu0  ;;  %15025 = vmatmul.mubr.msk.f32.gmra.mxu1 %vm471_vm0, %v3328_v60  ;;  %15081 = vmatmul.mubr.msk.f32.gmra.mxu0 %vm471_vm0, %v3755_v25  ;;  %v3760_v30 = vld [vmem:[%s16243_s17 + $0xcb] sm:$0xff] }
 0x12d   : > { %v17222_v59 = vadd.f32 %v1510_v53, %v1120_v5  ;;  %v1135_v20 = vadd.f32 %v14708_v13, %v16978_v12  ;;  %15027 = vmatprep.mubr.msk.f32.mxu1 %vm471_vm0, %v3329_v45  ;;  %15083 = vmatprep.mubr.msk.f32.mxu0 %vm471_vm0, %v3756_v27  ;;  %v3334_v45 = vld [vmem:[%s16243_s17 + $0xd2] sm:$0xff]  ;;  %v3335_v13 = vld [vmem:[%s16243_s17 + $0xda] sm:$0xff] }
 0x12e   : > { %v1129_v48 = vpop.f32.mrf.mxu1  ;;  %v1520_v57 = vpop.f32.mrf.mxu0  ;;  %v3761_v27 = vld [vmem:[%s16243_s17 + $0xd3] sm:$0xff] }
 0x12f   : > { %v17231_v32 = vadd.f32 %v14764_v21, %v1135_v20  ;;  %v1130_v17 = vadd.f32 %v1129_v48, %v16987_v15  ;;  %v3762_v21 = vld [vmem:[%s16243_s17 + $0xdb] sm:$0xff] }
 0x130   : > { %v14711_v12 = vpop.f32.mrf.mxu1  ;;  %v14767_v63 = vpop.f32.mrf.mxu0  ;;  %15028 = vmatmul.mubr.msk.f32.gmra.mxu1 %vm471_vm0, %v3330_v31  ;;  %15084 = vmatmul.mubr.msk.f32.gmra.mxu0 %vm471_vm0, %v3757_v22 }
 0x131   : > { %v17236_v40 = vadd.f32 %v1520_v57, %v1130_v17  ;;  %v1145_v50 = vadd.f32 %v14711_v12, %v16992_v19  ;;  %15030 = vmatprep.mubr.msk.f32.mxu1 %vm471_vm0, %v3331_v3  ;;  %15086 = vmatprep.mubr.msk.f32.mxu0 %vm471_vm0, %v3758_v35  ;;  %v3336_v3 = vld [vmem:[%s16243_s17 + $0xe2] sm:$0xff]  ;;  %v3337_v12 = vld [vmem:[%s16243_s17 + $0xea] sm:$0xff] }
 0x132   : > { %v1139_v52 = vpop.f32.mrf.mxu1  ;;  %v1530_v15 = vpop.f32.mrf.mxu0  ;;  %v3763_v35 = vld [vmem:[%s16243_s17 + $0xe3] sm:$0xff] }
 0x133   : > { %v17245_v60 = vadd.f32 %v14767_v63, %v1145_v50  ;;  %v1140_v25 = vadd.f32 %v1139_v52, %v17001_v23  ;;  %v3764_v63 = vld [vmem:[%s16243_s17 + $0xeb] sm:$0xff] }
 0x134   : > { %v14714_v49 = vpop.f32.mrf.mxu1  ;;  %v14770_v19 = vpop.f32.mrf.mxu0  ;;  %15031 = vmatmul.mubr.msk.f32.gmra.mxu1 %vm471_vm0, %v3332_v39  ;;  %15087 = vmatmul.mubr.msk.f32.gmra.mxu0 %vm471_vm0, %v3759_v38 }
 0x135   : > { %v17250_v9 = vadd.f32 %v1530_v15, %v1140_v25  ;;  %v1155_v53 = vadd.f32 %v14714_v49, %v17006_v1  ;;  %15033 = vmatprep.mubr.msk.f32.mxu1 %vm471_vm0, %v3333_v58  ;;  %15089 = vmatprep.mubr.msk.f32.mxu0 %vm471_vm0, %v3760_v30  ;;  %v3338_v58 = vld [vmem:[%s16243_s17 + $0xf2] sm:$0xff]  ;;  %v3339_v49 = vld [vmem:[%s16243_s17 + $0xfa] sm:$0xff] }
 0x136   : > { %v1149_v5 = vpop.f32.mrf.mxu1  ;;  %v1540_v23 = vpop.f32.mrf.mxu0  ;;  %v3765_v30 = vld [vmem:[%s16243_s17 + $0xf3] sm:$0xff] }
 0x137   : > { %v17259_v20 = vadd.f32 %v14770_v19, %v1155_v53  ;;  %v1150_v31 = vadd.f32 %v1149_v5, %v17015_v29  ;;  %v3766_v19 = vld [vmem:[%s16243_s17 + $0xfb] sm:$0xff] }
 0x138   : > { %v14717_v22 = vpop.f32.mrf.mxu1  ;;  %v14773_v1 = vpop.f32.mrf.mxu0  ;;  %15034 = vmatmul.mubr.msk.f32.gmra.mxu1 %vm471_vm0, %v3334_v45  ;;  %15090 = vmatmul.mubr.msk.f32.gmra.mxu0 %vm471_vm0, %v3761_v27  ;;  %v3340_v5 = vld [vmem:[%s16243_s17 + $0x102] sm:$0xff] }
 0x139   : > { %v17264_v48 = vadd.f32 %v1540_v23, %v1150_v31  ;;  %v1165_v57 = vadd.f32 %v14717_v22, %v17020_v24  ;;  %15036 = vmatprep.mubr.msk.f32.mxu1 %vm471_vm0, %v3335_v13  ;;  %15092 = vmatprep.mubr.msk.f32.mxu0 %vm471_vm0, %v3762_v21  ;;  %v3767_v23 = vld [vmem:[%s16243_s17 + $0x103] sm:$0xff]  ;;  %v3768_v22 = vld [vmem:[%s16243_s17 + $0x10b] sm:$0xff] }
 0x13a   : > { %v1159_v17 = vpop.f32.mrf.mxu1  ;;  %v1550_v29 = vpop.f32.mrf.mxu0  ;;  %v3341_v31 = vld [vmem:[%s16243_s17 + $0x10a] sm:$0xff] }
 0x13b   : > { %21295 = vst [vmem:[#allocation4_spill] sm:$0xff] %v17264_v48  ;;  %v17273_v50 = vadd.f32 %v14773_v1, %v1165_v57  ;;  %v1160_v39 = vadd.f32 %v1159_v17, %v17029_v37 }
 0x13c   : > { %v14720_v38 = vpop.f32.mrf.mxu1  ;;  %v14776_v24 = vpop.f32.mrf.mxu0  ;;  %15037 = vmatmul.mubr.msk.f32.gmra.mxu1 %vm471_vm0, %v3336_v3  ;;  %15093 = vmatmul.mubr.msk.f32.gmra.mxu0 %vm471_vm0, %v3763_v35 }
 0x13d   : > { %v17278_v52 = vadd.f32 %v1550_v29, %v1160_v39  ;;  %v1175_v15 = vadd.f32 %v14720_v38, %v17034_v28  ;;  %15039 = vmatprep.mubr.msk.f32.mxu1 %vm471_vm0, %v3337_v12  ;;  %15095 = vmatprep.mubr.msk.f32.mxu0 %vm471_vm0, %v3764_v63  ;;  %v3342_v29 = vld [vmem:[%s16243_s17 + $0x112] sm:$0xff]  ;;  %v3343_v39 = vld [vmem:[%s16243_s17 + $0x11a] sm:$0xff] }
 0x13e   : > { %v17285_v25 = vpop.f32.mrf.mxu1  ;;  %v17287_v37 = vpop.f32.mrf.mxu0  ;;  %v3769_v12 = vld [vmem:[%s16243_s17 + $0x113] sm:$0xff]  ;;  %v3770_v38 = vld [vmem:[%s16243_s17 + $0x11b] sm:$0xff] }
 0x13f   : > { %v17291_v53 = vadd.f32 %v14776_v24, %v1175_v15 }
 0x140   : > { %v14781_v45 = vpop.f32.mrf.mxu1  ;;  %v14837_v28 = vpop.f32.mrf.mxu0  ;;  %15040 = vmatmul.mubr.msk.f32.gmra.mxu1 %vm471_vm0, %v3338_v58  ;;  %15096 = vmatmul.mubr.msk.f32.gmra.mxu0 %vm471_vm0, %v3765_v30  ;;  %v3344_v30 = vld [vmem:[%s16243_s17 + $0x122] sm:$0xff] }
 0x141   : > { %v1997_v27 = vadd.f32 %v14781_v45, %v17053_v54  ;;  %15042 = vmatprep.mubr.msk.f32.mxu1 %vm471_vm0, %v3339_v49  ;;  %15098 = vmatprep.mubr.msk.f32.mxu0 %vm471_vm0, %v3766_v19  ;;  %v3771_v49 = vld [vmem:[%s16243_s17 + $0x123] sm:$0xff] }
 0x142   : > { %v1817_v13 = vpop.f32.mrf.mxu1  ;;  %v2244_v21 = vpop.f32.mrf.mxu0 }
 0x143   : > { %v17302_v1 = vadd.f32 %v14837_v28, %v1997_v27  ;;  %v1996_v57 = vadd.f32 %v1817_v13, %v17058_v43  ;;  %v3345_v28 = vld [vmem:[%s16243_s17 + $0x12a] sm:$0xff] }
 0x144   : > { %v14784_v3 = vpop.f32.mrf.mxu1  ;;  %v14840_v54 = vpop.f32.mrf.mxu0  ;;  %15043 = vmatmul.mubr.msk.f32.gmra.mxu1 %vm471_vm0, %v3340_v5  ;;  %15099 = vmatmul.mubr.msk.f32.gmra.mxu0 %vm471_vm0, %v3767_v23  ;;  %v3772_v27 = vld [vmem:[%s16243_s17 + $0x12b] sm:$0xff] }
 0x145   : > { %v17307_v35 = vadd.f32 %v2244_v21, %v1996_v57  ;;  %v1999_v17 = vadd.f32 %v14784_v3, %v17065_v8  ;;  %15045 = vmatprep.mubr.msk.f32.mxu1 %vm471_vm0, %v3341_v31  ;;  %15101 = vmatprep.mubr.msk.f32.mxu0 %vm471_vm0, %v3768_v22  ;;  %v3346_v22 = vld [vmem:[%s16243_s17 + $0x132] sm:$0xff] }
 0x146   : > { %v17314_v63 = vpop.f32.mrf.mxu1  ;;  %v17316_v43 = vpop.f32.mrf.mxu0  ;;  %v3773_v57 = vld [vmem:[%s16243_s17 + $0x133] sm:$0xff] }
 0x147   : > { %v17320_v24 = vadd.f32 %v14840_v54, %v1999_v17  ;;  %v3347_v17 = vld [vmem:[%s16243_s17 + $0x13a] sm:$0xff] }
 0x148   : > { %v14787_v15 = vpop.f32.mrf.mxu1  ;;  %v14843_v8 = vpop.f32.mrf.mxu0  ;;  %15046 = vmatmul.mubr.msk.f32.gmra.mxu1 %vm471_vm0, %v3342_v29  ;;  %15102 = vmatmul.mubr.msk.f32.gmra.mxu0 %vm471_vm0, %v3769_v12  ;;  %v3774_v29 = vld [vmem:[%s16243_s17 + $0x13b] sm:$0xff] }
 0x149   : > { %v2001_v58 = vadd.f32 %v14787_v15, %v17077_v33  ;;  %15048 = vmatprep.mubr.msk.f32.mxu1 %vm471_vm0, %v3343_v39  ;;  %15104 = vmatprep.mubr.msk.f32.mxu0 %vm471_vm0, %v3770_v38  ;;  %v3348_v15 = vld [vmem:[%s16243_s17 + $0x142] sm:$0xff] }
 0x14a   : > { %v1837_v19 = vpop.f32.mrf.mxu1  ;;  %v2264_v45 = vpop.f32.mrf.mxu0 }
 0x14b   : > { %v17331_v5 = vadd.f32 %v14843_v8, %v2001_v58  ;;  %v2000_v23 = vadd.f32 %v1837_v19, %v17082_v56  ;;  %v16046_v56 = vld [vmem:[%s21177_s3 + $0x10] sm:$0xff]   ;;  %v3775_v8 = vld [vmem:[%s16243_s17 + $0x143] sm:$0xff] }
 0x14c   : > { %v14790_v13 = vpop.f32.mrf.mxu1  ;;  %v14846_v33 = vpop.f32.mrf.mxu0  ;;  %15049 = vmatmul.mubr.msk.f32.gmra.mxu1 %vm471_vm0, %v3344_v30  ;;  %15105 = vmatmul.mubr.msk.f32.gmra.mxu0 %vm471_vm0, %v3771_v49 }
 0x14d   : > { %v17336_v21 = vadd.f32 %v2264_v45, %v2000_v23  ;;  %v2003_v31 = vadd.f32 %v14790_v13, %v17089_v47  ;;  %15051 = vmatprep.mubr.msk.f32.mxu1 %vm471_vm0, %v3345_v28  ;;  %15107 = vmatprep.mubr.msk.f32.mxu0 %vm471_vm0, %v3772_v27 }
 0x14e   : > { %v17346_v3 = vpop.f32.mrf.mxu1  ;;  %v17348_v54 = vpop.f32.mrf.mxu0  ;;  %15115 = vmatprep.subr.bf16.mxu1 %v16046_v56 }
 0x14f   : > { %v17352_v12 = vadd.f32 %v14846_v33, %v2003_v31  ;;  %15116 = vmatpush3.bf16.msra.mxu1 %v16046_v56 }
 0x150   : > { %v14793_v47 = vpop.f32.mrf.mxu1  ;;  %v14849_v39 = vpop.f32.mrf.mxu0  ;;  %15052 = vmatmul.mubr.msk.f32.gmra.mxu1 %vm471_vm0, %v3346_v22  ;;  %15108 = vmatmul.mubr.msk.f32.gmra.mxu0 %vm471_vm0, %v3773_v57 }
 0x151   : > { %v2005_v38 = vadd.f32 %v14793_v47, %v17102_v7  ;;  %15054 = vmatprep.mubr.msk.f32.mxu1 %vm471_vm0, %v3347_v17  ;;  %15110 = vmatprep.mubr.msk.f32.mxu0 %vm471_vm0, %v3774_v29 }
 0x152   : > { %v1857_v58 = vpop.f32.mrf.mxu1  ;;  %v2284_v30 = vpop.f32.mrf.mxu0 }
 0x153   : > { %v17373_v7 = vadd.f32 %v14849_v39, %v2005_v38  ;;  %v2004_v49 = vadd.f32 %v1857_v58, %v17107_v11 }
 0x154   : > { %v14796_v19 = vpop.f32.mrf.mxu1  ;;  %v14852_v45 = vpop.f32.mrf.mxu0  ;;  %15055 = vmatmul.mubr.msk.f32.gmra.mxu1 %vm471_vm0, %v3348_v15  ;;  %15111 = vmatmul.mubr.msk.f32.gmra.mxu0 %vm471_vm0, %v3775_v8 }
 0x155   : > { %v17378_v28 = vadd.f32 %v2284_v30, %v2004_v49  ;;  %v2007_v27 = vadd.f32 %v14796_v19, %v17116_v26 }
 0x156   : > { %v17381_v23 = vpop.f32.mrf.mxu1  ;;  %v17383_v13 = vpop.f32.mrf.mxu0 }
 0x157   : > { %v17385_v33 = vadd.f32 %v14852_v45, %v2007_v27 }
 0x158   : > { %v14799_v6 = vpop.f32.mrf.mxu1  ;;  %v14855_v31 = vpop.f32.mrf.mxu0 }
 0x159   : > { %v2009_v11 = vadd.f32 %v14799_v6, %v17130_v42 }
 0x15a   : > { %v1877_v22 = vpop.f32.mrf.mxu1  ;;  %v2304_v57 = vpop.f32.mrf.mxu0 }
 0x15b   : > { %v17388_v56 = vadd.f32 %v14855_v31, %v2009_v11  ;;  %v2008_v17 = vadd.f32 %v1877_v22, %v17135_v62 }
 0x15c   : > { %v14802_v29 = vpop.f32.mrf.mxu1  ;;  %v14858_v47 = vpop.f32.mrf.mxu0 }
 0x15d   : > { %v17391_v39 = vadd.f32 %v2304_v57, %v2008_v17  ;;  %v2011_v26 = vadd.f32 %v14802_v29, %v17144_v16 }
 0x15e   : > { %v17394_v38 = vpop.f32.mrf.mxu1  ;;  %v17396_v15 = vpop.f32.mrf.mxu0 }
 0x15f   : > { %v17398_v8 = vadd.f32 %v14858_v47, %v2011_v26 }
 0x160   : > { %v14805_v58 = vpop.f32.mrf.mxu1  ;;  %v14861_v42 = vpop.f32.mrf.mxu0 }
 0x161   : > { %v2013_v30 = vadd.f32 %v14805_v58, %v17158_v34 }
 0x162   : > { %v1897_v49 = vpop.f32.mrf.mxu1  ;;  %v2324_v19 = vpop.f32.mrf.mxu0 }
 0x163   : > { %v17401_v45 = vadd.f32 %v14861_v42, %v2013_v30  ;;  %v2012_v62 = vadd.f32 %v1897_v49, %v17163_v0  ;;  %v16049_v0 = vld [vmem:[%s21177_s3 + $0x8] sm:$0xff]  }
 0x164   : > { %v14808_v27 = vpop.f32.mrf.mxu1  ;;  %v14864_v6 = vpop.f32.mrf.mxu0  ;;  %15153 = vmatprep.subr.bf16.mxu0 %v16049_v0 }
 0x165   : > { %v17404_v31 = vadd.f32 %v2324_v19, %v2012_v62  ;;  %v2015_v16 = vadd.f32 %v14808_v27, %v17172_v2  ;;  %15154 = vmatpush3.bf16.msra.mxu0 %v16049_v0 }
 0x166   : > { %v17407_v11 = vpop.f32.mrf.mxu1  ;;  %v17409_v22 = vpop.f32.mrf.mxu0 }
 0x167   : > { %21296 = vst [vmem:[#allocation5_spill] sm:$0xff] %v17409_v22  ;;  %v17411_v57 = vadd.f32 %v14864_v6, %v2015_v16 }
 0x168   : > { %v14811_v17 = vpop.f32.mrf.mxu1  ;;  %v14867_v34 = vpop.f32.mrf.mxu0 }
 0x169   : > { %v2017_v29 = vadd.f32 %v14811_v17, %v17186_v14  ;;  %v16052_v14 = vld [vmem:[%s21177_s3] sm:$0xff]  }
 0x16a   : > { %v1917_v47 = vpop.f32.mrf.mxu1  ;;  %v2344_v26 = vpop.f32.mrf.mxu0  ;;  %15155 = vmatprep.subr.bf16.mxu0 %v16052_v14 }
 0x16b   : > { %v17417_v58 = vadd.f32 %v14867_v34, %v2017_v29  ;;  %v2016_v2 = vadd.f32 %v1917_v47, %v17191_v41  ;;  %15156 = vmatpush3.bf16.msra.mxu0 %v16052_v14 }
 0x16c   : > { %v14814_v42 = vpop.f32.mrf.mxu1  ;;  %v14870_v30 = vpop.f32.mrf.mxu0 }
 0x16d   : > { %v17420_v49 = vadd.f32 %v2344_v26, %v2016_v2  ;;  %v2019_v19 = vadd.f32 %v14814_v42, %v17200_v18 }
 0x16e   : > { %v17426_v62 = vpop.f32.mrf.mxu1  ;;  %v17428_v27 = vpop.f32.mrf.mxu0 }
 0x16f   : > { %21297 = vst [vmem:[#allocation6_spill] sm:$0xff] %v17428_v27  ;;  %v17430_v6 = vadd.f32 %v14870_v30, %v2019_v19 }
 0x170   : > { %v14817_v41 = vpop.f32.mrf.mxu1  ;;  %v14873_v16 = vpop.f32.mrf.mxu0 }
 0x171   : > { %v2021_v17 = vadd.f32 %v14817_v41, %v17217_v10 }
 0x172   : > { %v1937_v34 = vpop.f32.mrf.mxu1  ;;  %v2364_v29 = vpop.f32.mrf.mxu0 }
 0x173   : > { %v17433_v0 = vadd.f32 %v14873_v16, %v2021_v17  ;;  %v2020_v18 = vadd.f32 %v1937_v34, %v17222_v59  ;;  %v17449_v59 = vld [vmem:[%s21177_s3 + $0x28] sm:$0xff]  }
 0x174   : > { %v14820_v47 = vpop.f32.mrf.mxu1  ;;  %v14876_v26 = vpop.f32.mrf.mxu0  ;;  %21299 = vst [vmem:[#allocation8_spill] sm:$0xff] %v17449_v59  ;;  %15193 = vmatprep.subr.bf16.mxu1 %v17449_v59 }
 0x175   : > { %v17436_v2 = vadd.f32 %v2364_v29, %v2020_v18  ;;  %v2023_v42 = vadd.f32 %v14820_v47, %v17231_v32 }
 0x176   : > { %v17439_v30 = vpop.f32.mrf.mxu1  ;;  %v17441_v19 = vpop.f32.mrf.mxu0 }
 0x177   : > { %21298 = vst [vmem:[#allocation7_spill] sm:$0xff] %v17441_v19  ;;  %v17443_v48 = vadd.f32 %v14876_v26, %v2023_v42 }
 0x178   : > { %v14823_v14 = vpop.f32.mrf.mxu1  ;;  %v14879_v10 = vpop.f32.mrf.mxu0 }
 0x179   : > { %v2025_v41 = vadd.f32 %v14823_v14, %v17245_v60 }
 0x17a   : > { %v1957_v16 = vpop.f32.mrf.mxu1  ;;  %v2384_v17 = vpop.f32.mrf.mxu0 }
 0x17b   : > { %v17451_v34 = vadd.f32 %v14879_v10, %v2025_v41  ;;  %v2024_v32 = vadd.f32 %v1957_v16, %v17250_v9 }
 0x17c   : > { %v14826_v29 = vpop.f32.mrf.mxu1  ;;  %v14882_v18 = vpop.f32.mrf.mxu0 }
 0x17d   : > { %v17455_v47 = vadd.f32 %v2384_v17, %v2024_v32  ;;  %v2027_v26 = vadd.f32 %v14826_v29, %v17259_v20 }
 0x17e   : > { %v17458_v60 = vpop.f32.mrf.mxu1  ;;  %v17460_v42 = vpop.f32.mrf.mxu0 }
 0x17f   : > { %21300 = vst [vmem:[#allocation9_spill] sm:$0xff] %v17458_v60  ;;  %21301 = vst [vmem:[#allocation10_spill] sm:$0xff] %v17460_v42  ;;  %v17462_v14 = vadd.f32 %v14882_v18, %v2027_v26 }
 0x180   : > { %v14829_v19 = vpop.f32.mrf.mxu1  ;;  %v14885_v27 = vpop.f32.mrf.mxu0 }
 0x181   : > { %v2029_v10 = vadd.f32 %v14829_v19, %v17273_v50 }
 0x182   : > { %v1977_v41 = vpop.f32.mrf.mxu1  ;;  %v2404_v9 = vpop.f32.mrf.mxu0 }
 0x183   : > { %v17465_v16 = vadd.f32 %v14885_v27, %v2029_v10  ;;  %v2028_v59 = vadd.f32 %v1977_v41, %v17278_v52 }
 0x184   : > { %v14832_v17 = vpop.f32.mrf.mxu1  ;;  %v14888_v32 = vpop.f32.mrf.mxu0 }
 0x185   : > { %v17468_v22 = vadd.f32 %v2404_v9, %v2028_v59  ;;  %v2031_v20 = vadd.f32 %v14832_v17, %v17291_v53 }
 0x186   : > { %v17471_v29 = vpop.f32.mrf.mxu1  ;;  %v17473_v18 = vpop.f32.mrf.mxu0 }
 0x187   : > { %21302 = vst [vmem:[#allocation11_spill] sm:$0xff] %v17471_v29  ;;  %21303 = vst [vmem:[#allocation12_spill] sm:$0xff] %v17473_v18  ;;  %v17475_v26 = vadd.f32 %v14888_v32, %v2031_v20 }
 0x188   : > { %v14893_v42 = vpop.f32.mrf.mxu1  ;;  %v14949_v50 = vpop.f32.mrf.mxu0 }
 0x189   : > { %v2851_v19 = vadd.f32 %v14893_v42, %v17302_v1 }
 0x18a   : > { %v2671_v27 = vpop.f32.mrf.mxu1  ;;  %v3098_v10 = vpop.f32.mrf.mxu0 }
 0x18b   : > { %v17478_v60 = vadd.f32 %v14949_v50, %v2851_v19  ;;  %v2850_v52 = vadd.f32 %v2671_v27, %v17307_v35 }
 0x18c   : > { %v14896_v59 = vpop.f32.mrf.mxu1  ;;  %v14952_v41 = vpop.f32.mrf.mxu0 }
 0x18d   : > { %v17481_v9 = vadd.f32 %v3098_v10, %v2850_v52  ;;  %v2853_v53 = vadd.f32 %v14896_v59, %v17320_v24 }
 0x18e   : > { %v17484_v17 = vpop.f32.mrf.mxu1  ;;  %v17486_v32 = vpop.f32.mrf.mxu0 }
 0x18f   : > { %v17488_v20 = vadd.f32 %v14952_v41, %v2853_v53 }
 0x190   : > { %v14899_v18 = vpop.f32.mrf.mxu1  ;;  %v14955_v1 = vpop.f32.mrf.mxu0 }
 0x191   : > { %21304 = vst [vmem:[#allocation13_spill] sm:$0xff] %v17488_v20  ;;  %v2855_v42 = vadd.f32 %v14899_v18, %v17331_v5 }
 0x192   : > { %v2691_v50 = vpop.f32.mrf.mxu1  ;;  %v3118_v19 = vpop.f32.mrf.mxu0 }
 0x193   : > { %v17491_v29 = vadd.f32 %v14955_v1, %v2855_v42  ;;  %v2854_v35 = vadd.f32 %v2691_v50, %v17336_v21 }
 0x194   : > { %v14902_v27 = vpop.f32.mrf.mxu1  ;;  %v14958_v10 = vpop.f32.mrf.mxu0 }
 0x195   : > { %21305 = vst [vmem:[#allocation14_spill] sm:$0xff] %v17491_v29  ;;  %v17494_v52 = vadd.f32 %v3118_v19, %v2854_v35  ;;  %v2857_v24 = vadd.f32 %v14902_v27, %v17352_v12 }
 0x196   : > { %v17497_v59 = vpop.f32.mrf.mxu1  ;;  %v17499_v41 = vpop.f32.mrf.mxu0 }
 0x197   : > { %v17501_v53 = vadd.f32 %v14958_v10, %v2857_v24 }
 0x198   : > { %v14905_v20 = vpop.f32.mrf.mxu1  ;;  %v14961_v5 = vpop.f32.mrf.mxu0 }
 0x199   : > { %21306 = vst [vmem:[#allocation15_spill] sm:$0xff] %v17501_v53  ;;  %v2859_v18 = vadd.f32 %v14905_v20, %v17373_v7 }
 0x19a   : > { %v2711_v1 = vpop.f32.mrf.mxu1  ;;  %v3138_v42 = vpop.f32.mrf.mxu0 }
 0x19b   : > { %v17504_v29 = vadd.f32 %v14961_v5, %v2859_v18  ;;  %v2858_v21 = vadd.f32 %v2711_v1, %v17378_v28 }
 0x19c   : > { %v14908_v50 = vpop.f32.mrf.mxu1  ;;  %v14964_v19 = vpop.f32.mrf.mxu0 }
 0x19d   : > { %21307 = vst [vmem:[#allocation16_spill] sm:$0xff] %v17504_v29  ;;  %v17507_v35 = vadd.f32 %v3138_v42, %v2858_v21  ;;  %v2861_v12 = vadd.f32 %v14908_v50, %v17385_v33 }
 0x19e   : > { %v17510_v27 = vpop.f32.mrf.mxu1  ;;  %v17512_v10 = vpop.f32.mrf.mxu0 }
 0x19f   : > { %21308 = vst [vmem:[#allocation17_spill] sm:$0xff] %v17507_v35  ;;  %v17514_v24 = vadd.f32 %v14964_v19, %v2861_v12 }
 0x1a0   : > { %v14911_v53 = vpop.f32.mrf.mxu1  ;;  %v14967_v7 = vpop.f32.mrf.mxu0 }
 0x1a1   : > { %21309 = vst [vmem:[#allocation18_spill] sm:$0xff] %v17514_v24  ;;  %v2863_v20 = vadd.f32 %v14911_v53, %v17388_v56 }
 0x1a2   : > { %v2731_v5 = vpop.f32.mrf.mxu1  ;;  %v3158_v18 = vpop.f32.mrf.mxu0 }
 0x1a3   : > { %v17517_v29 = vadd.f32 %v14967_v7, %v2863_v20  ;;  %v2862_v28 = vadd.f32 %v2731_v5, %v17391_v39 }
 0x1a4   : > { %v14914_v1 = vpop.f32.mrf.mxu1  ;;  %v14970_v42 = vpop.f32.mrf.mxu0 }
 0x1a5   : > { %21310 = vst [vmem:[#allocation19_spill] sm:$0xff] %v17517_v29  ;;  %v17520_v21 = vadd.f32 %v3158_v18, %v2862_v28  ;;  %v2865_v33 = vadd.f32 %v14914_v1, %v17398_v8 }
 0x1a6   : > { %v17523_v50 = vpop.f32.mrf.mxu1  ;;  %v17525_v19 = vpop.f32.mrf.mxu0 }
 0x1a7   : > { %21311 = vst [vmem:[#allocation20_spill] sm:$0xff] %v17520_v21  ;;  %v17527_v12 = vadd.f32 %v14970_v42, %v2865_v33 }
 0x1a8   : > { %v14917_v24 = vpop.f32.mrf.mxu1  ;;  %v14973_v56 = vpop.f32.mrf.mxu0 }
 0x1a9   : > { %21312 = vst [vmem:[#allocation21_spill] sm:$0xff] %v17527_v12  ;;  %v2867_v53 = vadd.f32 %v14917_v24, %v17401_v45 }
 0x1aa   : > { %v2751_v7 = vpop.f32.mrf.mxu1  ;;  %v3178_v20 = vpop.f32.mrf.mxu0 }
 0x1ab   : > { %v17530_v29 = vadd.f32 %v14973_v56, %v2867_v53  ;;  %v2866_v39 = vadd.f32 %v2751_v7, %v17404_v31 }
 0x1ac   : > { %v14920_v5 = vpop.f32.mrf.mxu1  ;;  %v14976_v18 = vpop.f32.mrf.mxu0 }
 0x1ad   : > { %21313 = vst [vmem:[#allocation22_spill] sm:$0xff] %v17530_v29  ;;  %v17533_v28 = vadd.f32 %v3178_v20, %v2866_v39  ;;  %v2869_v8 = vadd.f32 %v14920_v5, %v17411_v57  ;;  %v17543_v29 = vpop.permute.xlu1 %4289  ;;  %v17548_v39 = vpop.permute.xlu0 %4283 }
 0x1ae   : > { %v17536_v1 = vpop.f32.mrf.mxu1  ;;  %v17538_v42 = vpop.f32.mrf.mxu0  ;;  %21317 = vst [vmem:[#allocation26_spill] sm:$0xff] %v17543_v29  ;;  %21319 = vst [vmem:[#allocation28_spill] sm:$0xff] %v17548_v39  ;;  %vm4390_vm8 = vcmp.eq.s32.totalorder %v17548_v39, 1  ;;  %vm4392_vm11 = vcmp.eq.s32.totalorder %v17543_v29, 1 }
 0x1af   : > { %21314 = vst [vmem:[#allocation23_spill] sm:$0xff] %v17533_v28  ;;  %21315 = vst [vmem:[#allocation24_spill] sm:$0xff] %v17538_v42  ;;  %v17540_v33 = vadd.f32 %v14976_v18, %v2869_v8 }
 0x1b0   : > { %v14923_v12 = vpop.f32.mrf.mxu1  ;;  %v14979_v45 = vpop.f32.mrf.mxu0 }
 0x1b1   : > { %21316 = vst [vmem:[#allocation25_spill] sm:$0xff] %v17540_v33  ;;  %v2871_v24 = vadd.f32 %v14923_v12, %v17417_v58 }
 0x1b2   : > { %v2771_v56 = vpop.f32.mrf.mxu1  ;;  %v3198_v53 = vpop.f32.mrf.mxu0 }
 0x1b3   : > { %v17545_v31 = vadd.f32 %v14979_v45, %v2871_v24  ;;  %v2870_v7 = vadd.f32 %v2771_v56, %v17420_v49  ;;  %v17559_v45 = vpop.permute.xlu1 %4292 }
 0x1b4   : > { %v14926_v20 = vpop.f32.mrf.mxu1  ;;  %v14982_v57 = vpop.f32.mrf.mxu0  ;;  %21323 = vst [vmem:[#allocation32_spill] sm:$0xff] %v17559_v45  ;;  %vm4393_vm10 = vcmp.eq.s32.totalorder %v17559_v45, 1 }
 0x1b5   : > { %21318 = vst [vmem:[#allocation27_spill] sm:$0xff] %v17545_v31  ;;  %v17550_v5 = vadd.f32 %v3198_v53, %v2870_v7  ;;  %v2873_v18 = vadd.f32 %v14926_v20, %v17430_v6  ;;  %v17562_v31 = vpop.permute.xlu0 %4286 }
 0x1b6   : > { %v17553_v8 = vpop.f32.mrf.mxu1  ;;  %v17555_v33 = vpop.f32.mrf.mxu0  ;;  %21324 = vst [vmem:[#allocation33_spill] sm:$0xff] %v17562_v31  ;;  %vm4391_vm9 = vcmp.eq.s32.totalorder %v17562_v31, 1 }
 0x1b7   : > { %21320 = vst [vmem:[#allocation29_spill] sm:$0xff] %v17550_v5  ;;  %21321 = vst [vmem:[#allocation30_spill] sm:$0xff] %v17555_v33  ;;  %v17557_v58 = vadd.f32 %v14982_v57, %v2873_v18  ;;  %v17574_v21 = vpop.permute.xlu1 %4298 }
 0x1b8   : > { %v14929_v12 = vpop.f32.mrf.mxu1  ;;  %v14985_v28 = vpop.f32.mrf.mxu0  ;;  %21328 = vst [vmem:[#allocation37_spill] sm:$0xff] %v17574_v21  ;;  %vm21185_vm12 = vcmp.eq.s32.totalorder %v17574_v21, 1 }
 0x1b9   : > { %21322 = vst [vmem:[#allocation31_spill] sm:$0xff] %v17557_v58  ;;  %v2875_v49 = vadd.f32 %v14929_v12, %v17433_v0 }
 0x1ba   : > { %v2791_v24 = vpop.f32.mrf.mxu1  ;;  %v3218_v56 = vpop.f32.mrf.mxu0 }
 0x1bb   : > { %v17564_v53 = vadd.f32 %v14985_v28, %v2875_v49  ;;  %v2874_v6 = vadd.f32 %v2791_v24, %v17436_v2  ;;  %v17578_v28 = vpop.permute.xlu0 %4295 }
 0x1bc   : > { %v14932_v7 = vpop.f32.mrf.mxu1  ;;  %v14988_v20 = vpop.f32.mrf.mxu0  ;;  %21330 = vst [vmem:[#allocation39_spill] sm:$0xff] %v17578_v28  ;;  %vm21187_vm13 = vcmp.eq.s32.totalorder %v17578_v28, 1 }
 0x1bd   : > { %21325 = vst [vmem:[#allocation34_spill] sm:$0xff] %v17564_v53  ;;  %v17567_v5 = vadd.f32 %v3218_v56, %v2874_v6  ;;  %v2877_v57 = vadd.f32 %v14932_v7, %v17443_v48 }
 0x1be   : > { %v17570_v18 = vpop.f32.mrf.mxu1  ;;  %v17572_v58 = vpop.f32.mrf.mxu0 }
 0x1bf   : > { %21326 = vst [vmem:[#allocation35_spill] sm:$0xff] %v17567_v5  ;;  %21327 = vst [vmem:[#allocation36_spill] sm:$0xff] %v17572_v58  ;;  %v17576_v0 = vadd.f32 %v14988_v20, %v2877_v57  ;;  %v17587_v5 = vld [vmem:[%s21177_s3 + $0x38] sm:$0xff]   ;;  %v17589_v20 = vpop.permute.xlu1 %4304 }
 0x1c0   : > { %v14935_v12 = vpop.f32.mrf.mxu1  ;;  %v14991_v35 = vpop.f32.mrf.mxu0  ;;  %21332 = vst [vmem:[#allocation41_spill] sm:$0xff] %v17587_v5  ;;  %21333 = vst [vmem:[#allocation42_spill] sm:$0xff] %v17589_v20  ;;  %15233 = vmatprep.subr.bf16.mxu0 %v17587_v5  ;;  %vm21186_vm14 = vcmp.eq.s32.totalorder %v17589_v20, 1 }
 0x1c1   : > { %21329 = vst [vmem:[#allocation38_spill] sm:$0xff] %v17576_v0  ;;  %v2879_v2 = vadd.f32 %v14935_v12, %v17451_v34  ;;  %v4643_v34 = vld [vmem:[#allocation2 + $0x4] sm:$0xf]  ;;  %v4642_v12 = vld [vmem:[#allocation2] sm:$0xc] }
 0x1c2   : > { %v2811_v49 = vpop.f32.mrf.mxu1  ;;  %v3238_v24 = vpop.f32.mrf.mxu0  ;;  %v13073_v58 = vcombine.low %v4642_v12, %v4643_v34  ;;  %v1170_v12 = vadd.f32 %v17285_v25, %v17043_v51  ;;  %v2014_v25 = vadd.f32 %v17407_v11, %v17177_v55 }
 0x1c3   : > { %v17581_v56 = vadd.f32 %v14991_v35, %v2879_v2  ;;  %v2878_v48 = vadd.f32 %v2811_v49, %v17455_v47  ;;  %v17599_v47 = vpop.permute.xlu0 %4301 }
 0x1c4   : > { %v14938_v6 = vpop.f32.mrf.mxu1  ;;  %v14994_v7 = vpop.f32.mrf.mxu0  ;;  %21336 = vst [vmem:[#allocation45_spill] sm:$0xff] %v17599_v47  ;;  %vm4396_vm15 = vcmp.eq.s32.totalorder %v17599_v47, 1 }
 0x1c5   : > { %21331 = vst [vmem:[#allocation40_spill] sm:$0xff] %v17581_v56  ;;  %v17591_v57 = vadd.f32 %v3238_v24, %v2878_v48  ;;  %v2881_v0 = vadd.f32 %v14938_v6, %v17462_v14  ;;  %v1998_v14 = vadd.f32 %v17314_v63, %v17070_v36  ;;  %v17606_v6 = vpop.permute.xlu1 %4310  ;;  %v2002_v63 = vadd.f32 %v17346_v3, %v17094_v4 }
 0x1c6   : > { %v17594_v53 = vpop.f32.mrf.mxu1  ;;  %v17596_v35 = vpop.f32.mrf.mxu0  ;;  %21338 = vst [vmem:[#allocation47_spill] sm:$0xff] %v17606_v6  ;;  %v2018_v4 = vadd.f32 %v17426_v62, %v17205_v44  ;;  %vm21188_vm3 = vcmp.eq.s32.totalorder %v17606_v6, 1 }
 0x1c7   : > { %21334 = vst [vmem:[#allocation43_spill] sm:$0xff] %v17591_v57  ;;  %21335 = vst [vmem:[#allocation44_spill] sm:$0xff] %v17596_v35  ;;  %v17601_v2 = vadd.f32 %v14994_v7, %v2881_v0  ;;  %v4683_v0 = vld [vmem:[#allocation2] sm:$0x8]  ;;  %v5068_v7 = vshrl.u32 %v13073_v58, 16  ;;  %v2425_v51 = vadd.f32 %v17316_v43, %v1998_v14  ;;  %v1603_v43 = vadd.f32 %v17287_v37, %v1170_v12 }
 0x1c8   : > { %v14941_v49 = vpop.f32.mrf.mxu1  ;;  %v14997_v56 = vpop.f32.mrf.mxu0  ;;  %v2429_v44 = vadd.f32 %v17348_v54, %v2002_v63  ;;  %v17657_v37 = vld [vmem:[%s21176_s2] ss:$0 sm:$0xff] }
 0x1c9   : > { %21337 = vst [vmem:[#allocation46_spill] sm:$0xff] %v17601_v2  ;;  %v2883_v24 = vadd.f32 %v14941_v49, %v17465_v16  ;;  %v5071_v2 = vshll.u32 %v13073_v58, 16  ;;  %v17613_v16 = vpop.permute.xlu0 %4307  ;;  %v17638_v3 = vrot.slane %v5068_v7, 2  ;;  %v17645_v55 = vpop.permute.xlu1 %4316  ;;  %v21345_v14 = vld [vmem:[#allocation9_spill] sm:$0xff] }
 0x1ca   : > { %v2831_v48 = vpop.f32.mrf.mxu1  ;;  %v3258_v57 = vpop.f32.mrf.mxu0  ;;  %21339 = vst [vmem:[#allocation48_spill] sm:$0xff] %v17613_v16  ;;  %21340 = vst [vmem:[#allocation49_spill] sm:$0xff] %v17645_v55  ;;  %vm21189_vm4 = vcmp.eq.s32.totalorder %v17613_v16, 1  ;;  %vm21190_vm5 = vcmp.eq.s32.totalorder %v17645_v55, 1 }
 0x1cb   : > { %v17608_v33 = vadd.f32 %v14997_v56, %v2883_v24  ;;  %v2882_v5 = vadd.f32 %v2831_v48, %v17468_v22  ;;  %v2006_v22 = vadd.f32 %v17381_v23, %v17121_v61  ;;  %v2010_v56 = vadd.f32 %v17394_v38, %v17149_v46  ;;  %v21344_v48 = vld [vmem:[#allocation4_spill] sm:$0xff] }
 0x1cc   : > { %v14944_v35 = vpop.f32.mrf.mxu1  ;;  %v15000_v42 = vpop.f32.mrf.mxu0  ;;  %v17640_v23 = vrot.slane %v5071_v2, 3  ;;  %v2852_v38 = vadd.f32 %v17484_v17, %v2425_v51  ;;  %v21346_v51 = vld [vmem:[#allocation13_spill] sm:$0xff] }
 0x1cd   : > { %v17615_v49 = vadd.f32 %v3258_v57, %v2882_v5  ;;  %v2885_v36 = vadd.f32 %v14944_v35, %v17475_v26  ;;  %v17633_v26 = vcombine.low %v4683_v0, %v4643_v34  ;;  %v2433_v62 = vadd.f32 %v17383_v13, %v2006_v22  ;;  %v21341_v35 = vld [vmem:[#allocation5_spill] sm:$0xff]  ;;  %v17662_v54 = vpop.permute.xlu0 %4313 }
 0x1ce   : > { %v17624_v24 = vpop.f32.mrf.mxu1  ;;  %v17626_v58 = vpop.f32.mrf.mxu0  ;;  %v2022_v57 = vadd.f32 %v17439_v30, %v17236_v40  ;;  %21342 = vst [vmem:[#allocation5_spill] sm:$0xff] %v17662_v54  ;;  %v21343_v40 = vld [vmem:[#allocation6_spill] sm:$0xff]  ;;  %v2026_v0 = vadd.f32 %v21345_v14, %v21344_v48  ;;  %v3279_v22 = vadd.f32 %v17486_v32, %v2852_v38  ;;  %vm21191_vm6 = vcmp.eq.s32.totalorder %v17662_v54, 1  ;;  %v16076_v48 = vld [vmem:[%s21177_s3 + $0x30] sm:$0xff]  }
 0x1cf   : > { %v17631_v5 = vadd.f32 %v15000_v42, %v2885_v36  ;;  %v2437_v42 = vadd.f32 %v17396_v15, %v2010_v56  ;;  %v4783_v2 = vrot.slane %v17633_v26, 3  ;;  %v2445_v30 = vadd.f32 %v21343_v40, %v2018_v4  ;;  %v21347_v4 = vld [vmem:[#allocation7_spill] sm:$0xff]  ;;  %v17680_v14 = vpop.permute.xlu1 %4322 }
 0x1d0   : > { %v15005_v61 = vpop.f32.mrf.mxu1  ;;  %v15061_v46 = vpop.f32.mrf.mxu0  ;;  %v5491_v63 = vshrl.u32 %v17633_v26, 16  ;;  %21349 = vst [vmem:[#allocation6_spill] sm:$0xff] %v17680_v14 }
 0x1d1   : > { %v3705_v11 = vadd.f32 %v15005_v61, %v17478_v60  ;;  %v17660_v60 = vadd.f32 %v21341_v35, %v2014_v25  ;;  %v2449_v61 = vadd.f32 %v21347_v4, %v2022_v57  ;;  %v2864_v57 = vadd.f32 %v17523_v50, %v2437_v42 }
 0x1d2   : > { %v3525_v17 = vpop.f32.mrf.mxu1  ;;  %v3952_v34 = vpop.f32.mrf.mxu0 }
 0x1d3   : > { %v4132_v13 = vadd.f32 %v15061_v46, %v3705_v11  ;;  %v3704_v15 = vadd.f32 %v3525_v17, %v17481_v9  ;;  %v21348_v46 = vld [vmem:[#allocation11_spill] sm:$0xff]  ;;  %v2856_v17 = vadd.f32 %v17497_v59, %v2429_v44  ;;  %v17686_v59 = vrot.slane %v5491_v63, 3  ;;  %v17689_v44 = vpop.permute.xlu0 %4319 }
 0x1d4   : > { %v15008_v7 = vpop.f32.mrf.mxu1  ;;  %v15064_v12 = vpop.f32.mrf.mxu0  ;;  %v2030_v11 = vadd.f32 %v21348_v46, %v1603_v43  ;;  %21351 = vst [vmem:[#allocation4_spill] sm:$0xff] %v17689_v44 }
 0x1d5   : > { %v4175_v9 = vadd.f32 %v17657_v37, %v4132_v13  ;;  %v4131_v56 = vadd.f32 %v3952_v34, %v3704_v15  ;;  %v3707_v25 = vadd.f32 %v15008_v7, %v21346_v51  ;;  %v21350_v34 = vld [vmem:[#allocation10_spill] sm:$0xff]  ;;  %v2860_v7 = vadd.f32 %v17510_v27, %v2433_v62 }
 0x1d6   : > { %v3535_v35 = vpop.f32.mrf.mxu1  ;;  %v3962_v40 = vpop.f32.mrf.mxu0  ;;  %v2453_v15 = vadd.f32 %v21350_v34, %v2026_v0  ;;  %v21352_v0 = vld [vmem:[#allocation12_spill] sm:$0xff]  ;;  %v3283_v27 = vadd.f32 %v17499_v41, %v2856_v17  ;;  %v21353_v62 = vld [vmem:[#allocation14_spill] sm:$0xff]  ;;  %v17707_v41 = vadd.f32 %v17525_v19, %v2864_v57  ;;  %v2868_v19 = vadd.f32 %v17536_v1, %v17660_v60 }
 0x1d7   : > { %v4211_v36 = vmax.f32 %v4175_v9, 0.0  ;;  %v4174_v32 = vadd.f32 %v17657_v37, %v4131_v56  ;;  %v4134_v38 = vadd.f32 %v15064_v12, %v3707_v25  ;;  %v3706_v13 = vadd.f32 %v3535_v35, %v3279_v22  ;;  %v17710_v34 = vpop.permute.xlu1 %4328 }
 0x1d8   : > { %v15011_v43 = vpop.f32.mrf.mxu1  ;;  %v15067_v51 = vpop.f32.mrf.mxu0  ;;  %v2457_v25 = vadd.f32 %v21352_v0, %v2030_v11  ;;  %21354 = vst [vmem:[#allocation9_spill] sm:$0xff] %v17710_v34  ;;  %v2872_v57 = vadd.f32 %v17553_v8, %v2445_v30  ;;  %v2876_v1 = vadd.f32 %v17570_v18, %v2449_v61  ;;  %v2880_v8 = vadd.f32 %v17594_v53, %v2453_v15  ;;  %v21359_v18 = vld [vmem:[#allocation30_spill] sm:$0xff] }
 0x1d9   : > { %v4427_v9 = vsel %vm4391_vm9, %v4211_v36, 0.0  ;;  %v4210_v56 = vmax.f32 %v4174_v32, 0.0  ;;  %v4177_v12 = vadd.f32 %v17657_v37, %v4134_v38  ;;  %v4133_v22 = vadd.f32 %v3962_v40, %v3706_v13  ;;  %v17721_v0 = vpop.permute.xlu0 %4325 }
 0x1da   : > { %v13701_v50 = vpack.c.bf16 %v4427_v9, %v4427_v9  ;;  %v3709_v42 = vadd.f32 %v15011_v43, %v21353_v62  ;;  %v3545_v63 = vpop.f32.mrf.mxu1  ;;  %v3972_v4 = vpop.f32.mrf.mxu0  ;;  %v17703_v40 = vadd.f32 %v17512_v10, %v2860_v7  ;;  %v21355_v10 = vld [vmem:[#allocation15_spill] sm:$0xff]  ;;  %21356 = vst [vmem:[#allocation13_spill] sm:$0xff] %v17721_v0  ;;  %v17736_v61 = vadd.f32 %v21359_v18, %v2872_v57 }
 0x1db   : > { %v4426_v46 = vsel %vm4390_vm8, %v4210_v56, 0.0  ;;  %v4213_v35 = vmax.f32 %v4177_v12, 0.0  ;;  %v4176_v36 = vadd.f32 %v17657_v37, %v4133_v22  ;;  %v3708_v32 = vadd.f32 %v3545_v63, %v17494_v52 }
 0x1dc   : > { %4607 = vst.msk [vmem:[#allocation2 + $0x10] sm:$0xf] %vm310_vm7, %v13701_v50  ;;  %v13700_v11 = vpack.c.bf16 %v4426_v46, %v4426_v46  ;;  %v4136_v17 = vadd.f32 %v15067_v51, %v3709_v42  ;;  %v15014_v38 = vpop.f32.mrf.mxu1  ;;  %v15070_v13 = vpop.f32.mrf.mxu0  ;;  %v2884_v53 = vadd.f32 %v17624_v24, %v2457_v25  ;;  %v21361_v24 = vld [vmem:[#allocation36_spill] sm:$0xff] }
 0x1dd   : > { %v4429_v43 = vsel %vm4393_vm10, %v4213_v35, 0.0  ;;  %v4212_v52 = vmax.f32 %v4176_v36, 0.0  ;;  %v4135_v9 = vadd.f32 %v3972_v4, %v3708_v32  ;;  %v3711_v7 = vadd.f32 %v15014_v38, %v21355_v10 }
 0x1de   : > { %4606 = vst.msk [vmem:[#allocation2 + $0xc] sm:$0xf] %vm310_vm7, %v13700_v11  ;;  %v13703_v51 = vpack.c.bf16 %v4429_v43, %v4429_v43  ;;  %v4179_v56 = vadd.f32 %v17657_v37, %v4136_v17  ;;  %v3555_v12 = vpop.f32.mrf.mxu1  ;;  %v3982_v22 = vpop.f32.mrf.mxu0  ;;  %v21357_v11 = vld [vmem:[#allocation16_spill] sm:$0xff]  ;;  %v17750_v25 = vadd.f32 %v21361_v24, %v2876_v1 }
 0x1df   : > { %v4428_v50 = vsel %vm4392_vm11, %v4212_v52, 0.0  ;;  %v4178_v62 = vadd.f32 %v17657_v37, %v4135_v9  ;;  %v4138_v42 = vadd.f32 %v15070_v13, %v3711_v7  ;;  %v3710_v63 = vadd.f32 %v3555_v12, %v3283_v27  ;;  %v21358_v27 = vld [vmem:[#allocation24_spill] sm:$0xff]  ;;  %v17743_v52 = vpop.permute.xlu1 %4334 }
 0x1e0   : > { %4609 = vst.msk [vmem:[#allocation2 + $0x18] sm:$0xf] %vm310_vm7, %v13703_v51  ;;  %v13702_v60 = vpack.c.bf16 %v4428_v50, %v4428_v50  ;;  %v4215_v30 = vmax.f32 %v4179_v56, 0.0  ;;  %v15017_v4 = vpop.f32.mrf.mxu1  ;;  %v15073_v46 = vpop.f32.mrf.mxu0  ;;  %v17733_v38 = vadd.f32 %v21358_v27, %v2868_v19  ;;  %21360 = vst [vmem:[#allocation7_spill] sm:$0xff] %v17743_v52  ;;  %v21362_v56 = vld [vmem:[#allocation17_spill] sm:$0xff] }
 0x1e1   : > { %v4214_v35 = vmax.f32 %v4178_v62, 0.0  ;;  %v4181_v36 = vadd.f32 %v17657_v37, %v4138_v42  ;;  %v4137_v32 = vadd.f32 %v3982_v22, %v3710_v63  ;;  %v3713_v17 = vadd.f32 %v15017_v4, %v21357_v11  ;;  %v17753_v62 = vpop.permute.xlu0 %4331  ;;  %v21364_v42 = vld [vmem:[#allocation44_spill] sm:$0xff]  ;;  %v21365_v4 = vld [vmem:[#allocation18_spill] sm:$0xff] }
 0x1e2   : > { %4608 = vst.msk [vmem:[#allocation2 + $0x14] sm:$0xf] %vm310_vm7, %v13702_v60  ;;  %v4431_v15 = vsel %vm21185_vm12, %v4215_v30, 0.0  ;;  %v3565_v13 = vpop.f32.mrf.mxu1  ;;  %v3992_v43 = vpop.f32.mrf.mxu0  ;;  %21363 = vst [vmem:[#allocation11_spill] sm:$0xff] %v17753_v62  ;;  %v17756_v63 = vadd.f32 %v21364_v42, %v2880_v8  ;;  %vm5066_vm12 = vsmask.f32 5376 }
 0x1e3   : > { %v13705_v9 = vpack.c.bf16 %v4431_v15, %v4431_v15  ;;  %v4430_v10 = vsel %vm21187_vm13, %v4214_v35, 0.0  ;;  %v4217_v7 = vmax.f32 %v4181_v36, 0.0  ;;  %v4180_v19 = vadd.f32 %v17657_v37, %v4137_v32 }
 0x1e4   : > { %v13704_v57 = vpack.c.bf16 %v4430_v10, %v4430_v10  ;;  %v4140_v51 = vadd.f32 %v15073_v46, %v3713_v17  ;;  %v3712_v12 = vadd.f32 %v3565_v13, %v21362_v56  ;;  %v15020_v22 = vpop.f32.mrf.mxu1  ;;  %v15076_v50 = vpop.f32.mrf.mxu0  ;;  %v17766_v46 = vadd.f32 %v17626_v58, %v2884_v53 }
 0x1e5   : > { %4611 = vst.msk [vmem:[#allocation2 + $0x20] sm:$0xf] %vm310_vm7, %v13705_v9  ;;  %v4433_v60 = vsel %vm21186_vm14, %v4217_v7, 0.0  ;;  %v4216_v30 = vmax.f32 %v4180_v19, 0.0  ;;  %v3715_v1 = vadd.f32 %v15020_v22, %v21365_v4  ;;  %v17762_v35 = vld [vmem:[#allocation2 + $0x8] sm:$0xff]   ;;  %vm21192_vm14 = vcmp.eq.s32.totalorder %v17680_v14, 1  ;;  %v17778_v19 = vpop.permute.xlu1 %4340 }
 0x1e6   : > { %4610 = vst.msk [vmem:[#allocation2 + $0x1c] sm:$0xf] %vm310_vm7, %v13704_v57  ;;  %v13707_v36 = vpack.c.bf16 %v4433_v60, %v4433_v60  ;;  %v4183_v8 = vadd.f32 %v17657_v37, %v4140_v51  ;;  %v4139_v32 = vadd.f32 %v3992_v43, %v3712_v12  ;;  %v3575_v11 = vpop.f32.mrf.mxu1  ;;  %v4002_v17 = vpop.f32.mrf.mxu0  ;;  %v4784_v13 = vrot.slane %v17762_v35, 3  ;;  %21366 = vst [vmem:[#allocation10_spill] sm:$0xff] %v17778_v19 }
 0x1e7   : > { %v4432_v27 = vsel %vm4396_vm15, %v4216_v30, 0.0  ;;  %v4142_v18 = vadd.f32 %v15076_v50, %v3715_v1  ;;  %v3714_v15 = vadd.f32 %v3575_v11, %v17703_v40  ;;  %v21194_v7 = vshrl.u32 %v17762_v35, 16  ;;  %v21367_v40 = vld [vmem:[#allocation19_spill] sm:$0xff] }
 0x1e8   : > { %4613 = vst.msk [vmem:[#allocation2 + $0x28] sm:$0xf] %vm310_vm7, %v13707_v36  ;;  %v13706_v58 = vpack.c.bf16 %v4432_v27, %v4432_v27  ;;  %v4219_v53 = vmax.f32 %v4183_v8, 0.0  ;;  %v4182_v9 = vadd.f32 %v17657_v37, %v4139_v32  ;;  %v15023_v43 = vpop.f32.mrf.mxu1  ;;  %v15079_v10 = vpop.f32.mrf.mxu0  ;;  %v4785_v56 = vsel %vm4782_vm1, %v4783_v2, %v4784_v13 }
 0x1e9   : > { %v4185_v24 = vadd.f32 %v17657_v37, %v4142_v18  ;;  %v4141_v57 = vadd.f32 %v4002_v17, %v3714_v15  ;;  %v3717_v51 = vadd.f32 %v15023_v43, %v21367_v40  ;;  %v17785_v12 = vld [vmem:[#allocation2 + $0x10] sm:$0xff]   ;;  %15117 = vmatprep.mubr.msk.bf16.mxu1 %vm317_vm2, %v4785_v56  ;;  %v5078_v30 = vrot.slane %v21194_v7, 2  ;;  %v17795_v2 = vpop.permute.xlu0 %4337  ;;  %v21369_v17 = vld [vmem:[#allocation20_spill] sm:$0xff]  ;;  %v16061_v40 = vld [vmem:[%s21177_s3 + $0x20] sm:$0xff]  }
 0x1ea   : > { %4612 = vst.msk [vmem:[#allocation2 + $0x24] sm:$0xf] %vm310_vm7, %v13706_v58  ;;  %v4435_v22 = vsel %vm21188_vm3, %v4219_v53, 0.0  ;;  %v4218_v50 = vmax.f32 %v4182_v9, 0.0  ;;  %v3585_v42 = vpop.f32.mrf.mxu1  ;;  %v4012_v60 = vpop.f32.mrf.mxu0  ;;  %v21193_v4 = vshll.u32 %v17762_v35, 16  ;;  %vm21195_vm13 = vcmp.eq.s32.totalorder %v17689_v44, 1 }
 0x1eb   : > { %21368 = vst [vmem:[#allocation12_spill] sm:$0xff] %v17795_v2  ;;  %v13709_v1 = vpack.c.bf16 %v4435_v22, %v4435_v22  ;;  %v4221_v36 = vmax.f32 %v4185_v24, 0.0  ;;  %v4184_v8 = vadd.f32 %v17657_v37, %v4141_v57  ;;  %v4144_v32 = vadd.f32 %v15079_v10, %v3717_v51  ;;  %v21370_v22 = vld [vmem:[#allocation21_spill] sm:$0xff] }
 0x1ec   : > { %v4434_v11 = vsel %vm21189_vm4, %v4218_v50, 0.0  ;;  %v3716_v27 = vadd.f32 %v3585_v42, %v21369_v17  ;;  %v15026_v18 = vpop.f32.mrf.mxu1  ;;  %v15082_v15 = vpop.f32.mrf.mxu0  ;;  %v4786_v58 = vrot.slane %v17785_v12, 3  ;;  %v5081_v53 = vrot.slane %v21193_v4, 3 }
 0x1ed   : > { %vm21198_vm3 = vcmp.eq.s32.totalorder %v17710_v34, 1  ;;  %4615 = vst.msk [vmem:[#allocation2 + $0x30] sm:$0xf] %vm310_vm7, %v13709_v1  ;;  %v13708_v9 = vpack.c.bf16 %v4434_v11, %v4434_v11  ;;  %v4437_v43 = vsel %vm21190_vm5, %v4221_v36, 0.0  ;;  %v4220_v10 = vmax.f32 %v4184_v8, 0.0  ;;  %v17809_v57 = vld [vmem:[#allocation2 + $0x18] sm:$0xff]   ;;  %v17817_v36 = vpop.permute.xlu1 %4346 }
 0x1ee   : > { %v4187_v24 = vadd.f32 %v17657_v37, %v4144_v32  ;;  %vm21226_vm4 = vcmp.eq.s32.totalorder %v17721_v0, 1  ;;  %v13711_v51 = vpack.c.bf16 %v4437_v43, %v4437_v43  ;;  %v4143_v56 = vadd.f32 %v4012_v60, %v3716_v27  ;;  %v3595_v42 = vpop.f32.mrf.mxu1  ;;  %v4022_v1 = vpop.f32.mrf.mxu0  ;;  %21371 = vst [vmem:[#allocation14_spill] sm:$0xff] %v17817_v36 }
 0x1ef   : > { %v3719_v50 = vadd.f32 %v15026_v18, %v21370_v22  ;;  %v4787_v11 = vsel %vm4782_vm1, %v4784_v13, %v4786_v58  ;;  %4614 = vst.msk [vmem:[#allocation2 + $0x2c] sm:$0xf] %vm310_vm7, %v13708_v9  ;;  %v4436_v8 = vsel %vm21191_vm6, %v4220_v10, 0.0  ;;  %v3718_v17 = vadd.f32 %v3595_v42, %v17707_v41  ;;  %v21372_v18 = vld [vmem:[#allocation8_spill] sm:$0xff]  ;;  %v16075_v42 = vld [vmem:[%s21177_s3 + $0x48] sm:$0xff]  }
 0x1f0   : > { %v4223_v32 = vmax.f32 %v4187_v24, 0.0  ;;  %15118 = vmatmul.mubr.msk.bf16.vlgmr.msra.gmra.mxu1 %vm317_vm2, %v4787_v11  ;;  %v17824_v43 = vor.u32 %v5081_v53, %v5078_v30  ;;  %vm21199_vm5 = vcmp.eq.s32.totalorder %v17743_v52, 1  ;;  %4617 = vst.msk [vmem:[#allocation2 + $0x38] sm:$0xf] %vm310_vm7, %v13711_v51  ;;  %v13710_v60 = vpack.c.bf16 %v4436_v8, %v4436_v8  ;;  %v15029_v9 = vpop.f32.mrf.mxu1  ;;  %v15085_v22 = vpop.f32.mrf.mxu0 }
 0x1f1   : > { %v4186_v13 = vadd.f32 %v17657_v37, %v4143_v56  ;;  %v4146_v27 = vadd.f32 %v15082_v15, %v3719_v50  ;;  %15194 = vmatpush3.bf16.msra.mxu1 %v21372_v18  ;;  %v4788_v10 = vrot.slane %v17809_v57, 3  ;;  %v17831_v24 = vpop.permute.xlu0 %4343  ;;  %v4145_v30 = vadd.f32 %v4022_v1, %v3718_v17  ;;  %v21375_v56 = vld [vmem:[#allocation22_spill] sm:$0xff]  ;;  %v17841_v50 = vld [vmem:[#allocation2 + $0x20] sm:$0xff]  }
 0x1f2   : > { %21373 = vst [vmem:[#allocation15_spill] sm:$0xff] %v17831_v24  ;;  %v4439_v41 = vsel %vm21192_vm14, %v4223_v32, 0.0  ;;  %v21374_v53 = vor.u32 %v17640_v23, %v17638_v3  ;;  %v3721_v15 = vadd.f32 %v15029_v9, %v21375_v56  ;;  %15195 = vmatprep.subr.bf16.mxu1 %v16061_v40  ;;  %vm21205_vm6 = vcmp.eq.s32.totalorder %v17753_v62, 1  ;;  %4616 = vst.msk [vmem:[#allocation2 + $0x34] sm:$0xf] %vm310_vm7, %v13710_v60  ;;  %v3605_v3 = vpop.f32.mrf.mxu1  ;;  %v4032_v23 = vpop.f32.mrf.mxu0  ;;  %v21376_v9 = vld [vmem:[#allocation23_spill] sm:$0xff] }
 0x1f3   : > { %v13713_v1 = vpack.c.bf16 %v4439_v41, %v4439_v41  ;;  %v4222_v11 = vmax.f32 %v4186_v13, 0.0  ;;  %v4189_v8 = vadd.f32 %v17657_v37, %v4146_v27  ;;  %v4789_v32 = vsel %vm4782_vm1, %v4786_v58, %v4788_v10 }
 0x1f4   : > { %v5083_v51 = vsel %vm5066_vm12, %v21374_v53, %v17824_v43  ;;  %v4188_v17 = vadd.f32 %v17657_v37, %v4145_v30  ;;  %v4148_v18 = vadd.f32 %v15085_v22, %v3721_v15  ;;  %v3720_v53 = vadd.f32 %v3605_v3, %v21376_v9  ;;  %15121 = vmatprep.mubr.msk.bf16.mxu1 %vm317_vm2, %v4789_v32  ;;  %v15032_v41 = vpop.f32.mrf.mxu1  ;;  %v17861_v22 = vpop.permute.xlu1 %4352 }
 0x1f5   : > { %15157 = vmatprep.mubr.msk.bf16.mxu0 %vm317_vm2, %v5083_v51  ;;  %v21197_v56 = vshrl.u32 %v17785_v12, 16  ;;  %4619 = vst.msk [vmem:[#allocation2 + $0x40] sm:$0xf] %vm310_vm7, %v13713_v1  ;;  %v4438_v60 = vsel %vm21195_vm13, %v4222_v11, 0.0  ;;  %v4225_v13 = vmax.f32 %v4189_v8, 0.0  ;;  %v21196_v27 = vshll.u32 %v17785_v12, 16  ;;  %v15088_v51 = vpop.f32.mrf.mxu0  ;;  %15196 = vmatpush3.bf16.msra.mxu1 %v16061_v40 }
 0x1f6   : > { %v21200_v58 = vrot.slane %v17841_v50, 3  ;;  %vm21206_vm14 = vcmp.eq.s32.totalorder %v17778_v19, 1  ;;  %21377 = vst [vmem:[#allocation16_spill] sm:$0xff] %v17861_v22  ;;  %v13712_v30 = vpack.c.bf16 %v4438_v60, %v4438_v60  ;;  %v4224_v15 = vmax.f32 %v4188_v17, 0.0  ;;  %15273 = vmatprep.subr.bf16.mxu1 %v16075_v42  ;;  %v21378_v40 = vld [vmem:[#allocation25_spill] sm:$0xff]  ;;  %v3615_v4 = vpop.f32.mrf.mxu1  ;;  %v17872_v17 = vpop.permute.xlu0 %4349 }
 0x1f7   : > { %v4191_v3 = vadd.f32 %v17657_v37, %v4148_v18  ;;  %v4147_v1 = vadd.f32 %v4032_v23, %v3720_v53  ;;  %v4441_v11 = vsel %vm21198_vm3, %v4225_v13, 0.0  ;;  %v5087_v8 = vrot.slane %v21197_v56, 2  ;;  %v4042_v7 = vpop.f32.mrf.mxu0  ;;  %21379 = vst [vmem:[#allocation24_spill] sm:$0xff] %v17872_v17 }
 0x1f8   : > { %v5090_v32 = vrot.slane %v21196_v27, 3  ;;  %v3723_v9 = vadd.f32 %v15032_v41, %v21378_v40  ;;  %vm21212_vm13 = vcmp.eq.s32.totalorder %v17795_v2, 1  ;;  %4618 = vst.msk [vmem:[#allocation2 + $0x3c] sm:$0xf] %vm310_vm7, %v13712_v30  ;;  %v13715_v42 = vpack.c.bf16 %v4441_v11, %v4441_v11  ;;  %v15035_v40 = vpop.f32.mrf.mxu1 }
 0x1f9   : > { %v4440_v23 = vsel %vm21226_vm4, %v4224_v15, 0.0  ;;  %v4227_v18 = vmax.f32 %v4191_v3, 0.0  ;;  %v4190_v53 = vadd.f32 %v17657_v37, %v4147_v1  ;;  %v3722_v41 = vadd.f32 %v3615_v4, %v17733_v38  ;;  %v15091_v56 = vpop.f32.mrf.mxu0  ;;  %v17891_v1 = vld [vmem:[#allocation2 + $0x28] sm:$0xff]  }
 0x1fa   : > { %v13714_v60 = vpack.c.bf16 %v4440_v23, %v4440_v23  ;;  %v17878_v13 = vor.u32 %v5090_v32, %v5087_v8  ;;  %v4150_v27 = vadd.f32 %v15088_v51, %v3723_v9  ;;  %4621 = vst.msk [vmem:[#allocation2 + $0x48] sm:$0xf] %vm310_vm7, %v13715_v42  ;;  %v4791_v3 = vsel %vm4782_vm1, %v4788_v10, %v21200_v58  ;;  %v3625_v32 = vpop.f32.mrf.mxu1  ;;  %v17901_v9 = vpop.permute.xlu1 %4358 }
 0x1fb   : > { %v4443_v30 = vsel %vm21199_vm5, %v4227_v18, 0.0  ;;  %v4226_v15 = vmax.f32 %v4190_v53, 0.0  ;;  %v21201_v51 = vshrl.u32 %v17809_v57, 16  ;;  %vm21213_vm3 = vcmp.eq.s32.totalorder %v17817_v36, 1  ;;  %15122 = vmatmul.mubr.msk.bf16.gmra.mxu1 %vm317_vm2, %v4791_v3  ;;  %v4052_v10 = vpop.f32.mrf.mxu0  ;;  %21380 = vst [vmem:[#allocation30_spill] sm:$0xff] %v17901_v9 }
 0x1fc   : > { %4620 = vst.msk [vmem:[#allocation2 + $0x44] sm:$0xf] %vm310_vm7, %v13714_v60  ;;  %v13717_v38 = vpack.c.bf16 %v4443_v30, %v4443_v30  ;;  %v5092_v4 = vsel %vm5066_vm12, %v17824_v43, %v17878_v13  ;;  %v4193_v11 = vadd.f32 %v17657_v37, %v4150_v27  ;;  %v4149_v8 = vadd.f32 %v4042_v7, %v3722_v41  ;;  %v21381_v27 = vld [vmem:[#allocation27_spill] sm:$0xff]  ;;  %v21382_v41 = vld [vmem:[#allocation29_spill] sm:$0xff]  ;;  %v15038_v3 = vpop.f32.mrf.mxu1 }
 0x1fd   : > { %vm21219_vm5 = vcmp.eq.s32.totalorder %v17831_v24, 1  ;;  %v4442_v42 = vsel %vm21205_vm6, %v4226_v15, 0.0  ;;  %15158 = vmatmul.mubr.msk.bf16.vlgmr.msra.gmra.mxu0 %vm317_vm2, %v5092_v4  ;;  %v5096_v23 = vrot.slane %v21201_v51, 2  ;;  %v21203_v43 = vshll.u32 %v17809_v57, 16  ;;  %v15094_v58 = vpop.f32.mrf.mxu0  ;;  %v21383_v15 = vld [vmem:[#allocation41_spill] sm:$0xff]  ;;  %v17914_v4 = vpop.permute.xlu0 %4355 }
 0x1fe   : > { %v3725_v7 = vadd.f32 %v15035_v40, %v21381_v27  ;;  %4623 = vst.msk [vmem:[#allocation2 + $0x50] sm:$0xf] %vm310_vm7, %v13717_v38  ;;  %v13716_v18 = vpack.c.bf16 %v4442_v42, %v4442_v42  ;;  %v4229_v53 = vmax.f32 %v4193_v11, 0.0  ;;  %v4192_v60 = vadd.f32 %v17657_v37, %v4149_v8  ;;  %15234 = vmatpush3.bf16.msra.mxu0 %v21383_v15  ;;  %v3635_v27 = vpop.f32.mrf.mxu1  ;;  %v17924_v15 = vld [vmem:[#allocation2 + $0x30] sm:$0xff]   ;;  %v18342_v55 = vld [vmem:[#allocation2 + $0x40] sm:$0xf] }
 0x1ff   : > { %v3724_v30 = vadd.f32 %v3625_v32, %v21382_v41  ;;  %21384 = vst [vmem:[#allocation36_spill] sm:$0xff] %v17914_v4  ;;  %v5099_v51 = vrot.slane %v21203_v43, 3  ;;  %v4792_v40 = vrot.slane %v17891_v1, 3  ;;  %15235 = vmatprep.subr.bf16.mxu0 %v16076_v48  ;;  %v21207_v42 = vshll.u32 %v17841_v50, 16  ;;  %v4062_v41 = vpop.f32.mrf.mxu0 }
 0x200   : > { %v4152_v52 = vadd.f32 %v15091_v56, %v3725_v7  ;;  %4622 = vst.msk [vmem:[#allocation2 + $0x4c] sm:$0xf] %vm310_vm7, %v13716_v18  ;;  %v4445_v11 = vsel %vm21206_vm14, %v4229_v53, 0.0  ;;  %v4228_v8 = vmax.f32 %v4192_v60, 0.0  ;;  %v21385_v38 = vrot.slane %v17841_v50, 3 }
 0x201   : > { %v4151_v32 = vadd.f32 %v4052_v10, %v3724_v30  ;;  %v13719_v43 = vpack.c.bf16 %v4445_v11, %v4445_v11  ;;  %v5100_v56 = vor.u32 %v5099_v51, %v5096_v23  ;;  %vm21220_vm6 = vcmp.eq.s32.totalorder %v17861_v22, 1  ;;  %v15097_v23 = vpop.f32.mrf.mxu0  ;;  %v17940_v30 = vpop.permute.xlu1 %4364 }
 0x202   : > { %v4195_v7 = vadd.f32 %v17657_v37, %v4152_v52  ;;  %v4793_v62 = vsel %vm4782_vm1, %v21385_v38, %v4792_v40  ;;  %v4444_v18 = vsel %vm21212_vm13, %v4228_v8, 0.0  ;;  %v21386_v53 = vshrl.u32 %v17841_v50, 16  ;;  %v15041_v52 = vpop.f32.mrf.mxu1  ;;  %15236 = vmatpush3.bf16.msra.mxu0 %v16076_v48  ;;  %21387 = vst [vmem:[#allocation17_spill] sm:$0xff] %v17940_v30  ;;  %v21388_v8 = vld [vmem:[#allocation31_spill] sm:$0xff]  ;;  %v17949_v34 = vpop.permute.xlu0 %4361 }
 0x203   : > { %v4194_v10 = vadd.f32 %v17657_v37, %v4151_v32  ;;  %15125 = vmatprep.mubr.msk.bf16.mxu1 %vm317_vm2, %v4793_v62  ;;  %v5108_v51 = vrot.slane %v21207_v42, 3  ;;  %vm21225_vm14 = vcmp.eq.s32.totalorder %v17872_v17, 1  ;;  %4625 = vst.msk [vmem:[#allocation2 + $0x58] sm:$0xf] %vm310_vm7, %v13719_v43  ;;  %v13718_v38 = vpack.c.bf16 %v4444_v18, %v4444_v18  ;;  %v4072_v14 = vpop.f32.mrf.mxu0  ;;  %21389 = vst [vmem:[#allocation44_spill] sm:$0xff] %v17949_v34  ;;  %v17956_v18 = vld [vmem:[#allocation2 + $0x38] sm:$0xff]  }
 0x204   : > { %v5105_v60 = vrot.slane %v21386_v53, 2  ;;  %v5101_v11 = vsel %vm5066_vm12, %v17878_v13, %v5100_v56  ;;  %v4231_v62 = vmax.f32 %v4195_v7, 0.0  ;;  %v3727_v32 = vadd.f32 %v15038_v3, %v21388_v8  ;;  %v3645_v2 = vpop.f32.mrf.mxu1 }
 0x205   : > { %15161 = vmatprep.mubr.msk.bf16.mxu0 %vm317_vm2, %v5101_v11  ;;  %v4230_v53 = vmax.f32 %v4194_v10, 0.0  ;;  %v3726_v19 = vadd.f32 %v3635_v27, %v17736_v61  ;;  %v4794_v48 = vrot.slane %v17924_v15, 3  ;;  %4624 = vst.msk [vmem:[#allocation2 + $0x54] sm:$0xf] %vm310_vm7, %v13718_v38  ;;  %v21214_v3 = vshrl.u32 %v17891_v1, 16  ;;  %v15100_v11 = vpop.f32.mrf.mxu0 }
 0x206   : > { %v5109_v42 = vor.u32 %v5108_v51, %v5105_v60  ;;  %v4447_v13 = vsel %vm21213_vm3, %v4231_v62, 0.0  ;;  %v4154_v43 = vadd.f32 %v15094_v58, %v3727_v32  ;;  %v21216_v7 = vshll.u32 %v17891_v1, 16  ;;  %v15044_v51 = vpop.f32.mrf.mxu1 }
 0x207   : > { %v13721_v10 = vpack.c.bf16 %v4447_v13, %v4447_v13  ;;  %v4446_v61 = vsel %vm21219_vm5, %v4230_v53, 0.0  ;;  %v4153_v60 = vadd.f32 %v4062_v41, %v3726_v19  ;;  %vm21232_vm13 = vcmp.eq.s32.totalorder %v17901_v9, 1  ;;  %v21391_v53 = vld [vmem:[#allocation35_spill] sm:$0xff] }
 0x208   : > { %v5110_v27 = vsel %vm5066_vm12, %v5100_v56, %v5109_v42  ;;  %v13720_v38 = vpack.c.bf16 %v4446_v61, %v4446_v61  ;;  %v4197_v58 = vadd.f32 %v17657_v37, %v4154_v43  ;;  %v4795_v62 = vsel %vm4782_vm1, %v4792_v40, %v4794_v48  ;;  %v21390_v56 = vld [vmem:[#allocation34_spill] sm:$0xff]  ;;  %v3655_v43 = vpop.f32.mrf.mxu1  ;;  %v4082_v40 = vpop.f32.mrf.mxu0 }
 0x209   : > { %15162 = vmatmul.mubr.msk.bf16.gmra.mxu0 %vm317_vm2, %v5110_v27  ;;  %v5114_v8 = vrot.slane %v21214_v3, 2  ;;  %vm21237_vm3 = vcmp.eq.s32.totalorder %v17914_v4, 1  ;;  %4627 = vst.msk [vmem:[#allocation2 + $0x60] sm:$0xf] %vm310_vm7, %v13721_v10  ;;  %v4196_v19 = vadd.f32 %v17657_v37, %v4153_v60  ;;  %15126 = vmatmul.mubr.msk.bf16.gmra.mxu1 %vm317_vm2, %v4795_v62  ;;  %v5117_v41 = vrot.slane %v21216_v7, 3  ;;  %v17975_v61 = vpop.permute.xlu1 %4370 }
 0x20a   : > { %v3729_v32 = vadd.f32 %v15041_v52, %v21390_v56  ;;  %v3728_v13 = vadd.f32 %v3645_v2, %v21391_v53  ;;  %21392 = vst [vmem:[#allocation18_spill] sm:$0xff] %v17975_v61  ;;  %4626 = vst.msk [vmem:[#allocation2 + $0x5c] sm:$0xf] %vm310_vm7, %v13720_v38  ;;  %v4233_v27 = vmax.f32 %v4197_v58, 0.0  ;;  %v4796_v10 = vrot.slane %v17956_v18, 3  ;;  %v17981_v52 = vld [vmem:[#allocation2 + $0x40] sm:$0xff]   ;;  %v15047_v2 = vpop.f32.mrf.mxu1  ;;  %v17983_v56 = vpop.f32.mrf.mxu0 }
 0x20b   : > { %v21222_v60 = vshrl.u32 %v17924_v15, 16  ;;  %v21221_v62 = vshll.u32 %v17924_v15, 16  ;;  %v4232_v3 = vmax.f32 %v4196_v19, 0.0  ;;  %v5118_v36 = vor.u32 %v5117_v41, %v5114_v8  ;;  %v17985_v53 = vpop.permute.xlu0 %4367 }
 0x20c   : > { %v4156_v7 = vadd.f32 %v15097_v23, %v3729_v32  ;;  %v4155_v24 = vadd.f32 %v4072_v14, %v3728_v13  ;;  %21393 = vst [vmem:[#allocation19_spill] sm:$0xff] %v17985_v53  ;;  %v4449_v38 = vsel %vm21220_vm6, %v4233_v27, 0.0  ;;  %v4797_v58 = vsel %vm4782_vm1, %v4794_v48, %v4796_v10  ;;  %v3665_v32 = vpop.f32.mrf.mxu1  ;;  %v4092_v48 = vpop.f32.mrf.mxu0  ;;  %v18045_v4 = vld [vmem:[#allocation2 + $0x50] sm:$0xff]  }
 0x20d   : > { %v5123_v44 = vrot.slane %v21222_v60, 2  ;;  %v5126_v8 = vrot.slane %v21221_v62, 3  ;;  %vm21233_vm5 = vcmp.eq.s32.totalorder %v17940_v30, 1  ;;  %v13723_v14 = vpack.c.bf16 %v4449_v38, %v4449_v38  ;;  %15129 = vmatprep.mubr.msk.bf16.mxu1 %vm317_vm2, %v4797_v58  ;;  %v21394_v38 = vld [vmem:[#allocation38_spill] sm:$0xff] }
 0x20e   : > { %v4448_v23 = vsel %vm21225_vm14, %v4232_v3, 0.0  ;;  %v5119_v19 = vsel %vm5066_vm12, %v5109_v42, %v5118_v36  ;;  %v4199_v41 = vadd.f32 %v17657_v37, %v4156_v7  ;;  %vm21240_vm6 = vcmp.eq.s32.totalorder %v17949_v34, 1  ;;  %v15050_v22 = vpop.f32.mrf.mxu1  ;;  %v18008_v17 = vpop.f32.mrf.mxu0 }
 0x20f   : > { %v13722_v13 = vpack.c.bf16 %v4448_v23, %v4448_v23  ;;  %15165 = vmatprep.mubr.msk.bf16.mxu0 %vm317_vm2, %v5119_v19  ;;  %v4198_v27 = vadd.f32 %v17657_v37, %v4155_v24  ;;  %v5127_v62 = vor.u32 %v5126_v8, %v5123_v44  ;;  %v3731_v60 = vadd.f32 %v15044_v51, %v21394_v38  ;;  %v18013_v23 = vld [vmem:[%s21177_s3 + $0x58] sm:$0xff]   ;;  %v18020_v8 = vpop.permute.xlu1 %4376 }
 0x210   : > { %4629 = vst.msk [vmem:[#allocation2 + $0x68] sm:$0xf] %vm310_vm7, %v13723_v14  ;;  %v4235_v3 = vmax.f32 %v4199_v41, 0.0  ;;  %v3730_v42 = vadd.f32 %v3655_v43, %v17750_v25  ;;  %v4798_v7 = vrot.slane %v17981_v52, 3  ;;  %v21227_v58 = vshrl.u32 %v17956_v18, 16  ;;  %v18018_v43 = vld [vmem:[#allocation2 + $0x48] sm:$0xff]   ;;  %15313 = vmatprep.subr.bf16.mxu0 %v18013_v23  ;;  %v4102_v0 = vpop.f32.mrf.mxu0 }
 0x211   : > { %4628 = vst.msk [vmem:[#allocation2 + $0x64] sm:$0xf] %vm310_vm7, %v13722_v13  ;;  %v4234_v44 = vmax.f32 %v4198_v27, 0.0  ;;  %v5128_v24 = vsel %vm5066_vm12, %v5118_v36, %v5127_v62  ;;  %v4158_v51 = vadd.f32 %v15100_v11, %v3731_v60  ;;  %v21235_v25 = vshll.u32 %v17956_v18, 16  ;;  %21395 = vst [vmem:[#allocation20_spill] sm:$0xff] %v18020_v8  ;;  %v3675_v27 = vpop.f32.mrf.mxu1  ;;  %v18031_v36 = vpop.permute.xlu0 %4373 }
 0x212   : > { %v4451_v14 = vsel %vm21232_vm13, %v4235_v3, 0.0  ;;  %15166 = vmatmul.mubr.msk.bf16.gmra.mxu0 %vm317_vm2, %v5128_v24  ;;  %v4157_v19 = vadd.f32 %v4082_v40, %v3730_v42  ;;  %v4799_v41 = vsel %vm4782_vm1, %v4796_v10, %v4798_v7  ;;  %v5132_v13 = vrot.slane %v21227_v58, 2  ;;  %21396 = vst [vmem:[#allocation21_spill] sm:$0xff] %v18031_v36  ;;  %v21397_v42 = vld [vmem:[#allocation40_spill] sm:$0xff]  ;;  %v21398_v58 = vld [vmem:[#allocation43_spill] sm:$0xff] }
 0x213   : > { %vm21239_vm14 = vcmp.eq.s32.totalorder %v17985_v53, 1  ;;  %vm21238_vm4 = vcmp.eq.s32.totalorder %v17975_v61, 1  ;;  %v13725_v11 = vpack.c.bf16 %v4451_v14, %v4451_v14  ;;  %v4450_v60 = vsel %vm21237_vm3, %v4234_v44, 0.0  ;;  %15130 = vmatmul.mubr.msk.bf16.gmra.mxu1 %vm317_vm2, %v4799_v41  ;;  %v15053_v6 = vpop.f32.mrf.mxu1 }
 0x214   : > { %v4201_v40 = vadd.f32 %v17657_v37, %v4158_v51  ;;  %v5135_v10 = vrot.slane %v21235_v25, 3  ;;  %v13724_v38 = vpack.c.bf16 %v4450_v60, %v4450_v60  ;;  %v4200_v3 = vadd.f32 %v17657_v37, %v4157_v19 }
 0x215   : > { %v3733_v24 = vadd.f32 %v15047_v2, %v21397_v42  ;;  %v3732_v9 = vadd.f32 %v3665_v32, %v21398_v58  ;;  %4631 = vst.msk [vmem:[#allocation2 + $0x70] sm:$0xf] %vm310_vm7, %v13725_v11  ;;  %v4800_v51 = vrot.slane %v18018_v43, 3  ;;  %v21234_v41 = vshrl.u32 %v17981_v52, 16  ;;  %v15109_v58 = vpop.f32.mrf.mxu0 }
 0x216   : > { %v4237_v14 = vmax.f32 %v4201_v40, 0.0  ;;  %v5136_v44 = vor.u32 %v5135_v10, %v5132_v13  ;;  %4630 = vst.msk [vmem:[#allocation2 + $0x6c] sm:$0xf] %vm310_vm7, %v13724_v38  ;;  %v4236_v60 = vmax.f32 %v4200_v3, 0.0  ;;  %v21236_v32 = vshll.u32 %v17981_v52, 16  ;;  %v18057_v38 = vpop.permute.xlu1 %4382 }
 0x217   : > { %v4160_v19 = vadd.f32 %v17983_v56, %v3733_v24  ;;  %v4159_v2 = vadd.f32 %v4092_v48, %v3732_v9  ;;  %v4801_v40 = vsel %vm4782_vm1, %v4798_v7, %v4800_v51  ;;  %v5141_v10 = vrot.slane %v21234_v41, 2  ;;  %21399 = vst [vmem:[#allocation8_spill] sm:$0xff] %v18057_v38  ;;  %v18066_v7 = vpop.permute.xlu0 %4379 }
 0x218   : > { %v4453_v11 = vsel %vm21233_vm5, %v4237_v14, 0.0  ;;  %v5137_v13 = vsel %vm5066_vm12, %v5127_v62, %v5136_v44  ;;  %vm4421_vm13 = vcmp.eq.s32.totalorder %v18020_v8, 1  ;;  %v4452_v9 = vsel %vm21240_vm6, %v4236_v60, 0.0  ;;  %15133 = vmatprep.mubr.msk.bf16.mxu1 %vm317_vm2, %v4801_v40  ;;  %v3685_v62 = vpop.f32.mrf.mxu1  ;;  %21400 = vst [vmem:[#allocation22_spill] sm:$0xff] %v18066_v7  ;;  %v21401_v14 = vld [vmem:[#allocation46_spill] sm:$0xff]  ;;  %v4112_v40 = vpop.f32.mrf.mxu0 }
 0x219   : > { %v13727_v3 = vpack.c.bf16 %v4453_v11, %v4453_v11  ;;  %15169 = vmatprep.mubr.msk.bf16.mxu0 %vm317_vm2, %v5137_v13  ;;  %v4203_v56 = vadd.f32 %v17657_v37, %v4160_v19  ;;  %v4202_v48 = vadd.f32 %v17657_v37, %v4159_v2  ;;  %vm4420_vm5 = vcmp.eq.s32.totalorder %v18031_v36, 1 }
 0x21a   : > { %v13726_v42 = vpack.c.bf16 %v4452_v9, %v4452_v9  ;;  %v5144_v24 = vrot.slane %v21236_v32, 3  ;;  %v3735_v11 = vadd.f32 %v15050_v22, %v21401_v14  ;;  %v3734_v60 = vadd.f32 %v3675_v27, %v17756_v63  ;;  %v18078_v22 = vld [vmem:[#allocation2 + $0x58] sm:$0xff]   ;;  %v18093_v14 = vpop.permute.xlu1 %4388 }
 0x21b   : > { %4633 = vst.msk [vmem:[#allocation2 + $0x78] sm:$0xf] %vm310_vm7, %v13727_v3  ;;  %v4239_v19 = vmax.f32 %v4203_v56, 0.0  ;;  %v4238_v13 = vmax.f32 %v4202_v48, 0.0  ;;  %v4802_v37 = vrot.slane %v18045_v4, 3  ;;  %v21242_v2 = vshrl.u32 %v18018_v43, 16  ;;  %v15056_v48 = vpop.f32.mrf.mxu1 }
 0x21c   : > { %4632 = vst.msk [vmem:[#allocation2 + $0x74] sm:$0xf] %vm310_vm7, %v13726_v42  ;;  %v5145_v41 = vor.u32 %v5144_v24, %v5141_v10  ;;  %v4162_v9 = vadd.f32 %v18008_v17, %v3735_v11  ;;  %v4161_v25 = vadd.f32 %v4102_v0, %v3734_v60  ;;  %v21241_v32 = vshll.u32 %v18018_v43, 16  ;;  %v16160_v42 = vld [vmem:[%s21176_s2] ss:$0 sm:$0xff]  ;;  %21402 = vst [vmem:[#allocation23_spill] sm:$0xff] %v18093_v14 }
 0x21d   : > { %v4455_v63 = vsel %vm21238_vm4, %v4239_v19, 0.0  ;;  %v4454_v27 = vsel %vm21239_vm14, %v4238_v13, 0.0  ;;  %v4803_v3 = vsel %vm4782_vm1, %v4800_v51, %v4802_v37  ;;  %v5150_v56 = vrot.slane %v21242_v2, 2  ;;  %v18100_v13 = vpop.permute.xlu0 %4385  ;;  %v18450_v20 = vld [vmem:[#allocation2 + $0x6c] sm:$0xf] }
 0x21e   : > { %vm4423_vm3 = vcmp.eq.s32.totalorder %v18057_v38, 1  ;;  %v13729_v17 = vpack.c.bf16 %v4455_v63, %v4455_v63  ;;  %v13728_v0 = vpack.c.bf16 %v4454_v27, %v4454_v27  ;;  %v5146_v10 = vsel %vm5066_vm12, %v5136_v44, %v5145_v41  ;;  %15134 = vmatmul.mubr.msk.bf16.gmra.mxu1 %vm317_vm2, %v4803_v3  ;;  %v15112_v44 = vpop.f32.mrf.mxu0  ;;  %21403 = vst [vmem:[#allocation25_spill] sm:$0xff] %v18100_v13  ;;  %v18636_v29 = vld [vmem:[#allocation2 + $0x6c] sm:$0xff]  }
 0x21f   : > { %v4205_v24 = vadd.f32 %v16160_v42, %v4162_v9  ;;  %15170 = vmatmul.mubr.msk.bf16.gmra.mxu0 %vm317_vm2, %v5146_v10  ;;  %v4204_v51 = vadd.f32 %v16160_v42, %v4161_v25  ;;  %v5153_v11 = vrot.slane %v21241_v32, 3  ;;  %v3737_v60 = vadd.f32 %v15053_v6, %v17608_v33  ;;  %v18109_v10 = vld [vmem:[#allocation2 + $0x60] sm:$0xff]  }
 0x220   : > { %v3736_v19 = vadd.f32 %v3685_v62, %v17615_v49  ;;  %4635 = vst.msk [vmem:[#allocation2 + $0x80] sm:$0xf] %vm310_vm7, %v13729_v17  ;;  %4634 = vst.msk [vmem:[#allocation2 + $0x7c] sm:$0xf] %vm310_vm7, %v13728_v0  ;;  %v4804_v63 = vrot.slane %v18078_v22, 3  ;;  %v21254_v27 = vshrl.u32 %v18045_v4, 16  ;;  %v3739_v49 = vadd.f32 %v15056_v48, %v17631_v5  ;;  %v3695_v62 = vpop.f32.mrf.mxu1 }
 0x221   : > { %v4241_v9 = vmax.f32 %v4205_v24, 0.0  ;;  %v21243_v25 = vshll.u32 %v18045_v4, 16  ;;  %vm4422_vm4 = vcmp.eq.s32.totalorder %v18066_v7, 1  ;;  %v4240_v3 = vmax.f32 %v4204_v51, 0.0 }
 0x222   : > { %v5154_v33 = vor.u32 %v5153_v11, %v5150_v56  ;;  %v4164_v6 = vadd.f32 %v15109_v58, %v3737_v60  ;;  %vm4425_vm14 = vcmp.eq.s32.totalorder %v18093_v14, 1  ;;  %v4805_v0 = vsel %vm4782_vm1, %v4802_v37, %v4804_v63  ;;  %v4122_v11 = vpop.f32.mrf.mxu0 }
 0x223   : > { %v4457_v17 = vsel %vm4421_vm13, %v4241_v9, 0.0  ;;  %v5159_v24 = vrot.slane %v21254_v27, 2  ;;  %v5162_v51 = vrot.slane %v21243_v25, 3  ;;  %vm4424_vm6 = vcmp.eq.s32.totalorder %v18100_v13, 1  ;;  %15137 = vmatprep.mubr.msk.bf16.mxu1 %vm317_vm2, %v4805_v0  ;;  %v18220_v27 = vld [vmem:[#allocation2 + $0x10] sm:$0xf] }
 0x224   : > { %v13731_v58 = vpack.c.bf16 %v4457_v17, %v4457_v17  ;;  %v4456_v5 = vsel %vm4420_vm5, %v4240_v3, 0.0  ;;  %v5155_v56 = vsel %vm5066_vm12, %v5145_v41, %v5154_v33  ;;  %v4207_v48 = vadd.f32 %v16160_v42, %v4164_v6  ;;  %v18129_v41 = vld [vmem:[#allocation2 + $0x68] sm:$0xff]   ;;  %v18455_v28 = vld [vmem:[#allocation2 + $0x74] sm:$0xf] }
 0x225   : > { %v13730_v60 = vpack.c.bf16 %v4456_v5, %v4456_v5  ;;  %15173 = vmatprep.mubr.msk.bf16.mxu0 %vm317_vm2, %v5155_v56  ;;  %v5163_v37 = vor.u32 %v5162_v51, %v5159_v24  ;;  %v4163_v9 = vadd.f32 %v4112_v40, %v3736_v19  ;;  %v3738_v32 = vadd.f32 %v3695_v62, %v17766_v46  ;;  %v18134_v19 = vld [vmem:[#allocation2 + $0x70] sm:$0xff]  }
 0x226   : > { %4637 = vst.msk [vmem:[#allocation2 + $0x88] sm:$0xf] %vm310_vm7, %v13731_v58  ;;  %v4243_v2 = vmax.f32 %v4207_v48, 0.0  ;;  %v4166_v17 = vadd.f32 %v15112_v44, %v3739_v49  ;;  %v4806_v25 = vrot.slane %v18109_v10, 3  ;;  %v21247_v3 = vshrl.u32 %v18078_v22, 16 }
 0x227   : > { %4636 = vst.msk [vmem:[#allocation2 + $0x84] sm:$0xf] %vm310_vm7, %v13730_v60  ;;  %v5164_v6 = vsel %vm5066_vm12, %v5154_v33, %v5163_v37  ;;  %v4206_v0 = vadd.f32 %v16160_v42, %v4163_v9  ;;  %v21246_v24 = vshll.u32 %v18078_v22, 16  ;;  %v4165_v40 = vadd.f32 %v4122_v11, %v3738_v32  ;;  %v18484_v39 = vld [vmem:[#allocation2 + $0x7c] sm:$0xf] }
 0x228   : > { %v4459_v46 = vsel %vm4423_vm3, %v4243_v2, 0.0  ;;  %15174 = vmatmul.mubr.msk.bf16.gmra.mxu0 %vm317_vm2, %v5164_v6  ;;  %v4209_v44 = vadd.f32 %v16160_v42, %v4166_v17  ;;  %v4807_v49 = vsel %vm4782_vm1, %v4804_v63, %v4806_v25  ;;  %v5168_v62 = vrot.slane %v21247_v3, 2  ;;  %v18152_v17 = vld [vmem:[#allocation2 + $0x78] sm:$0xff]  }
 0x229   : > { %v13733_v51 = vpack.c.bf16 %v4459_v46, %v4459_v46  ;;  %v4242_v58 = vmax.f32 %v4206_v0, 0.0  ;;  %15138 = vmatmul.mubr.msk.bf16.gmra.mxu1 %vm317_vm2, %v4807_v49  ;;  %v5171_v32 = vrot.slane %v21246_v24, 3  ;;  %v4208_v33 = vadd.f32 %v16160_v42, %v4165_v40  ;;  %v18199_v24 = vld [vmem:[#allocation2 + $0xc] sm:$0xf] }
 0x22a   : > { %v4245_v5 = vmax.f32 %v4209_v44, 0.0  ;;  %v4808_v56 = vrot.slane %v18129_v41, 3  ;;  %v21253_v2 = vshrl.u32 %v18109_v10, 16  ;;  %v21252_v48 = vshll.u32 %v18109_v10, 16 }
 0x22b   : > { %4639 = vst.msk [vmem:[#allocation2 + $0x90] sm:$0xf] %vm310_vm7, %v13733_v51  ;;  %v4458_v63 = vsel %vm4422_vm4, %v4242_v58, 0.0  ;;  %v5172_v11 = vor.u32 %v5171_v32, %v5168_v62  ;;  %v4244_v60 = vmax.f32 %v4208_v33, 0.0  ;;  %v4810_v9 = vrot.slane %v18134_v19, 3 }
 0x22c   : > { %v13732_v6 = vpack.c.bf16 %v4458_v63, %v4458_v63  ;;  %v4461_v42 = vsel %vm4425_vm14, %v4245_v5, 0.0  ;;  %v4809_v0 = vsel %vm4782_vm1, %v4806_v25, %v4808_v56  ;;  %v5177_v40 = vrot.slane %v21253_v2, 2 }
 0x22d   : > { %v13735_v46 = vpack.c.bf16 %v4461_v42, %v4461_v42  ;;  %v5173_v44 = vsel %vm5066_vm12, %v5163_v37, %v5172_v11  ;;  %v4460_v49 = vsel %vm4424_vm6, %v4244_v60, 0.0  ;;  %15141 = vmatprep.mubr.msk.bf16.mxu1 %vm317_vm2, %v4809_v0  ;;  %v5180_v62 = vrot.slane %v21252_v48, 3 }
 0x22e   : > { %4638 = vst.msk [vmem:[#allocation2 + $0x8c] sm:$0xf] %vm310_vm7, %v13732_v6  ;;  %15177 = vmatprep.mubr.msk.bf16.mxu0 %vm317_vm2, %v5173_v44  ;;  %v13734_v51 = vpack.c.bf16 %v4460_v49, %v4460_v49  ;;  %v4811_v25 = vsel %vm4782_vm1, %v4808_v56, %v4810_v9  ;;  %v21245_v58 = vshrl.u32 %v18129_v41, 16  ;;  %v21244_v32 = vshll.u32 %v18129_v41, 16  ;;  %v18170_v37 = vld [vmem:[#allocation2 + $0x80] sm:$0xff]  }
 0x22f   : > { %4641 = vst.msk [vmem:[#allocation2 + $0x98] sm:$0xf] %vm310_vm7, %v13735_v46  ;;  %v5181_v33 = vor.u32 %v5180_v62, %v5177_v40  ;;  %v4812_v5 = vrot.slane %v18152_v17, 3  ;;  %v21250_v63 = vshrl.u32 %v18134_v19, 16  ;;  %v21249_v60 = vshll.u32 %v18134_v19, 16 }
 0x230   : > { %4640 = vst.msk [vmem:[#allocation2 + $0x94] sm:$0xf] %vm310_vm7, %v13734_v51  ;;  %v5186_v56 = vrot.slane %v21245_v58, 2  ;;  %v5189_v6 = vrot.slane %v21244_v32, 3  ;;  %v21248_v42 = vshrl.u32 %v18152_v17, 16  ;;  %v21404_v0 = vshll.u32 %v17633_v26, 16 }
 0x231   : > { %v5182_v40 = vsel %vm5066_vm12, %v5172_v11, %v5181_v33  ;;  %15142 = vmatmul.mubr.msk.bf16.gmra.mxu1 %vm317_vm2, %v4811_v25  ;;  %v4813_v44 = vsel %vm4782_vm1, %v4810_v9, %v4812_v5  ;;  %v5195_v49 = vrot.slane %v21250_v63, 2  ;;  %v5198_v62 = vrot.slane %v21249_v60, 3  ;;  %v5854_v58 = vld [vmem:[#allocation2 + $0x8] sm:$0x8] }
 0x232   : > { %v5496_v46 = vrot.slane %v21404_v0, 4  ;;  %15178 = vmatmul.mubr.msk.bf16.gmra.mxu0 %vm317_vm2, %v5182_v40  ;;  %v5190_v51 = vor.u32 %v5189_v6, %v5186_v56  ;;  %15145 = vmatprep.mubr.msk.bf16.mxu1 %vm317_vm2, %v4813_v44  ;;  %v4814_v26 = vrot.slane %v18170_v37, 3  ;;  %v5204_v11 = vrot.slane %v21248_v42, 2  ;;  %v16069_v40 = vld [vmem:[#allocation2 + $0x90] ss:$0 sps:$4 sm:$0x77]  }
 0x233   : > { %v21251_v25 = vshll.u32 %v18152_v17, 16  ;;  %vm5489_vm7 = vsmask.f32 4352  ;;  %v5199_v9 = vor.u32 %v5198_v62, %v5195_v49  ;;  %v21256_v0 = vshrl.u32 %v18170_v37, 16 }
 0x234   : > { %v21255_v32 = vshll.u32 %v18170_v37, 16  ;;  %v5191_v56 = vsel %vm5066_vm12, %v5181_v33, %v5190_v51  ;;  %v21405_v3 = vshrl.u32 %v17762_v35, 16  ;;  %v21406_v62 = vshll.u32 %v17762_v35, 16  ;;  %v18222_v35 = vld [vmem:[#allocation2 + $0x14] sm:$0xf] }
 0x235   : > { %v5207_v6 = vrot.slane %v21251_v25, 3  ;;  %15181 = vmatprep.mubr.msk.bf16.mxu0 %vm317_vm2, %v5191_v56  ;;  %v18205_v44 = vld [vmem:[#allocation2 + $0x88] sm:$0xff]   ;;  %v4815_v60 = vsel %vm4782_vm1, %v4812_v5, %v4814_v26  ;;  %v5213_v33 = vrot.slane %v21256_v0, 2  ;;  %v5200_v48 = vsel %vm5066_vm12, %v5190_v51, %v5199_v9 }
 0x236   : > { %v5498_v49 = vrot.slane %v21405_v3, 3  ;;  %v5499_v42 = vrot.slane %v21406_v62, 4  ;;  %v5216_v25 = vrot.slane %v21255_v32, 3  ;;  %v4816_v56 = vrot.slane %v18205_v44, 3 }
 0x237   : > { %v5208_v63 = vor.u32 %v5207_v6, %v5204_v11  ;;  %v21258_v2 = vshrl.u32 %v18205_v44, 16  ;;  %v5497_v11 = vor.u32 %v5496_v46, %v17686_v59  ;;  %v18226_v6 = vld [vmem:[#allocation2 + $0x18] sm:$0xf]  ;;  %v13123_v62 = vcombine.low %v5854_v58, %v18199_v24 }
 0x238   : > { %v4817_v51 = vsel %vm4782_vm1, %v4814_v26, %v4816_v56  ;;  %v18233_v0 = vor.u32 %v5499_v42, %v5498_v49  ;;  %v5229_v3 = vshrl.u32 %v16069_v40, 16  ;;  %v21407_v59 = vshll.u32 %v18205_v44, 16 }
 0x239   : > { %v5209_v5 = vsel %vm5066_vm12, %v5199_v9, %v5208_v63  ;;  %15146 = vmatmul.mubr.msk.bf16.gmra.mxu1 %vm317_vm2, %v4815_v60  ;;  %v5222_v32 = vrot.slane %v21258_v2, 2  ;;  %v5217_v9 = vor.u32 %v5216_v25, %v5213_v33  ;;  %v5232_v38 = vshll.u32 %v16069_v40, 16  ;;  %v18242_v60 = vld [vmem:[#allocation2 + $0x1c] sm:$0xf]  ;;  %v18248_v33 = vld [vmem:[#allocation2 + $0x24] sm:$0xf] }
 0x23a   : > { %15182 = vmatmul.mubr.msk.bf16.gmra.mxu0 %vm317_vm2, %v5200_v48  ;;  %15149 = vmatprep.mubr.msk.bf16.mxu1 %vm317_vm2, %v4817_v51  ;;  %v5225_v46 = vrot.slane %v21407_v59, 3  ;;  %v13124_v58 = vcombine.low %v18220_v27, %v18222_v35  ;;  %v21408_v51 = vshrl.u32 %v17785_v12, 16  ;;  %v4818_v59 = vrot.slane %v16069_v40, 3 }
 0x23b   : > { %15185 = vmatprep.mubr.msk.bf16.mxu0 %vm317_vm2, %v5209_v5  ;;  %v5501_v2 = vsel %vm5489_vm7, %v5497_v11, %v18233_v0  ;;  %v5231_v14 = vrot.slane %v5229_v3, 2  ;;  %v21409_v5 = vshll.u32 %v17785_v12, 16  ;;  %v5218_v13 = vsel %vm5066_vm12, %v5208_v63, %v5217_v9 }
 0x23c   : > { %v5226_v26 = vor.u32 %v5225_v46, %v5222_v32  ;;  %v5998_v49 = vshrl.u32 %v13124_v58, 16  ;;  %v6001_v48 = vshll.u32 %v13124_v58, 16  ;;  %v5502_v25 = vrot.slane %v21408_v51, 3  ;;  %v18255_v46 = vld [vmem:[#allocation2 + $0x20] sm:$0xf] }
 0x23d   : > { %v5503_v7 = vrot.slane %v21409_v5, 4  ;;  %v5234_v61 = vrot.slane %v5232_v38, 3  ;;  %v5990_v42 = vshrl.u32 %v13123_v62, 16  ;;  %v5993_v32 = vshll.u32 %v13123_v62, 16 }
 0x23e   : > { %v4819_v58 = vsel %vm4782_vm1, %v4816_v56, %v4818_v59  ;;  %v13125_v51 = vcombine.low %v18226_v6, %v18242_v60  ;;  %v21410_v40 = vshrl.u32 %v17809_v57, 16  ;;  %v21411_v3 = vshll.u32 %v17809_v57, 16 }
 0x23f   : > { %v5227_v12 = vsel %vm5066_vm12, %v5217_v9, %v5226_v26  ;;  %v6000_v5 = vrot.slane %v5998_v49, 3  ;;  %v6003_v63 = vrot.slane %v6001_v48, 4  ;;  %v5504_v38 = vor.u32 %v5503_v7, %v5502_v25 }
 0x240   : > { %v5506_v8 = vrot.slane %v21410_v40, 3  ;;  %v5507_v11 = vrot.slane %v21411_v3, 4  ;;  %v13126_v56 = vcombine.low %v18255_v46, %v18248_v33  ;;  %v21412_v59 = vshrl.u32 %v17841_v50, 16  ;;  %v18280_v3 = vld [vmem:[#allocation2 + $0x2c] sm:$0xf] }
 0x241   : > { %15150 = vmatmul.mubr.msk.bf16.gmra.mxu1 %vm317_vm2, %v4819_v58  ;;  %v21413_v36 = vshll.u32 %v17841_v50, 16  ;;  %v5992_v57 = vrot.slane %v5990_v42, 3  ;;  %v5995_v9 = vrot.slane %v5993_v32, 4  ;;  %v21414_v49 = vshrl.u32 %v17891_v1, 16 }
 0x242   : > { %v5508_v62 = vor.u32 %v5507_v11, %v5506_v8  ;;  %v5510_v53 = vrot.slane %v21412_v59, 3  ;;  %15186 = vmatmul.mubr.msk.bf16.gmra.mxu0 %vm317_vm2, %v5218_v13  ;;  %15197 = vmatprep.mubr.msk.bf16.mxu1 %vm317_vm2, %v5501_v2  ;;  %v21415_v25 = vshll.u32 %v17891_v1, 16  ;;  %v18282_v50 = vor.u32 %v6003_v63, %v6000_v5  ;;  %v18284_v2 = vld [vmem:[#allocation2 + $0x34] sm:$0xf]  ;;  %v18293_v5 = vld [vmem:[#allocation2 + $0x30] sm:$0xf] }
 0x243   : > { %v5511_v40 = vrot.slane %v21413_v36, 4  ;;  %15189 = vmatprep.mubr.msk.bf16.mxu0 %vm317_vm2, %v5227_v12  ;;  %v5514_v48 = vrot.slane %v21414_v49, 3  ;;  %v6007_v36 = vshrl.u32 %v13125_v51, 16  ;;  %v6010_v13 = vshll.u32 %v13125_v51, 16  ;;  %v18287_v12 = vld [vmem:[#allocation2 + $0x28] sm:$0xf] }
 0x244   : > { %v5509_v7 = vsel %vm5489_vm7, %v5504_v38, %v5508_v62  ;;  %v5515_v58 = vrot.slane %v21415_v25, 4  ;;  %v6016_v42 = vshrl.u32 %v13126_v56, 16  ;;  %v6019_v1 = vshll.u32 %v13126_v56, 16 }
 0x245   : > { %v5512_v8 = vor.u32 %v5511_v40, %v5510_v53  ;;  %v21416_v53 = vshrl.u32 %v17924_v15, 16  ;;  %v5235_v40 = vor.u32 %v5234_v61, %v5231_v14  ;;  %v13127_v49 = vcombine.low %v18287_v12, %v18280_v3 }
 0x246   : > { %v5516_v11 = vor.u32 %v5515_v58, %v5514_v48  ;;  %v21417_v51 = vshll.u32 %v17924_v15, 16  ;;  %v5996_v25 = vor.u32 %v5995_v9, %v5992_v57  ;;  %v21418_v48 = vshrl.u32 %v17956_v18, 16  ;;  %v16084_v15 = vld [vmem:[%s21177_s3 + $0x40] sm:$0xff]  }
 0x247   : > { %v5513_v32 = vsel %vm5489_vm7, %v5508_v62, %v5512_v8  ;;  %v5518_v59 = vrot.slane %v21416_v53, 3  ;;  %v13128_v62 = vcombine.low %v18293_v5, %v18284_v2  ;;  %v5236_v61 = vsel %vm5066_vm12, %v5226_v26, %v5235_v40 }
 0x248   : > { %v5519_v63 = vrot.slane %v21417_v51, 4  ;;  %v5517_v30 = vsel %vm5489_vm7, %v5512_v8, %v5516_v11  ;;  %v5522_v58 = vrot.slane %v21418_v48, 3  ;;  %v5505_v14 = vsel %vm5489_vm7, %v18233_v0, %v5504_v38  ;;  %v16161_v0 = vld [vmem:[%s21177_s3 + $0x48] sm:$0xff]  }
 0x249   : > { %v6009_v56 = vrot.slane %v6007_v36, 3  ;;  %v6005_v57 = vsel %vm5489_vm7, %v5996_v25, %v18282_v50  ;;  %15198 = vmatmul.mubr.msk.bf16.vlgmr.msra.gmra.mxu1 %vm317_vm2, %v5505_v14  ;;  %v6012_v9 = vrot.slane %v6010_v13, 4  ;;  %v6018_v8 = vrot.slane %v6016_v42, 3 }
 0x24a   : > { %v5520_v53 = vor.u32 %v5519_v63, %v5518_v59  ;;  %v21419_v51 = vshll.u32 %v17956_v18, 16  ;;  %15190 = vmatmul.mubr.msk.bf16.gmra.mxu0 %vm317_vm2, %v5236_v61  ;;  %15274 = vmatpush3.bf16.msra.mxu1 %v16161_v0  ;;  %v6021_v26 = vrot.slane %v6019_v1, 4  ;;  %v6025_v38 = vshrl.u32 %v13127_v49, 16  ;;  %v18320_v59 = vld [vmem:[#allocation2 + $0x3c] sm:$0xf]  ;;  %v18329_v1 = vld [vmem:[%s21177_s3 + $0x68] sm:$0xff]  }
 0x24b   : > { %v21420_v13 = vshrl.u32 %v17981_v52, 16  ;;  %15237 = vmatprep.mubr.msk.bf16.mxu0 %vm317_vm2, %v6005_v57  ;;  %15201 = vmatprep.mubr.msk.bf16.mxu1 %vm317_vm2, %v5509_v7  ;;  %v6028_v18 = vshll.u32 %v13127_v49, 16  ;;  %v6034_v40 = vshrl.u32 %v13128_v62, 16  ;;  %v6037_v63 = vshll.u32 %v13128_v62, 16  ;;  %v18338_v49 = vld [vmem:[#allocation2 + $0x44] sm:$0xf] }
 0x24c   : > { %v5523_v48 = vrot.slane %v21419_v51, 4  ;;  %v18318_v36 = vsel %vm5489_vm7, %v5516_v11, %v5520_v53  ;;  %v18331_v11 = vld [vmem:[#allocation2 + $0x38] sm:$0xf]  ;;  %v21421_v61 = vshll.u32 %v17981_v52, 16  ;;  %15275 = vmatprep.subr.bf16.mxu1 %v16084_v15  ;;  %v6013_v51 = vor.u32 %v6012_v9, %v6009_v56 }
 0x24d   : > { %v5526_v42 = vrot.slane %v21420_v13, 3  ;;  %v13129_v7 = vcombine.low %v18331_v11, %v18320_v59  ;;  %v6022_v62 = vor.u32 %v6021_v26, %v6018_v8  ;;  %v6030_v0 = vrot.slane %v6028_v18, 4  ;;  %v16100_v26 = vld [vmem:[%s21177_s3 + $0x50] sm:$0xff]  }
 0x24e   : > { %v5524_v25 = vor.u32 %v5523_v48, %v5522_v58  ;;  %v5527_v14 = vrot.slane %v21421_v61, 4  ;;  %15276 = vmatpush3.bf16.msra.mxu1 %v16084_v15  ;;  %v6027_v48 = vrot.slane %v6025_v38, 3  ;;  %v6036_v13 = vrot.slane %v6034_v40, 3 }
 0x24f   : > { %v6039_v34 = vrot.slane %v6037_v63, 4  ;;  %15353 = vmatprep.subr.bf16.mxu1 %v18329_v1  ;;  %v13130_v52 = vcombine.low %v18342_v55, %v18338_v49  ;;  %v21423_v15 = vshll.u32 %v18045_v4, 16  ;;  %v6014_v38 = vsel %vm5489_vm7, %v18282_v50, %v6013_v51 }
 0x250   : > { %v5525_v57 = vsel %vm5489_vm7, %v5520_v53, %v5524_v25  ;;  %v18340_v58 = vor.u32 %v5527_v14, %v5526_v42  ;;  %v21422_v53 = vshrl.u32 %v18045_v4, 16  ;;  %v6043_v42 = vshrl.u32 %v13129_v7, 16  ;;  %v18367_v4 = vld [vmem:[#allocation2 + $0x4c] sm:$0xf] }
 0x251   : > { %v5535_v8 = vrot.slane %v21423_v15, 4  ;;  %15202 = vmatmul.mubr.msk.bf16.gmra.mxu1 %vm317_vm2, %v5513_v32  ;;  %v6046_v18 = vshll.u32 %v13129_v7, 16  ;;  %v6023_v40 = vsel %vm5489_vm7, %v6013_v51, %v6022_v62  ;;  %v6040_v50 = vor.u32 %v6039_v34, %v6036_v13  ;;  %v18370_v32 = vld [vmem:[#allocation2 + $0x48] sm:$0xf]  ;;  %v18372_v51 = vld [vmem:[#allocation2 + $0x54] sm:$0xf] }
 0x252   : > { %v18349_v56 = vsel %vm5489_vm7, %v5524_v25, %v18340_v58  ;;  %v5534_v9 = vrot.slane %v21422_v53, 3  ;;  %15238 = vmatmul.mubr.msk.bf16.vlgmr.msra.gmra.mxu0 %vm317_vm2, %v6014_v38  ;;  %15205 = vmatprep.mubr.msk.bf16.mxu1 %vm317_vm2, %v5517_v30  ;;  %v6031_v25 = vor.u32 %v6030_v0, %v6027_v48  ;;  %v6052_v61 = vshrl.u32 %v13130_v52, 16  ;;  %v18384_v13 = vld [vmem:[#allocation2 + $0x50] sm:$0xf] }
 0x253   : > { %15241 = vmatprep.mubr.msk.bf16.mxu0 %vm317_vm2, %v6023_v40  ;;  %15314 = vmatpush3.bf16.msra.mxu0 %v18013_v23  ;;  %v6045_v14 = vrot.slane %v6043_v42, 3  ;;  %v6048_v7 = vrot.slane %v6046_v18, 4  ;;  %v6055_v53 = vshll.u32 %v13130_v52, 16  ;;  %v21424_v30 = vshrl.u32 %v18109_v10, 16 }
 0x254   : > { %v18364_v63 = vor.u32 %v5535_v8, %v5534_v9  ;;  %15315 = vmatprep.subr.bf16.mxu0 %v16100_v26  ;;  %v21425_v15 = vshrl.u32 %v18018_v43, 16  ;;  %v21426_v38 = vshll.u32 %v18018_v43, 16  ;;  %v13131_v34 = vcombine.low %v18370_v32, %v18367_v4 }
 0x255   : > { %v5542_v9 = vrot.slane %v21424_v30, 3  ;;  %v21427_v48 = vshll.u32 %v18109_v10, 16  ;;  %v13132_v52 = vcombine.low %v18384_v13, %v18372_v51  ;;  %v6032_v18 = vsel %vm5489_vm7, %v6022_v62, %v6031_v25 }
 0x256   : > { %v5530_v8 = vrot.slane %v21425_v15, 3  ;;  %v5531_v23 = vrot.slane %v21426_v38, 4  ;;  %v6041_v40 = vsel %vm5489_vm7, %v6031_v25, %v6040_v50  ;;  %v6054_v43 = vrot.slane %v6052_v61, 3 }
 0x257   : > { %v5543_v0 = vrot.slane %v21427_v48, 4  ;;  %15316 = vmatpush3.bf16.msra.mxu0 %v16100_v26  ;;  %v6049_v10 = vor.u32 %v6048_v7, %v6045_v14  ;;  %v6057_v30 = vrot.slane %v6055_v53, 4  ;;  %v6061_v15 = vshrl.u32 %v13131_v34, 16  ;;  %v18406_v14 = vld [vmem:[#allocation2 + $0x5c] sm:$0xf] }
 0x258   : > { %v5532_v26 = vor.u32 %v5531_v23, %v5530_v8  ;;  %v6064_v62 = vshll.u32 %v13131_v34, 16  ;;  %v21428_v25 = vshrl.u32 %v18134_v19, 16  ;;  %v21429_v61 = vshll.u32 %v18134_v19, 16 }
 0x259   : > { %v18388_v42 = vor.u32 %v5543_v0, %v5542_v9  ;;  %15206 = vmatmul.mubr.msk.bf16.gmra.mxu1 %vm317_vm2, %v18318_v36  ;;  %v18399_v9 = vld [vmem:[%s21177_s3 + $0x78] sm:$0xff]   ;;  %v6070_v48 = vshrl.u32 %v13132_v52, 16  ;;  %v6050_v53 = vsel %vm5489_vm7, %v6040_v50, %v6049_v10  ;;  %v6058_v8 = vor.u32 %v6057_v30, %v6054_v43 }
 0x25a   : > { %15242 = vmatmul.mubr.msk.bf16.gmra.mxu0 %vm317_vm2, %v6032_v18  ;;  %15209 = vmatprep.mubr.msk.bf16.mxu1 %vm317_vm2, %v5525_v57  ;;  %v5550_v36 = vrot.slane %v21428_v25, 3  ;;  %v5551_v38 = vrot.slane %v21429_v61, 4  ;;  %v6073_v57 = vshll.u32 %v13132_v52, 16  ;;  %v5533_v23 = vsel %vm5489_vm7, %v18340_v58, %v5532_v26  ;;  %v18414_v0 = vld [vmem:[#allocation2 + $0x58] sm:$0xf] }
 0x25b   : > { %15245 = vmatprep.mubr.msk.bf16.mxu0 %vm317_vm2, %v6041_v40  ;;  %15393 = vmatprep.subr.bf16.mxu0 %v18399_v9  ;;  %v6063_v34 = vrot.slane %v6061_v15, 3  ;;  %v18416_v18 = vld [vmem:[#allocation2 + $0x64] sm:$0xf]  ;;  %v6066_v19 = vrot.slane %v6064_v62, 4  ;;  %v13133_v52 = vcombine.low %v18414_v0, %v18406_v14  ;;  %v21430_v40 = vshrl.u32 %v18152_v17, 16 }
 0x25c   : > { %v18409_v7 = vor.u32 %v5551_v38, %v5550_v36  ;;  %v21431_v36 = vshll.u32 %v18152_v17, 16  ;;  %v6072_v50 = vrot.slane %v6070_v48, 3  ;;  %v6075_v43 = vrot.slane %v6073_v57, 4  ;;  %v18426_v15 = vld [vmem:[#allocation2 + $0x60] sm:$0xf] }
 0x25d   : > { %v5554_v25 = vrot.slane %v21430_v40, 3  ;;  %v21432_v30 = vshrl.u32 %v18078_v22, 16  ;;  %v21433_v38 = vshrl.u32 %v18170_v37, 16  ;;  %v21434_v62 = vshll.u32 %v18078_v22, 16 }
 0x25e   : > { %v5555_v61 = vrot.slane %v21431_v36, 4  ;;  %v13134_v17 = vcombine.low %v18426_v15, %v18416_v18  ;;  %v21435_v48 = vshll.u32 %v18170_v37, 16  ;;  %v6059_v36 = vsel %vm5489_vm7, %v6049_v10, %v6058_v8 }
 0x25f   : > { %v5538_v58 = vrot.slane %v21432_v30, 3  ;;  %v5558_v16 = vrot.slane %v21433_v38, 3  ;;  %v5539_v54 = vrot.slane %v21434_v62, 4  ;;  %v21436_v30 = vshrl.u32 %v18205_v44, 16 }
 0x260   : > { %v5556_v40 = vor.u32 %v5555_v61, %v5554_v25  ;;  %v5559_v57 = vrot.slane %v21435_v48, 4  ;;  %v6079_v22 = vshrl.u32 %v13133_v52, 16  ;;  %v6082_v62 = vshll.u32 %v13133_v52, 16 }
 0x261   : > { %15210 = vmatmul.mubr.msk.bf16.gmra.mxu1 %vm317_vm2, %v18349_v56  ;;  %v5562_v38 = vrot.slane %v21436_v30, 3  ;;  %v16093_v56 = vld [vmem:[#allocation2 + $0x90] ss:$0 sps:$4 sm:$0xff]   ;;  %v6067_v61 = vor.u32 %v6066_v19, %v6063_v34  ;;  %v6076_v10 = vor.u32 %v6075_v43, %v6072_v50  ;;  %v5540_v21 = vor.u32 %v5539_v54, %v5538_v58  ;;  %v18461_v50 = vld [vmem:[#allocation2 + $0x68] sm:$0xf] }
 0x262   : > { %15246 = vmatmul.mubr.msk.bf16.gmra.mxu0 %vm317_vm2, %v6050_v53  ;;  %15213 = vmatprep.mubr.msk.bf16.mxu1 %vm317_vm2, %v5533_v23  ;;  %v18446_v25 = vsel %vm5489_vm7, %v18409_v7, %v5556_v40  ;;  %v5560_v37 = vor.u32 %v5559_v57, %v5558_v16  ;;  %v21437_v53 = vshll.u32 %v18205_v44, 16  ;;  %v6088_v23 = vshrl.u32 %v13134_v17, 16 }
 0x263   : > { %15249 = vmatprep.mubr.msk.bf16.mxu0 %vm317_vm2, %v6059_v36  ;;  %v6091_v36 = vshll.u32 %v13134_v17, 16  ;;  %v5567_v47 = vshrl.u32 %v16093_v56, 16  ;;  %v5570_v31 = vshll.u32 %v16093_v56, 16  ;;  %v5537_v16 = vsel %vm5489_vm7, %v5532_v26, %v18364_v63 }
 0x264   : > { %v5563_v48 = vrot.slane %v21437_v53, 4  ;;  %v18453_v30 = vsel %vm5489_vm7, %v5556_v40, %v5560_v37  ;;  %v6081_v34 = vrot.slane %v6079_v22, 3  ;;  %v6084_v44 = vrot.slane %v6082_v62, 4  ;;  %v18467_v40 = vld [vmem:[#allocation2 + $0x70] sm:$0xf] }
 0x265   : > { %v21438_v19 = vshrl.u32 %v18129_v41, 16  ;;  %v21439_v43 = vshll.u32 %v18129_v41, 16  ;;  %v13135_v17 = vcombine.low %v18461_v50, %v18450_v20  ;;  %v6068_v26 = vsel %vm5489_vm7, %v6058_v8, %v6067_v61 }
 0x266   : > { %v5564_v52 = vor.u32 %v5563_v48, %v5562_v38  ;;  %v5569_v38 = vrot.slane %v5567_v47, 3  ;;  %v6077_v56 = vsel %vm5489_vm7, %v6067_v61, %v6076_v10  ;;  %v5541_v22 = vsel %vm5489_vm7, %v18364_v63, %v5540_v21 }
 0x267   : > { %v5546_v54 = vrot.slane %v21438_v19, 3  ;;  %v5547_v58 = vrot.slane %v21439_v43, 4  ;;  %v13136_v41 = vcombine.low %v18467_v40, %v18455_v28  ;;  %v6090_v62 = vrot.slane %v6088_v23, 3  ;;  %v18491_v23 = vld [vmem:[#allocation2 + $0x84] sm:$0xf] }
 0x268   : > { %v18470_v57 = vsel %vm5489_vm7, %v5560_v37, %v5564_v52  ;;  %v6093_v37 = vrot.slane %v6091_v36, 4  ;;  %v5572_v53 = vrot.slane %v5570_v31, 4  ;;  %v13166_v47 = vcombine.low %v18199_v24, %v18220_v27 }
 0x269   : > { %15214 = vmatmul.mubr.msk.bf16.gmra.mxu1 %vm317_vm2, %v5537_v16  ;;  %v6085_v8 = vor.u32 %v6084_v44, %v6081_v34  ;;  %v5548_v61 = vor.u32 %v5547_v58, %v5546_v54  ;;  %v6097_v48 = vshrl.u32 %v13135_v17, 16  ;;  %v6100_v16 = vshll.u32 %v13135_v17, 16  ;;  %v18498_v17 = vld [vmem:[#allocation2 + $0x78] sm:$0xf] }
 0x26a   : > { %15250 = vmatmul.mubr.msk.bf16.gmra.mxu0 %vm317_vm2, %v6068_v26  ;;  %15217 = vmatprep.mubr.msk.bf16.mxu1 %vm317_vm2, %v5541_v22  ;;  %v5573_v63 = vor.u32 %v5572_v53, %v5569_v38  ;;  %v6106_v19 = vshrl.u32 %v13136_v41, 16  ;;  %v6109_v43 = vshll.u32 %v13136_v41, 16  ;;  %v6094_v45 = vor.u32 %v6093_v37, %v6090_v62  ;;  %v18552_v37 = vld [vmem:[#allocation2 + $0x98] sm:$0xf] }
 0x26b   : > { %15253 = vmatprep.mubr.msk.bf16.mxu0 %vm317_vm2, %v6077_v56  ;;  %v5545_v31 = vsel %vm5489_vm7, %v5540_v21, %v18388_v42  ;;  %v13168_v36 = vcombine.low %v18242_v60, %v18255_v46  ;;  %v6086_v34 = vsel %vm5489_vm7, %v6076_v10, %v6085_v8  ;;  %v5549_v44 = vsel %vm5489_vm7, %v18388_v42, %v5548_v61  ;;  %v18503_v56 = vld [vmem:[#allocation2 + $0x80] sm:$0xf] }
 0x26c   : > { %v18487_v26 = vsel %vm5489_vm7, %v5564_v52, %v5573_v63  ;;  %v6099_v54 = vrot.slane %v6097_v48, 3  ;;  %v6102_v58 = vrot.slane %v6100_v16, 4  ;;  %v6108_v52 = vrot.slane %v6106_v19, 3  ;;  %21440 = vst [vmem:[#allocation27_spill] sm:$0xff] %v18552_v37 }
 0x26d   : > { %v6111_v38 = vrot.slane %v6109_v43, 4  ;;  %v13137_v21 = vcombine.low %v18498_v17, %v18484_v39  ;;  %v13169_v22 = vcombine.low %v18248_v33, %v18287_v12  ;;  %v6095_v42 = vsel %vm5489_vm7, %v6085_v8, %v6094_v45  ;;  %v18519_v43 = vld [vmem:[#allocation2 + $0x8c] sm:$0xf] }
 0x26e   : > { %v13138_v10 = vcombine.low %v18503_v56, %v18491_v23  ;;  %v13170_v41 = vcombine.low %v18280_v3, %v18293_v5  ;;  %v6103_v62 = vor.u32 %v6102_v58, %v6099_v54  ;;  %v5553_v54 = vsel %vm5489_vm7, %v5548_v61, %v18409_v7  ;;  %v18528_v58 = vld [vmem:[#allocation2 + $0x88] sm:$0xf] }
 0x26f   : > { %v6112_v53 = vor.u32 %v6111_v38, %v6108_v52  ;;  %v6115_v48 = vshrl.u32 %v13137_v21, 16  ;;  %v6118_v16 = vshll.u32 %v13137_v21, 16  ;;  %vm6875_vm12 = vsmask.f32 7424 }
 0x270   : > { %v6124_v63 = vshrl.u32 %v13138_v10, 16  ;;  %v6127_v19 = vshll.u32 %v13138_v10, 16  ;;  %v13139_v10 = vcombine.low %v18528_v58, %v18519_v43  ;;  %vm8200_vm1 = vsmask.f32 6400 }
 0x271   : > { %15218 = vmatmul.mubr.msk.bf16.gmra.mxu1 %vm317_vm2, %v5545_v31  ;;  %v18521_v31 = vld [vmem:[#allocation2 + $0x94] sm:$0xf]  ;;  %v6113_v38 = vsel %vm5489_vm7, %v6103_v62, %v6112_v53  ;;  %v6117_v21 = vrot.slane %v6115_v48, 3 }
 0x272   : > { %15254 = vmatmul.mubr.msk.bf16.gmra.mxu0 %vm317_vm2, %v6086_v34  ;;  %15221 = vmatprep.mubr.msk.bf16.mxu1 %vm317_vm2, %v5549_v44  ;;  %v6104_v44 = vsel %vm5489_vm7, %v6094_v45, %v6103_v62  ;;  %v18536_v34 = vld [vmem:[#allocation2 + $0x90] sm:$0xf]  ;;  %v6126_v45 = vrot.slane %v6124_v63, 3  ;;  %v6129_v7 = vrot.slane %v6127_v19, 4  ;;  %v6136_v52 = vshll.u32 %v13139_v10, 16 }
 0x273   : > { %15257 = vmatprep.mubr.msk.bf16.mxu0 %vm317_vm2, %v6095_v42  ;;  %v6120_v42 = vrot.slane %v6118_v16, 4  ;;  %v13140_v61 = vcombine.low %v18536_v34, %v18521_v31 }
 0x275   : > { %v6121_v16 = vor.u32 %v6120_v42, %v6117_v21  ;;  %v6142_v63 = vshrl.u32 %v13140_v61, 16  ;;  %v6145_v19 = vshll.u32 %v13140_v61, 16  ;;  %v6138_v42 = vrot.slane %v6136_v52, 4  ;;  %v16097_v52 = vld [vmem:[#allocation2 + $0xc] sm:$0xff]  }
 0x277   : > { %v6122_v62 = vsel %vm5489_vm7, %v6112_v53, %v6121_v16  ;;  %v6147_v61 = vrot.slane %v6145_v19, 4  ;;  %v13141_v53 = vcombine.low %v18552_v37, %v18552_v37 }
 0x279   : > { %15222 = vmatmul.mubr.msk.bf16.gmra.mxu1 %vm317_vm2, %v5553_v54  ;;  %v6133_v54 = vshrl.u32 %v13139_v10, 16  ;;  %v6154_v19 = vshll.u32 %v13141_v53, 16 }
 0x27a   : > { %15258 = vmatmul.mubr.msk.bf16.gmra.mxu0 %vm317_vm2, %v6104_v44  ;;  %15225 = vmatprep.mubr.msk.bf16.mxu1 %vm317_vm2, %v18446_v25  ;;  %v6130_v25 = vor.u32 %v6129_v7, %v6126_v45  ;;  %v6144_v7 = vrot.slane %v6142_v63, 3  ;;  %v6151_v63 = vshrl.u32 %v13141_v53, 16  ;;  %v16102_v53 = vld [vmem:[#allocation2 + $0x1c] sm:$0xff]  }
 0x27b   : > { %15261 = vmatprep.mubr.msk.bf16.mxu0 %vm317_vm2, %v6113_v38  ;;  %v6135_v21 = vrot.slane %v6133_v54, 3  ;;  %v18574_v38 = vld [vmem:[#allocation2 + $0x24] sm:$0xff]  }
 0x27c   : > { %v6131_v45 = vsel %vm5489_vm7, %v6121_v16, %v6130_v25  ;;  %v6148_v10 = vor.u32 %v6147_v61, %v6144_v7  ;;  %v16098_v16 = vld [vmem:[#allocation2 + $0x14] sm:$0xff]   ;;  %21441 = vst [vmem:[#allocation29_spill] sm:$0xff] %v18574_v38  ;;  %v6156_v7 = vrot.slane %v6154_v19, 4  ;;  %v21279_v61 = vshll.u32 %v18574_v38, 16 }
 0x281   : > { %15226 = vmatmul.mubr.msk.bf16.gmra.mxu1 %vm317_vm2, %v18453_v30  ;;  %v16103_v30 = vld [vmem:[#allocation2 + $0x24] sm:$0xff]  }
 0x282   : > { %15262 = vmatmul.mubr.msk.bf16.gmra.mxu0 %vm317_vm2, %v6122_v62  ;;  %15229 = vmatprep.mubr.msk.bf16.mxu1 %vm317_vm2, %v18470_v57  ;;  %v6139_v62 = vor.u32 %v6138_v42, %v6135_v21  ;;  %v6884_v21 = vshll.u32 %v16098_v16, 16  ;;  %v6153_v42 = vrot.slane %v6151_v63, 3  ;;  %v16118_v63 = vld [vmem:[%s21177_s3 + $0x60] sm:$0xff]  }
 0x283   : > { %15265 = vmatprep.mubr.msk.bf16.mxu0 %vm317_vm2, %v6131_v45  ;;  %v6879_v45 = vshll.u32 %v16097_v52, 16 }
 0x284   : > { %v6140_v8 = vsel %vm5489_vm7, %v6130_v25, %v6139_v62  ;;  %v6149_v54 = vsel %vm5489_vm7, %v6139_v62, %v6148_v10  ;;  %v6877_v62 = vshrl.u32 %v16097_v52, 16  ;;  %v6886_v57 = vrot.slane %v6884_v21, 1 }
 0x285   : > { %v6881_v25 = vrot.slane %v6879_v45, 1  ;;  %v6157_v24 = vor.u32 %v6156_v7, %v6153_v42  ;;  %v21442_v52 = vcombine.low %v18222_v35, %v18226_v6  ;;  %v6900_v42 = vshll.u32 %v16103_v30, 16  ;;  %v16106_v7 = vld [vmem:[#allocation2 + $0x2c] sm:$0xff]  }
 0x286   : > { %v18613_v35 = vld [vmem:[%s21177_s3 + $0x88] sm:$0xff]  }
 0x287   : > { %v6158_v45 = vsel %vm5489_vm7, %v6148_v10, %v6157_v24  ;;  %v16107_v10 = vld [vmem:[#allocation2 + $0x34] sm:$0xff]   ;;  %21443 = vst [vmem:[#allocation41_spill] sm:$0xff] %v18613_v35  ;;  %v6902_v24 = vrot.slane %v6900_v42, 1  ;;  %vm7874_vm7 = vcmask 1046528  }
 0x288   : > { %v6916_v46 = vshll.u32 %v16107_v10, 16 }
 0x289   : > { %15230 = vmatmul.mubr.msk.bf16.gmra.mxu1 %vm317_vm2, %v18487_v26  ;;  %v21278_v26 = vshrl.u32 %v18574_v38, 16 }
 0x28a   : > { %15266 = vmatmul.mubr.msk.bf16.gmra.mxu0 %vm317_vm2, %v6140_v8  ;;  %15277 = vmatprep.mubr.msk.bf16.mxu1 %vm317_vm2, %v13166_v47  ;;  %v8214_v8 = vrot.slane %v21279_v61, 2  ;;  %v6882_v47 = vor.u32 %v6881_v25, %v6877_v62  ;;  %v16110_v25 = vld [vmem:[#allocation2 + $0x3c] sm:$0xff]   ;;  %v16114_v62 = vld [vmem:[#allocation2 + $0x4c] sm:$0xff]  }
 0x28b   : > { %15269 = vmatprep.mubr.msk.bf16.mxu0 %vm317_vm2, %v6149_v54  ;;  %v8213_v27 = vrot.slane %v21278_v26, 1  ;;  %v6892_v54 = vshll.u32 %v16102_v53, 16  ;;  %v18616_v26 = vld [vmem:[#allocation2 + $0x64] sm:$0xff]   ;;  %v6928_v5 = vshrl.u32 %v16110_v25, 16 }
 0x28c   : > { %v6887_v21 = vsel %vm6875_vm12, %v6882_v47, %v6886_v57  ;;  %v6908_v47 = vshll.u32 %v16106_v7, 16 }
 0x28d   : > { %v18595_v19 = vor.u32 %v8214_v8, %v8213_v27  ;;  %v6894_v6 = vrot.slane %v6892_v54, 1  ;;  %v6888_v8 = vshrl.u32 %v16098_v16, 16  ;;  %v6896_v27 = vshrl.u32 %v16102_v53, 16  ;;  %v16141_v16 = vld [vmem:[%s21177_s3 + $0x70] sm:$0xff]  }
 0x28e   : > { %v6904_v53 = vshrl.u32 %v16103_v30, 16  ;;  %v6918_v30 = vrot.slane %v6916_v46, 1  ;;  %v6944_v46 = vshrl.u32 %v16114_v62, 16 }
 0x28f   : > { %v6890_v60 = vor.u32 %v6888_v8, %v6886_v57  ;;  %v6910_v8 = vrot.slane %v6908_v47, 1 }
 0x290   : > { %v6906_v33 = vor.u32 %v6904_v53, %v6902_v24  ;;  %v18642_v53 = vld [vmem:[#allocation2 + $0x74] sm:$0xff]  }
 0x291   : > { %15278 = vmatmul.mubr.msk.bf16.vlgmr.msra.gmra.mxu1 %vm317_vm2, %v21442_v52  ;;  %v16119_v52 = vld [vmem:[#allocation2 + $0x5c] sm:$0xff]   ;;  %v6895_v54 = vsel %vm6875_vm12, %v6890_v60, %v6894_v6  ;;  %v6912_v60 = vshrl.u32 %v16106_v7, 16 }
 0x292   : > { %15270 = vmatmul.mubr.msk.bf16.gmra.mxu0 %vm317_vm2, %v6158_v45  ;;  %15354 = vmatpush3.bf16.msra.mxu1 %v18329_v1  ;;  %v16111_v1 = vld [vmem:[#allocation2 + $0x44] sm:$0xff]   ;;  %v16115_v45 = vld [vmem:[#allocation2 + $0x54] sm:$0xff]   ;;  %v6911_v3 = vsel %vm6875_vm12, %v6906_v33, %v6910_v8  ;;  %v6960_v7 = vshrl.u32 %v16119_v52, 16 }
 0x293   : > { %15317 = vmatprep.mubr.msk.bf16.mxu0 %vm317_vm2, %v6887_v21  ;;  %15281 = vmatprep.mubr.msk.bf16.mxu1 %vm317_vm2, %v13168_v36  ;;  %v6898_v36 = vor.u32 %v6896_v27, %v6894_v6  ;;  %v6924_v21 = vshll.u32 %v16110_v25, 16  ;;  %v6932_v57 = vshll.u32 %v16111_v1, 16  ;;  %v6948_v27 = vshll.u32 %v16115_v45, 16 }
 0x294   : > { %15355 = vmatprep.subr.bf16.mxu1 %v16118_v63  ;;  %v6956_v6 = vshll.u32 %v16119_v52, 16  ;;  %v6914_v44 = vor.u32 %v6912_v60, %v6910_v8  ;;  %v18652_v8 = vld [vmem:[#allocation2 + $0x1c] sm:$0xff]   ;;  %v18656_v52 = vld [vmem:[#allocation2 + $0x54] sm:$0xff]  }
 0x295   : > { %v6903_v42 = vsel %vm6875_vm12, %v6898_v36, %v6902_v24  ;;  %v6926_v12 = vrot.slane %v6924_v21, 1  ;;  %v6920_v36 = vshrl.u32 %v16107_v10, 16  ;;  %v6952_v21 = vshrl.u32 %v16115_v45, 16  ;;  %v18654_v45 = vld [vmem:[#allocation2 + $0x2c] sm:$0xff]  }
 0x296   : > { %15356 = vmatpush3.bf16.msra.mxu1 %v16118_v63  ;;  %v6940_v63 = vshll.u32 %v16114_v62, 16  ;;  %v6958_v47 = vrot.slane %v6956_v6, 1  ;;  %v6919_v25 = vsel %vm6875_vm12, %v6914_v44, %v6918_v30  ;;  %21445 = vst [vmem:[#allocation31_spill] sm:$0xff] %v18654_v45  ;;  %v21446_v44 = vcombine.low %v18320_v59, %v18342_v55  ;;  %v18666_v6 = vld [vmem:[#allocation2 + $0x64] sm:$0xff]  }
 0x297   : > { %15433 = vmatprep.subr.bf16.mxu1 %v18613_v35  ;;  %v6922_v48 = vor.u32 %v6920_v36, %v6918_v30  ;;  %v6930_v24 = vor.u32 %v6928_v5, %v6926_v12  ;;  %v21286_v5 = vshrl.u32 %v18652_v8, 16 }
 0x298   : > { %v6942_v61 = vrot.slane %v6940_v63, 1 }
 0x299   : > { %15282 = vmatmul.mubr.msk.bf16.gmra.mxu1 %vm317_vm2, %v13169_v22  ;;  %v6964_v22 = vshll.u32 %v18616_v26, 16  ;;  %v6927_v62 = vsel %vm6875_vm12, %v6922_v48, %v6926_v12  ;;  %v18664_v48 = vld [vmem:[#allocation2 + $0x3c] sm:$0xff]   ;;  %v18677_v12 = vld [vmem:[#allocation2 + $0x74] sm:$0xff]  }
 0x29a   : > { %15318 = vmatmul.mubr.msk.bf16.vlgmr.msra.gmra.mxu0 %vm317_vm2, %v6895_v54  ;;  %15285 = vmatprep.mubr.msk.bf16.mxu1 %vm317_vm2, %v13170_v41  ;;  %v6934_v54 = vrot.slane %v6932_v57, 1  ;;  %v6950_v41 = vrot.slane %v6948_v27, 1  ;;  %v18644_v57 = vld [vmem:[#allocation2 + $0x44] sm:$0xff]   ;;  %v6946_v63 = vor.u32 %v6944_v46, %v6942_v61  ;;  %v6962_v27 = vor.u32 %v6960_v7, %v6958_v47 }
 0x29b   : > { %15321 = vmatprep.mubr.msk.bf16.mxu0 %vm317_vm2, %v6903_v42  ;;  %15394 = vmatpush3.bf16.msra.mxu0 %v18399_v9  ;;  %v6936_v42 = vshrl.u32 %v16111_v1, 16  ;;  %v18638_v9 = vld [vmem:[#allocation2 + $0x34] sm:$0xff]   ;;  %v18640_v10 = vrot.slane %v6964_v22, 1  ;;  %v21444_v1 = vcombine.low %v18284_v2, %v18331_v11  ;;  %v18696_v46 = vld [vmem:[#allocation2 + $0x84] sm:$0xff]   ;;  %v21453_v38 = vshll.u32 %v18664_v48, 16 }
 0x29c   : > { %15395 = vmatprep.subr.bf16.mxu0 %v16141_v16  ;;  %v6935_v2 = vsel %vm6875_vm12, %v6930_v24, %v6934_v54  ;;  %v6954_v11 = vor.u32 %v6952_v21, %v6950_v41  ;;  %v18673_v33 = vsel %vm6875_vm12, %v6946_v63, %v6950_v41  ;;  %v21281_v59 = vshrl.u32 %v18638_v9, 16  ;;  %v18716_v41 = vld [vmem:[#allocation2 + $0x8c] sm:$0xff]   ;;  %v18727_v24 = vld [vmem:[#allocation2 + $0x94] sm:$0xff]  }
 0x29d   : > { %v18684_v60 = vsel %vm6875_vm12, %v6962_v27, %v18640_v10  ;;  %v21285_v27 = vshrl.u32 %v18677_v12, 16  ;;  %v21287_v55 = vshrl.u32 %v18696_v46, 16 }
 0x29e   : > { %v18680_v22 = vsel %vm6875_vm12, %v6954_v11, %v6958_v47  ;;  %v21283_v47 = vshrl.u32 %v18656_v52, 16  ;;  %v8221_v63 = vrot.slane %v21281_v59, 1  ;;  %v18708_v11 = vld [vmem:[#allocation2 + $0x7c] sm:$0xff]   ;;  %v21447_v59 = vcombine.low %v18338_v49, %v18370_v32 }
 0x29f   : > { %15396 = vmatpush3.bf16.msra.mxu0 %v16141_v16  ;;  %v6938_v16 = vor.u32 %v6936_v42, %v6934_v54  ;;  %v21282_v54 = vshrl.u32 %v18644_v57, 16  ;;  %v18693_v42 = vld [vmem:[#allocation2 + $0x5c] sm:$0xff]   ;;  %v21454_v32 = vshll.u32 %v18644_v57, 16 }
 0x2a0   : > { %v8237_v36 = vrot.slane %v21283_v47, 1 }
 0x2a1   : > { %15286 = vmatmul.mubr.msk.bf16.gmra.mxu1 %vm317_vm2, %v21444_v1  ;;  %v18670_v30 = vsel %vm6875_vm12, %v6938_v16, %v6942_v61  ;;  %v18687_v61 = vld [vmem:[#allocation2 + $0x4c] sm:$0xff]   ;;  %v21284_v1 = vshrl.u32 %v18666_v6, 16  ;;  %v8229_v7 = vrot.slane %v21282_v54, 1  ;;  %v21448_v54 = vcombine.low %v18367_v4, %v18384_v13 }
 0x2a2   : > { %15322 = vmatmul.mubr.msk.bf16.gmra.mxu0 %vm317_vm2, %v6911_v3  ;;  %15289 = vmatprep.mubr.msk.bf16.mxu1 %vm317_vm2, %v21446_v44  ;;  %v21289_v3 = vshll.u32 %v18652_v8, 16  ;;  %v18739_v44 = vld [vmem:[#allocation2 + $0x9c] sm:$0xff]   ;;  %v8253_v13 = vrot.slane %v21285_v27, 1  ;;  %v21449_v4 = vshrl.u32 %v18654_v45, 16 }
 0x2a3   : > { %15325 = vmatprep.mubr.msk.bf16.mxu0 %vm317_vm2, %v6919_v25  ;;  %v18701_v25 = vld [vmem:[#allocation2 + $0x6c] sm:$0xff]   ;;  %v8245_v47 = vrot.slane %v21284_v1, 1  ;;  %v8209_v1 = vrot.slane %v21286_v5, 1  ;;  %v21451_v5 = vshll.u32 %v18638_v9, 16 }
 0x2a4   : > { %v8210_v16 = vrot.slane %v21289_v3, 2  ;;  %v8217_v27 = vrot.slane %v21449_v4, 1  ;;  %v8226_v4 = vrot.slane %v21453_v38, 2 }
 0x2a5   : > { %v8222_v21 = vrot.slane %v21451_v5, 2 }
 0x2a6   : > { %v18766_v35 = vor.u32 %v8210_v16, %v8209_v1  ;;  %v21456_v16 = vshrl.u32 %v18687_v61, 16 }
 0x2a7   : > { %v8223_v37 = vor.u32 %v8222_v21, %v8221_v63 }
 0x2a8   : > { %v18781_v5 = vsel %vm8200_vm1, %v18766_v35, %v18595_v19  ;;  %v8233_v38 = vrot.slane %v21456_v16, 1 }
 0x2a9   : > { %15290 = vmatmul.mubr.msk.bf16.gmra.mxu1 %vm317_vm2, %v21447_v59  ;;  %v21450_v59 = vshll.u32 %v18654_v45, 16  ;;  %v8230_v45 = vrot.slane %v21454_v32, 2  ;;  %v21461_v32 = vshll.u32 %v18656_v52, 16 }
 0x2aa   : > { %15326 = vmatmul.mubr.msk.bf16.gmra.mxu0 %vm317_vm2, %v6927_v62  ;;  %15293 = vmatprep.mubr.msk.bf16.mxu1 %vm317_vm2, %v21448_v54  ;;  %v21452_v62 = vshrl.u32 %v18664_v48, 16 }
 0x2ab   : > { %15329 = vmatprep.mubr.msk.bf16.mxu0 %vm317_vm2, %v6935_v2  ;;  %v8261_v2 = vrot.slane %v21287_v55, 1  ;;  %v8218_v49 = vrot.slane %v21450_v59, 2  ;;  %v21455_v59 = vcombine.low %v18372_v51, %v18414_v0  ;;  %v21458_v51 = vcombine.low %v18406_v14, %v18426_v15 }
 0x2ac   : > { %v8225_v3 = vrot.slane %v21452_v62, 1  ;;  %v21459_v0 = vshrl.u32 %v18727_v24, 16  ;;  %v8238_v62 = vrot.slane %v21461_v32, 2  ;;  %v8231_v15 = vor.u32 %v8230_v45, %v8229_v7 }
 0x2ad   : > { %v8219_v54 = vor.u32 %v8218_v49, %v8217_v27  ;;  %v21457_v27 = vshll.u32 %v18687_v61, 16  ;;  %v21469_v45 = vshll.u32 %v18701_v25, 16 }
 0x2ae   : > { %v8227_v1 = vor.u32 %v8226_v4, %v8225_v3  ;;  %v8269_v63 = vrot.slane %v21459_v0, 1  ;;  %v21463_v4 = vshrl.u32 %v18693_v42, 16  ;;  %v8239_v16 = vor.u32 %v8238_v62, %v8237_v36 }
 0x2af   : > { %v8234_v21 = vrot.slane %v21457_v27, 2  ;;  %v18797_v3 = vsel %vm8200_vm1, %v18595_v19, %v8219_v54  ;;  %v18800_v49 = vsel %vm8200_vm1, %v8219_v54, %v8223_v37  ;;  %v21464_v19 = vshll.u32 %v18693_v42, 16 }
 0x2b0   : > { %21460 = vst [vmem:[#allocation34_spill] sm:$0xff] %v18800_v49  ;;  %v18807_v14 = vsel %vm8200_vm1, %v8223_v37, %v8227_v1  ;;  %v21465_v54 = vshll.u32 %v18666_v6, 16  ;;  %v21466_v0 = vshrl.u32 %v18701_v25, 16  ;;  %v15119_v55 = vpop.f32.mrf.mxu1  ;;  %v8250_v7 = vrot.slane %v21469_v45, 2 }
 0x2b1   : > { %15294 = vmatmul.mubr.msk.bf16.gmra.mxu1 %vm317_vm2, %v21455_v59  ;;  %21462 = vst [vmem:[#allocation35_spill] sm:$0xff] %v18807_v14  ;;  %v8241_v59 = vrot.slane %v21463_v4, 1  ;;  %v8242_v27 = vrot.slane %v21464_v19, 2  ;;  %v21470_v36 = vshll.u32 %v18677_v12, 16  ;;  %v21471_v19 = vshrl.u32 %v18708_v11, 16 }
 0x2b2   : > { %15330 = vmatmul.mubr.msk.bf16.gmra.mxu0 %vm317_vm2, %v18670_v30  ;;  %15297 = vmatprep.mubr.msk.bf16.mxu1 %vm317_vm2, %v21458_v51  ;;  %v8235_v30 = vor.u32 %v8234_v21, %v8233_v38  ;;  %v8246_v51 = vrot.slane %v21465_v54, 2  ;;  %v8249_v32 = vrot.slane %v21466_v0, 1  ;;  %v4920_v0 = vpop.f32.mrf.mxu1  ;;  %v21473_v14 = vshll.u32 %v18696_v46, 16 }
 0x2b3   : > { %15333 = vmatprep.mubr.msk.bf16.mxu0 %vm317_vm2, %v18673_v33  ;;  %v18818_v33 = vsel %vm8200_vm1, %v8227_v1, %v8231_v15  ;;  %v8254_v38 = vrot.slane %v21470_v36, 2  ;;  %v8243_v62 = vor.u32 %v8242_v27, %v8241_v59  ;;  %v8257_v54 = vrot.slane %v21471_v19, 1 }
 0x2b4   : > { %21467 = vst [vmem:[#allocation38_spill] sm:$0xff] %v18818_v33  ;;  %v18821_v37 = vsel %vm8200_vm1, %v8231_v15, %v8235_v30  ;;  %v18828_v21 = vsel %vm8200_vm1, %v8235_v30, %v8239_v16  ;;  %v8247_v4 = vor.u32 %v8246_v51, %v8245_v47  ;;  %v8251_v1 = vor.u32 %v8250_v7, %v8249_v32  ;;  %v15120_v32 = vpop.f32.mrf.mxu1 }
 0x2b5   : > { %21468 = vst [vmem:[#allocation40_spill] sm:$0xff] %v18821_v37  ;;  %v8255_v33 = vor.u32 %v8254_v38, %v8253_v13  ;;  %v21472_v15 = vshll.u32 %v18708_v11, 16  ;;  %v8262_v45 = vrot.slane %v21473_v14, 2  ;;  %v18837_v49 = vsel %vm8200_vm1, %v8239_v16, %v8243_v62 }
 0x2b6   : > { %v18840_v30 = vsel %vm8200_vm1, %v8243_v62, %v8247_v4  ;;  %v21474_v47 = vshrl.u32 %v18716_v41, 16  ;;  %v21475_v27 = vshll.u32 %v18716_v41, 16  ;;  %v21476_v13 = vcombine.low %v18416_v18, %v18461_v50 }
 0x2b7   : > { %v8258_v37 = vrot.slane %v21472_v15, 2  ;;  %v18851_v14 = vsel %vm8200_vm1, %v8247_v4, %v8251_v1  ;;  %v18854_v16 = vsel %vm8200_vm1, %v8251_v1, %v8255_v33  ;;  %v8263_v36 = vor.u32 %v8262_v45, %v8261_v2 }
 0x2b8   : > { %v8265_v59 = vrot.slane %v21474_v47, 1  ;;  %v8266_v51 = vrot.slane %v21475_v27, 2  ;;  %21477 = vst [vmem:[#allocation43_spill] sm:$0xff] %v18854_v16  ;;  %v21478_v38 = vcombine.low %v18450_v20, %v18467_v40  ;;  %v21479_v50 = vshll.u32 %v18727_v24, 16 }
 0x2b9   : > { %15298 = vmatmul.mubr.msk.bf16.gmra.mxu1 %vm317_vm2, %v21476_v13  ;;  %v8259_v7 = vor.u32 %v8258_v37, %v8257_v54  ;;  %v21480_v4 = vshrl.u32 %v18739_v44, 16  ;;  %v21481_v1 = vshll.u32 %v18739_v44, 16  ;;  %v21484_v40 = vshll.u32 %v18636_v29, 16  ;;  %v16127_v37 = vld [vmem:[#allocation2 + $0x7c] sm:$0xff]   ;;  %v4923_v54 = vpop.f32.mrf.mxu1  ;;  %v16128_v13 = vld [vmem:[#allocation2 + $0x84] sm:$0xff]  }
 0x2ba   : > { %15334 = vmatmul.mubr.msk.bf16.gmra.mxu0 %vm317_vm2, %v18680_v22  ;;  %15301 = vmatprep.mubr.msk.bf16.mxu1 %vm317_vm2, %v21478_v38  ;;  %v8267_v18 = vor.u32 %v8266_v51, %v8265_v59  ;;  %v8270_v62 = vrot.slane %v21479_v50, 2  ;;  %v6968_v27 = vshrl.u32 %v18616_v26, 16  ;;  %v18895_v26 = vld [vmem:[#allocation2 + $0x18] sm:$0xf] }
 0x2bb   : > { %v8273_v19 = vrot.slane %v21480_v4, 1  ;;  %v8274_v15 = vrot.slane %v21481_v1, 2  ;;  %15337 = vmatprep.mubr.msk.bf16.mxu0 %vm317_vm2, %v18684_v60  ;;  %v18871_v22 = vsel %vm8200_vm1, %v8255_v33, %v8259_v7  ;;  %v18874_v20 = vsel %vm8200_vm1, %v8259_v7, %v8263_v36  ;;  %v7303_v7 = vld [vmem:[#allocation2 + $0x14] sm:$0xf]  ;;  %v15123_v4 = vpop.f32.mrf.mxu1 }
 0x2bc   : > { %21482 = vst [vmem:[#allocation46_spill] sm:$0xff] %v18871_v22  ;;  %21483 = vst [vmem:[#allocation50_spill] sm:$0xff] %v18874_v20  ;;  %v6974_v2 = vrot.slane %v21484_v40, 1  ;;  %v18879_v45 = vsel %vm8200_vm1, %v8263_v36, %v8267_v18  ;;  %v8271_v47 = vor.u32 %v8270_v62, %v8269_v63  ;;  %v6976_v60 = vshrl.u32 %v18636_v29, 16 }
 0x2bd   : > { %21485 = vst [vmem:[#allocation51_spill] sm:$0xff] %v18879_v45  ;;  %v18881_v59 = vor.u32 %v8274_v15, %v8273_v19  ;;  %v21486_v33 = vshll.u32 %v18642_v53, 16  ;;  %v6970_v63 = vor.u32 %v6968_v27, %v18640_v10  ;;  %v6988_v62 = vshll.u32 %v16127_v37, 16 }
 0x2be   : > { %v18888_v38 = vsel %vm8200_vm1, %v8267_v18, %v8271_v47  ;;  %v6978_v36 = vor.u32 %v6976_v60, %v6974_v2  ;;  %v21489_v19 = vcombine.low %v18455_v28, %v18498_v17  ;;  %v15159_v18 = vpop.f32.mrf.mxu0  ;;  %v13251_v1 = vcombine.low %v7303_v7, %v18895_v26 }
 0x2bf   : > { %v6982_v51 = vrot.slane %v21486_v33, 1  ;;  %21487 = vst [vmem:[#allocation52_spill] sm:$0xff] %v18888_v38  ;;  %v18892_v50 = vsel %vm8200_vm1, %v8271_v47, %v18881_v59  ;;  %v6975_v29 = vsel %vm6875_vm12, %v6970_v63, %v6974_v2  ;;  %v21490_v10 = vcombine.low %v18484_v39, %v18503_v56  ;;  %v4936_v47 = vpop.f32.mrf.mxu1  ;;  %v16131_v33 = vld [vmem:[#allocation2 + $0x8c] sm:$0xff]  }
 0x2c0   : > { %21488 = vst [vmem:[#allocation53_spill] sm:$0xff] %v18892_v50  ;;  %v18909_v40 = vadd.f32 %v15159_v18, %v15119_v55  ;;  %v6996_v2 = vshll.u32 %v16128_v13, 16  ;;  %v5337_v28 = vpop.f32.mrf.mxu0  ;;  %v6990_v17 = vrot.slane %v6988_v62, 1  ;;  %v6984_v7 = vshrl.u32 %v18642_v53, 16  ;;  %v16132_v55 = vld [vmem:[#allocation2 + $0x94] sm:$0xff]  }
 0x2c1   : > { %15302 = vmatmul.mubr.msk.bf16.gmra.mxu1 %vm317_vm2, %v21489_v19  ;;  %v6983_v15 = vsel %vm6875_vm12, %v6978_v36, %v6982_v51  ;;  %v18912_v27 = vadd.f32 %v5337_v28, %v4920_v0  ;;  %v15124_v60 = vpop.f32.mrf.mxu1  ;;  %v7441_v36 = vshll.u32 %v13251_v1, 16  ;;  %v21491_v28 = vcombine.low %v18491_v23, %v18528_v58 }
 0x2c2   : > { %15338 = vmatmul.mubr.msk.bf16.gmra.mxu0 %vm317_vm2, %v6975_v29  ;;  %15305 = vmatprep.mubr.msk.bf16.mxu1 %vm317_vm2, %v21490_v10  ;;  %v15160_v63 = vpop.f32.mrf.mxu0  ;;  %v6992_v29 = vshrl.u32 %v16127_v37, 16  ;;  %v6998_v39 = vrot.slane %v6996_v2, 1  ;;  %v6986_v19 = vor.u32 %v6984_v7, %v6982_v51  ;;  %v21492_v37 = vcombine.low %v18519_v43, %v18536_v34 }
 0x2c3   : > { %15341 = vmatprep.mubr.msk.bf16.mxu0 %vm317_vm2, %v6983_v15  ;;  %v18915_v56 = vadd.f32 %v15160_v63, %v15120_v32  ;;  %v7004_v15 = vshll.u32 %v16131_v33, 16  ;;  %v4939_v62 = vpop.f32.mrf.mxu1  ;;  %v7443_v53 = vrot.slane %v7441_v36, 1  ;;  %v7439_v2 = vshrl.u32 %v13251_v1, 16 }
 0x2c4   : > { %v5340_v18 = vpop.f32.mrf.mxu0  ;;  %v6994_v10 = vor.u32 %v6992_v29, %v6990_v17  ;;  %v6991_v0 = vsel %vm6875_vm12, %v6986_v19, %v6990_v17  ;;  %v7000_v7 = vshrl.u32 %v16128_v13, 16  ;;  %v21493_v29 = vshll.u32 %v18652_v8, 16  ;;  %v21494_v13 = vld [vmem:[#allocation27_spill] sm:$0xff] }
 0x2c5   : > { %v18917_v50 = vadd.f32 %v5340_v18, %v4923_v54  ;;  %v7012_v54 = vshll.u32 %v16132_v55, 16  ;;  %v7006_v23 = vrot.slane %v7004_v15, 1  ;;  %v7444_v36 = vor.u32 %v7443_v53, %v7439_v2  ;;  %v16136_v18 = vld [vmem:[#allocation2 + $0x9c] ss:$0 sps:$4 sm:$0x11]  }
 0x2c6   : > { %v6999_v32 = vsel %vm6875_vm12, %v6994_v10, %v6998_v39  ;;  %v7448_v19 = vrot.slane %v21493_v29, 1  ;;  %v7008_v10 = vshrl.u32 %v16131_v33, 16  ;;  %v21495_v53 = vcombine.low %v18521_v31, %v21494_v13  ;;  %v21499_v13 = vld [vmem:[#allocation31_spill] sm:$0xff] }
 0x2c7   : > { %v7014_v43 = vrot.slane %v7012_v54, 1  ;;  %v7020_v54 = vshll.u32 %v16136_v18, 16  ;;  %v7888_v20 = vrot.slane %v18687_v61, 1 }
 0x2c9   : > { %15306 = vmatmul.mubr.msk.bf16.gmra.mxu1 %vm317_vm2, %v21491_v28  ;;  %v15163_v51 = vpop.f32.mrf.mxu0  ;;  %v15127_v58 = vpop.f32.mrf.mxu1  ;;  %v7002_v28 = vor.u32 %v7000_v7, %v6998_v39 }
 0x2ca   : > { %15342 = vmatmul.mubr.msk.bf16.gmra.mxu0 %vm317_vm2, %v6991_v0  ;;  %15309 = vmatprep.mubr.msk.bf16.mxu1 %vm317_vm2, %v21492_v37  ;;  %v18931_v17 = vadd.f32 %v15163_v51, %v15123_v4  ;;  %v7010_v37 = vor.u32 %v7008_v10, %v7006_v23  ;;  %v7449_v51 = vsel %vm6875_vm12, %v7444_v36, %v7448_v19 }
 0x2cb   : > { %15345 = vmatprep.mubr.msk.bf16.mxu0 %vm317_vm2, %v6999_v32  ;;  %v5353_v63 = vpop.f32.mrf.mxu0  ;;  %v4952_v0 = vpop.f32.mrf.mxu1  ;;  %v7007_v15 = vsel %vm6875_vm12, %v7002_v28, %v7006_v23  ;;  %v7016_v23 = vshrl.u32 %v16132_v55, 16  ;;  %v7022_v28 = vrot.slane %v7020_v54, 1 }
 0x2cc   : > { %v18935_v34 = vadd.f32 %v5353_v63, %v4936_v47  ;;  %v7865_v47 = vld [vmem:[#allocation2 + $0x14] sm:$0xe]  ;;  %v7015_v39 = vsel %vm6875_vm12, %v7010_v37, %v7014_v43  ;;  %v21496_v63 = vld [vmem:[#allocation29_spill] sm:$0xff]  ;;  %v21498_v37 = vshrl.u32 %v18652_v8, 16 }
 0x2cd   : > { %v15164_v32 = vpop.f32.mrf.mxu0  ;;  %v15128_v4 = vpop.f32.mrf.mxu1  ;;  %v18952_v7 = vcombine.low %v7865_v47, %v18895_v26  ;;  %v21497_v36 = vshll.u32 %v21496_v63, 16  ;;  %v7018_v18 = vor.u32 %v7016_v23, %v7014_v43  ;;  %v21501_v54 = vshrl.u32 %v21496_v63, 16 }
 0x2ce   : > { %v18937_v1 = vadd.f32 %v15164_v32, %v15124_v60 }
 0x2cf   : > { %v5356_v33 = vpop.f32.mrf.mxu0  ;;  %v4955_v2 = vpop.f32.mrf.mxu1  ;;  %v7456_v29 = vrot.slane %v21497_v36, 1  ;;  %v7875_v47 = vrot.slane %v18952_v7, 1  ;;  %v21502_v36 = vld [vmem:[#allocation41_spill] sm:$0xff] }
 0x2d0   : > { %v18948_v60 = vadd.f32 %v5356_v33, %v4939_v62  ;;  %v7452_v62 = vor.u32 %v21498_v37, %v7448_v19  ;;  %v7023_v19 = vsel %vm6875_vm12, %v7018_v18, %v7022_v28  ;;  %v21503_v18 = vshll.u32 %v18638_v9, 16 }
 0x2d1   : > { %15310 = vmatmul.mubr.msk.bf16.gmra.mxu1 %vm317_vm2, %v21495_v53  ;;  %v21500_v53 = vshll.u32 %v21499_v13, 16 }
 0x2d2   : > { %15346 = vmatmul.mubr.msk.bf16.gmra.mxu0 %vm317_vm2, %v7007_v15  ;;  %15357 = vmatprep.mubr.msk.bf16.mxu1 %vm317_vm2, %v7449_v51  ;;  %v15167_v31 = vpop.f32.mrf.mxu0  ;;  %v7876_v15 = vrot.slane %v18652_v8, 1  ;;  %v16151_v8 = vld [vmem:[%s21177_s3 + $0x80] sm:$0xff]   ;;  %v7472_v28 = vrot.slane %v21503_v18, 1 }
 0x2d3   : > { %15349 = vmatprep.mubr.msk.bf16.mxu0 %vm317_vm2, %v7015_v39  ;;  %v18956_v10 = vadd.f32 %v15167_v31, %v15127_v58  ;;  %v15131_v32 = vpop.f32.mrf.mxu1  ;;  %v7464_v51 = vrot.slane %v21500_v53, 1  ;;  %v7457_v58 = vsel %vm6875_vm12, %v7452_v62, %v7456_v29  ;;  %v7460_v39 = vor.u32 %v21501_v54, %v7456_v29 }
 0x2d4   : > { %v5369_v55 = vpop.f32.mrf.mxu0  ;;  %v7877_v31 = vsel %vm7874_vm7, %v7875_v47, %v7876_v15  ;;  %v21504_v53 = vshll.u32 %v18664_v48, 16  ;;  %v7880_v54 = vrot.slane %v21499_v13, 1 }
 0x2d5   : > { %v18963_v26 = vadd.f32 %v5369_v55, %v4952_v0  ;;  %v4968_v33 = vpop.f32.mrf.mxu1  ;;  %v7465_v37 = vsel %vm6875_vm12, %v7460_v39, %v7464_v51  ;;  %v7878_v55 = vrot.slane %v21496_v63, 1 }
 0x2d6   : > { %v15168_v43 = vpop.f32.mrf.mxu0  ;;  %v7480_v47 = vrot.slane %v21504_v53, 1 }
 0x2d7   : > { %v18973_v23 = vadd.f32 %v15168_v43, %v15128_v4  ;;  %v15132_v0 = vpop.f32.mrf.mxu1  ;;  %v21505_v43 = vshrl.u32 %v21499_v13, 16  ;;  %v7879_v63 = vsel %vm7874_vm7, %v7876_v15, %v7878_v55  ;;  %v7881_v13 = vsel %vm7874_vm7, %v7878_v55, %v7880_v54 }
 0x2d8   : > { %v5372_v29 = vpop.f32.mrf.mxu0 }
 0x2d9   : > { %15358 = vmatmul.mubr.msk.bf16.vlgmr.msra.gmra.mxu1 %vm317_vm2, %v7457_v58  ;;  %v18982_v62 = vadd.f32 %v5372_v29, %v4955_v2  ;;  %v4971_v4 = vpop.f32.mrf.mxu1  ;;  %v7468_v58 = vor.u32 %v21505_v43, %v7464_v51  ;;  %v21506_v2 = vshrl.u32 %v18638_v9, 16  ;;  %v7882_v43 = vrot.slane %v18638_v9, 1 }
 0x2da   : > { %15350 = vmatmul.mubr.msk.bf16.gmra.mxu0 %vm317_vm2, %v7023_v19  ;;  %15434 = vmatpush3.bf16.msra.mxu1 %v21502_v36 }
 0x2db   : > { %15397 = vmatprep.mubr.msk.bf16.mxu0 %vm317_vm2, %v7877_v31  ;;  %15361 = vmatprep.mubr.msk.bf16.mxu1 %vm317_vm2, %v7465_v37  ;;  %v7476_v19 = vor.u32 %v21506_v2, %v7472_v28  ;;  %v7473_v36 = vsel %vm6875_vm12, %v7468_v58, %v7472_v28  ;;  %v21507_v28 = vshll.u32 %v18644_v57, 16  ;;  %v7883_v9 = vsel %vm7874_vm7, %v7880_v54, %v7882_v43 }
 0x2dc   : > { %15435 = vmatprep.subr.bf16.mxu1 %v16151_v8 }
 0x2dd   : > { %v7481_v29 = vsel %vm6875_vm12, %v7476_v19, %v7480_v47  ;;  %v7488_v15 = vrot.slane %v21507_v28, 1  ;;  %v21508_v19 = vshll.u32 %v18687_v61, 16  ;;  %v16159_v28 = vld [vmem:[#allocation2 + $0xa4] ss:$0 sps:$4 sm:$0x33]  }
 0x2de   : > { %15436 = vmatpush3.bf16.msra.mxu1 %v16151_v8  ;;  %v15135_v39 = vpop.f32.mrf.mxu1 }
 0x2df   : > { %v15171_v31 = vpop.f32.mrf.mxu0  ;;  %v7496_v55 = vrot.slane %v21508_v19, 1 }
 0x2e0   : > { %v18995_v37 = vadd.f32 %v15171_v31, %v15131_v32  ;;  %v4984_v18 = vpop.f32.mrf.mxu1  ;;  %v21509_v31 = vshrl.u32 %v18664_v48, 16 }
 0x2e1   : > { %15362 = vmatmul.mubr.msk.bf16.gmra.mxu1 %vm317_vm2, %v7473_v36  ;;  %v5385_v51 = vpop.f32.mrf.mxu0 }
 0x2e2   : > { %15398 = vmatmul.mubr.msk.bf16.vlgmr.msra.gmra.mxu0 %vm317_vm2, %v7879_v63  ;;  %15365 = vmatprep.mubr.msk.bf16.mxu1 %vm317_vm2, %v7481_v29  ;;  %v19004_v8 = vadd.f32 %v5385_v51, %v4968_v33  ;;  %v15136_v32 = vpop.f32.mrf.mxu1  ;;  %v7484_v36 = vor.u32 %v21509_v31, %v7480_v47  ;;  %v7884_v33 = vrot.slane %v18664_v48, 1  ;;  %v8278_v31 = vshrl.u32 %v16159_v28, 16 }
 0x2e3   : > { %15401 = vmatprep.mubr.msk.bf16.mxu0 %vm317_vm2, %v7881_v13  ;;  %v15172_v53 = vpop.f32.mrf.mxu0  ;;  %v21510_v13 = vshrl.u32 %v18644_v57, 16  ;;  %v8281_v48 = vshll.u32 %v16159_v28, 16 }
 0x2e4   : > { %v19009_v58 = vadd.f32 %v15172_v53, %v15132_v0  ;;  %v4987_v2 = vpop.f32.mrf.mxu1  ;;  %v7489_v0 = vsel %vm6875_vm12, %v7484_v36, %v7488_v15  ;;  %v8280_v36 = vrot.slane %v8278_v31, 1 }
 0x2e5   : > { %v5388_v63 = vpop.f32.mrf.mxu0  ;;  %v7492_v51 = vor.u32 %v21510_v13, %v7488_v15  ;;  %v8283_v13 = vrot.slane %v8281_v48, 2  ;;  %v21514_v48 = vshrl.u32 %v18656_v52, 16 }
 0x2e6   : > { %v19016_v29 = vadd.f32 %v5388_v63, %v4971_v4  ;;  %v7885_v4 = vsel %vm7874_vm7, %v7882_v43, %v7884_v33  ;;  %v21512_v43 = vshll.u32 %v18693_v42, 16 }
 0x2e7   : > { %v7497_v47 = vsel %vm6875_vm12, %v7492_v51, %v7496_v55 }
 0x2e8   : > { %v15175_v38 = vpop.f32.mrf.mxu0  ;;  %v7512_v45 = vrot.slane %v21512_v43, 1 }
 0x2e9   : > { %v19022_v53 = vadd.f32 %v15175_v38, %v15135_v39  ;;  %v15139_v19 = vpop.f32.mrf.mxu1  ;;  %15366 = vmatmul.mubr.msk.bf16.gmra.mxu1 %vm317_vm2, %v7489_v0  ;;  %v21511_v39 = vshll.u32 %v18656_v52, 16 }
 0x2ea   : > { %15402 = vmatmul.mubr.msk.bf16.gmra.mxu0 %vm317_vm2, %v7883_v9  ;;  %v5401_v63 = vpop.f32.mrf.mxu0  ;;  %15369 = vmatprep.mubr.msk.bf16.mxu1 %vm317_vm2, %v7497_v47  ;;  %v7886_v9 = vrot.slane %v18644_v57, 1  ;;  %v8284_v47 = vor.u32 %v8283_v13, %v8280_v36 }
 0x2eb   : > { %15405 = vmatprep.mubr.msk.bf16.mxu0 %vm317_vm2, %v7885_v4  ;;  %v19030_v54 = vadd.f32 %v5401_v63, %v4984_v18  ;;  %v5000_v38 = vpop.f32.mrf.mxu1  ;;  %v7504_v15 = vrot.slane %v21511_v39, 1  ;;  %v21513_v4 = vshrl.u32 %v18687_v61, 16 }
 0x2ec   : > { %v15176_v51 = vpop.f32.mrf.mxu0  ;;  %v19048_v39 = vsel %vm8200_vm1, %v18881_v59, %v8284_v47  ;;  %v7887_v36 = vsel %vm7874_vm7, %v7884_v33, %v7886_v9 }
 0x2ed   : > { %v19034_v0 = vadd.f32 %v15176_v51, %v15136_v32  ;;  %v15140_v28 = vpop.f32.mrf.mxu1  ;;  %v7500_v18 = vor.u32 %v21513_v4, %v7496_v55  ;;  %v7508_v32 = vor.u32 %v21514_v48, %v7504_v15  ;;  %21515 = vst [vmem:[#allocation27_spill] sm:$0xff] %v19048_v39 }
 0x2ee   : > { %v5404_v63 = vpop.f32.mrf.mxu0 }
 0x2ef   : > { %v19042_v22 = vadd.f32 %v5404_v63, %v4987_v2  ;;  %v5003_v31 = vpop.f32.mrf.mxu1  ;;  %v7505_v57 = vsel %vm6875_vm12, %v7500_v18, %v7504_v15  ;;  %v7513_v55 = vsel %vm6875_vm12, %v7508_v32, %v7512_v45  ;;  %v7889_v2 = vsel %vm7874_vm7, %v7886_v9, %v7888_v20 }
 0x2f0   : > { %v21516_v15 = vshll.u32 %v18666_v6, 16  ;;  %v7890_v18 = vrot.slane %v18656_v52, 1  ;;  %v21517_v63 = vshll.u32 %v18701_v25, 16  ;;  %v21518_v32 = vshrl.u32 %v18693_v42, 16 }
 0x2f1   : > { %v15143_v13 = vpop.f32.mrf.mxu1  ;;  %15370 = vmatmul.mubr.msk.bf16.gmra.mxu1 %vm317_vm2, %v7505_v57  ;;  %v7892_v57 = vrot.slane %v18693_v42, 1 }
 0x2f2   : > { %v15179_v61 = vpop.f32.mrf.mxu0  ;;  %15406 = vmatmul.mubr.msk.bf16.gmra.mxu0 %vm317_vm2, %v7887_v36  ;;  %15373 = vmatprep.mubr.msk.bf16.mxu1 %vm317_vm2, %v7513_v55  ;;  %v7520_v33 = vrot.slane %v21516_v15, 1  ;;  %v7528_v48 = vrot.slane %v21517_v63, 1  ;;  %v7891_v52 = vsel %vm7874_vm7, %v7888_v20, %v7890_v18 }
 0x2f3   : > { %v19057_v51 = vadd.f32 %v15179_v61, %v15139_v19  ;;  %15409 = vmatprep.mubr.msk.bf16.mxu0 %vm317_vm2, %v7889_v2  ;;  %v5016_v59 = vpop.f32.mrf.mxu1  ;;  %v7516_v19 = vor.u32 %v21518_v32, %v7512_v45  ;;  %v21519_v61 = vshrl.u32 %v18666_v6, 16  ;;  %v7893_v42 = vsel %vm7874_vm7, %v7890_v18, %v7892_v57 }
 0x2f4   : > { %v5417_v43 = vpop.f32.mrf.mxu0 }
 0x2f5   : > { %v19062_v47 = vadd.f32 %v5417_v43, %v5000_v38  ;;  %v15144_v4 = vpop.f32.mrf.mxu1  ;;  %v7524_v2 = vor.u32 %v21519_v61, %v7520_v33  ;;  %v7521_v15 = vsel %vm6875_vm12, %v7516_v19, %v7520_v33  ;;  %v21520_v33 = vshll.u32 %v18677_v12, 16 }
 0x2f6   : > { %v15180_v9 = vpop.f32.mrf.mxu0 }
 0x2f7   : > { %v19070_v36 = vadd.f32 %v15180_v9, %v15140_v28  ;;  %v5019_v55 = vpop.f32.mrf.mxu1  ;;  %v7529_v45 = vsel %vm6875_vm12, %v7524_v2, %v7528_v48  ;;  %v7536_v20 = vrot.slane %v21520_v33, 1  ;;  %v7894_v2 = vrot.slane %v18666_v6, 1 }
 0x2f8   : > { %v5420_v38 = vpop.f32.mrf.mxu0  ;;  %v21523_v33 = vshrl.u32 %v18677_v12, 16 }
 0x2f9   : > { %v19075_v43 = vadd.f32 %v5420_v38, %v5003_v31  ;;  %v15147_v63 = vpop.f32.mrf.mxu1  ;;  %15374 = vmatmul.mubr.msk.bf16.gmra.mxu1 %vm317_vm2, %v7521_v15  ;;  %v21521_v38 = vshll.u32 %v18708_v11, 16  ;;  %v7895_v6 = vsel %vm7874_vm7, %v7892_v57, %v7894_v2  ;;  %v21525_v57 = vshll.u32 %v18696_v46, 16 }
 0x2fa   : > { %v15183_v32 = vpop.f32.mrf.mxu0  ;;  %15410 = vmatmul.mubr.msk.bf16.gmra.mxu0 %vm317_vm2, %v7891_v52  ;;  %15377 = vmatprep.mubr.msk.bf16.mxu1 %vm317_vm2, %v7529_v45  ;;  %v21522_v52 = vshrl.u32 %v18701_v25, 16  ;;  %v7896_v45 = vrot.slane %v18701_v25, 1  ;;  %v7540_v39 = vor.u32 %v21523_v33, %v7536_v20  ;;  %v7898_v33 = vrot.slane %v18677_v12, 1 }
 0x2fb   : > { %v19083_v28 = vadd.f32 %v15183_v32, %v15143_v13  ;;  %15413 = vmatprep.mubr.msk.bf16.mxu0 %vm317_vm2, %v7893_v42  ;;  %v5032_v31 = vpop.f32.mrf.mxu1  ;;  %v7544_v15 = vrot.slane %v21521_v38, 1 }
 0x2fc   : > { %v5433_v9 = vpop.f32.mrf.mxu0  ;;  %v7532_v13 = vor.u32 %v21522_v52, %v7528_v48  ;;  %v7897_v25 = vsel %vm7874_vm7, %v7894_v2, %v7896_v45 }
 0x2fd   : > { %v19088_v19 = vadd.f32 %v5433_v9, %v5016_v59  ;;  %v15148_v61 = vpop.f32.mrf.mxu1  ;;  %v7545_v48 = vsel %vm6875_vm12, %v7540_v39, %v7544_v15 }
 0x2fe   : > { %v15184_v18 = vpop.f32.mrf.mxu0  ;;  %v7537_v9 = vsel %vm6875_vm12, %v7532_v13, %v7536_v20  ;;  %v7552_v20 = vrot.slane %v21525_v57, 1  ;;  %v21530_v57 = vshrl.u32 %v18696_v46, 16 }
 0x2ff   : > { %v19096_v32 = vadd.f32 %v15184_v18, %v15144_v4  ;;  %v5035_v42 = vpop.f32.mrf.mxu1 }
 0x300   : > { %v5436_v59 = vpop.f32.mrf.mxu0 }
 0x301   : > { %v19101_v16 = vadd.f32 %v5436_v59, %v5019_v55  ;;  %v15151_v38 = vpop.f32.mrf.mxu1  ;;  %15378 = vmatmul.mubr.msk.bf16.gmra.mxu1 %vm317_vm2, %v7537_v9  ;;  %v21527_v59 = vshll.u32 %v18716_v41, 16 }
 0x302   : > { %v15187_v52 = vpop.f32.mrf.mxu0  ;;  %15414 = vmatmul.mubr.msk.bf16.gmra.mxu0 %vm317_vm2, %v7895_v6  ;;  %15381 = vmatprep.mubr.msk.bf16.mxu1 %vm317_vm2, %v7545_v48  ;;  %v7900_v48 = vrot.slane %v18708_v11, 1 }
 0x303   : > { %v19109_v4 = vadd.f32 %v15187_v52, %v15147_v63  ;;  %15417 = vmatprep.mubr.msk.bf16.mxu0 %vm317_vm2, %v7897_v25  ;;  %v19112_v55 = vpop.f32.mrf.mxu1  ;;  %v7560_v2 = vrot.slane %v21527_v59, 1  ;;  %v21528_v63 = vshrl.u32 %v18708_v11, 16  ;;  %v7899_v59 = vsel %vm7874_vm7, %v7896_v45, %v7898_v33 }
 0x304   : > { %21524 = vst [vmem:[#allocation29_spill] sm:$0xff] %v19112_v55  ;;  %v5449_v18 = vpop.f32.mrf.mxu0  ;;  %v21531_v11 = vshll.u32 %v18727_v24, 16 }
 0x305   : > { %v19116_v13 = vadd.f32 %v5449_v18, %v5032_v31  ;;  %v15152_v39 = vpop.f32.mrf.mxu1  ;;  %v7548_v6 = vor.u32 %v21528_v63, %v7544_v15  ;;  %v7556_v31 = vor.u32 %v21530_v57, %v7552_v20  ;;  %v7901_v63 = vsel %vm7874_vm7, %v7898_v33, %v7900_v48 }
 0x306   : > { %v15188_v9 = vpop.f32.mrf.mxu0  ;;  %v21533_v33 = vshrl.u32 %v18727_v24, 16 }
 0x307   : > { %21526 = vst [vmem:[#allocation31_spill] sm:$0xff] %v19116_v13  ;;  %v19124_v52 = vadd.f32 %v15188_v9, %v15148_v61  ;;  %v19126_v25 = vpop.f32.mrf.mxu1  ;;  %v7553_v55 = vsel %vm6875_vm12, %v7548_v6, %v7552_v20  ;;  %v7561_v15 = vsel %vm6875_vm12, %v7556_v31, %v7560_v2  ;;  %v7568_v61 = vrot.slane %v21531_v11, 1 }
 0x308   : > { %21529 = vst [vmem:[#allocation41_spill] sm:$0xff] %v19126_v25  ;;  %v5452_v18 = vpop.f32.mrf.mxu0 }
 0x309   : > { %v19131_v12 = vadd.f32 %v5452_v18, %v5035_v42  ;;  %v15199_v13 = vpop.f32.mrf.mxu1  ;;  %15382 = vmatmul.mubr.msk.bf16.gmra.mxu1 %vm317_vm2, %v7553_v55  ;;  %v19142_v42 = vld [vmem:[#allocation2 + $0xa4] ss:$0 sps:$4 sm:$0x11]   ;;  %v7902_v18 = vrot.slane %v18696_v46, 1  ;;  %v8202_v46 = vshrl.u32 %v18952_v7, 16 }
 0x30a   : > { %v15191_v9 = vpop.f32.mrf.mxu0  ;;  %15418 = vmatmul.mubr.msk.bf16.gmra.mxu0 %vm317_vm2, %v7899_v59  ;;  %v5820_v57 = vadd.f32 %v15199_v13, %v18909_v40  ;;  %15385 = vmatprep.mubr.msk.bf16.mxu1 %vm317_vm2, %v7561_v15  ;;  %v7572_v40 = vor.u32 %v21533_v33, %v7568_v61  ;;  %v21534_v13 = vshll.u32 %v18739_v44, 16  ;;  %v8205_v33 = vshll.u32 %v18952_v7, 16 }
 0x30b   : > { %v19144_v45 = vadd.f32 %v15191_v9, %v15151_v38  ;;  %15421 = vmatprep.mubr.msk.bf16.mxu0 %vm317_vm2, %v7901_v63  ;;  %v5675_v55 = vpop.f32.mrf.mxu1  ;;  %v21535_v38 = vshrl.u32 %v18716_v41, 16  ;;  %v7904_v63 = vrot.slane %v18716_v41, 1 }
 0x30c   : > { %v19147_v20 = vpop.f32.mrf.mxu0  ;;  %v19150_v6 = vadd.f32 %v5675_v55, %v18912_v27  ;;  %v7576_v59 = vrot.slane %v21534_v13, 1  ;;  %v7582_v27 = vshll.u32 %v19142_v42, 16 }
 0x30d   : > { %v15200_v31 = vpop.f32.mrf.mxu1  ;;  %v7564_v11 = vor.u32 %v21535_v38, %v7560_v2  ;;  %v21537_v38 = vshrl.u32 %v18739_v44, 16 }
 0x30e   : > { %21532 = vst [vmem:[#allocation54_spill] sm:$0xff] %v19150_v6  ;;  %v15192_v15 = vpop.f32.mrf.mxu0  ;;  %v5821_v9 = vadd.f32 %v15200_v31, %v18915_v56  ;;  %v7903_v56 = vsel %vm7874_vm7, %v7900_v48, %v7902_v18  ;;  %v7577_v41 = vsel %vm6875_vm12, %v7572_v40, %v7576_v59  ;;  %v8207_v40 = vrot.slane %v8205_v33, 2 }
 0x30f   : > { %v19162_v55 = vadd.f32 %v15192_v15, %v15152_v39  ;;  %v5678_v25 = vpop.f32.mrf.mxu1  ;;  %v7569_v2 = vsel %vm6875_vm12, %v7564_v11, %v7568_v61  ;;  %v7905_v15 = vsel %vm7874_vm7, %v7902_v18, %v7904_v63  ;;  %v8204_v11 = vrot.slane %v8202_v46, 1 }
 0x310   : > { %v19166_v6 = vpop.f32.mrf.mxu0  ;;  %v19169_v13 = vadd.f32 %v5678_v25, %v18917_v50  ;;  %v7580_v50 = vor.u32 %v21537_v38, %v7576_v59  ;;  %v7584_v25 = vrot.slane %v7582_v27, 1  ;;  %v7908_v27 = vrot.slane %v18739_v44, 1 }
 0x311   : > { %21536 = vst [vmem:[#allocation55_spill] sm:$0xff] %v19166_v6  ;;  %v15203_v31 = vpop.f32.mrf.mxu1  ;;  %15386 = vmatmul.mubr.msk.bf16.gmra.mxu1 %vm317_vm2, %v7569_v2  ;;  %v8208_v46 = vor.u32 %v8207_v40, %v8204_v11 }
 0x312   : > { %v15239_v39 = vpop.f32.mrf.mxu0  ;;  %15422 = vmatmul.mubr.msk.bf16.gmra.mxu0 %vm317_vm2, %v7903_v56  ;;  %v5824_v7 = vadd.f32 %v15203_v31, %v18931_v17  ;;  %15389 = vmatprep.mubr.msk.bf16.mxu1 %vm317_vm2, %v7577_v41  ;;  %v7906_v17 = vrot.slane %v18727_v24, 1 }
 0x313   : > { %v19181_v61 = vadd.f32 %v15239_v39, %v5820_v57  ;;  %15425 = vmatprep.mubr.msk.bf16.mxu0 %vm317_vm2, %v7905_v15  ;;  %v5691_v48 = vpop.f32.mrf.mxu1  ;;  %v7585_v57 = vsel %vm6875_vm12, %v7580_v50, %v7584_v25  ;;  %v8212_v24 = vsel %vm8200_vm1, %v8208_v46, %v18766_v35 }
 0x314   : > { %v19184_v2 = vpop.f32.mrf.mxu0  ;;  %v19187_v56 = vadd.f32 %v5691_v48, %v18935_v34  ;;  %v7907_v34 = vsel %vm7874_vm7, %v7904_v63, %v7906_v17  ;;  %v7910_v63 = vrot.slane %v19142_v42, 1 }
 0x315   : > { %v15204_v18 = vpop.f32.mrf.mxu1 }
 0x316   : > { %v15240_v31 = vpop.f32.mrf.mxu0  ;;  %v5825_v59 = vadd.f32 %v15204_v18, %v18937_v1  ;;  %v7909_v1 = vsel %vm7874_vm7, %v7906_v17, %v7908_v27 }
 0x317   : > { %v19193_v41 = vadd.f32 %v15240_v31, %v5821_v9  ;;  %v5694_v39 = vpop.f32.mrf.mxu1 }
 0x318   : > { %v19195_v33 = vpop.f32.mrf.mxu0  ;;  %v19198_v15 = vadd.f32 %v5694_v39, %v18948_v60 }
 0x319   : > { %v15207_v38 = vpop.f32.mrf.mxu1  ;;  %15390 = vmatmul.mubr.msk.bf16.gmra.mxu1 %vm317_vm2, %v7585_v57 }
 0x31a   : > { %v15243_v44 = vpop.f32.mrf.mxu0  ;;  %15426 = vmatmul.mubr.msk.bf16.gmra.mxu0 %vm317_vm2, %v7907_v34  ;;  %v5828_v9 = vadd.f32 %v15207_v38, %v18956_v10  ;;  %15437 = vmatprep.mubr.msk.bf16.mxu1 %vm317_vm2, %v8212_v24  ;;  %v7911_v10 = vsel %vm7874_vm7, %v7908_v27, %v7910_v63 }
 0x31b   : > { %v19208_v50 = vadd.f32 %v15243_v44, %v5824_v7  ;;  %15429 = vmatprep.mubr.msk.bf16.mxu0 %vm317_vm2, %v7909_v1  ;;  %v5707_v60 = vpop.f32.mrf.mxu1  ;;  %v21539_v44 = vld [vmem:[#allocation34_spill] sm:$0xff] }
 0x31c   : > { %v19212_v25 = vpop.f32.mrf.mxu0  ;;  %v19215_v35 = vadd.f32 %v5707_v60, %v18963_v26 }
 0x31d   : > { %v15208_v48 = vpop.f32.mrf.mxu1 }
 0x31e   : > { %v15244_v11 = vpop.f32.mrf.mxu0  ;;  %v5829_v40 = vadd.f32 %v15208_v48, %v18973_v23 }
 0x31f   : > { %v19218_v18 = vadd.f32 %v15244_v11, %v5825_v59  ;;  %v5710_v7 = vpop.f32.mrf.mxu1 }
 0x320   : > { %v19221_v17 = vpop.f32.mrf.mxu0  ;;  %v19224_v31 = vadd.f32 %v5710_v7, %v18982_v62 }
 0x321   : > { %v15211_v42 = vpop.f32.mrf.mxu1  ;;  %15438 = vmatmul.mubr.msk.bf16.vlgmr.msra.gmra.mxu1 %vm317_vm2, %v18781_v5 }
 0x322   : > { %v15247_v26 = vpop.f32.mrf.mxu0  ;;  %15430 = vmatmul.mubr.msk.bf16.gmra.mxu0 %vm317_vm2, %v7911_v10  ;;  %v5832_v57 = vadd.f32 %v15211_v42, %v18995_v37  ;;  %15441 = vmatprep.mubr.msk.bf16.mxu1 %vm317_vm2, %v18797_v3 }
 0x323   : > { %v19232_v23 = vadd.f32 %v15247_v26, %v5828_v9  ;;  %v5723_v59 = vpop.f32.mrf.mxu1  ;;  %v21540_v9 = vld [vmem:[#allocation35_spill] sm:$0xff] }
 0x324   : > { %v19234_v27 = vpop.f32.mrf.mxu0  ;;  %v19237_v62 = vadd.f32 %v5723_v59, %v19004_v8 }
 0x325   : > { %v15212_v39 = vpop.f32.mrf.mxu1 }
 0x326   : > { %v15248_v46 = vpop.f32.mrf.mxu0  ;;  %v5833_v5 = vadd.f32 %v15212_v39, %v19009_v58  ;;  %v21546_v39 = vld [vmem:[#allocation40_spill] sm:$0xff] }
 0x327   : > { %v19240_v34 = vadd.f32 %v15248_v46, %v5829_v40  ;;  %v5726_v38 = vpop.f32.mrf.mxu1 }
 0x328   : > { %v19242_v24 = vpop.f32.mrf.mxu0  ;;  %v19245_v37 = vadd.f32 %v5726_v38, %v19016_v29 }
 0x329   : > { %v15215_v3 = vpop.f32.mrf.mxu1  ;;  %15442 = vmatmul.mubr.msk.bf16.gmra.mxu1 %vm317_vm2, %v21539_v44 }
 0x32a   : > { %21538 = vst [vmem:[#allocation56_spill] sm:$0xff] %v19245_v37  ;;  %v15251_v1 = vpop.f32.mrf.mxu0  ;;  %v5836_v8 = vadd.f32 %v15215_v3, %v19022_v53  ;;  %15445 = vmatprep.mubr.msk.bf16.mxu1 %vm317_vm2, %v21540_v9  ;;  %v13344_v53 = vld [vmem:[%s21179_s5 + $0x38] sm:$0xff] }
 0x32b   : > { %v19252_v60 = vadd.f32 %v15251_v1, %v5832_v57  ;;  %v5739_v58 = vpop.f32.mrf.mxu1  ;;  %15473 = vmatprep.subr.mxu0 %v13344_v53 }
 0x32c   : > { %v19254_v63 = vpop.f32.mrf.mxu0  ;;  %v19257_v48 = vadd.f32 %v5739_v58, %v19030_v54  ;;  %v21545_v54 = vld [vmem:[#allocation38_spill] sm:$0xff]  ;;  %15474 = vmatpush3.msra.mxu0 %v13344_v53 }
 0x32d   : > { %21541 = vst [vmem:[#allocation34_spill] sm:$0xff] %v19254_v63  ;;  %v15216_v29 = vpop.f32.mrf.mxu1 }
 0x32e   : > { %21542 = vst [vmem:[#allocation35_spill] sm:$0xff] %v19257_v48  ;;  %v15252_v11 = vpop.f32.mrf.mxu0  ;;  %v5837_v40 = vadd.f32 %v15216_v29, %v19034_v0 }
 0x32f   : > { %v19260_v10 = vadd.f32 %v15252_v11, %v5833_v5  ;;  %v5742_v7 = vpop.f32.mrf.mxu1 }
 0x330   : > { %v19265_v42 = vpop.f32.mrf.mxu0  ;;  %v19268_v26 = vadd.f32 %v5742_v7, %v19042_v22 }
 0x331   : > { %21543 = vst [vmem:[#allocation57_spill] sm:$0xff] %v19265_v42  ;;  %v15219_v57 = vpop.f32.mrf.mxu1  ;;  %15446 = vmatmul.mubr.msk.bf16.gmra.mxu1 %vm317_vm2, %v21545_v54 }
 0x332   : > { %21544 = vst [vmem:[#allocation58_spill] sm:$0xff] %v19268_v26  ;;  %v15255_v59 = vpop.f32.mrf.mxu0  ;;  %v5840_v0 = vadd.f32 %v15219_v57, %v19057_v51  ;;  %15449 = vmatprep.mubr.msk.bf16.mxu1 %vm317_vm2, %v21546_v39 }
 0x333   : > { %v19275_v46 = vadd.f32 %v15255_v59, %v5836_v8  ;;  %v5755_v5 = vpop.f32.mrf.mxu1 }
 0x334   : > { %v19277_v38 = vpop.f32.mrf.mxu0  ;;  %v19280_v22 = vadd.f32 %v5755_v5, %v19062_v47 }
 0x335   : > { %21547 = vst [vmem:[#allocation38_spill] sm:$0xff] %v19277_v38  ;;  %v15220_v3 = vpop.f32.mrf.mxu1 }
 0x336   : > { %21548 = vst [vmem:[#allocation40_spill] sm:$0xff] %v19280_v22  ;;  %v15256_v44 = vpop.f32.mrf.mxu0  ;;  %v5841_v1 = vadd.f32 %v15220_v3, %v19070_v36 }
 0x337   : > { %v19283_v9 = vadd.f32 %v15256_v44, %v5837_v40  ;;  %v5758_v58 = vpop.f32.mrf.mxu1  ;;  %v21556_v44 = vld [vmem:[#allocation31_spill] sm:$0xff] }
 0x338   : > { %v19285_v29 = vpop.f32.mrf.mxu0  ;;  %v19288_v51 = vadd.f32 %v5758_v58, %v19075_v43 }
 0x339   : > { %21549 = vst [vmem:[#allocation59_spill] sm:$0xff] %v19285_v29  ;;  %v15223_v8 = vpop.f32.mrf.mxu1  ;;  %15450 = vmatmul.mubr.msk.bf16.gmra.mxu1 %vm317_vm2, %v18828_v21 }
 0x33a   : > { %21550 = vst [vmem:[#allocation60_spill] sm:$0xff] %v19288_v51  ;;  %v15259_v11 = vpop.f32.mrf.mxu0  ;;  %v5844_v47 = vadd.f32 %v15223_v8, %v19083_v28  ;;  %15453 = vmatprep.mubr.msk.bf16.mxu1 %vm317_vm2, %v18837_v49 }
 0x33b   : > { %v19295_v7 = vadd.f32 %v15259_v11, %v5840_v0  ;;  %v5771_v36 = vpop.f32.mrf.mxu1 }
 0x33c   : > { %v19297_v40 = vpop.f32.mrf.mxu0  ;;  %v19300_v53 = vadd.f32 %v5771_v36, %v19088_v19  ;;  %v13343_v19 = vld [vmem:[%s21179_s5 + $0x30] sm:$0xff] }
 0x33d   : > { %21551 = vst [vmem:[#allocation61_spill] sm:$0xff] %v19297_v40  ;;  %v15224_v43 = vpop.f32.mrf.mxu1  ;;  %15475 = vmatprep.subr.mxu0 %v13343_v19 }
 0x33e   : > { %21552 = vst [vmem:[#allocation62_spill] sm:$0xff] %v19300_v53  ;;  %v15260_v57 = vpop.f32.mrf.mxu0  ;;  %v5845_v54 = vadd.f32 %v15224_v43, %v19096_v32  ;;  %15476 = vmatpush3.msra.mxu0 %v13343_v19  ;;  %v21560_v43 = vld [vmem:[#allocation43_spill] sm:$0xff] }
 0x33f   : > { %v19303_v59 = vadd.f32 %v15260_v57, %v5841_v1  ;;  %v5774_v21 = vpop.f32.mrf.mxu1  ;;  %v21561_v57 = vld [vmem:[#allocation29_spill] sm:$0xff] }
 0x340   : > { %v19305_v39 = vpop.f32.mrf.mxu0  ;;  %v19308_v28 = vadd.f32 %v5774_v21, %v19101_v16  ;;  %v5466_v21 = vadd.f32 %v19147_v20, %v21561_v57 }
 0x341   : > { %21553 = vst [vmem:[#allocation63_spill] sm:$0xff] %v19305_v39  ;;  %v15227_v49 = vpop.f32.mrf.mxu1  ;;  %15454 = vmatmul.mubr.msk.bf16.gmra.mxu1 %vm317_vm2, %v18840_v30 }
 0x342   : > { %21554 = vst [vmem:[#allocation64_spill] sm:$0xff] %v19308_v28  ;;  %v15263_v0 = vpop.f32.mrf.mxu0  ;;  %v5848_v5 = vadd.f32 %v15227_v49, %v19109_v4  ;;  %15457 = vmatprep.mubr.msk.bf16.mxu1 %vm317_vm2, %v18851_v14 }
 0x343   : > { %v19318_v32 = vadd.f32 %v15263_v0, %v5844_v47  ;;  %v5787_v3 = vpop.f32.mrf.mxu1  ;;  %v21562_v0 = vld [vmem:[#allocation46_spill] sm:$0xff] }
 0x344   : > { %v19320_v16 = vpop.f32.mrf.mxu0  ;;  %v19323_v1 = vadd.f32 %v5787_v3, %v21556_v44 }
 0x345   : > { %21555 = vst [vmem:[#allocation65_spill] sm:$0xff] %v19320_v16  ;;  %v15228_v30 = vpop.f32.mrf.mxu1 }
 0x346   : > { %21557 = vst [vmem:[#allocation31_spill] sm:$0xff] %v19323_v1  ;;  %v15264_v58 = vpop.f32.mrf.mxu0  ;;  %v5849_v8 = vadd.f32 %v15228_v30, %v19124_v52 }
 0x347   : > { %v19326_v11 = vadd.f32 %v15264_v58, %v5845_v54  ;;  %v5790_v4 = vpop.f32.mrf.mxu1 }
 0x348   : > { %v19328_v36 = vpop.f32.mrf.mxu0  ;;  %v19331_v14 = vadd.f32 %v5790_v4, %v19131_v12 }
 0x349   : > { %21558 = vst [vmem:[#allocation66_spill] sm:$0xff] %v19328_v36  ;;  %v15231_v47 = vpop.f32.mrf.mxu1  ;;  %15458 = vmatmul.mubr.msk.bf16.gmra.mxu1 %vm317_vm2, %v21560_v43 }
 0x34a   : > { %21559 = vst [vmem:[#allocation67_spill] sm:$0xff] %v19331_v14  ;;  %v15267_v49 = vpop.f32.mrf.mxu0  ;;  %v5852_v19 = vadd.f32 %v15231_v47, %v19144_v45  ;;  %15461 = vmatprep.mubr.msk.bf16.mxu1 %vm317_vm2, %v21562_v0  ;;  %v21567_v47 = vld [vmem:[#allocation50_spill] sm:$0xff] }
 0x34b   : > { %v19340_v52 = vadd.f32 %v15267_v49, %v5848_v5  ;;  %v5803_v54 = vpop.f32.mrf.mxu1  ;;  %v21568_v49 = vld [vmem:[#allocation51_spill] sm:$0xff] }
 0x34c   : > { %v19342_v3 = vpop.f32.mrf.mxu0  ;;  %v19344_v12 = vadd.f32 %v5803_v54, %v5466_v21 }
 0x34d   : > { %21563 = vst [vmem:[#allocation43_spill] sm:$0xff] %v19342_v3  ;;  %v15232_v44 = vpop.f32.mrf.mxu1 }
 0x34e   : > { %21564 = vst [vmem:[#allocation29_spill] sm:$0xff] %v19344_v12  ;;  %v15268_v30 = vpop.f32.mrf.mxu0  ;;  %v5853_v58 = vadd.f32 %v15232_v44, %v19162_v55  ;;  %v13342_v55 = vld [vmem:[%s21179_s5 + $0x28] sm:$0xff] }
 0x34f   : > { %v19347_v4 = vadd.f32 %v15268_v30, %v5849_v8  ;;  %v19349_v20 = vpop.f32.mrf.mxu1  ;;  %15477 = vmatprep.subr.mxu0 %v13342_v55 }
 0x350   : > { %21565 = vst [vmem:[#allocation46_spill] sm:$0xff] %v19349_v20  ;;  %v19351_v43 = vpop.f32.mrf.mxu0  ;;  %15478 = vmatpush3.msra.mxu0 %v13342_v55 }
 0x351   : > { %21566 = vst [vmem:[#allocation68_spill] sm:$0xff] %v19351_v43  ;;  %v15279_v45 = vpop.f32.mrf.mxu1  ;;  %15462 = vmatmul.mubr.msk.bf16.gmra.mxu1 %vm317_vm2, %v21567_v47 }
 0x352   : > { %v15271_v5 = vpop.f32.mrf.mxu0  ;;  %v6706_v57 = vadd.f32 %v15279_v45, %v19181_v61  ;;  %15465 = vmatprep.mubr.msk.bf16.mxu1 %vm317_vm2, %v21568_v49 }
 0x353   : > { %v19358_v21 = vadd.f32 %v15271_v5, %v5852_v19  ;;  %v19360_v0 = vpop.f32.mrf.mxu1  ;;  %v21571_v5 = vld [vmem:[#allocation52_spill] sm:$0xff] }
 0x354   : > { %v19365_v8 = vpop.f32.mrf.mxu0 }
 0x355   : > { %21569 = vst [vmem:[#allocation50_spill] sm:$0xff] %v19365_v8  ;;  %v15280_v54 = vpop.f32.mrf.mxu1  ;;  %v21572_v8 = vld [vmem:[#allocation53_spill] sm:$0xff] }
 0x356   : > { %v15272_v44 = vpop.f32.mrf.mxu0  ;;  %v6707_v30 = vadd.f32 %v15280_v54, %v19193_v41 }
 0x357   : > { %v19368_v61 = vadd.f32 %v15272_v44, %v5853_v58  ;;  %v19370_v45 = vpop.f32.mrf.mxu1 }
 0x358   : > { %v19372_v19 = vpop.f32.mrf.mxu0 }
 0x359   : > { %21570 = vst [vmem:[#allocation51_spill] sm:$0xff] %v19372_v19  ;;  %v15283_v47 = vpop.f32.mrf.mxu1  ;;  %15466 = vmatmul.mubr.msk.bf16.gmra.mxu1 %vm317_vm2, %v21571_v5 }
 0x35a   : > { %v15319_v49 = vpop.f32.mrf.mxu0  ;;  %v6710_v12 = vadd.f32 %v15283_v47, %v19208_v50  ;;  %15469 = vmatprep.mubr.msk.bf16.mxu1 %vm317_vm2, %v21572_v8  ;;  %v21573_v47 = vld [vmem:[#allocation27_spill] sm:$0xff] }
 0x35b   : > { %v19379_v55 = vadd.f32 %v15319_v49, %v6706_v57  ;;  %v19381_v20 = vpop.f32.mrf.mxu1 }
 0x35c   : > { %v19383_v41 = vpop.f32.mrf.mxu0 }
 0x35d   : > { %v15284_v58 = vpop.f32.mrf.mxu1 }
 0x35e   : > { %v15320_v54 = vpop.f32.mrf.mxu0  ;;  %v6711_v44 = vadd.f32 %v15284_v58, %v19218_v18 }
 0x35f   : > { %v19386_v19 = vadd.f32 %v15320_v54, %v6707_v30  ;;  %v19388_v43 = vpop.f32.mrf.mxu1  ;;  %v13341_v30 = vld [vmem:[%s21179_s5 + $0x20] sm:$0xff] }
 0x360   : > { %v19390_v5 = vpop.f32.mrf.mxu0  ;;  %15479 = vmatprep.subr.mxu0 %v13341_v30 }
 0x361   : > { %v15287_v50 = vpop.f32.mrf.mxu1  ;;  %15470 = vmatmul.mubr.msk.bf16.gmra.mxu1 %vm317_vm2, %v21573_v47  ;;  %15480 = vmatpush3.msra.mxu0 %v13341_v30 }
 0x362   : > { %v15323_v57 = vpop.f32.mrf.mxu0  ;;  %v6714_v8 = vadd.f32 %v15287_v50, %v19232_v23 }
 0x363   : > { %v19395_v49 = vadd.f32 %v15323_v57, %v6710_v12  ;;  %v19397_v14 = vpop.f32.mrf.mxu1 }
 0x364   : > { %v19399_v6 = vpop.f32.mrf.mxu0 }
 0x365   : > { %v15288_v18 = vpop.f32.mrf.mxu1 }
 0x366   : > { %v15324_v58 = vpop.f32.mrf.mxu0  ;;  %v6715_v54 = vadd.f32 %v15288_v18, %v19240_v34 }
 0x367   : > { %v19405_v3 = vadd.f32 %v15324_v58, %v6711_v44  ;;  %v19407_v47 = vpop.f32.mrf.mxu1 }
 0x368   : > { %v19409_v23 = vpop.f32.mrf.mxu0 }
 0x369   : > { %v15291_v12 = vpop.f32.mrf.mxu1 }
 0x36a   : > { %v15327_v50 = vpop.f32.mrf.mxu0  ;;  %v6718_v57 = vadd.f32 %v15291_v12, %v19252_v60  ;;  %v8755_v60 = vld [vmem:[%s21179_s5 + $0x18] sm:$0xff] }
 0x36b   : > { %v19412_v1 = vadd.f32 %v15327_v50, %v6714_v8  ;;  %v19414_v36 = vpop.f32.mrf.mxu1  ;;  %15535 = vmatprep.subr.mxu1 %v8755_v60 }
 0x36c   : > { %21574 = vst [vmem:[#allocation52_spill] sm:$0xff] %v19414_v36  ;;  %v19416_v28 = vpop.f32.mrf.mxu0  ;;  %15536 = vmatpush3.msra.mxu1 %v8755_v60 }
 0x36d   : > { %v15292_v16 = vpop.f32.mrf.mxu1 }
 0x36e   : > { %v15328_v34 = vpop.f32.mrf.mxu0  ;;  %v6719_v44 = vadd.f32 %v15292_v16, %v19260_v10  ;;  %v8754_v10 = vld [vmem:[%s21179_s5 + $0x10] sm:$0xff] }
 0x36f   : > { %v19419_v18 = vadd.f32 %v15328_v34, %v6715_v54  ;;  %v19421_v58 = vpop.f32.mrf.mxu1  ;;  %15537 = vmatprep.subr.mxu1 %v8754_v10 }
 0x370   : > { %21575 = vst [vmem:[#allocation53_spill] sm:$0xff] %v19421_v58  ;;  %v19423_v30 = vpop.f32.mrf.mxu0  ;;  %15538 = vmatpush3.msra.mxu1 %v8754_v10 }
 0x371   : > { %21576 = vst [vmem:[#allocation27_spill] sm:$0xff] %v19423_v30  ;;  %v15295_v53 = vpop.f32.mrf.mxu1 }
 0x372   : > { %v15331_v8 = vpop.f32.mrf.mxu0  ;;  %v6722_v12 = vadd.f32 %v15295_v53, %v19275_v46  ;;  %v8753_v46 = vld [vmem:[%s21179_s5 + $0x8] sm:$0xff] }
 0x373   : > { %v19429_v50 = vadd.f32 %v15331_v8, %v6718_v57  ;;  %v19431_v39 = vpop.f32.mrf.mxu1  ;;  %15539 = vmatprep.subr.mxu1 %v8753_v46  ;;  %v8752_v8 = vld [vmem:[%s21179_s5] sm:$0xff] }
 0x374   : > { %21577 = vst [vmem:[#allocation69_spill] sm:$0xff] %v19431_v39  ;;  %v19436_v16 = vpop.f32.mrf.mxu0  ;;  %15540 = vmatpush3.msra.mxu1 %v8753_v46 }
 0x375   : > { %21578 = vst [vmem:[#allocation70_spill] sm:$0xff] %v19436_v16  ;;  %v15296_v54 = vpop.f32.mrf.mxu1  ;;  %15541 = vmatprep.subr.mxu1 %v8752_v8  ;;  %v13417_v16 = vld [vmem:[%s21179_s5 + $0x40] sm:$0xff] }
 0x376   : > { %v15332_v53 = vpop.f32.mrf.mxu0  ;;  %v6723_v57 = vadd.f32 %v15296_v54, %v19283_v9  ;;  %15542 = vmatpush3.msra.mxu1 %v8752_v8  ;;  %v13420_v54 = vld [vmem:[%s21179_s5 + $0x58] sm:$0xff] }
 0x377   : > { %v19442_v34 = vadd.f32 %v15332_v53, %v6719_v44  ;;  %v19444_v60 = vpop.f32.mrf.mxu1  ;;  %v16172_v44 = vmov 0.0   ;;  %15597 = vmatprep.subr.mxu0 %v13420_v54 }
 0x378   : > { %21579 = vst [vmem:[#allocation71_spill] sm:$0xff] %v19444_v60  ;;  %v19456_v9 = vpop.f32.mrf.mxu0  ;;  %318 = vst.msk [vmem:[#allocation3] sm:$0xff] %vm317_vm2, %v16172_v44 }
 0x379   : > { %21580 = vst [vmem:[#allocation72_spill] sm:$0xff] %v19456_v9  ;;  %319 = vst.msk [vmem:[#allocation3 + $0x8] sm:$0xff] %vm317_vm2, %v16172_v44  ;;  %v15299_v10 = vpop.f32.mrf.mxu1 }
 0x37a   : > { %12556 = vst.msk [vmem:[%s19454_s13] sm:$0xff] %vm471_vm0, %v16172_v44  ;;  %12557 = vst.msk [vmem:[%s19454_s13 + $0x8] sm:$0xff] %vm471_vm0, %v16172_v44  ;;  %v15335_v46 = vpop.f32.mrf.mxu0  ;;  %v6726_v53 = vadd.f32 %v15299_v10, %v19295_v7 }
 0x37b   : > { %12558 = vst.msk [vmem:[%s19454_s13 + $0x10] sm:$0xff] %vm471_vm0, %v16172_v44  ;;  %12595 = vst.msk [vmem:[%s19454_s13 + $0x138] sm:$0xff] %vm471_vm0, %v16172_v44  ;;  %v19480_v51 = vadd.f32 %v15335_v46, %v6722_v12  ;;  %v19482_v40 = vpop.f32.mrf.mxu1 }
 0x37c   : > { %12596 = vst.msk [vmem:[%s19454_s13 + $0x140] sm:$0xff] %vm471_vm0, %v16172_v44  ;;  %12597 = vst.msk [vmem:[%s19454_s13 + $0x148] sm:$0xff] %vm471_vm0, %v16172_v44  ;;  %v19484_v22 = vpop.f32.mrf.mxu0 }
 0x37d   : > { %320 = vst.msk [vmem:[#allocation3 + $0x10] sm:$0xff] %vm317_vm2, %v16172_v44  ;;  %321 = vst.msk [vmem:[#allocation3 + $0x138] sm:$0xff] %vm317_vm2, %v16172_v44  ;;  %v15300_v60 = vpop.f32.mrf.mxu1 }
 0x37e   : > { %322 = vst.msk [vmem:[#allocation3 + $0x140] sm:$0xff] %vm317_vm2, %v16172_v44  ;;  %323 = vst.msk [vmem:[#allocation3 + $0x148] sm:$0xff] %vm317_vm2, %v16172_v44  ;;  %v15336_v29 = vpop.f32.mrf.mxu0  ;;  %v6727_v44 = vadd.f32 %v15300_v60, %v19303_v59 }
 0x37f   : > { %21581 = vst [vmem:[#allocation73_spill] sm:$0xff] %v19482_v40  ;;  %21582 = vst [vmem:[#allocation74_spill] sm:$0xff] %v19484_v22  ;;  %v19487_v26 = vadd.f32 %v15336_v29, %v6723_v57  ;;  %v19489_v8 = vpop.f32.mrf.mxu1 }
 0x380   : > { %21583 = vst [vmem:[#allocation75_spill] sm:$0xff] %v19489_v8  ;;  %v8756_v39 = vld [vmem:[#allocation3 + $0x6] sm:$0xff]  ;;  %v19491_v48 = vpop.f32.mrf.mxu0 }
 0x381   : > { %v8716_v9 = vld [vmem:[#allocation3 + $0x5] sm:$0xff]  ;;  %21584 = vst [vmem:[#allocation76_spill] sm:$0xff] %v19491_v48  ;;  %15481 = vmatprep.mubr.msk.f32.mxu0 %vm317_vm2, %v8756_v39  ;;  %v15303_v12 = vpop.f32.mrf.mxu1 }
 0x382   : > { %15543 = vmatprep.mubr.msk.f32.mxu1 %vm317_vm2, %v8716_v9  ;;  %v15339_v59 = vpop.f32.mrf.mxu0  ;;  %v6730_v29 = vadd.f32 %v15303_v12, %v19318_v32  ;;  %v13419_v12 = vld [vmem:[%s21179_s5 + $0x50] sm:$0xff] }
 0x383   : > { %v19498_v57 = vadd.f32 %v15339_v59, %v6726_v53  ;;  %v19500_v60 = vpop.f32.mrf.mxu1 }
 0x384   : > { %v8757_v38 = vld [vmem:[#allocation3 + $0xe] sm:$0xff]  ;;  %21585 = vst [vmem:[#allocation77_spill] sm:$0xff] %v19500_v60  ;;  %v19502_v10 = vpop.f32.mrf.mxu0 }
 0x385   : > { %v8717_v7 = vld [vmem:[#allocation3 + $0xd] sm:$0xff]  ;;  %15482 = vmatmul.mubr.msk.f32.vlgmr.msra.gmra.mxu0 %vm317_vm2, %v8757_v38  ;;  %21586 = vst [vmem:[#allocation78_spill] sm:$0xff] %v19502_v10  ;;  %v15304_v46 = vpop.f32.mrf.mxu1 }
 0x386   : > { %15544 = vmatmul.mubr.msk.f32.vlgmr.msra.gmra.mxu1 %vm317_vm2, %v8717_v7  ;;  %15598 = vmatpush3.msra.mxu0 %v13420_v54  ;;  %v15340_v39 = vpop.f32.mrf.mxu0  ;;  %v6731_v9 = vadd.f32 %v15304_v46, %v19326_v11 }
 0x387   : > { %v19505_v8 = vadd.f32 %v15340_v39, %v6727_v44  ;;  %v19507_v40 = vpop.f32.mrf.mxu1  ;;  %15599 = vmatprep.subr.mxu0 %v13419_v12 }
 0x388   : > { %21587 = vst [vmem:[#allocation79_spill] sm:$0xff] %v19507_v40  ;;  %v19509_v38 = vpop.f32.mrf.mxu0  ;;  %15600 = vmatpush3.msra.mxu0 %v13419_v12 }
 0x389   : > { %21588 = vst [vmem:[#allocation80_spill] sm:$0xff] %v19509_v38  ;;  %v15307_v7 = vpop.f32.mrf.mxu1 }
 0x38a   : > { %v15343_v48 = vpop.f32.mrf.mxu0  ;;  %v6734_v32 = vadd.f32 %v15307_v7, %v19340_v52 }
 0x38b   : > { %v19512_v54 = vadd.f32 %v15343_v48, %v6730_v29  ;;  %v19514_v53 = vpop.f32.mrf.mxu1 }
 0x38c   : > { %21589 = vst [vmem:[#allocation81_spill] sm:$0xff] %v19514_v53  ;;  %v19519_v59 = vpop.f32.mrf.mxu0 }
 0x38d   : > { %21590 = vst [vmem:[#allocation82_spill] sm:$0xff] %v19519_v59  ;;  %v15308_v11 = vpop.f32.mrf.mxu1 }
 0x38e   : > { %v15344_v44 = vpop.f32.mrf.mxu0  ;;  %v6735_v46 = vadd.f32 %v15308_v11, %v19347_v4 }
 0x38f   : > { %v19522_v39 = vadd.f32 %v15344_v44, %v6731_v9  ;;  %v19524_v40 = vpop.f32.mrf.mxu1 }
 0x390   : > { %21591 = vst [vmem:[#allocation83_spill] sm:$0xff] %v19524_v40  ;;  %v19526_v48 = vpop.f32.mrf.mxu0 }
 0x391   : > { %21592 = vst [vmem:[#allocation84_spill] sm:$0xff] %v19526_v48  ;;  %v15311_v52 = vpop.f32.mrf.mxu1 }
 0x392   : > { %v15347_v29 = vpop.f32.mrf.mxu0  ;;  %v6738_v7 = vadd.f32 %v15311_v52, %v19358_v21 }
 0x393   : > { %v19529_v53 = vadd.f32 %v15347_v29, %v6734_v32  ;;  %v19531_v60 = vpop.f32.mrf.mxu1 }
 0x394   : > { %21593 = vst [vmem:[#allocation85_spill] sm:$0xff] %v19531_v60  ;;  %v19533_v59 = vpop.f32.mrf.mxu0 }
 0x395   : > { %21594 = vst [vmem:[#allocation86_spill] sm:$0xff] %v19533_v59  ;;  %v15312_v12 = vpop.f32.mrf.mxu1 }
 0x396   : > { %v15348_v38 = vpop.f32.mrf.mxu0  ;;  %v6739_v4 = vadd.f32 %v15312_v12, %v19368_v61  ;;  %v13418_v61 = vld [vmem:[%s21179_s5 + $0x48] sm:$0xff] }
 0x397   : > { %v19536_v9 = vadd.f32 %v15348_v38, %v6735_v46  ;;  %v19538_v11 = vpop.f32.mrf.mxu1  ;;  %15601 = vmatprep.subr.mxu0 %v13418_v61 }
 0x398   : > { %21595 = vst [vmem:[#allocation87_spill] sm:$0xff] %v19538_v11  ;;  %v19540_v44 = vpop.f32.mrf.mxu0  ;;  %15602 = vmatpush3.msra.mxu0 %v13418_v61 }
 0x399   : > { %21596 = vst [vmem:[#allocation88_spill] sm:$0xff] %v19540_v44  ;;  %v15359_v40 = vpop.f32.mrf.mxu1  ;;  %15603 = vmatprep.subr.mxu0 %v13417_v16 }
 0x39a   : > { %v15351_v48 = vpop.f32.mrf.mxu0  ;;  %v19543_v21 = vadd.f32 %v15359_v40, %v19379_v55  ;;  %15604 = vmatpush3.msra.mxu0 %v13417_v16 }
 0x39b   : > { %v19545_v32 = vadd.f32 %v15351_v48, %v6738_v7  ;;  %v19547_v52 = vpop.f32.mrf.mxu1 }
 0x39c   : > { %v19549_v29 = vpop.f32.mrf.mxu0 }
 0x39d   : > { %21597 = vst [vmem:[#allocation89_spill] sm:$0xff] %v19549_v29  ;;  %v15360_v60 = vpop.f32.mrf.mxu1 }
 0x39e   : > { %v15352_v38 = vpop.f32.mrf.mxu0  ;;  %v19555_v46 = vadd.f32 %v15360_v60, %v19386_v19 }
 0x39f   : > { %v19557_v12 = vadd.f32 %v15352_v38, %v6739_v4  ;;  %v19559_v40 = vpop.f32.mrf.mxu1 }
 0x3a0   : > { %v19561_v55 = vpop.f32.mrf.mxu0 }
 0x3a1   : > { %21598 = vst [vmem:[#allocation90_spill] sm:$0xff] %v19561_v55  ;;  %v15363_v48 = vpop.f32.mrf.mxu1 }
 0x3a2   : > { %v19563_v7 = vpop.f32.mrf.mxu0  ;;  %v19566_v11 = vadd.f32 %v15363_v48, %v19395_v49 }
 0x3a3   : > { %v19568_v29 = vpop.f32.mrf.mxu1 }
 0x3a4   : > { %v19570_v44 = vpop.f32.mrf.mxu0 }
 0x3a5   : > { %v15364_v19 = vpop.f32.mrf.mxu1 }
 0x3a6   : > { %v19572_v60 = vpop.f32.mrf.mxu0  ;;  %v19575_v4 = vadd.f32 %v15364_v19, %v19405_v3 }
 0x3a7   : > { %v19577_v38 = vpop.f32.mrf.mxu1 }
 0x3a8   : > { %v19579_v61 = vpop.f32.mrf.mxu0 }
 0x3a9   : > { %v15367_v55 = vpop.f32.mrf.mxu1 }
 0x3aa   : > { %v19581_v59 = vpop.f32.mrf.mxu0  ;;  %v19584_v49 = vadd.f32 %v15367_v55, %v19412_v1 }
 0x3ab   : > { %v19586_v48 = vpop.f32.mrf.mxu1 }
 0x3ac   : > { %v19588_v10 = vpop.f32.mrf.mxu0 }
 0x3ad   : > { %v15368_v22 = vpop.f32.mrf.mxu1 }
 0x3ae   : > { %v19590_v58 = vpop.f32.mrf.mxu0  ;;  %v19593_v3 = vadd.f32 %v15368_v22, %v19419_v18  ;;  %v13460_v22 = vld [vmem:[%s21179_s5 + $0x78] sm:$0xff]  ;;  %v13459_v18 = vld [vmem:[%s21179_s5 + $0x70] sm:$0xff] }
 0x3af   : > { %v19595_v19 = vpop.f32.mrf.mxu1  ;;  %15659 = vmatprep.subr.mxu1 %v13460_v22 }
 0x3b0   : > { %21599 = vst [vmem:[#allocation91_spill] sm:$0xff] %v19593_v3  ;;  %21600 = vst [vmem:[#allocation92_spill] sm:$0xff] %v19595_v19  ;;  %v19600_v1 = vpop.f32.mrf.mxu0  ;;  %15660 = vmatpush3.msra.mxu1 %v13460_v22  ;;  %v13500_v22 = vld [vmem:[%s21179_s5 + $0x98] sm:$0xff] }
 0x3b1   : > { %v15371_v42 = vpop.f32.mrf.mxu1  ;;  %15661 = vmatprep.subr.mxu1 %v13459_v18  ;;  %15721 = vmatprep.subr.mxu0 %v13500_v22 }
 0x3b2   : > { %v19603_v55 = vadd.f32 %v15371_v42, %v19429_v50  ;;  %v19613_v19 = vpop.f32.mrf.mxu0  ;;  %15662 = vmatpush3.msra.mxu1 %v13459_v18  ;;  %v13458_v50 = vld [vmem:[%s21179_s5 + $0x68] sm:$0xff] }
 0x3b3   : > { %v19605_v37 = vpop.f32.mrf.mxu1  ;;  %15663 = vmatprep.subr.mxu1 %v13458_v50 }
 0x3b4   : > { %21601 = vst [vmem:[#allocation93_spill] sm:$0xff] %v19603_v55  ;;  %21602 = vst [vmem:[#allocation94_spill] sm:$0xff] %v19605_v37  ;;  %v13457_v55 = vld [vmem:[%s21179_s5 + $0x60] sm:$0xff]  ;;  %15664 = vmatpush3.msra.mxu1 %v13458_v50 }
 0x3b5   : > { %v15372_v3 = vpop.f32.mrf.mxu1  ;;  %15665 = vmatprep.subr.mxu1 %v13457_v55 }
 0x3b6   : > { %v19616_v16 = vadd.f32 %v15372_v3, %v19442_v34  ;;  %v19629_v34 = vpop.f32.mrf.mxu0  ;;  %15666 = vmatpush3.msra.mxu1 %v13457_v55 }
 0x3b7   : > { %v19618_v42 = vpop.f32.mrf.mxu1 }
 0x3b8   : > { %21603 = vst [vmem:[#allocation95_spill] sm:$0xff] %v19616_v16  ;;  %21604 = vst [vmem:[#allocation96_spill] sm:$0xff] %v19618_v42  ;;  %v19636_v42 = vpop.f32.mrf.mxu0 }
 0x3b9   : > { %v15375_v37 = vpop.f32.mrf.mxu1 }
 0x3ba   : > { %v19632_v3 = vadd.f32 %v15375_v37, %v19480_v51  ;;  %v19643_v50 = vpop.f32.mrf.mxu0 }
 0x3bb   : > { %v19634_v18 = vpop.f32.mrf.mxu1 }
 0x3bc   : > { %21605 = vst [vmem:[#allocation97_spill] sm:$0xff] %v19632_v3  ;;  %21606 = vst [vmem:[#allocation98_spill] sm:$0xff] %v19634_v18  ;;  %v19650_v3 = vpop.f32.mrf.mxu0 }
 0x3bd   : > { %v15376_v16 = vpop.f32.mrf.mxu1 }
 0x3be   : > { %v19639_v36 = vadd.f32 %v15376_v16, %v19487_v26  ;;  %v19657_v16 = vpop.f32.mrf.mxu0 }
 0x3bf   : > { %v19641_v30 = vpop.f32.mrf.mxu1 }
 0x3c0   : > { %21607 = vst [vmem:[#allocation99_spill] sm:$0xff] %v19639_v36  ;;  %21608 = vst [vmem:[#allocation100_spill] sm:$0xff] %v19641_v30 }
 0x3c1   : > { %v15379_v63 = vpop.f32.mrf.mxu1 }
 0x3c2   : > { %v19646_v22 = vadd.f32 %v15379_v63, %v19498_v57  ;;  %v19664_v57 = vpop.f32.mrf.mxu0 }
 0x3c3   : > { %v19648_v37 = vpop.f32.mrf.mxu1 }
 0x3c4   : > { %21609 = vst [vmem:[#allocation101_spill] sm:$0xff] %v19646_v22  ;;  %21610 = vst [vmem:[#allocation102_spill] sm:$0xff] %v19648_v37 }
 0x3c5   : > { %v15380_v51 = vpop.f32.mrf.mxu1 }
 0x3c6   : > { %v19653_v55 = vadd.f32 %v15380_v51, %v19505_v8  ;;  %v19671_v51 = vpop.f32.mrf.mxu0 }
 0x3c7   : > { %v19655_v18 = vpop.f32.mrf.mxu1  ;;  %21617 = vst [vmem:[#allocation109_spill] sm:$0xff] %v19671_v51 }
 0x3c8   : > { %21611 = vst [vmem:[#allocation103_spill] sm:$0xff] %v19653_v55  ;;  %21612 = vst [vmem:[#allocation104_spill] sm:$0xff] %v19655_v18 }
 0x3c9   : > { %v15383_v26 = vpop.f32.mrf.mxu1 }
 0x3ca   : > { %v19660_v36 = vadd.f32 %v15383_v26, %v19512_v54  ;;  %v19678_v26 = vpop.f32.mrf.mxu0 }
 0x3cb   : > { %v19662_v30 = vpop.f32.mrf.mxu1 }
 0x3cc   : > { %21613 = vst [vmem:[#allocation105_spill] sm:$0xff] %v19660_v36  ;;  %21614 = vst [vmem:[#allocation106_spill] sm:$0xff] %v19662_v30 }
 0x3cd   : > { %v15384_v63 = vpop.f32.mrf.mxu1 }
 0x3ce   : > { %v19667_v22 = vadd.f32 %v15384_v63, %v19522_v39  ;;  %v21621_v63 = vld [vmem:[#allocation54_spill] sm:$0xff] }
 0x3cf   : > { %v19669_v37 = vpop.f32.mrf.mxu1 }
 0x3d0   : > { %21615 = vst [vmem:[#allocation107_spill] sm:$0xff] %v19667_v22  ;;  %21616 = vst [vmem:[#allocation108_spill] sm:$0xff] %v19669_v37  ;;  %v6402_v22 = vadd.f32 %v19184_v2, %v21621_v63  ;;  %v19687_v37 = vpop.f32.mrf.mxu0 }
 0x3d1   : > { %v15387_v8 = vpop.f32.mrf.mxu1 }
 0x3d2   : > { %v19674_v55 = vadd.f32 %v15387_v8, %v19529_v53  ;;  %v6704_v8 = vadd.f32 %v19360_v0, %v6402_v22  ;;  %v8157_v0 = vadd.f32 %v19563_v7, %v19543_v21  ;;  %v6406_v22 = vadd.f32 %v19212_v25, %v19187_v56 }
 0x3d3   : > { %v19676_v18 = vpop.f32.mrf.mxu1  ;;  %v8158_v56 = vadd.f32 %v19572_v60, %v19555_v46  ;;  %v8161_v60 = vadd.f32 %v19581_v59, %v19566_v11 }
 0x3d4   : > { %21618 = vst [vmem:[#allocation110_spill] sm:$0xff] %v19674_v55 }
 0x3d5   : > { %v15388_v54 = vpop.f32.mrf.mxu1 }
 0x3d6   : > { %v19681_v36 = vadd.f32 %v15388_v54, %v19536_v9  ;;  %v6403_v9 = vadd.f32 %v19195_v33, %v19169_v13  ;;  %v7267_v54 = vadd.f32 %v19383_v41, %v6704_v8  ;;  %v19714_v33 = vld [vmem:[%s21178_s4] ss:$0 sm:$0xff]  ;;  %v6407_v8 = vadd.f32 %v19221_v17, %v19198_v15 }
 0x3d7   : > { %v19683_v30 = vpop.f32.mrf.mxu1 }
 0x3d8   : > { %21619 = vst [vmem:[#allocation111_spill] sm:$0xff] %v19681_v36  ;;  %21620 = vst [vmem:[#allocation112_spill] sm:$0xff] %v19683_v30  ;;  %v19698_v36 = vpop.f32.mrf.mxu0 }
 0x3d9   : > { %v15391_v39 = vpop.f32.mrf.mxu1 }
 0x3da   : > { %v19690_v51 = vadd.f32 %v15391_v39, %v19545_v32  ;;  %v6705_v32 = vadd.f32 %v19370_v45, %v6403_v9  ;;  %v7829_v39 = vadd.f32 %v19547_v52, %v7267_v54  ;;  %v6708_v52 = vadd.f32 %v19381_v20, %v6406_v22 }
 0x3db   : > { %v19692_v53 = vpop.f32.mrf.mxu1 }
 0x3dc   : > { %v7268_v41 = vadd.f32 %v19390_v5, %v6705_v32  ;;  %v7271_v5 = vadd.f32 %v19399_v6, %v6708_v52 }
 0x3dd   : > { %v15392_v55 = vpop.f32.mrf.mxu1 }
 0x3de   : > { %v19701_v30 = vadd.f32 %v15392_v55, %v19557_v12  ;;  %v8155_v12 = vadd.f32 %v19570_v44, %v7829_v39  ;;  %v19718_v55 = vpop.f32.mrf.mxu0  ;;  %v7830_v21 = vadd.f32 %v19559_v40, %v7268_v41  ;;  %v6709_v39 = vadd.f32 %v19388_v43, %v6407_v8 }
 0x3df   : > { %v19703_v2 = vpop.f32.mrf.mxu1  ;;  %v7833_v46 = vadd.f32 %v19568_v29, %v7271_v5  ;;  %v6411_v5 = vadd.f32 %v19242_v24, %v19224_v31  ;;  %v8165_v24 = vadd.f32 %v19613_v19, %v19584_v49 }
 0x3e0   : > { %v8156_v9 = vadd.f32 %v19579_v61, %v7830_v21  ;;  %v19729_v54 = vpop.f32.mrf.mxu0  ;;  %v7272_v41 = vadd.f32 %v19409_v23, %v6709_v39 }
 0x3e1   : > { %v15439_v13 = vpop.f32.mrf.mxu1  ;;  %v8159_v43 = vadd.f32 %v19588_v10, %v7833_v46  ;;  %v6713_v39 = vadd.f32 %v19407_v47, %v6411_v5 }
 0x3e2   : > { %v8531_v45 = vadd.f32 %v15439_v13, %v8157_v0  ;;  %v6410_v13 = vadd.f32 %v19234_v27, %v19215_v35  ;;  %v7834_v35 = vadd.f32 %v19577_v38, %v7272_v41  ;;  %v8162_v27 = vadd.f32 %v19590_v58, %v19575_v4 }
 0x3e3   : > { %v8386_v63 = vpop.f32.mrf.mxu1 }
 0x3e4   : > { %v8574_v25 = vadd.f32 %v19714_v33, %v8531_v45  ;;  %v8529_v7 = vadd.f32 %v8386_v63, %v8155_v12  ;;  %v19744_v12 = vpop.f32.mrf.mxu0  ;;  %v6712_v21 = vadd.f32 %v19397_v14, %v6410_v13  ;;  %v8160_v38 = vadd.f32 %v19600_v1, %v7834_v35  ;;  %v21641_v1 = vld [vmem:[#allocation53_spill] sm:$0xff] }
 0x3e5   : > { %v15440_v44 = vpop.f32.mrf.mxu1 }
 0x3e6   : > { %v8610_v20 = vmax.f32 %v8574_v25, 0.0  ;;  %v8572_v32 = vadd.f32 %v19714_v33, %v8529_v7  ;;  %v8532_v40 = vadd.f32 %v15440_v44, %v8158_v56  ;;  %v7275_v14 = vadd.f32 %v19416_v28, %v6712_v21  ;;  %v19762_v4 = vpop.f32.mrf.mxu0  ;;  %v21633_v21 = vld [vmem:[#allocation91_spill] sm:$0xff] }
 0x3e7   : > { %v8389_v0 = vpop.f32.mrf.mxu1 }
 0x3e8   : > { %v8646_v6 = vsel %vm4392_vm11, %v8610_v20, 0.0  ;;  %v8608_v17 = vmax.f32 %v8572_v32, 0.0  ;;  %v8575_v61 = vadd.f32 %v19714_v33, %v8532_v40  ;;  %v8530_v22 = vadd.f32 %v8389_v0, %v8156_v9  ;;  %v19780_v19 = vpop.f32.mrf.mxu0 }
 0x3e9   : > { %8682 = vst.msk [vmem:[#allocation3 + $0x28] sm:$0xff] %vm317_vm2, %v8646_v6  ;;  %v15443_v29 = vpop.f32.mrf.mxu1  ;;  %v7837_v31 = vadd.f32 %v19586_v48, %v7275_v14  ;;  %v21627_v6 = vld [vmem:[#allocation34_spill] sm:$0xff] }
 0x3ea   : > { %v8644_v11 = vsel %vm4390_vm8, %v8608_v17, 0.0  ;;  %v8611_v45 = vmax.f32 %v8575_v61, 0.0  ;;  %v8573_v52 = vadd.f32 %v19714_v33, %v8530_v22  ;;  %v8535_v63 = vadd.f32 %v15443_v29, %v8161_v60  ;;  %v21628_v61 = vld [vmem:[#allocation27_spill] sm:$0xff]  ;;  %v21638_v14 = vld [vmem:[#allocation70_spill] sm:$0xff]  ;;  %v19800_v44 = vpop.f32.mrf.mxu0 }
 0x3eb   : > { %8680 = vst.msk [vmem:[#allocation3 + $0x18] sm:$0xff] %vm317_vm2, %v8644_v11  ;;  %v8402_v23 = vpop.f32.mrf.mxu1  ;;  %v6414_v17 = vadd.f32 %v21627_v6, %v19237_v62  ;;  %v7276_v47 = vadd.f32 %v21628_v61, %v6713_v39  ;;  %v8163_v48 = vadd.f32 %v19629_v34, %v7837_v31  ;;  %v21629_v22 = vld [vmem:[#allocation39_spill] sm:$0xff]  ;;  %v8166_v34 = vadd.f32 %v19636_v42, %v21633_v21  ;;  %v21644_v61 = vld [vmem:[#allocation5_spill] sm:$0xff] }
 0x3ec   : > { %v8647_v56 = vsel %vm4393_vm10, %v8611_v45, 0.0  ;;  %v8609_v25 = vmax.f32 %v8573_v52, 0.0  ;;  %v8578_v7 = vadd.f32 %v19714_v33, %v8535_v63  ;;  %v8533_v8 = vadd.f32 %v8402_v23, %v8159_v43  ;;  %v21631_v45 = vld [vmem:[#allocation52_spill] sm:$0xff] }
 0x3ed   : > { %8683 = vst.msk [vmem:[#allocation3 + $0x30] sm:$0xff] %vm317_vm2, %v8647_v56  ;;  %v15444_v58 = vpop.f32.mrf.mxu1  ;;  %vm21630_vm8 = vcmp.eq.s32.totalorder %v21629_v22, 1  ;;  %v6716_v62 = vadd.f32 %v21631_v45, %v6414_v17  ;;  %v21632_v52 = vld [vmem:[#allocation92_spill] sm:$0xff]  ;;  %vm21645_vm11 = vcmp.eq.s32.totalorder %v21644_v61, 1 }
 0x3ee   : > { %v8645_v9 = vsel %vm4391_vm9, %v8609_v25, 0.0  ;;  %v8614_v20 = vmax.f32 %v8578_v7, 0.0  ;;  %v8576_v32 = vadd.f32 %v19714_v33, %v8533_v8  ;;  %v8536_v40 = vadd.f32 %v15444_v58, %v8162_v27  ;;  %v21634_v27 = vld [vmem:[#allocation42_spill] sm:$0xff]  ;;  %v21636_v7 = vld [vmem:[#allocation56_spill] sm:$0xff]  ;;  %v21637_v8 = vld [vmem:[#allocation57_spill] sm:$0xff] }
 0x3ef   : > { %8681 = vst.msk [vmem:[#allocation3 + $0x20] sm:$0xff] %vm317_vm2, %v8645_v9  ;;  %v8405_v28 = vpop.f32.mrf.mxu1  ;;  %v7838_v63 = vadd.f32 %v21632_v52, %v7276_v47  ;;  %vm21635_vm9 = vcmp.eq.s32.totalorder %v21634_v27, 1  ;;  %v6415_v5 = vadd.f32 %v21637_v8, %v21636_v7  ;;  %v21639_v9 = vld [vmem:[#allocation37_spill] sm:$0xff]  ;;  %v21649_v52 = vld [vmem:[#allocation48_spill] sm:$0xff]  ;;  %v21653_v8 = vld [vmem:[#allocation95_spill] sm:$0xff] }
 0x3f0   : > { %v8650_v46 = vsel %vm4396_vm15, %v8614_v20, 0.0  ;;  %v8612_v60 = vmax.f32 %v8576_v32, 0.0  ;;  %v8579_v0 = vadd.f32 %v19714_v33, %v8536_v40  ;;  %v8534_v15 = vadd.f32 %v8405_v28, %v8160_v38  ;;  %v21652_v7 = vld [vmem:[#allocation96_spill] sm:$0xff] }
 0x3f1   : > { %8686 = vst.msk [vmem:[#allocation3 + $0x48] sm:$0xff] %vm317_vm2, %v8650_v46  ;;  %v15447_v49 = vpop.f32.mrf.mxu1  ;;  %v7279_v38 = vadd.f32 %v21638_v14, %v6716_v62  ;;  %v8164_v42 = vadd.f32 %v19643_v50, %v7838_v63  ;;  %vm21640_vm10 = vcmp.eq.s32.totalorder %v21639_v9, 1  ;;  %v6717_v46 = vadd.f32 %v21641_v1, %v6415_v5  ;;  %v21643_v50 = vld [vmem:[#allocation93_spill] sm:$0xff]  ;;  %v19822_v62 = vpop.f32.mrf.mxu0 }
 0x3f2   : > { %v8648_v13 = vsel %vm21630_vm8, %v8612_v60, 0.0  ;;  %v8615_v41 = vmax.f32 %v8579_v0, 0.0  ;;  %v8577_v43 = vadd.f32 %v19714_v33, %v8534_v15  ;;  %v8539_v29 = vadd.f32 %v15447_v49, %v8165_v24  ;;  %v8758_v59 = vld [vmem:[#allocation3 + $0x16] sm:$0xff]  ;;  %v21642_v60 = vld [vmem:[#allocation94_spill] sm:$0xff] }
 0x3f3   : > { %v8718_v11 = vld [vmem:[#allocation3 + $0x15] sm:$0xff]  ;;  %8684 = vst.msk [vmem:[#allocation3 + $0x38] sm:$0xff] %vm317_vm2, %v8648_v13  ;;  %v8418_v35 = vpop.f32.mrf.mxu1  ;;  %15484 = vmatprep.mubr.msk.f32.mxu0 %vm317_vm2, %v8758_v59  ;;  %v7841_v0 = vadd.f32 %v21642_v60, %v7279_v38  ;;  %v8169_v15 = vadd.f32 %v19650_v3, %v21643_v50  ;;  %v21646_v3 = vld [vmem:[#allocation35_spill] sm:$0xff]  ;;  %v21647_v13 = vld [vmem:[#allocation38_spill] sm:$0xff]  ;;  %vm21650_vm15 = vcmp.eq.s32.totalorder %v21649_v52, 1  ;;  %v8170_v5 = vadd.f32 %v19664_v57, %v21653_v8  ;;  %v19850_v60 = vpop.f32.mrf.mxu0 }
 0x3f4   : > { %15546 = vmatprep.mubr.msk.f32.mxu1 %vm317_vm2, %v8718_v11  ;;  %v8651_v23 = vsel %vm21635_vm9, %v8615_v41, 0.0  ;;  %v8613_v10 = vmax.f32 %v8577_v43, 0.0  ;;  %v8582_v56 = vadd.f32 %v19714_v33, %v8539_v29  ;;  %v8537_v25 = vadd.f32 %v8418_v35, %v8163_v48  ;;  %v21648_v43 = vld [vmem:[#allocation72_spill] sm:$0xff]  ;;  %v21656_v57 = vld [vmem:[#allocation58_spill] sm:$0xff] }
 0x3f5   : > { %8687 = vst.msk [vmem:[#allocation3 + $0x50] sm:$0xff] %vm317_vm2, %v8651_v23  ;;  %v15448_v58 = vpop.f32.mrf.mxu1  ;;  %v6418_v41 = vadd.f32 %v21647_v13, %v21646_v3  ;;  %v7280_v29 = vadd.f32 %v21648_v43, %v6717_v46  ;;  %v8167_v59 = vadd.f32 %v19657_v16, %v7841_v0  ;;  %v8761_v45 = vld [vmem:[#allocation3 + $0x2e] sm:$0xff]  ;;  %v21663_v3 = vld [vmem:[#allocation98_spill] sm:$0xff] }
 0x3f6   : > { %v8649_v20 = vsel %vm21640_vm10, %v8613_v10, 0.0  ;;  %v8618_v32 = vmax.f32 %v8582_v56, 0.0  ;;  %v8580_v40 = vadd.f32 %v19714_v33, %v8537_v25  ;;  %v8540_v39 = vadd.f32 %v15448_v58, %v8166_v34  ;;  %v8759_v31 = vld [vmem:[#allocation3 + $0x1e] sm:$0xff]  ;;  %v8760_v28 = vld [vmem:[#allocation3 + $0x26] sm:$0xff]  ;;  %v19837_v38 = vld [vmem:[%s21179_s5 + $0xb8] sm:$0xff] }
 0x3f7   : > { %v8719_v24 = vld [vmem:[#allocation3 + $0x1d] sm:$0xff]  ;;  %8685 = vst.msk [vmem:[#allocation3 + $0x40] sm:$0xff] %vm317_vm2, %v8649_v20  ;;  %v8421_v6 = vpop.f32.mrf.mxu1  ;;  %15485 = vmatmul.mubr.msk.f32.gmra.mxu0 %vm317_vm2, %v8759_v31  ;;  %v8720_v17 = vld [vmem:[#allocation3 + $0x25] sm:$0xff]  ;;  %v8721_v27 = vld [vmem:[#allocation3 + $0x2d] sm:$0xff]  ;;  %v7842_v16 = vadd.f32 %v21652_v7, %v7280_v29  ;;  %15783 = vmatprep.subr.mxu1 %v19837_v38  ;;  %v19872_v7 = vpop.f32.mrf.mxu0 }
 0x3f8   : > { %15547 = vmatmul.mubr.msk.f32.gmra.mxu1 %vm317_vm2, %v8719_v24  ;;  %v8654_v47 = vsel %vm21645_vm11, %v8618_v32, 0.0  ;;  %v8616_v48 = vmax.f32 %v8580_v40, 0.0  ;;  %v8583_v49 = vadd.f32 %v19714_v33, %v8540_v39  ;;  %v8538_v22 = vadd.f32 %v8421_v6, %v8164_v42  ;;  %15487 = vmatprep.mubr.msk.f32.mxu0 %vm317_vm2, %v8760_v28  ;;  %v21651_v56 = vld [vmem:[#allocation69_spill] sm:$0xff]  ;;  %v21657_v40 = vld [vmem:[#allocation59_spill] sm:$0xff]  ;;  %v21658_v31 = vld [vmem:[#allocation74_spill] sm:$0xff] }
 0x3f9   : > { %15549 = vmatprep.mubr.msk.f32.mxu1 %vm317_vm2, %v8720_v17  ;;  %8690 = vst.msk [vmem:[#allocation3 + $0x68] sm:$0xff] %vm317_vm2, %v8654_v47  ;;  %v15451_v11 = vpop.f32.mrf.mxu1  ;;  %v6720_v25 = vadd.f32 %v21651_v56, %v6418_v41  ;;  %v21654_v42 = vld [vmem:[#allocation49_spill] sm:$0xff]  ;;  %v6419_v39 = vadd.f32 %v21657_v40, %v21656_v57  ;;  %v21660_v0 = vld [vmem:[#allocation47_spill] sm:$0xff]  ;;  %v21673_v40 = vld [vmem:[#allocation100_spill] sm:$0xff] }
 0x3fa   : > { %v8652_v63 = vsel %vm21650_vm15, %v8616_v48, 0.0  ;;  %v8619_v21 = vmax.f32 %v8583_v49, 0.0  ;;  %v8581_v34 = vadd.f32 %v19714_v33, %v8538_v22  ;;  %v8543_v35 = vadd.f32 %v15451_v11, %v8169_v15  ;;  %v8762_v23 = vld [vmem:[#allocation3 + $0x36] sm:$0xff]  ;;  %v21662_v49 = vld [vmem:[#allocation71_spill] sm:$0xff] }
 0x3fb   : > { %v8722_v10 = vld [vmem:[#allocation3 + $0x35] sm:$0xff]  ;;  %8688 = vst.msk [vmem:[#allocation3 + $0x58] sm:$0xff] %vm317_vm2, %v8652_v63  ;;  %v8434_v14 = vpop.f32.mrf.mxu1  ;;  %15488 = vmatmul.mubr.msk.f32.gmra.mxu0 %vm317_vm2, %v8761_v45  ;;  %vm21655_vm12 = vcmp.eq.s32.totalorder %v21654_v42, 1  ;;  %v7283_v24 = vadd.f32 %v21658_v31, %v6720_v25  ;;  %vm21661_vm1 = vcmp.eq.s32.totalorder %v21660_v0, 1  ;;  %v6721_v22 = vadd.f32 %v21662_v49, %v6419_v39  ;;  %v21674_v39 = vld [vmem:[#allocation99_spill] sm:$0xff]  ;;  %v19894_v49 = vpop.f32.mrf.mxu0 }
 0x3fc   : > { %15550 = vmatmul.mubr.msk.f32.gmra.mxu1 %vm317_vm2, %v8721_v27  ;;  %v8655_v58 = vsel %vm21655_vm12, %v8619_v21, 0.0  ;;  %v8617_v9 = vmax.f32 %v8581_v34, 0.0  ;;  %v8586_v20 = vadd.f32 %v19714_v33, %v8543_v35  ;;  %v8541_v32 = vadd.f32 %v8434_v14, %v8167_v59  ;;  %15490 = vmatprep.mubr.msk.f32.mxu0 %vm317_vm2, %v8762_v23  ;;  %v21659_v28 = vld [vmem:[#allocation109_spill] sm:$0xff]  ;;  %v21669_v27 = vld [vmem:[#allocation76_spill] sm:$0xff] }
 0x3fd   : > { %15552 = vmatprep.mubr.msk.f32.mxu1 %vm317_vm2, %v8722_v10  ;;  %v8168_v1 = vadd.f32 %v21659_v28, %v7842_v16  ;;  %8691 = vst.msk [vmem:[#allocation3 + $0x70] sm:$0xff] %vm317_vm2, %v8655_v58  ;;  %v15452_v46 = vpop.f32.mrf.mxu1  ;;  %v7845_v13 = vadd.f32 %v21663_v3, %v7283_v24  ;;  %v21664_v41 = vld [vmem:[#allocation97_spill] sm:$0xff]  ;;  %v7284_v23 = vadd.f32 %v21669_v27, %v6721_v22  ;;  %v8765_v25 = vld [vmem:[#allocation3 + $0x4e] sm:$0xff]  ;;  %v21680_v22 = vld [vmem:[#allocation6_spill] sm:$0xff] }
 0x3fe   : > { %v8653_v50 = vsel %vm21661_vm1, %v8617_v9, 0.0  ;;  %v8622_v15 = vmax.f32 %v8586_v20, 0.0  ;;  %v8584_v6 = vadd.f32 %v19714_v33, %v8541_v32  ;;  %v8544_v17 = vadd.f32 %v15452_v46, %v8170_v5  ;;  %v8763_v61 = vld [vmem:[#allocation3 + $0x3e] sm:$0xff]  ;;  %v8764_v48 = vld [vmem:[#allocation3 + $0x46] sm:$0xff]  ;;  %v21670_v16 = vld [vmem:[#allocation4_spill] sm:$0xff] }
 0x3ff   : > { %v8723_v47 = vld [vmem:[#allocation3 + $0x3d] sm:$0xff]  ;;  %v8173_v43 = vadd.f32 %v19678_v26, %v21664_v41  ;;  %8689 = vst.msk [vmem:[#allocation3 + $0x60] sm:$0xff] %vm317_vm2, %v8653_v50  ;;  %v8437_v29 = vpop.f32.mrf.mxu1  ;;  %15491 = vmatmul.mubr.msk.f32.gmra.mxu0 %vm317_vm2, %v8763_v61  ;;  %v8724_v59 = vld [vmem:[#allocation3 + $0x45] sm:$0xff]  ;;  %v21667_v26 = vld [vmem:[#allocation40_spill] sm:$0xff]  ;;  %v8171_v10 = vadd.f32 %v19687_v37, %v7845_v13  ;;  %vm21671_vm8 = vcmp.eq.s32.totalorder %v21670_v16, 1  ;;  %v7846_v37 = vadd.f32 %v21673_v40, %v7284_v23 }
 0x400   : > { %15553 = vmatmul.mubr.msk.f32.gmra.mxu1 %vm317_vm2, %v8723_v47  ;;  %v21665_v11 = vld [vmem:[#allocation13_spill] sm:$0xff]  ;;  %v8620_v52 = vmax.f32 %v8584_v6, 0.0  ;;  %v8587_v63 = vadd.f32 %v19714_v33, %v8544_v17  ;;  %v8542_v21 = vadd.f32 %v8437_v29, %v8168_v1  ;;  %15493 = vmatprep.mubr.msk.f32.mxu0 %vm317_vm2, %v8764_v48  ;;  %v8725_v58 = vld [vmem:[#allocation3 + $0x4d] sm:$0xff]  ;;  %v8174_v31 = vadd.f32 %v19698_v36, %v21674_v39  ;;  %v21679_v17 = vld [vmem:[#allocation78_spill] sm:$0xff] }
 0x401   : > { %vm21666_vm7 = vcmp.eq.s32.totalorder %v21665_v11, 1  ;;  %15555 = vmatprep.mubr.msk.f32.mxu1 %vm317_vm2, %v8724_v59  ;;  %v21668_v34 = vld [vmem:[#allocation61_spill] sm:$0xff]  ;;  %v15455_v56 = vpop.f32.mrf.mxu1  ;;  %v21678_v36 = vld [vmem:[#allocation63_spill] sm:$0xff]  ;;  %v8172_v47 = vadd.f32 %v19718_v55, %v7846_v37  ;;  %vm21681_vm10 = vcmp.eq.s32.totalorder %v21680_v22, 1  ;;  %v21685_v27 = vld [vmem:[#allocation12_spill] sm:$0xff] }
 0x402   : > { %v8658_v45 = vsel %vm21666_vm7, %v8622_v15, 0.0  ;;  %v6422_v35 = vadd.f32 %v21668_v34, %v21667_v26  ;;  %v8656_v8 = vsel %vm21671_vm8, %v8620_v52, 0.0  ;;  %v8623_v5 = vmax.f32 %v8587_v63, 0.0  ;;  %v8766_v9 = vld [vmem:[#allocation3 + $0x56] sm:$0xff]  ;;  %v21683_v63 = vld [vmem:[#allocation102_spill] sm:$0xff] }
 0x403   : > { %8694 = vst.msk [vmem:[#allocation3 + $0x88] sm:$0xff] %vm317_vm2, %v8658_v45  ;;  %v8585_v14 = vadd.f32 %v19714_v33, %v8542_v21  ;;  %v8547_v42 = vadd.f32 %v15455_v56, %v8173_v43  ;;  %v8726_v20 = vld [vmem:[#allocation3 + $0x55] sm:$0xff]  ;;  %8692 = vst.msk [vmem:[#allocation3 + $0x78] sm:$0xff] %vm317_vm2, %v8656_v8  ;;  %v8450_v24 = vpop.f32.mrf.mxu1  ;;  %15494 = vmatmul.mubr.msk.f32.gmra.mxu0 %vm317_vm2, %v8765_v25  ;;  %v21682_v45 = vld [vmem:[#allocation75_spill] sm:$0xff]  ;;  %vm21686_vm11 = vcmp.eq.s32.totalorder %v21685_v27, 1 }
 0x404   : > { %v21672_v32 = vld [vmem:[#allocation73_spill] sm:$0xff]  ;;  %15556 = vmatmul.mubr.msk.f32.gmra.mxu1 %vm317_vm2, %v8725_v58  ;;  %v8545_v50 = vadd.f32 %v8450_v24, %v8171_v10  ;;  %15496 = vmatprep.mubr.msk.f32.mxu0 %vm317_vm2, %v8766_v9  ;;  %v21677_v15 = vld [vmem:[#allocation60_spill] sm:$0xff] }
 0x405   : > { %v6724_v57 = vadd.f32 %v21672_v32, %v6422_v35  ;;  %v21675_v28 = vld [vmem:[#allocation9_spill] sm:$0xff]  ;;  %v8621_v46 = vmax.f32 %v8585_v14, 0.0  ;;  %v8590_v0 = vadd.f32 %v19714_v33, %v8547_v42  ;;  %15558 = vmatprep.mubr.msk.f32.mxu1 %vm317_vm2, %v8726_v20  ;;  %v6423_v6 = vadd.f32 %v21678_v36, %v21677_v15  ;;  %v15456_v48 = vpop.f32.mrf.mxu1  ;;  %v8769_v9 = vld [vmem:[#allocation3 + $0x6e] sm:$0xff]  ;;  %v19916_v20 = vpop.f32.mrf.mxu0 }
 0x406   : > { %vm21676_vm9 = vcmp.eq.s32.totalorder %v21675_v28, 1  ;;  %v8588_v41 = vadd.f32 %v19714_v33, %v8545_v50  ;;  %v8548_v43 = vadd.f32 %v15456_v48, %v8174_v31  ;;  %v8767_v29 = vld [vmem:[#allocation3 + $0x5e] sm:$0xff]  ;;  %v8768_v11 = vld [vmem:[#allocation3 + $0x66] sm:$0xff]  ;;  %v21697_v22 = vld [vmem:[#allocation64_spill] sm:$0xff] }
 0x407   : > { %v8659_v1 = vsel %vm21676_vm9, %v8623_v5, 0.0  ;;  %v7287_v61 = vadd.f32 %v21679_v17, %v6724_v57  ;;  %v8657_v3 = vsel %vm21681_vm10, %v8621_v46, 0.0  ;;  %v8626_v13 = vmax.f32 %v8590_v0, 0.0  ;;  %v8727_v59 = vld [vmem:[#allocation3 + $0x5d] sm:$0xff]  ;;  %v8453_v34 = vpop.f32.mrf.mxu1  ;;  %15497 = vmatmul.mubr.msk.f32.gmra.mxu0 %vm317_vm2, %v8767_v29  ;;  %v8728_v35 = vld [vmem:[#allocation3 + $0x65] sm:$0xff]  ;;  %v21689_v5 = vld [vmem:[#allocation80_spill] sm:$0xff] }
 0x408   : > { %8695 = vst.msk [vmem:[#allocation3 + $0x90] sm:$0xff] %vm317_vm2, %v8659_v1  ;;  %v6725_v52 = vadd.f32 %v21682_v45, %v6423_v6  ;;  %v21684_v55 = vld [vmem:[#allocation101_spill] sm:$0xff]  ;;  %8693 = vst.msk [vmem:[#allocation3 + $0x80] sm:$0xff] %vm317_vm2, %v8657_v3  ;;  %15559 = vmatmul.mubr.msk.f32.gmra.mxu1 %vm317_vm2, %v8727_v59  ;;  %v8624_v10 = vmax.f32 %v8588_v41, 0.0  ;;  %v8591_v56 = vadd.f32 %v19714_v33, %v8548_v43  ;;  %15499 = vmatprep.mubr.msk.f32.mxu0 %vm317_vm2, %v8768_v11  ;;  %v21690_v32 = vld [vmem:[#allocation11_spill] sm:$0xff]  ;;  %v19938_v59 = vpop.f32.mrf.mxu0 }
 0x409   : > { %v7849_v21 = vadd.f32 %v21683_v63, %v7287_v61  ;;  %v8177_v26 = vadd.f32 %v19729_v54, %v21684_v55  ;;  %v8662_v23 = vsel %vm21686_vm11, %v8626_v13, 0.0  ;;  %v8546_v25 = vadd.f32 %v8453_v34, %v8172_v47  ;;  %15561 = vmatprep.mubr.msk.f32.mxu1 %vm317_vm2, %v8728_v35  ;;  %v21687_v54 = vld [vmem:[#allocation62_spill] sm:$0xff]  ;;  %v21688_v16 = vld [vmem:[#allocation65_spill] sm:$0xff]  ;;  %v15459_v58 = vpop.f32.mrf.mxu1  ;;  %v8729_v31 = vld [vmem:[#allocation3 + $0x6d] sm:$0xff] }
 0x40a   : > { %v6426_v8 = vadd.f32 %v21688_v16, %v21687_v54  ;;  %v7288_v14 = vadd.f32 %v21689_v5, %v6725_v52  ;;  %8698 = vst.msk [vmem:[#allocation3 + $0xa8] sm:$0xff] %vm317_vm2, %v8662_v23  ;;  %vm21691_vm15 = vcmp.eq.s32.totalorder %v21690_v32, 1  ;;  %v8627_v40 = vmax.f32 %v8591_v56, 0.0  ;;  %v8770_v24 = vld [vmem:[#allocation3 + $0x76] sm:$0xff]  ;;  %v21694_v50 = vld [vmem:[#allocation103_spill] sm:$0xff]  ;;  %v21695_v6 = vld [vmem:[#allocation10_spill] sm:$0xff] }
 0x40b   : > { %v8175_v42 = vadd.f32 %v19744_v12, %v7849_v21  ;;  %v8660_v57 = vsel %vm21691_vm15, %v8624_v10, 0.0  ;;  %v8589_v37 = vadd.f32 %v19714_v33, %v8546_v25  ;;  %v8551_v39 = vadd.f32 %v15459_v58, %v8177_v26  ;;  %v8730_v28 = vld [vmem:[#allocation3 + $0x75] sm:$0xff]  ;;  %v8466_v36 = vpop.f32.mrf.mxu1  ;;  %15500 = vmatmul.mubr.msk.f32.gmra.mxu0 %vm317_vm2, %v8769_v9  ;;  %v21699_v13 = vld [vmem:[#allocation82_spill] sm:$0xff]  ;;  %v21700_v11 = vld [vmem:[#allocation7_spill] sm:$0xff] }
 0x40c   : > { %v21692_v1 = vld [vmem:[#allocation77_spill] sm:$0xff]  ;;  %v21693_v0 = vld [vmem:[#allocation104_spill] sm:$0xff]  ;;  %v8178_v15 = vadd.f32 %v19762_v4, %v21694_v50  ;;  %8696 = vst.msk [vmem:[#allocation3 + $0x98] sm:$0xff] %vm317_vm2, %v8660_v57  ;;  %15562 = vmatmul.mubr.msk.f32.gmra.mxu1 %vm317_vm2, %v8729_v31  ;;  %vm21696_vm12 = vcmp.eq.s32.totalorder %v21695_v6, 1  ;;  %15502 = vmatprep.mubr.msk.f32.mxu0 %vm317_vm2, %v8770_v24  ;;  %v21698_v4 = vld [vmem:[#allocation66_spill] sm:$0xff]  ;;  %vm21701_vm1 = vcmp.eq.s32.totalorder %v21700_v11, 1  ;;  %v19960_v31 = vpop.f32.mrf.mxu0 }
 0x40d   : > { %v6728_v46 = vadd.f32 %v21692_v1, %v6426_v8  ;;  %v7850_v12 = vadd.f32 %v21693_v0, %v7288_v14  ;;  %v8663_v17 = vsel %vm21696_vm12, %v8627_v40, 0.0  ;;  %v8625_v61 = vmax.f32 %v8589_v37, 0.0  ;;  %15564 = vmatprep.mubr.msk.f32.mxu1 %vm317_vm2, %v8730_v28  ;;  %v15460_v29 = vpop.f32.mrf.mxu1  ;;  %v21702_v35 = vld [vmem:[#allocation79_spill] sm:$0xff]  ;;  %v21703_v23 = vld [vmem:[#allocation106_spill] sm:$0xff]  ;;  %v21705_v16 = vld [vmem:[#allocation24_spill] sm:$0xff] }
 0x40e   : > { %v8594_v47 = vadd.f32 %v19714_v33, %v8551_v39  ;;  %v8549_v48 = vadd.f32 %v8466_v36, %v8175_v42  ;;  %v6427_v3 = vadd.f32 %v21698_v4, %v21697_v22  ;;  %8699 = vst.msk [vmem:[#allocation3 + $0xb0] sm:$0xff] %vm317_vm2, %v8663_v17  ;;  %v8552_v21 = vadd.f32 %v15460_v29, %v8178_v15  ;;  %v21708_v58 = vld [vmem:[#allocation43_spill] sm:$0xff]  ;;  %v21709_v32 = vld [vmem:[#allocation84_spill] sm:$0xff]  ;;  %v21712_v36 = vld [vmem:[#allocation81_spill] sm:$0xff] }
 0x40f   : > { %v7291_v41 = vadd.f32 %v21699_v13, %v6728_v46  ;;  %v8176_v43 = vadd.f32 %v19780_v19, %v7850_v12  ;;  %v8661_v45 = vsel %vm21701_vm1, %v8625_v61, 0.0  ;;  %v8771_v55 = vld [vmem:[#allocation3 + $0x7e] sm:$0xff]  ;;  %v8772_v34 = vld [vmem:[#allocation3 + $0x86] sm:$0xff]  ;;  %v8469_v25 = vpop.f32.mrf.mxu1  ;;  %vm21706_vm7 = vcmp.eq.s32.totalorder %v21705_v16, 1  ;;  %v8773_v39 = vld [vmem:[#allocation3 + $0x8e] sm:$0xff] }
 0x410   : > { %v8630_v52 = vmax.f32 %v8594_v47, 0.0  ;;  %v8592_v63 = vadd.f32 %v19714_v33, %v8549_v48  ;;  %v8731_v26 = vld [vmem:[#allocation3 + $0x7d] sm:$0xff]  ;;  %v6729_v27 = vadd.f32 %v21702_v35, %v6427_v3  ;;  %8697 = vst.msk [vmem:[#allocation3 + $0xa0] sm:$0xff] %vm317_vm2, %v8661_v45  ;;  %15503 = vmatmul.mubr.msk.f32.gmra.mxu0 %vm317_vm2, %v8771_v55  ;;  %v8732_v54 = vld [vmem:[#allocation3 + $0x85] sm:$0xff]  ;;  %v8595_v14 = vadd.f32 %v19714_v33, %v8552_v21  ;;  %v8733_v12 = vld [vmem:[#allocation3 + $0x8d] sm:$0xff] }
 0x411   : > { %v7853_v10 = vadd.f32 %v21703_v23, %v7291_v41  ;;  %v21704_v19 = vld [vmem:[#allocation105_spill] sm:$0xff]  ;;  %15565 = vmatmul.mubr.msk.f32.gmra.mxu1 %vm317_vm2, %v8731_v26  ;;  %v8550_v42 = vadd.f32 %v8469_v25, %v8176_v43  ;;  %15505 = vmatprep.mubr.msk.f32.mxu0 %vm317_vm2, %v8772_v34  ;;  %v15463_v37 = vpop.f32.mrf.mxu1  ;;  %v21710_v24 = vld [vmem:[#allocation15_spill] sm:$0xff]  ;;  %v21713_v17 = vld [vmem:[#allocation108_spill] sm:$0xff]  ;;  %v19984_v34 = vpop.f32.mrf.mxu0 }
 0x412   : > { %v8181_v56 = vadd.f32 %v19800_v44, %v21704_v19  ;;  %v8666_v8 = vsel %vm21706_vm7, %v8630_v52, 0.0  ;;  %v8628_v5 = vmax.f32 %v8592_v63, 0.0  ;;  %15567 = vmatprep.mubr.msk.f32.mxu1 %vm317_vm2, %v8732_v54  ;;  %v21707_v44 = vld [vmem:[#allocation31_spill] sm:$0xff]  ;;  %v7292_v57 = vadd.f32 %v21709_v32, %v6729_v27  ;;  %v21715_v22 = vld [vmem:[#allocation16_spill] sm:$0xff]  ;;  %v21717_v43 = vld [vmem:[#allocation41_spill] sm:$0xff] }
 0x413   : > { %v6430_v9 = vadd.f32 %v21708_v58, %v21707_v44  ;;  %v8179_v40 = vadd.f32 %v19822_v62, %v7853_v10  ;;  %8702 = vst.msk [vmem:[#allocation3 + $0xc8] sm:$0xff] %vm317_vm2, %v8666_v8  ;;  %vm21711_vm8 = vcmp.eq.s32.totalorder %v21710_v24, 1  ;;  %v8631_v1 = vmax.f32 %v8595_v14, 0.0  ;;  %v8774_v50 = vld [vmem:[#allocation3 + $0x96] sm:$0xff]  ;;  %v21714_v61 = vld [vmem:[#allocation107_spill] sm:$0xff]  ;;  %v8482_v48 = vpop.f32.mrf.mxu1  ;;  %v21721_v63 = vld [vmem:[#allocation86_spill] sm:$0xff] }
 0x414   : > { %v8664_v28 = vsel %vm21711_vm8, %v8628_v5, 0.0  ;;  %v8593_v46 = vadd.f32 %v19714_v33, %v8550_v42  ;;  %v8555_v0 = vadd.f32 %v15463_v37, %v8181_v56  ;;  %v8734_v15 = vld [vmem:[#allocation3 + $0x95] sm:$0xff]  ;;  %v7854_v62 = vadd.f32 %v21713_v17, %v7292_v57  ;;  %15506 = vmatmul.mubr.msk.f32.gmra.mxu0 %vm317_vm2, %v8773_v39  ;;  %v21719_v11 = vld [vmem:[#allocation67_spill] sm:$0xff]  ;;  %v21722_v35 = vld [vmem:[#allocation14_spill] sm:$0xff] }
 0x415   : > { %v6732_v6 = vadd.f32 %v21712_v36, %v6430_v9  ;;  %v8182_v47 = vadd.f32 %v19850_v60, %v21714_v61  ;;  %8700 = vst.msk [vmem:[#allocation3 + $0xb8] sm:$0xff] %vm317_vm2, %v8664_v28  ;;  %15568 = vmatmul.mubr.msk.f32.gmra.mxu1 %vm317_vm2, %v8733_v12  ;;  %vm21716_vm9 = vcmp.eq.s32.totalorder %v21715_v22, 1  ;;  %v8553_v41 = vadd.f32 %v8482_v48, %v8179_v40  ;;  %v21718_v60 = vld [vmem:[#allocation55_spill] sm:$0xff]  ;;  %v21720_v45 = vld [vmem:[#allocation68_spill] sm:$0xff]  ;;  %v15464_v26 = vpop.f32.mrf.mxu1  ;;  %v21729_v37 = vld [vmem:[#allocation29_spill] sm:$0xff] }
 0x416   : > { %v8667_v4 = vsel %vm21716_vm9, %v8631_v1, 0.0  ;;  %v8629_v3 = vmax.f32 %v8593_v46, 0.0  ;;  %v8598_v13 = vadd.f32 %v19714_v33, %v8555_v0  ;;  %15508 = vmatprep.mubr.msk.f32.mxu0 %vm317_vm2, %v8774_v50  ;;  %15570 = vmatprep.mubr.msk.f32.mxu1 %vm317_vm2, %v8734_v15  ;;  %v5469_v29 = vadd.f32 %v21718_v60, %v21717_v43  ;;  %v21724_v16 = vld [vmem:[#allocation83_spill] sm:$0xff]  ;;  %v21726_v58 = vld [vmem:[#allocation44_spill] sm:$0xff]  ;;  %v21730_v39 = vld [vmem:[#allocation50_spill] sm:$0xff]  ;;  %v8140_v50 = vpop.f32.mrf.mxu0 }
 0x417   : > { %v6431_v52 = vadd.f32 %v21720_v45, %v21719_v11  ;;  %v7295_v21 = vadd.f32 %v21721_v63, %v6732_v6  ;;  %v8180_v55 = vadd.f32 %v19872_v7, %v7854_v62  ;;  %8703 = vst.msk [vmem:[#allocation3 + $0xd0] sm:$0xff] %vm317_vm2, %v8667_v4  ;;  %vm21723_vm10 = vcmp.eq.s32.totalorder %v21722_v35, 1  ;;  %v8775_v56 = vld [vmem:[#allocation3 + $0x9e] sm:$0xff]  ;;  %v8776_v54 = vld [vmem:[#allocation3 + $0xa6] sm:$0xff]  ;;  %v8485_v42 = vpop.f32.mrf.mxu1  ;;  %v21731_v28 = vld [vmem:[#allocation88_spill] sm:$0xff] }
 0x418   : > { %v8665_v27 = vsel %vm21723_vm10, %v8629_v3, 0.0  ;;  %v8634_v23 = vmax.f32 %v8598_v13, 0.0  ;;  %v8596_v10 = vadd.f32 %v19714_v33, %v8553_v41  ;;  %v8556_v19 = vadd.f32 %v15464_v26, %v8182_v47  ;;  %v8735_v25 = vld [vmem:[#allocation3 + $0x9d] sm:$0xff]  ;;  %15509 = vmatmul.mubr.msk.f32.gmra.mxu0 %vm317_vm2, %v8775_v56  ;;  %v8736_v44 = vld [vmem:[#allocation3 + $0xa5] sm:$0xff]  ;;  %v8777_v12 = vld [vmem:[#allocation3 + $0xae] sm:$0xff] }
 0x419   : > { %v6733_v8 = vadd.f32 %v21724_v16, %v6431_v52  ;;  %v7857_v5 = vadd.f32 %v19676_v18, %v7295_v21  ;;  %v21725_v7 = vld [vmem:[#allocation110_spill] sm:$0xff]  ;;  %8701 = vst.msk [vmem:[#allocation3 + $0xc0] sm:$0xff] %vm317_vm2, %v8665_v27  ;;  %15571 = vmatmul.mubr.msk.f32.gmra.mxu1 %vm317_vm2, %v8735_v25  ;;  %vm21727_vm11 = vcmp.eq.s32.totalorder %v21726_v58, 1  ;;  %v8554_v40 = vadd.f32 %v8485_v42, %v8180_v55  ;;  %v15467_v0 = vpop.f32.mrf.mxu1  ;;  %v21732_v15 = vld [vmem:[#allocation36_spill] sm:$0xff]  ;;  %v21734_v22 = vld [vmem:[#allocation85_spill] sm:$0xff]  ;;  %v15432_v27 = vpop.f32.mrf.mxu0 }
 0x41a   : > { %v8185_v14 = vadd.f32 %v19894_v49, %v21725_v7  ;;  %v8670_v9 = vsel %vm21727_vm11, %v8634_v23, 0.0  ;;  %v8632_v32 = vmax.f32 %v8596_v10, 0.0  ;;  %v8599_v57 = vadd.f32 %v19714_v33, %v8556_v19  ;;  %15511 = vmatprep.mubr.msk.f32.mxu0 %vm317_vm2, %v8776_v54  ;;  %15573 = vmatprep.mubr.msk.f32.mxu1 %vm317_vm2, %v8736_v44  ;;  %v21728_v18 = vld [vmem:[#allocation46_spill] sm:$0xff]  ;;  %v8737_v61 = vld [vmem:[#allocation3 + $0xad] sm:$0xff]  ;;  %v21737_v60 = vld [vmem:[#allocation17_spill] sm:$0xff] }
 0x41b   : > { %v5851_v49 = vadd.f32 %v21728_v18, %v5469_v29  ;;  %v6434_v24 = vadd.f32 %v21730_v39, %v21729_v37  ;;  %v7296_v1 = vadd.f32 %v21731_v28, %v6733_v8  ;;  %v8183_v46 = vadd.f32 %v19916_v20, %v7857_v5  ;;  %8706 = vst.msk [vmem:[#allocation3 + $0xe8] sm:$0xff] %vm317_vm2, %v8670_v9  ;;  %v21735_v3 = vld [vmem:[#allocation112_spill] sm:$0xff]  ;;  %v21736_v20 = vld [vmem:[#allocation111_spill] sm:$0xff]  ;;  %v8498_v43 = vpop.f32.mrf.mxu1  ;;  %v21740_v21 = vld [vmem:[#allocation89_spill] sm:$0xff]  ;;  %v8143_v37 = vpop.f32.mrf.mxu0 }
 0x41c   : > { %vm21733_vm15 = vcmp.eq.s32.totalorder %v21732_v15, 1  ;;  %v8635_v6 = vmax.f32 %v8599_v57, 0.0  ;;  %v8597_v17 = vadd.f32 %v19714_v33, %v8554_v40  ;;  %v8559_v62 = vadd.f32 %v15467_v0, %v8185_v14  ;;  %v8778_v47 = vld [vmem:[#allocation3 + $0xb6] sm:$0xff]  ;;  %15512 = vmatmul.mubr.msk.f32.gmra.mxu0 %vm317_vm2, %v8777_v12  ;;  %v21739_v63 = vld [vmem:[#allocation51_spill] sm:$0xff]  ;;  %v21741_v23 = vld [vmem:[#allocation30_spill] sm:$0xff] }
 0x41d   : > { %v8668_v36 = vsel %vm21733_vm15, %v8632_v32, 0.0  ;;  %v8738_v48 = vld [vmem:[#allocation3 + $0xb5] sm:$0xff]  ;;  %v6736_v4 = vadd.f32 %v21734_v22, %v6434_v24  ;;  %v7858_v13 = vadd.f32 %v21735_v3, %v7296_v1  ;;  %v8186_v41 = vadd.f32 %v19938_v59, %v21736_v20  ;;  %15574 = vmatmul.mubr.msk.f32.gmra.mxu1 %vm317_vm2, %v8737_v61  ;;  %15514 = vmatprep.mubr.msk.f32.mxu0 %vm317_vm2, %v8778_v47  ;;  %v15468_v35 = vpop.f32.mrf.mxu1  ;;  %v21743_v5 = vld [vmem:[#allocation87_spill] sm:$0xff]  ;;  %v21749_v22 = vld [vmem:[#allocation18_spill] sm:$0xff] }
 0x41e   : > { %8704 = vst.msk [vmem:[#allocation3 + $0xd8] sm:$0xff] %vm317_vm2, %v8668_v36  ;;  %vm21738_vm12 = vcmp.eq.s32.totalorder %v21737_v60, 1  ;;  %v8633_v11 = vmax.f32 %v8597_v17, 0.0  ;;  %v8602_v45 = vadd.f32 %v19714_v33, %v8559_v62  ;;  %v8557_v52 = vadd.f32 %v8498_v43, %v8183_v46  ;;  %15576 = vmatprep.mubr.msk.f32.mxu1 %vm317_vm2, %v8738_v48  ;;  %v21746_v39 = vld [vmem:[#allocation19_spill] sm:$0xff]  ;;  %v13537_v17 = vld [vmem:[%s21179_s5 + $0xa0] sm:$0xff] }
 0x41f   : > { %v8671_v29 = vsel %vm21738_vm12, %v8635_v6, 0.0  ;;  %v6435_v59 = vadd.f32 %v21739_v63, %v5851_v49  ;;  %v7299_v55 = vadd.f32 %v21740_v21, %v6736_v4  ;;  %v8184_v26 = vadd.f32 %v19960_v31, %v7858_v13  ;;  %v8501_v42 = vpop.f32.mrf.mxu1  ;;  %v8781_v49 = vld [vmem:[#allocation3 + $0xce] sm:$0xff] }
 0x420   : > { %8707 = vst.msk [vmem:[#allocation3 + $0xf0] sm:$0xff] %vm317_vm2, %v8671_v29  ;;  %vm21742_vm1 = vcmp.eq.s32.totalorder %v21741_v23, 1  ;;  %v8638_v19 = vmax.f32 %v8602_v45, 0.0  ;;  %v8600_v56 = vadd.f32 %v19714_v33, %v8557_v52  ;;  %v8560_v25 = vadd.f32 %v15468_v35, %v8186_v41  ;;  %v8779_v54 = vld [vmem:[#allocation3 + $0xbe] sm:$0xff]  ;;  %v8780_v8 = vld [vmem:[#allocation3 + $0xc6] sm:$0xff] }
 0x421   : > { %v8669_v10 = vsel %vm21742_vm1, %v8633_v11, 0.0  ;;  %v8739_v16 = vld [vmem:[#allocation3 + $0xbd] sm:$0xff]  ;;  %v6737_v7 = vadd.f32 %v21743_v5, %v6435_v59  ;;  %v7861_v14 = vadd.f32 %v19692_v53, %v7299_v55  ;;  %v8189_v31 = vadd.f32 %v19984_v34, %v19690_v51  ;;  %15515 = vmatmul.mubr.msk.f32.gmra.mxu0 %vm317_vm2, %v8779_v54  ;;  %v8740_v44 = vld [vmem:[#allocation3 + $0xc5] sm:$0xff]  ;;  %v15471_v18 = vpop.f32.mrf.mxu1  ;;  %v8741_v0 = vld [vmem:[#allocation3 + $0xcd] sm:$0xff] }
 0x422   : > { %8705 = vst.msk [vmem:[#allocation3 + $0xe0] sm:$0xff] %vm317_vm2, %v8669_v10  ;;  %15577 = vmatmul.mubr.msk.f32.gmra.mxu1 %vm317_vm2, %v8739_v16  ;;  %v8674_v9 = vsel %vm4420_vm5, %v8638_v19, 0.0  ;;  %v8636_v32 = vmax.f32 %v8600_v56, 0.0  ;;  %v8603_v57 = vadd.f32 %v19714_v33, %v8560_v25  ;;  %v8558_v40 = vadd.f32 %v8501_v42, %v8184_v26  ;;  %15517 = vmatprep.mubr.msk.f32.mxu0 %vm317_vm2, %v8780_v8  ;;  %v21745_v51 = vld [vmem:[#allocation90_spill] sm:$0xff] }
 0x423   : > { %15579 = vmatprep.mubr.msk.f32.mxu1 %vm317_vm2, %v8740_v44  ;;  %v7300_v53 = vadd.f32 %v21745_v51, %v6737_v7  ;;  %v8187_v34 = vadd.f32 %v8140_v50, %v7861_v14  ;;  %8710 = vst.msk [vmem:[#allocation3 + $0x108] sm:$0xff] %vm317_vm2, %v8674_v9  ;;  %vm21747_vm7 = vcmp.eq.s32.totalorder %v21746_v39, 1  ;;  %v8563_v46 = vadd.f32 %v15471_v18, %v8189_v31  ;;  %v8514_v50 = vpop.f32.mrf.mxu1  ;;  %v9933_v51 = vld [vmem:[#allocation3 + $0x17] sm:$0xff]  ;;  %v13499_v18 = vld [vmem:[%s21179_s5 + $0x90] sm:$0xff] }
 0x424   : > { %v8672_v24 = vsel %vm21747_vm7, %v8636_v32, 0.0  ;;  %v8639_v28 = vmax.f32 %v8603_v57, 0.0  ;;  %v8601_v1 = vadd.f32 %v19714_v33, %v8558_v40  ;;  %v8190_v6 = vadd.f32 %v15432_v27, %v19701_v30  ;;  %v9503_v32 = vld [vmem:[#allocation3 + $0x7] sm:$0xff]  ;;  %v9936_v39 = vld [vmem:[#allocation3 + $0x2f] sm:$0xff] }
 0x425   : > { %v8782_v12 = vld [vmem:[#allocation3 + $0xd6] sm:$0xff]  ;;  %v7862_v36 = vadd.f32 %v19703_v2, %v7300_v53  ;;  %8708 = vst.msk [vmem:[#allocation3 + $0xf8] sm:$0xff] %vm317_vm2, %v8672_v24  ;;  %15518 = vmatmul.mubr.msk.f32.gmra.mxu0 %vm317_vm2, %v8781_v49  ;;  %v8606_v47 = vadd.f32 %v19714_v33, %v8563_v46  ;;  %v8561_v48 = vadd.f32 %v8514_v50, %v8187_v34  ;;  %v15472_v30 = vpop.f32.mrf.mxu1  ;;  %vm21750_vm5 = vcmp.eq.s32.totalorder %v21749_v22, 1  ;;  %v9934_v34 = vld [vmem:[#allocation3 + $0x1f] sm:$0xff]  ;;  %v9955_v45 = vld [vmem:[#allocation3 + $0xc7] sm:$0xff] }
 0x426   : > { %v8742_v15 = vld [vmem:[#allocation3 + $0xd5] sm:$0xff]  ;;  %15580 = vmatmul.mubr.msk.f32.gmra.mxu1 %vm317_vm2, %v8741_v0  ;;  %v8675_v62 = vsel %vm4421_vm13, %v8639_v28, 0.0  ;;  %v8637_v61 = vmax.f32 %v8601_v1, 0.0  ;;  %15520 = vmatprep.mubr.msk.f32.mxu0 %vm317_vm2, %v8782_v12  ;;  %v8564_v20 = vadd.f32 %v15472_v30, %v8190_v6  ;;  %v13498_v24 = vld [vmem:[%s21179_s5 + $0x88] sm:$0xff]  ;;  %v13539_v28 = vld [vmem:[%s21179_s5 + $0xb0] sm:$0xff] }
 0x427   : > { %15582 = vmatprep.mubr.msk.f32.mxu1 %vm317_vm2, %v8742_v15  ;;  %v8188_v2 = vadd.f32 %v8143_v37, %v7862_v36  ;;  %8711 = vst.msk [vmem:[#allocation3 + $0x110] sm:$0xff] %vm317_vm2, %v8675_v62  ;;  %v8642_v3 = vmax.f32 %v8606_v47, 0.0  ;;  %v8604_v13 = vadd.f32 %v19714_v33, %v8561_v48  ;;  %v8517_v29 = vpop.f32.mrf.mxu1  ;;  %v8785_v55 = vld [vmem:[#allocation3 + $0xee] sm:$0xff]  ;;  %v9937_v1 = vld [vmem:[#allocation3 + $0x37] sm:$0xff]  ;;  %v9938_v12 = vld [vmem:[#allocation3 + $0x3f] sm:$0xff] }
 0x428   : > { %v8673_v4 = vsel %vm21750_vm5, %v8637_v61, 0.0  ;;  %v8607_v59 = vadd.f32 %v19714_v33, %v8564_v20  ;;  %v8745_v10 = vld [vmem:[#allocation3 + $0xed] sm:$0xff]  ;;  %v13538_v15 = vld [vmem:[%s21179_s5 + $0xa8] sm:$0xff]  ;;  %v9941_v61 = vld [vmem:[#allocation3 + $0x57] sm:$0xff] }
 0x429   : > { %v8783_v41 = vld [vmem:[#allocation3 + $0xde] sm:$0xff]  ;;  %v8784_v60 = vld [vmem:[#allocation3 + $0xe6] sm:$0xff]  ;;  %8709 = vst.msk [vmem:[#allocation3 + $0x100] sm:$0xff] %vm317_vm2, %v8673_v4  ;;  %v8678_v52 = vsel %vm4424_vm6, %v8642_v3, 0.0  ;;  %v8640_v63 = vmax.f32 %v8604_v13, 0.0  ;;  %v8562_v21 = vadd.f32 %v8517_v29, %v8188_v2  ;;  %v9504_v53 = vld [vmem:[#allocation3 + $0xf] sm:$0xff] }
 0x42a   : > { %v8743_v43 = vld [vmem:[#allocation3 + $0xdd] sm:$0xff]  ;;  %15521 = vmatmul.mubr.msk.f32.gmra.mxu0 %vm317_vm2, %v8783_v41  ;;  %v8744_v11 = vld [vmem:[#allocation3 + $0xe5] sm:$0xff]  ;;  %8714 = vst.msk [vmem:[#allocation3 + $0x128] sm:$0xff] %vm317_vm2, %v8678_v52  ;;  %v8643_v27 = vmax.f32 %v8607_v59, 0.0  ;;  %v16162_v49 = vld [vmem:[%s21179_s5 + $0x98] sm:$0xff] }
 0x42b   : > { %15583 = vmatmul.mubr.msk.f32.gmra.mxu1 %vm317_vm2, %v8743_v43  ;;  %15523 = vmatprep.mubr.msk.f32.mxu0 %vm317_vm2, %v8784_v60  ;;  %v8676_v35 = vsel %vm4422_vm4, %v8640_v63, 0.0  ;;  %v8605_v23 = vadd.f32 %v19714_v33, %v8562_v21  ;;  %v9935_v37 = vld [vmem:[#allocation3 + $0x27] sm:$0xff]  ;;  %v9940_v50 = vld [vmem:[#allocation3 + $0x4f] sm:$0xff]  ;;  %v9942_v47 = vld [vmem:[#allocation3 + $0x5f] sm:$0xff] }
 0x42c   : > { %15585 = vmatprep.mubr.msk.f32.mxu1 %vm317_vm2, %v8744_v11  ;;  %v8786_v19 = vld [vmem:[#allocation3 + $0xf6] sm:$0xff]  ;;  %8712 = vst.msk [vmem:[#allocation3 + $0x118] sm:$0xff] %vm317_vm2, %v8676_v35  ;;  %v8679_v54 = vsel %vm4425_vm14, %v8643_v27, 0.0  ;;  %v9939_v6 = vld [vmem:[#allocation3 + $0x47] sm:$0xff]  ;;  %v9946_v4 = vld [vmem:[#allocation3 + $0x7f] sm:$0xff] }
 0x42d   : > { %v8746_v56 = vld [vmem:[#allocation3 + $0xf5] sm:$0xff]  ;;  %v8641_v16 = vmax.f32 %v8605_v23, 0.0  ;;  %8715 = vst.msk [vmem:[#allocation3 + $0x130] sm:$0xff] %vm317_vm2, %v8679_v54  ;;  %v9943_v2 = vld [vmem:[#allocation3 + $0x67] sm:$0xff]  ;;  %v9950_v41 = vld [vmem:[#allocation3 + $0x9f] sm:$0xff] }
 0x42e   : > { %15524 = vmatmul.mubr.msk.f32.gmra.mxu0 %vm317_vm2, %v8785_v55  ;;  %v8789_v42 = vld [vmem:[#allocation3 + $0x10e] sm:$0xff]  ;;  %v9945_v22 = vld [vmem:[#allocation3 + $0x77] sm:$0xff]  ;;  %v9954_v11 = vld [vmem:[#allocation3 + $0xbf] sm:$0xff] }
 0x42f   : > { %15586 = vmatmul.mubr.msk.f32.gmra.mxu1 %vm317_vm2, %v8745_v10  ;;  %15526 = vmatprep.mubr.msk.f32.mxu0 %vm317_vm2, %v8786_v19  ;;  %v8677_v8 = vsel %vm4423_vm3, %v8641_v16, 0.0  ;;  %v8749_v44 = vld [vmem:[#allocation3 + $0x10d] sm:$0xff]  ;;  %v9949_v20 = vld [vmem:[#allocation3 + $0x97] sm:$0xff]  ;;  %v9958_v59 = vld [vmem:[#allocation3 + $0xdf] sm:$0xff] }
 0x430   : > { %15588 = vmatprep.mubr.msk.f32.mxu1 %vm317_vm2, %v8746_v56  ;;  %v8787_v5 = vld [vmem:[#allocation3 + $0xfe] sm:$0xff]  ;;  %v8788_v14 = vld [vmem:[#allocation3 + $0x106] sm:$0xff]  ;;  %8713 = vst.msk [vmem:[#allocation3 + $0x120] sm:$0xff] %vm317_vm2, %v8677_v8  ;;  %v20134_v62 = vld [vmem:[%s21179_s5 + $0xd8] sm:$0xff] }
 0x431   : > { %v8747_v7 = vld [vmem:[#allocation3 + $0xfd] sm:$0xff]  ;;  %v8748_v31 = vld [vmem:[#allocation3 + $0x105] sm:$0xff]  ;;  %v20144_v48 = vld [vmem:[%s21179_s5 + $0xf8] sm:$0xff] }
 0x432   : > { %15527 = vmatmul.mubr.msk.f32.gmra.mxu0 %vm317_vm2, %v8787_v5  ;;  %v9944_v30 = vld [vmem:[#allocation3 + $0x6f] sm:$0xff]  ;;  %v9947_v3 = vld [vmem:[#allocation3 + $0x87] sm:$0xff]  ;;  %v9953_v29 = vld [vmem:[#allocation3 + $0xb7] sm:$0xff] }
 0x433   : > { %15589 = vmatmul.mubr.msk.f32.gmra.mxu1 %vm317_vm2, %v8747_v7  ;;  %15529 = vmatprep.mubr.msk.f32.mxu0 %vm317_vm2, %v8788_v14  ;;  %v8790_v58 = vld [vmem:[#allocation3 + $0x116] sm:$0xff]  ;;  %v9951_v43 = vld [vmem:[#allocation3 + $0xa7] sm:$0xff]  ;;  %v9962_v35 = vld [vmem:[#allocation3 + $0xff] sm:$0xff] }
 0x434   : > { %15591 = vmatprep.mubr.msk.f32.mxu1 %vm317_vm2, %v8748_v31  ;;  %v8750_v9 = vld [vmem:[#allocation3 + $0x115] sm:$0xff]  ;;  %v9959_v21 = vld [vmem:[#allocation3 + $0xe7] sm:$0xff] }
 0x435   : > { %v9948_v13 = vld [vmem:[#allocation3 + $0x8f] sm:$0xff]  ;;  %v9957_v63 = vld [vmem:[#allocation3 + $0xd7] sm:$0xff]  ;;  %v9963_v27 = vld [vmem:[#allocation3 + $0x107] sm:$0xff] }
 0x436   : > { %15530 = vmatmul.mubr.msk.f32.gmra.mxu0 %vm317_vm2, %v8789_v42  ;;  %v9952_v60 = vld [vmem:[#allocation3 + $0xaf] sm:$0xff]  ;;  %v9961_v26 = vld [vmem:[#allocation3 + $0xf7] sm:$0xff]  ;;  %v10364_v33 = vld [vmem:[#allocation3 + $0x20] sm:$0xff] }
 0x437   : > { %15592 = vmatmul.mubr.msk.f32.gmra.mxu1 %vm317_vm2, %v8749_v44  ;;  %15532 = vmatprep.mubr.msk.f32.mxu0 %vm317_vm2, %v8790_v58  ;;  %v8791_v57 = vld [vmem:[#allocation3 + $0x11e] sm:$0xff]  ;;  %v9956_v52 = vld [vmem:[#allocation3 + $0xcf] sm:$0xff]  ;;  %v9967_v56 = vld [vmem:[#allocation3 + $0x127] sm:$0xff] }
 0x438   : > { %15594 = vmatprep.mubr.msk.f32.mxu1 %vm317_vm2, %v8750_v9  ;;  %v8751_v40 = vld [vmem:[#allocation3 + $0x11d] sm:$0xff]  ;;  %v9960_v55 = vld [vmem:[#allocation3 + $0xef] sm:$0xff] }
 0x439   : > { %v9964_v23 = vld [vmem:[#allocation3 + $0x10f] sm:$0xff]  ;;  %v9965_v10 = vld [vmem:[#allocation3 + $0x117] sm:$0xff]  ;;  %v9966_v19 = vld [vmem:[#allocation3 + $0x11f] sm:$0xff] }
 0x43a   : > { %15533 = vmatmul.mubr.msk.f32.gmra.mxu0 %vm317_vm2, %v8791_v57  ;;  %v9968_v25 = vld [vmem:[#allocation3 + $0x12f] sm:$0xff]  ;;  %v10363_v54 = vld [vmem:[#allocation3 + $0x18] sm:$0xff]  ;;  %v10794_v8 = vld [vmem:[#allocation3 + $0x21] sm:$0xff] }
 0x43b   : > { %15595 = vmatmul.mubr.msk.f32.gmra.mxu1 %vm317_vm2, %v8751_v40  ;;  %15605 = vmatprep.mubr.msk.f32.mxu0 %vm317_vm2, %v9503_v32  ;;  %v10793_v16 = vld [vmem:[#allocation3 + $0x19] sm:$0xff]  ;;  %v13579_v5 = vld [vmem:[%s21179_s5 + $0xd0] sm:$0xff]  ;;  %v10366_v31 = vld [vmem:[#allocation3 + $0x30] sm:$0xff] }
 0x43c   : > { %15667 = vmatprep.mubr.msk.f32.mxu1 %vm317_vm2, %v9933_v51  ;;  %v10365_v7 = vld [vmem:[#allocation3 + $0x28] sm:$0xff]  ;;  %v20214_v42 = vld [vmem:[#allocation3 + $0x31] sm:$0xff]  ;;  %v13578_v44 = vld [vmem:[%s21179_s5 + $0xc8] sm:$0xff] }
 0x43d   : > { %v20210_v14 = vld [vmem:[#allocation3 + $0x29] sm:$0xff]  ;;  %v10367_v9 = vld [vmem:[#allocation3 + $0x38] sm:$0xff]  ;;  %v10368_v57 = vld [vmem:[#allocation3 + $0x40] sm:$0xff] }
 0x43e   : > { %15606 = vmatmul.mubr.msk.f32.vlgmr.msra.gmra.mxu0 %vm317_vm2, %v9504_v53  ;;  %v13619_v58 = vld [vmem:[%s21179_s5 + $0xf0] sm:$0xff]  ;;  %v20226_v32 = vld [vmem:[#allocation3 + $0x39] sm:$0xff] }
 0x43f   : > { %15668 = vmatmul.mubr.msk.f32.vlgmr.msra.gmra.mxu1 %vm317_vm2, %v9934_v34  ;;  %15722 = vmatpush3.msra.mxu0 %v16162_v49  ;;  %v20231_v40 = vld [vmem:[#allocation3 + $0x41] sm:$0xff]  ;;  %v10370_v49 = vld [vmem:[#allocation3 + $0x50] sm:$0xff] }
 0x440   : > { %15608 = vmatprep.mubr.msk.f32.mxu0 %vm317_vm2, %v9933_v51  ;;  %15670 = vmatprep.mubr.msk.f32.mxu1 %vm317_vm2, %v9935_v37  ;;  %v13577_v51 = vld [vmem:[%s21179_s5 + $0xc0] sm:$0xff]  ;;  %v13618_v53 = vld [vmem:[%s21179_s5 + $0xe8] sm:$0xff] }
 0x441   : > { %15723 = vmatprep.subr.mxu0 %v13499_v18  ;;  %15784 = vmatpush3.msra.mxu1 %v19837_v38  ;;  %v13497_v38 = vld [vmem:[%s21179_s5 + $0x80] sm:$0xff] }
 0x442   : > { %15724 = vmatpush3.msra.mxu0 %v13499_v18  ;;  %15785 = vmatprep.subr.mxu1 %v13539_v28  ;;  %v20242_v18 = vld [vmem:[#allocation3 + $0x49] sm:$0xff] }
 0x443   : > { %15609 = vmatmul.mubr.msk.f32.gmra.mxu0 %vm317_vm2, %v9934_v34  ;;  %15671 = vmatmul.mubr.msk.f32.gmra.mxu1 %vm317_vm2, %v9936_v39  ;;  %v10369_v34 = vld [vmem:[#allocation3 + $0x48] sm:$0xff] }
 0x444   : > { %15611 = vmatprep.mubr.msk.f32.mxu0 %vm317_vm2, %v9935_v37  ;;  %15673 = vmatprep.mubr.msk.f32.mxu1 %vm317_vm2, %v9937_v1  ;;  %v20247_v37 = vld [vmem:[#allocation3 + $0x51] sm:$0xff] }
 0x445   : > { %15725 = vmatprep.subr.mxu0 %v13498_v24  ;;  %v15483_v46 = vpop.f32.mrf.mxu0  ;;  %15786 = vmatpush3.msra.mxu1 %v13539_v28  ;;  %v10371_v28 = vld [vmem:[#allocation3 + $0x58] sm:$0xff] }
 0x446   : > { %v15545_v0 = vpop.f32.mrf.mxu1  ;;  %15726 = vmatpush3.msra.mxu0 %v13498_v24  ;;  %15787 = vmatprep.subr.mxu1 %v13538_v15  ;;  %v20255_v24 = vld [vmem:[%s21179_s5 + $0x118] sm:$0xff] }
 0x447   : > { %v20122_v36 = vadd.f32 %v15545_v0, %v15483_v46  ;;  %15612 = vmatmul.mubr.msk.f32.gmra.mxu0 %vm317_vm2, %v9936_v39  ;;  %15674 = vmatmul.mubr.msk.f32.gmra.mxu1 %vm317_vm2, %v9938_v12  ;;  %v13617_v39 = vld [vmem:[%s21179_s5 + $0xe0] sm:$0xff]  ;;  %v10372_v46 = vld [vmem:[#allocation3 + $0x60] sm:$0xff] }
 0x448   : > { %15614 = vmatprep.mubr.msk.f32.mxu0 %vm317_vm2, %v9937_v1  ;;  %15676 = vmatprep.mubr.msk.f32.mxu1 %vm317_vm2, %v9939_v6  ;;  %v20260_v1 = vld [vmem:[#allocation3 + $0x59] sm:$0xff]  ;;  %v20266_v0 = vld [vmem:[#allocation3 + $0x61] sm:$0xff] }
 0x449   : > { %15727 = vmatprep.subr.mxu0 %v13497_v38  ;;  %15788 = vmatpush3.msra.mxu1 %v13538_v15  ;;  %v10374_v15 = vld [vmem:[#allocation3 + $0x70] sm:$0xff] }
 0x44a   : > { %15728 = vmatpush3.msra.mxu0 %v13497_v38  ;;  %15789 = vmatprep.subr.mxu1 %v13537_v17  ;;  %v20271_v38 = vld [vmem:[#allocation3 + $0x69] sm:$0xff] }
 0x44b   : > { %15615 = vmatmul.mubr.msk.f32.gmra.mxu0 %vm317_vm2, %v9938_v12  ;;  %15677 = vmatmul.mubr.msk.f32.gmra.mxu1 %vm317_vm2, %v9940_v50  ;;  %v10373_v12 = vld [vmem:[#allocation3 + $0x68] sm:$0xff] }
 0x44c   : > { %15617 = vmatprep.mubr.msk.f32.mxu0 %vm317_vm2, %v9939_v6  ;;  %15679 = vmatprep.mubr.msk.f32.mxu1 %vm317_vm2, %v9941_v61  ;;  %v20276_v6 = vld [vmem:[#allocation3 + $0x71] sm:$0xff] }
 0x44d   : > { %15845 = vmatprep.subr.mxu0 %v20134_v62  ;;  %15790 = vmatpush3.msra.mxu1 %v13537_v17  ;;  %v20281_v17 = vld [vmem:[#allocation3 + $0x79] sm:$0xff] }
 0x44e   : > { %15907 = vmatprep.subr.mxu1 %v20144_v48 }
 0x44f   : > { %15618 = vmatmul.mubr.msk.f32.gmra.mxu0 %vm317_vm2, %v9940_v50  ;;  %15680 = vmatmul.mubr.msk.f32.gmra.mxu1 %vm317_vm2, %v9942_v47  ;;  %v10375_v50 = vld [vmem:[#allocation3 + $0x78] sm:$0xff] }
 0x450   : > { %15620 = vmatprep.mubr.msk.f32.mxu0 %vm317_vm2, %v9941_v61  ;;  %15682 = vmatprep.mubr.msk.f32.mxu1 %vm317_vm2, %v9943_v2  ;;  %v20286_v61 = vld [vmem:[#allocation3 + $0x81] sm:$0xff] }
 0x453   : > { %15621 = vmatmul.mubr.msk.f32.gmra.mxu0 %vm317_vm2, %v9942_v47  ;;  %15683 = vmatmul.mubr.msk.f32.gmra.mxu1 %vm317_vm2, %v9944_v30  ;;  %v10377_v47 = vld [vmem:[#allocation3 + $0x88] sm:$0xff] }
 0x454   : > { %15623 = vmatprep.mubr.msk.f32.mxu0 %vm317_vm2, %v9943_v2  ;;  %15685 = vmatprep.mubr.msk.f32.mxu1 %vm317_vm2, %v9945_v22  ;;  %v10378_v2 = vld [vmem:[#allocation3 + $0x90] sm:$0xff] }
 0x457   : > { %15624 = vmatmul.mubr.msk.f32.gmra.mxu0 %vm317_vm2, %v9944_v30  ;;  %15686 = vmatmul.mubr.msk.f32.gmra.mxu1 %vm317_vm2, %v9946_v4  ;;  %v20296_v30 = vld [vmem:[#allocation3 + $0x91] sm:$0xff] }
 0x458   : > { %15626 = vmatprep.mubr.msk.f32.mxu0 %vm317_vm2, %v9945_v22  ;;  %15688 = vmatprep.mubr.msk.f32.mxu1 %vm317_vm2, %v9947_v3  ;;  %v10379_v22 = vld [vmem:[#allocation3 + $0x98] sm:$0xff] }
 0x45b   : > { %15627 = vmatmul.mubr.msk.f32.gmra.mxu0 %vm317_vm2, %v9946_v4  ;;  %15689 = vmatmul.mubr.msk.f32.gmra.mxu1 %vm317_vm2, %v9948_v13  ;;  %v20301_v4 = vld [vmem:[#allocation3 + $0x99] sm:$0xff] }
 0x45c   : > { %15629 = vmatprep.mubr.msk.f32.mxu0 %vm317_vm2, %v9947_v3  ;;  %15691 = vmatprep.mubr.msk.f32.mxu1 %vm317_vm2, %v9949_v20  ;;  %v10380_v3 = vld [vmem:[#allocation3 + $0xa0] sm:$0xff] }
 0x45f   : > { %15630 = vmatmul.mubr.msk.f32.gmra.mxu0 %vm317_vm2, %v9948_v13  ;;  %15692 = vmatmul.mubr.msk.f32.gmra.mxu1 %vm317_vm2, %v9950_v41  ;;  %v20306_v13 = vld [vmem:[#allocation3 + $0xa1] sm:$0xff] }
 0x460   : > { %15632 = vmatprep.mubr.msk.f32.mxu0 %vm317_vm2, %v9949_v20  ;;  %15694 = vmatprep.mubr.msk.f32.mxu1 %vm317_vm2, %v9951_v43  ;;  %v10381_v20 = vld [vmem:[#allocation3 + $0xa8] sm:$0xff] }
 0x463   : > { %15633 = vmatmul.mubr.msk.f32.gmra.mxu0 %vm317_vm2, %v9950_v41  ;;  %15695 = vmatmul.mubr.msk.f32.gmra.mxu1 %vm317_vm2, %v9952_v60  ;;  %v20311_v41 = vld [vmem:[#allocation3 + $0xa9] sm:$0xff] }
 0x464   : > { %15635 = vmatprep.mubr.msk.f32.mxu0 %vm317_vm2, %v9951_v43  ;;  %15697 = vmatprep.mubr.msk.f32.mxu1 %vm317_vm2, %v9953_v29  ;;  %v10382_v43 = vld [vmem:[#allocation3 + $0xb0] sm:$0xff] }
 0x467   : > { %15636 = vmatmul.mubr.msk.f32.gmra.mxu0 %vm317_vm2, %v9952_v60  ;;  %15698 = vmatmul.mubr.msk.f32.gmra.mxu1 %vm317_vm2, %v9954_v11  ;;  %v20316_v60 = vld [vmem:[#allocation3 + $0xb1] sm:$0xff] }
 0x468   : > { %15638 = vmatprep.mubr.msk.f32.mxu0 %vm317_vm2, %v9953_v29  ;;  %15700 = vmatprep.mubr.msk.f32.mxu1 %vm317_vm2, %v9955_v45  ;;  %v10383_v29 = vld [vmem:[#allocation3 + $0xb8] sm:$0xff] }
 0x46b   : > { %15639 = vmatmul.mubr.msk.f32.gmra.mxu0 %vm317_vm2, %v9954_v11  ;;  %15701 = vmatmul.mubr.msk.f32.gmra.mxu1 %vm317_vm2, %v9956_v52  ;;  %v20321_v11 = vld [vmem:[#allocation3 + $0xb9] sm:$0xff] }
 0x46c   : > { %15641 = vmatprep.mubr.msk.f32.mxu0 %vm317_vm2, %v9955_v45  ;;  %15703 = vmatprep.mubr.msk.f32.mxu1 %vm317_vm2, %v9957_v63  ;;  %v10384_v45 = vld [vmem:[#allocation3 + $0xc0] sm:$0xff] }
 0x46f   : > { %15642 = vmatmul.mubr.msk.f32.gmra.mxu0 %vm317_vm2, %v9956_v52  ;;  %15704 = vmatmul.mubr.msk.f32.gmra.mxu1 %vm317_vm2, %v9958_v59  ;;  %v20326_v52 = vld [vmem:[#allocation3 + $0xc1] sm:$0xff] }
 0x470   : > { %15644 = vmatprep.mubr.msk.f32.mxu0 %vm317_vm2, %v9957_v63  ;;  %15706 = vmatprep.mubr.msk.f32.mxu1 %vm317_vm2, %v9959_v21  ;;  %v10385_v63 = vld [vmem:[#allocation3 + $0xc8] sm:$0xff] }
 0x473   : > { %15645 = vmatmul.mubr.msk.f32.gmra.mxu0 %vm317_vm2, %v9958_v59  ;;  %15707 = vmatmul.mubr.msk.f32.gmra.mxu1 %vm317_vm2, %v9960_v55  ;;  %v20331_v59 = vld [vmem:[#allocation3 + $0xc9] sm:$0xff] }
 0x474   : > { %15647 = vmatprep.mubr.msk.f32.mxu0 %vm317_vm2, %v9959_v21  ;;  %15709 = vmatprep.mubr.msk.f32.mxu1 %vm317_vm2, %v9961_v26  ;;  %v10386_v21 = vld [vmem:[#allocation3 + $0xd0] sm:$0xff] }
 0x477   : > { %15648 = vmatmul.mubr.msk.f32.gmra.mxu0 %vm317_vm2, %v9960_v55  ;;  %15710 = vmatmul.mubr.msk.f32.gmra.mxu1 %vm317_vm2, %v9962_v35  ;;  %v20336_v55 = vld [vmem:[#allocation3 + $0xd1] sm:$0xff] }
 0x478   : > { %15650 = vmatprep.mubr.msk.f32.mxu0 %vm317_vm2, %v9961_v26  ;;  %15712 = vmatprep.mubr.msk.f32.mxu1 %vm317_vm2, %v9963_v27  ;;  %v10387_v26 = vld [vmem:[#allocation3 + $0xd8] sm:$0xff] }
 0x47b   : > { %15651 = vmatmul.mubr.msk.f32.gmra.mxu0 %vm317_vm2, %v9962_v35  ;;  %15713 = vmatmul.mubr.msk.f32.gmra.mxu1 %vm317_vm2, %v9964_v23  ;;  %v20341_v35 = vld [vmem:[#allocation3 + $0xd9] sm:$0xff] }
 0x47c   : > { %15653 = vmatprep.mubr.msk.f32.mxu0 %vm317_vm2, %v9963_v27  ;;  %15715 = vmatprep.mubr.msk.f32.mxu1 %vm317_vm2, %v9965_v10  ;;  %v10388_v27 = vld [vmem:[#allocation3 + $0xe0] sm:$0xff] }
 0x47f   : > { %15654 = vmatmul.mubr.msk.f32.gmra.mxu0 %vm317_vm2, %v9964_v23  ;;  %15716 = vmatmul.mubr.msk.f32.gmra.mxu1 %vm317_vm2, %v9966_v19  ;;  %v20346_v23 = vld [vmem:[#allocation3 + $0xe1] sm:$0xff] }
 0x480   : > { %15656 = vmatprep.mubr.msk.f32.mxu0 %vm317_vm2, %v9965_v10  ;;  %15718 = vmatprep.mubr.msk.f32.mxu1 %vm317_vm2, %v9967_v56  ;;  %v10389_v10 = vld [vmem:[#allocation3 + $0xe8] sm:$0xff]  ;;  %v20356_v56 = vpop.f32.mrf.mxu0 }
 0x483   : > { %15657 = vmatmul.mubr.msk.f32.gmra.mxu0 %vm317_vm2, %v9966_v19  ;;  %15719 = vmatmul.mubr.msk.f32.gmra.mxu1 %vm317_vm2, %v9968_v25  ;;  %v20351_v19 = vld [vmem:[#allocation3 + $0xe9] sm:$0xff]  ;;  %v20358_v25 = vpop.f32.mrf.mxu1 }
 0x484   : > { %15729 = vmatprep.mubr.msk.f32.mxu0 %vm317_vm2, %v10363_v54  ;;  %15791 = vmatprep.mubr.msk.f32.mxu1 %vm317_vm2, %v10793_v16  ;;  %v10390_v54 = vld [vmem:[#allocation3 + $0xf0] sm:$0xff] }
 0x485   : > { %v20360_v16 = vld [vmem:[#allocation3 + $0xf1] sm:$0xff] }
 0x487   : > { %15730 = vmatmul.mubr.msk.f32.vlgmr.msra.gmra.mxu0 %vm317_vm2, %v10364_v33  ;;  %15792 = vmatmul.mubr.msk.f32.vlgmr.msra.gmra.mxu1 %vm317_vm2, %v10794_v8 }
 0x488   : > { %15846 = vmatpush3.msra.mxu0 %v20134_v62  ;;  %15732 = vmatprep.mubr.msk.f32.mxu0 %vm317_vm2, %v10365_v7  ;;  %v10376_v62 = vld [vmem:[#allocation3 + $0x80] sm:$0xff] }
 0x489   : > { %15794 = vmatprep.mubr.msk.f32.mxu1 %vm317_vm2, %v20210_v14  ;;  %15847 = vmatprep.subr.mxu0 %v13579_v5  ;;  %v20365_v7 = vld [vmem:[#allocation3 + $0xf9] sm:$0xff] }
 0x48a   : > { %15848 = vmatpush3.msra.mxu0 %v13579_v5  ;;  %15908 = vmatpush3.msra.mxu1 %v20144_v48  ;;  %v20291_v48 = vld [vmem:[#allocation3 + $0x89] sm:$0xff]  ;;  %v10391_v5 = vld [vmem:[#allocation3 + $0xf8] sm:$0xff] }
 0x48b   : > { %15733 = vmatmul.mubr.msk.f32.gmra.mxu0 %vm317_vm2, %v10366_v31  ;;  %15795 = vmatmul.mubr.msk.f32.gmra.mxu1 %vm317_vm2, %v20214_v42 }
 0x48c   : > { %15735 = vmatprep.mubr.msk.f32.mxu0 %vm317_vm2, %v10367_v9  ;;  %15797 = vmatprep.mubr.msk.f32.mxu1 %vm317_vm2, %v20226_v32 }
 0x48d   : > { %15849 = vmatprep.subr.mxu0 %v13578_v44  ;;  %15909 = vmatprep.subr.mxu1 %v13619_v58 }
 0x48e   : > { %15850 = vmatpush3.msra.mxu0 %v13578_v44  ;;  %15910 = vmatpush3.msra.mxu1 %v13619_v58 }
 0x48f   : > { %15736 = vmatmul.mubr.msk.f32.gmra.mxu0 %vm317_vm2, %v10368_v57  ;;  %15798 = vmatmul.mubr.msk.f32.gmra.mxu1 %vm317_vm2, %v20231_v40  ;;  %v10392_v57 = vld [vmem:[#allocation3 + $0x100] sm:$0xff] }
 0x490   : > { %15738 = vmatprep.mubr.msk.f32.mxu0 %vm317_vm2, %v10369_v34  ;;  %15800 = vmatprep.mubr.msk.f32.mxu1 %vm317_vm2, %v20242_v18 }
 0x491   : > { %15851 = vmatprep.subr.mxu0 %v13577_v51  ;;  %15911 = vmatprep.subr.mxu1 %v13618_v53 }
 0x492   : > { %15852 = vmatpush3.msra.mxu0 %v13577_v51  ;;  %15912 = vmatpush3.msra.mxu1 %v13618_v53  ;;  %v20374_v51 = vld [vmem:[#allocation3 + $0x101] sm:$0xff] }
 0x493   : > { %15739 = vmatmul.mubr.msk.f32.gmra.mxu0 %vm317_vm2, %v10370_v49  ;;  %15801 = vmatmul.mubr.msk.f32.gmra.mxu1 %vm317_vm2, %v20247_v37  ;;  %v10393_v49 = vld [vmem:[#allocation3 + $0x108] sm:$0xff] }
 0x494   : > { %15741 = vmatprep.mubr.msk.f32.mxu0 %vm317_vm2, %v10371_v28  ;;  %15803 = vmatprep.mubr.msk.f32.mxu1 %vm317_vm2, %v20260_v1 }
 0x495   : > { %15913 = vmatprep.subr.mxu1 %v13617_v39  ;;  %15969 = vmatprep.subr.mxu0 %v20255_v24 }
 0x496   : > { %15914 = vmatpush3.msra.mxu1 %v13617_v39  ;;  %v20379_v39 = vld [vmem:[#allocation3 + $0x109] sm:$0xff] }
 0x497   : > { %15742 = vmatmul.mubr.msk.f32.gmra.mxu0 %vm317_vm2, %v10372_v46  ;;  %15804 = vmatmul.mubr.msk.f32.gmra.mxu1 %vm317_vm2, %v20266_v0 }
 0x498   : > { %15744 = vmatprep.mubr.msk.f32.mxu0 %vm317_vm2, %v10373_v12  ;;  %15806 = vmatprep.mubr.msk.f32.mxu1 %vm317_vm2, %v20271_v38 }
 0x49b   : > { %15745 = vmatmul.mubr.msk.f32.gmra.mxu0 %vm317_vm2, %v10374_v15  ;;  %15807 = vmatmul.mubr.msk.f32.gmra.mxu1 %vm317_vm2, %v20276_v6 }
 0x49c   : > { %15747 = vmatprep.mubr.msk.f32.mxu0 %vm317_vm2, %v10375_v50  ;;  %15809 = vmatprep.mubr.msk.f32.mxu1 %vm317_vm2, %v20281_v17  ;;  %v10394_v50 = vld [vmem:[#allocation3 + $0x110] sm:$0xff] }
 0x49f   : > { %15748 = vmatmul.mubr.msk.f32.gmra.mxu0 %vm317_vm2, %v10376_v62  ;;  %15810 = vmatmul.mubr.msk.f32.gmra.mxu1 %vm317_vm2, %v20286_v61  ;;  %v20388_v62 = vld [vmem:[#allocation3 + $0x111] sm:$0xff] }
 0x4a0   : > { %15750 = vmatprep.mubr.msk.f32.mxu0 %vm317_vm2, %v10377_v47  ;;  %15812 = vmatprep.mubr.msk.f32.mxu1 %vm317_vm2, %v20291_v48 }
 0x4a3   : > { %15751 = vmatmul.mubr.msk.f32.gmra.mxu0 %vm317_vm2, %v10378_v2  ;;  %15813 = vmatmul.mubr.msk.f32.gmra.mxu1 %vm317_vm2, %v20296_v30 }
 0x4a4   : > { %15753 = vmatprep.mubr.msk.f32.mxu0 %vm317_vm2, %v10379_v22  ;;  %15815 = vmatprep.mubr.msk.f32.mxu1 %vm317_vm2, %v20301_v4  ;;  %v10395_v22 = vld [vmem:[#allocation3 + $0x118] sm:$0xff] }
 0x4a7   : > { %15754 = vmatmul.mubr.msk.f32.gmra.mxu0 %vm317_vm2, %v10380_v3  ;;  %15816 = vmatmul.mubr.msk.f32.gmra.mxu1 %vm317_vm2, %v20306_v13  ;;  %v20393_v3 = vld [vmem:[#allocation3 + $0x119] sm:$0xff] }
 0x4a8   : > { %15756 = vmatprep.mubr.msk.f32.mxu0 %vm317_vm2, %v10381_v20  ;;  %15818 = vmatprep.mubr.msk.f32.mxu1 %vm317_vm2, %v20311_v41 }
 0x4ab   : > { %15757 = vmatmul.mubr.msk.f32.gmra.mxu0 %vm317_vm2, %v10382_v43  ;;  %15819 = vmatmul.mubr.msk.f32.gmra.mxu1 %vm317_vm2, %v20316_v60 }
 0x4ac   : > { %15759 = vmatprep.mubr.msk.f32.mxu0 %vm317_vm2, %v10383_v29  ;;  %15821 = vmatprep.mubr.msk.f32.mxu1 %vm317_vm2, %v20321_v11 }
 0x4af   : > { %15760 = vmatmul.mubr.msk.f32.gmra.mxu0 %vm317_vm2, %v10384_v45  ;;  %15822 = vmatmul.mubr.msk.f32.gmra.mxu1 %vm317_vm2, %v20326_v52 }
 0x4b0   : > { %15762 = vmatprep.mubr.msk.f32.mxu0 %vm317_vm2, %v10385_v63  ;;  %15824 = vmatprep.mubr.msk.f32.mxu1 %vm317_vm2, %v20331_v59  ;;  %v10396_v63 = vld [vmem:[#allocation3 + $0x120] sm:$0xff] }
 0x4b3   : > { %15763 = vmatmul.mubr.msk.f32.gmra.mxu0 %vm317_vm2, %v10386_v21  ;;  %15825 = vmatmul.mubr.msk.f32.gmra.mxu1 %vm317_vm2, %v20336_v55  ;;  %v20402_v21 = vld [vmem:[#allocation3 + $0x121] sm:$0xff] }
 0x4b4   : > { %15765 = vmatprep.mubr.msk.f32.mxu0 %vm317_vm2, %v10387_v26  ;;  %15827 = vmatprep.mubr.msk.f32.mxu1 %vm317_vm2, %v20341_v35 }
 0x4b7   : > { %15766 = vmatmul.mubr.msk.f32.gmra.mxu0 %vm317_vm2, %v10388_v27  ;;  %15828 = vmatmul.mubr.msk.f32.gmra.mxu1 %vm317_vm2, %v20346_v23  ;;  %v15486_v33 = vpop.f32.mrf.mxu0 }
 0x4b8   : > { %15768 = vmatprep.mubr.msk.f32.mxu0 %vm317_vm2, %v10389_v10  ;;  %15830 = vmatprep.mubr.msk.f32.mxu1 %vm317_vm2, %v20351_v19  ;;  %v15548_v8 = vpop.f32.mrf.mxu1  ;;  %v10397_v10 = vld [vmem:[#allocation3 + $0x128] sm:$0xff] }
 0x4b9   : > { %v20367_v31 = vadd.f32 %v15548_v8, %v15486_v33  ;;  %v8981_v44 = vpop.f32.mrf.mxu0 }
 0x4ba   : > { %v9334_v58 = vpop.f32.mrf.mxu1 }
 0x4bb   : > { %15769 = vmatmul.mubr.msk.f32.gmra.mxu0 %vm317_vm2, %v10390_v54  ;;  %15831 = vmatmul.mubr.msk.f32.gmra.mxu1 %vm317_vm2, %v20360_v16  ;;  %v20372_v9 = vadd.f32 %v9334_v58, %v8981_v44  ;;  %v15489_v53 = vpop.f32.mrf.mxu0  ;;  %v20407_v54 = vld [vmem:[#allocation3 + $0x129] sm:$0xff] }
 0x4bc   : > { %15771 = vmatprep.mubr.msk.f32.mxu0 %vm317_vm2, %v10391_v5  ;;  %15833 = vmatprep.mubr.msk.f32.mxu1 %vm317_vm2, %v20365_v7  ;;  %v15551_v34 = vpop.f32.mrf.mxu1  ;;  %v10398_v58 = vld [vmem:[#allocation3 + $0x130] sm:$0xff] }
 0x4bd   : > { %v20381_v28 = vadd.f32 %v15551_v34, %v15489_v53  ;;  %v8991_v46 = vpop.f32.mrf.mxu0 }
 0x4be   : > { %v9344_v12 = vpop.f32.mrf.mxu1 }
 0x4bf   : > { %15772 = vmatmul.mubr.msk.f32.gmra.mxu0 %vm317_vm2, %v10392_v57  ;;  %15834 = vmatmul.mubr.msk.f32.gmra.mxu1 %vm317_vm2, %v20374_v51  ;;  %v20386_v15 = vadd.f32 %v9344_v12, %v8991_v46  ;;  %v15492_v47 = vpop.f32.mrf.mxu0  ;;  %v20416_v57 = vld [vmem:[#allocation3 + $0x131] sm:$0xff] }
 0x4c0   : > { %15774 = vmatprep.mubr.msk.f32.mxu0 %vm317_vm2, %v10393_v49  ;;  %15836 = vmatprep.mubr.msk.f32.mxu1 %vm317_vm2, %v20379_v39  ;;  %v15554_v2 = vpop.f32.mrf.mxu1  ;;  %v11653_v49 = vld [vmem:[#allocation3 + $0x2a] sm:$0xff] }
 0x4c1   : > { %v20395_v20 = vadd.f32 %v15554_v2, %v15492_v47  ;;  %v9001_v43 = vpop.f32.mrf.mxu0  ;;  %v11654_v2 = vld [vmem:[#allocation3 + $0x32] sm:$0xff] }
 0x4c2   : > { %v9354_v29 = vpop.f32.mrf.mxu1 }
 0x4c3   : > { %15775 = vmatmul.mubr.msk.f32.gmra.mxu0 %vm317_vm2, %v10394_v50  ;;  %15837 = vmatmul.mubr.msk.f32.gmra.mxu1 %vm317_vm2, %v20388_v62  ;;  %v20400_v45 = vadd.f32 %v9354_v29, %v9001_v43  ;;  %v15495_v26 = vpop.f32.mrf.mxu0 }
 0x4c4   : > { %15777 = vmatprep.mubr.msk.f32.mxu0 %vm317_vm2, %v10395_v22  ;;  %15839 = vmatprep.mubr.msk.f32.mxu1 %vm317_vm2, %v20393_v3  ;;  %v15557_v27 = vpop.f32.mrf.mxu1  ;;  %v13659_v22 = vld [vmem:[%s21179_s5 + $0x110] sm:$0xff] }
 0x4c5   : > { %v20409_v33 = vadd.f32 %v15557_v27, %v15495_v26  ;;  %v9011_v8 = vpop.f32.mrf.mxu0 }
 0x4c6   : > { %v9364_v5 = vpop.f32.mrf.mxu1 }
 0x4c7   : > { %15778 = vmatmul.mubr.msk.f32.gmra.mxu0 %vm317_vm2, %v10396_v63  ;;  %15840 = vmatmul.mubr.msk.f32.gmra.mxu1 %vm317_vm2, %v20402_v21  ;;  %v20414_v44 = vadd.f32 %v9364_v5, %v9011_v8  ;;  %v15498_v53 = vpop.f32.mrf.mxu0  ;;  %v11656_v8 = vld [vmem:[#allocation3 + $0x42] sm:$0xff] }
 0x4c8   : > { %15780 = vmatprep.mubr.msk.f32.mxu0 %vm317_vm2, %v10397_v10  ;;  %15842 = vmatprep.mubr.msk.f32.mxu1 %vm317_vm2, %v20407_v54  ;;  %v15560_v34 = vpop.f32.mrf.mxu1 }
 0x4c9   : > { %v20421_v46 = vadd.f32 %v15560_v34, %v15498_v53  ;;  %v9021_v12 = vpop.f32.mrf.mxu0 }
 0x4ca   : > { %v9374_v50 = vpop.f32.mrf.mxu1 }
 0x4cb   : > { %15781 = vmatmul.mubr.msk.f32.gmra.mxu0 %vm317_vm2, %v10398_v58  ;;  %15843 = vmatmul.mubr.msk.f32.gmra.mxu1 %vm317_vm2, %v20416_v57  ;;  %v20426_v47 = vadd.f32 %v9374_v50, %v9021_v12  ;;  %v15501_v43 = vpop.f32.mrf.mxu0  ;;  %v11658_v12 = vld [vmem:[#allocation3 + $0x52] sm:$0xff] }
 0x4cc   : > { %15853 = vmatprep.mubr.msk.f32.mxu0 %vm317_vm2, %v20210_v14  ;;  %15915 = vmatprep.mubr.msk.f32.mxu1 %vm317_vm2, %v11653_v49  ;;  %v15563_v29 = vpop.f32.mrf.mxu1  ;;  %v11655_v14 = vld [vmem:[#allocation3 + $0x3a] sm:$0xff] }
 0x4cd   : > { %v20434_v63 = vadd.f32 %v15563_v29, %v15501_v43  ;;  %v9031_v26 = vpop.f32.mrf.mxu0 }
 0x4ce   : > { %v9384_v27 = vpop.f32.mrf.mxu1 }
 0x4cf   : > { %15854 = vmatmul.mubr.msk.f32.vlgmr.msra.gmra.mxu0 %vm317_vm2, %v20214_v42  ;;  %15916 = vmatmul.mubr.msk.f32.vlgmr.msra.gmra.mxu1 %vm317_vm2, %v11654_v2  ;;  %v20440_v10 = vadd.f32 %v9384_v27, %v9031_v26  ;;  %v13658_v42 = vld [vmem:[%s21179_s5 + $0x108] sm:$0xff] }
 0x4d0   : > { %15970 = vmatpush3.msra.mxu0 %v20255_v24  ;;  %15856 = vmatprep.mubr.msk.f32.mxu0 %vm317_vm2, %v20226_v32  ;;  %v15504_v5 = vpop.f32.mrf.mxu0  ;;  %v11657_v32 = vld [vmem:[#allocation3 + $0x4a] sm:$0xff]  ;;  %v11660_v26 = vld [vmem:[#allocation3 + $0x62] sm:$0xff] }
 0x4d1   : > { %15918 = vmatprep.mubr.msk.f32.mxu1 %vm317_vm2, %v11655_v14  ;;  %15971 = vmatprep.subr.mxu0 %v13659_v22  ;;  %v15566_v58 = vpop.f32.mrf.mxu1 }
 0x4d2   : > { %15972 = vmatpush3.msra.mxu0 %v13659_v22  ;;  %v20448_v24 = vadd.f32 %v15566_v58, %v15504_v5  ;;  %v9041_v53 = vpop.f32.mrf.mxu0 }
 0x4d3   : > { %15857 = vmatmul.mubr.msk.f32.gmra.mxu0 %vm317_vm2, %v20231_v40  ;;  %15919 = vmatmul.mubr.msk.f32.gmra.mxu1 %vm317_vm2, %v11656_v8  ;;  %v9394_v34 = vpop.f32.mrf.mxu1  ;;  %v13657_v40 = vld [vmem:[%s21179_s5 + $0x100] sm:$0xff] }
 0x4d4   : > { %15859 = vmatprep.mubr.msk.f32.mxu0 %vm317_vm2, %v20242_v18  ;;  %15921 = vmatprep.mubr.msk.f32.mxu1 %vm317_vm2, %v11657_v32  ;;  %v20453_v49 = vadd.f32 %v9394_v34, %v9041_v53  ;;  %v15507_v50 = vpop.f32.mrf.mxu0  ;;  %v11659_v18 = vld [vmem:[#allocation3 + $0x5a] sm:$0xff]  ;;  %v11662_v32 = vld [vmem:[#allocation3 + $0x72] sm:$0xff] }
 0x4d5   : > { %15973 = vmatprep.subr.mxu0 %v13658_v42  ;;  %v15569_v2 = vpop.f32.mrf.mxu1 }
 0x4d6   : > { %15974 = vmatpush3.msra.mxu0 %v13658_v42  ;;  %v20461_v22 = vadd.f32 %v15569_v2, %v15507_v50  ;;  %v9051_v43 = vpop.f32.mrf.mxu0  ;;  %v11664_v2 = vld [vmem:[#allocation3 + $0x82] sm:$0xff] }
 0x4d7   : > { %15860 = vmatmul.mubr.msk.f32.gmra.mxu0 %vm317_vm2, %v20247_v37  ;;  %15922 = vmatmul.mubr.msk.f32.gmra.mxu1 %vm317_vm2, %v11658_v12  ;;  %v9404_v29 = vpop.f32.mrf.mxu1  ;;  %v11661_v37 = vld [vmem:[#allocation3 + $0x6a] sm:$0xff] }
 0x4d8   : > { %15862 = vmatprep.mubr.msk.f32.mxu0 %vm317_vm2, %v20260_v1  ;;  %15924 = vmatprep.mubr.msk.f32.mxu1 %vm317_vm2, %v11659_v18  ;;  %v20466_v14 = vadd.f32 %v9404_v29, %v9051_v43  ;;  %v15510_v27 = vpop.f32.mrf.mxu0 }
 0x4d9   : > { %15975 = vmatprep.subr.mxu0 %v13657_v40  ;;  %v15572_v8 = vpop.f32.mrf.mxu1 }
 0x4da   : > { %15976 = vmatpush3.msra.mxu0 %v13657_v40  ;;  %v20471_v42 = vadd.f32 %v15572_v8, %v15510_v27  ;;  %v9061_v1 = vpop.f32.mrf.mxu0  ;;  %v11666_v8 = vld [vmem:[#allocation3 + $0x92] sm:$0xff] }
 0x4db   : > { %15863 = vmatmul.mubr.msk.f32.gmra.mxu0 %vm317_vm2, %v20266_v0  ;;  %15925 = vmatmul.mubr.msk.f32.gmra.mxu1 %vm317_vm2, %v11660_v26  ;;  %v9414_v5 = vpop.f32.mrf.mxu1  ;;  %v11663_v0 = vld [vmem:[#allocation3 + $0x7a] sm:$0xff] }
 0x4dc   : > { %15865 = vmatprep.mubr.msk.f32.mxu0 %vm317_vm2, %v20271_v38  ;;  %15927 = vmatprep.mubr.msk.f32.mxu1 %vm317_vm2, %v11661_v37  ;;  %v20476_v58 = vadd.f32 %v9414_v5, %v9061_v1  ;;  %v15513_v53 = vpop.f32.mrf.mxu0 }
 0x4dd   : > { %v15575_v34 = vpop.f32.mrf.mxu1 }
 0x4de   : > { %v20481_v12 = vadd.f32 %v15575_v34, %v15513_v53  ;;  %v9071_v38 = vpop.f32.mrf.mxu0  ;;  %v11668_v34 = vld [vmem:[#allocation3 + $0xa2] sm:$0xff] }
 0x4df   : > { %15866 = vmatmul.mubr.msk.f32.gmra.mxu0 %vm317_vm2, %v20276_v6  ;;  %15928 = vmatmul.mubr.msk.f32.gmra.mxu1 %vm317_vm2, %v11662_v32  ;;  %v9424_v40 = vpop.f32.mrf.mxu1  ;;  %v11665_v6 = vld [vmem:[#allocation3 + $0x8a] sm:$0xff] }
 0x4e0   : > { %15868 = vmatprep.mubr.msk.f32.mxu0 %vm317_vm2, %v20281_v17  ;;  %15930 = vmatprep.mubr.msk.f32.mxu1 %vm317_vm2, %v11663_v0  ;;  %v20486_v50 = vadd.f32 %v9424_v40, %v9071_v38 }
 0x4e1   : > { %v15516_v18 = vpop.f32.mrf.mxu0 }
 0x4e2   : > { %v15578_v43 = vpop.f32.mrf.mxu1 }
 0x4e3   : > { %15869 = vmatmul.mubr.msk.f32.gmra.mxu0 %vm317_vm2, %v20286_v61  ;;  %15931 = vmatmul.mubr.msk.f32.gmra.mxu1 %vm317_vm2, %v11664_v2  ;;  %v20491_v29 = vadd.f32 %v15578_v43, %v15516_v18  ;;  %v9081_v17 = vpop.f32.mrf.mxu0  ;;  %v11667_v61 = vld [vmem:[#allocation3 + $0x9a] sm:$0xff]  ;;  %v11670_v43 = vld [vmem:[#allocation3 + $0xb2] sm:$0xff] }
 0x4e4   : > { %15871 = vmatprep.mubr.msk.f32.mxu0 %vm317_vm2, %v20291_v48  ;;  %15933 = vmatprep.mubr.msk.f32.mxu1 %vm317_vm2, %v11665_v6  ;;  %v9434_v26 = vpop.f32.mrf.mxu1 }
 0x4e5   : > { %v20496_v27 = vadd.f32 %v9434_v26, %v9081_v17  ;;  %v15519_v37 = vpop.f32.mrf.mxu0 }
 0x4e6   : > { %v15581_v1 = vpop.f32.mrf.mxu1 }
 0x4e7   : > { %15872 = vmatmul.mubr.msk.f32.gmra.mxu0 %vm317_vm2, %v20296_v30  ;;  %15934 = vmatmul.mubr.msk.f32.gmra.mxu1 %vm317_vm2, %v11666_v8  ;;  %v20501_v5 = vadd.f32 %v15581_v1, %v15519_v37  ;;  %v9091_v48 = vpop.f32.mrf.mxu0  ;;  %v11669_v30 = vld [vmem:[#allocation3 + $0xaa] sm:$0xff]  ;;  %v11672_v1 = vld [vmem:[#allocation3 + $0xc2] sm:$0xff] }
 0x4e8   : > { %15874 = vmatprep.mubr.msk.f32.mxu0 %vm317_vm2, %v20301_v4  ;;  %15936 = vmatprep.mubr.msk.f32.mxu1 %vm317_vm2, %v11667_v61  ;;  %v9444_v32 = vpop.f32.mrf.mxu1 }
 0x4e9   : > { %v20506_v53 = vadd.f32 %v9444_v32, %v9091_v48 }
 0x4ea   : > { %v15522_v0 = vpop.f32.mrf.mxu0 }
 0x4eb   : > { %v15584_v38 = vpop.f32.mrf.mxu1  ;;  %15875 = vmatmul.mubr.msk.f32.gmra.mxu0 %vm317_vm2, %v20306_v13  ;;  %15937 = vmatmul.mubr.msk.f32.gmra.mxu1 %vm317_vm2, %v11668_v34  ;;  %v11671_v13 = vld [vmem:[#allocation3 + $0xba] sm:$0xff] }
 0x4ec   : > { %v20511_v40 = vadd.f32 %v15584_v38, %v15522_v0  ;;  %15877 = vmatprep.mubr.msk.f32.mxu0 %vm317_vm2, %v20311_v41  ;;  %15939 = vmatprep.mubr.msk.f32.mxu1 %vm317_vm2, %v11669_v30  ;;  %v9101_v4 = vpop.f32.mrf.mxu0  ;;  %v11674_v38 = vld [vmem:[#allocation3 + $0xd2] sm:$0xff] }
 0x4ed   : > { %v9454_v2 = vpop.f32.mrf.mxu1 }
 0x4ee   : > { %v20516_v18 = vadd.f32 %v9454_v2, %v9101_v4  ;;  %v15525_v6 = vpop.f32.mrf.mxu0 }
 0x4ef   : > { %v15587_v17 = vpop.f32.mrf.mxu1  ;;  %15878 = vmatmul.mubr.msk.f32.gmra.mxu0 %vm317_vm2, %v20316_v60  ;;  %15940 = vmatmul.mubr.msk.f32.gmra.mxu1 %vm317_vm2, %v11670_v43  ;;  %v11673_v60 = vld [vmem:[#allocation3 + $0xca] sm:$0xff] }
 0x4f0   : > { %v20521_v26 = vadd.f32 %v15587_v17, %v15525_v6  ;;  %15880 = vmatprep.mubr.msk.f32.mxu0 %vm317_vm2, %v20321_v11  ;;  %15942 = vmatprep.mubr.msk.f32.mxu1 %vm317_vm2, %v11671_v13  ;;  %v9111_v41 = vpop.f32.mrf.mxu0  ;;  %v11676_v17 = vld [vmem:[#allocation3 + $0xe2] sm:$0xff] }
 0x4f1   : > { %v9464_v8 = vpop.f32.mrf.mxu1 }
 0x4f2   : > { %v20526_v37 = vadd.f32 %v9464_v8, %v9111_v41  ;;  %v15528_v61 = vpop.f32.mrf.mxu0 }
 0x4f3   : > { %v15590_v48 = vpop.f32.mrf.mxu1  ;;  %15881 = vmatmul.mubr.msk.f32.gmra.mxu0 %vm317_vm2, %v20326_v52  ;;  %15943 = vmatmul.mubr.msk.f32.gmra.mxu1 %vm317_vm2, %v11672_v1  ;;  %v11675_v52 = vld [vmem:[#allocation3 + $0xda] sm:$0xff] }
 0x4f4   : > { %v20531_v32 = vadd.f32 %v15590_v48, %v15528_v61  ;;  %15883 = vmatprep.mubr.msk.f32.mxu0 %vm317_vm2, %v20331_v59  ;;  %15945 = vmatprep.mubr.msk.f32.mxu1 %vm317_vm2, %v11673_v60  ;;  %v9121_v11 = vpop.f32.mrf.mxu0  ;;  %v11678_v48 = vld [vmem:[#allocation3 + $0xf2] sm:$0xff] }
 0x4f5   : > { %v9474_v34 = vpop.f32.mrf.mxu1 }
 0x4f6   : > { %v20536_v0 = vadd.f32 %v9474_v34, %v9121_v11  ;;  %v15531_v30 = vpop.f32.mrf.mxu0  ;;  %v9325_v34 = vadd.f32 %v20358_v25, %v20356_v56  ;;  %v11681_v56 = vld [vmem:[#allocation3 + $0x10a] sm:$0xff] }
 0x4f7   : > { %v15593_v4 = vpop.f32.mrf.mxu1  ;;  %15884 = vmatmul.mubr.msk.f32.gmra.mxu0 %vm317_vm2, %v20336_v55  ;;  %15946 = vmatmul.mubr.msk.f32.gmra.mxu1 %vm317_vm2, %v11674_v38  ;;  %v11677_v55 = vld [vmem:[#allocation3 + $0xea] sm:$0xff] }
 0x4f8   : > { %v20541_v2 = vadd.f32 %v15593_v4, %v15531_v30  ;;  %15886 = vmatprep.mubr.msk.f32.mxu0 %vm317_vm2, %v20341_v35  ;;  %15948 = vmatprep.mubr.msk.f32.mxu1 %vm317_vm2, %v11675_v52  ;;  %v9131_v59 = vpop.f32.mrf.mxu0 }
 0x4f9   : > { %v9484_v43 = vpop.f32.mrf.mxu1 }
 0x4fa   : > { %v20546_v6 = vadd.f32 %v9484_v43, %v9131_v59  ;;  %v15534_v13 = vpop.f32.mrf.mxu0  ;;  %v11680_v59 = vld [vmem:[#allocation3 + $0x102] sm:$0xff] }
 0x4fb   : > { %v15596_v41 = vpop.f32.mrf.mxu1  ;;  %15887 = vmatmul.mubr.msk.f32.gmra.mxu0 %vm317_vm2, %v20346_v23  ;;  %15949 = vmatmul.mubr.msk.f32.gmra.mxu1 %vm317_vm2, %v11676_v17  ;;  %v11679_v23 = vld [vmem:[#allocation3 + $0xfa] sm:$0xff] }
 0x4fc   : > { %v20551_v8 = vadd.f32 %v15596_v41, %v15534_v13  ;;  %15889 = vmatprep.mubr.msk.f32.mxu0 %vm317_vm2, %v20351_v19  ;;  %15951 = vmatprep.mubr.msk.f32.mxu1 %vm317_vm2, %v11677_v55  ;;  %v9141_v35 = vpop.f32.mrf.mxu0  ;;  %v11682_v55 = vld [vmem:[#allocation3 + $0x112] sm:$0xff] }
 0x4fd   : > { %v9494_v1 = vpop.f32.mrf.mxu1 }
 0x4fe   : > { %v20556_v61 = vadd.f32 %v9494_v1, %v9141_v35  ;;  %v15607_v60 = vpop.f32.mrf.mxu0 }
 0x4ff   : > { %v15669_v11 = vpop.f32.mrf.mxu1  ;;  %15890 = vmatmul.mubr.msk.f32.gmra.mxu0 %vm317_vm2, %v20360_v16  ;;  %15952 = vmatmul.mubr.msk.f32.gmra.mxu1 %vm317_vm2, %v11678_v48  ;;  %v9898_v19 = vadd.f32 %v15607_v60, %v20122_v36 }
 0x500   : > { %15892 = vmatprep.mubr.msk.f32.mxu0 %vm317_vm2, %v20365_v7  ;;  %15954 = vmatprep.mubr.msk.f32.mxu1 %vm317_vm2, %v11679_v23  ;;  %v9718_v38 = vpop.f32.mrf.mxu0  ;;  %v11684_v23 = vld [vmem:[#allocation3 + $0x122] sm:$0xff] }
 0x501   : > { %v10148_v30 = vpop.f32.mrf.mxu1  ;;  %v20567_v4 = vadd.f32 %v15669_v11, %v9898_v19  ;;  %v9897_v52 = vadd.f32 %v9718_v38, %v9325_v34 }
 0x503   : > { %v15610_v16 = vpop.f32.mrf.mxu0  ;;  %v15672_v43 = vpop.f32.mrf.mxu1  ;;  %15893 = vmatmul.mubr.msk.f32.gmra.mxu0 %vm317_vm2, %v20374_v51  ;;  %15955 = vmatmul.mubr.msk.f32.gmra.mxu1 %vm317_vm2, %v11680_v59  ;;  %v20572_v36 = vadd.f32 %v10148_v30, %v9897_v52  ;;  %v11257_v30 = vld [vmem:[#allocation3 + $0x139] sm:$0xff] }
 0x504   : > { %v9900_v25 = vadd.f32 %v15610_v16, %v20367_v31  ;;  %15895 = vmatprep.mubr.msk.f32.mxu0 %vm317_vm2, %v20379_v39  ;;  %15957 = vmatprep.mubr.msk.f32.mxu1 %vm317_vm2, %v11681_v56  ;;  %v11683_v31 = vld [vmem:[#allocation3 + $0x11a] sm:$0xff]  ;;  %v11686_v16 = vld [vmem:[#allocation3 + $0x132] sm:$0xff] }
 0x505   : > { %v9728_v7 = vpop.f32.mrf.mxu0  ;;  %v10158_v17 = vpop.f32.mrf.mxu1  ;;  %v11687_v52 = vld [vmem:[#allocation3 + $0x13a] sm:$0xff] }
 0x506   : > { %v20578_v13 = vadd.f32 %v15672_v43, %v9900_v25  ;;  %v9899_v41 = vadd.f32 %v9728_v7, %v20372_v9  ;;  %v11258_v25 = vld [vmem:[#allocation3 + $0x141] sm:$0xff] }
 0x507   : > { %v15613_v51 = vpop.f32.mrf.mxu0  ;;  %v15675_v35 = vpop.f32.mrf.mxu1  ;;  %15896 = vmatmul.mubr.msk.f32.gmra.mxu0 %vm317_vm2, %v20388_v62  ;;  %15958 = vmatmul.mubr.msk.f32.gmra.mxu1 %vm317_vm2, %v11682_v55  ;;  %v11688_v7 = vld [vmem:[#allocation3 + $0x142] sm:$0xff] }
 0x508   : > { %v20584_v1 = vadd.f32 %v10158_v17, %v9899_v41  ;;  %v9902_v39 = vadd.f32 %v15613_v51, %v20381_v28  ;;  %15898 = vmatprep.mubr.msk.f32.mxu0 %vm317_vm2, %v20393_v3  ;;  %15960 = vmatprep.mubr.msk.f32.mxu1 %vm317_vm2, %v11683_v31  ;;  %v11685_v28 = vld [vmem:[#allocation3 + $0x12a] sm:$0xff] }
 0x509   : > { %v9738_v48 = vpop.f32.mrf.mxu0  ;;  %v10168_v9 = vpop.f32.mrf.mxu1 }
 0x50a   : > { %v20590_v60 = vadd.f32 %v15675_v35, %v9902_v39  ;;  %v9901_v11 = vadd.f32 %v9738_v48, %v20386_v15  ;;  %v12083_v35 = vld [vmem:[#allocation3 + $0x2b] sm:$0xff] }
 0x50b   : > { %v15616_v62 = vpop.f32.mrf.mxu0  ;;  %v15678_v34 = vpop.f32.mrf.mxu1  ;;  %15899 = vmatmul.mubr.msk.f32.gmra.mxu0 %vm317_vm2, %v20402_v21  ;;  %15961 = vmatmul.mubr.msk.f32.gmra.mxu1 %vm317_vm2, %v11684_v23 }
 0x50c   : > { %v20596_v19 = vadd.f32 %v10168_v9, %v9901_v11  ;;  %v9904_v3 = vadd.f32 %v15616_v62, %v20395_v20  ;;  %15901 = vmatprep.mubr.msk.f32.mxu0 %vm317_vm2, %v20407_v54  ;;  %15963 = vmatprep.mubr.msk.f32.mxu1 %vm317_vm2, %v11685_v28 }
 0x50d   : > { %v9748_v38 = vpop.f32.mrf.mxu0  ;;  %v10178_v15 = vpop.f32.mrf.mxu1 }
 0x50e   : > { %v20602_v59 = vadd.f32 %v15678_v34, %v9904_v3  ;;  %v9903_v21 = vadd.f32 %v9748_v38, %v20400_v45  ;;  %v12085_v34 = vld [vmem:[#allocation3 + $0x3b] sm:$0xff] }
 0x50f   : > { %v15619_v43 = vpop.f32.mrf.mxu0  ;;  %v15681_v56 = vpop.f32.mrf.mxu1  ;;  %15902 = vmatmul.mubr.msk.f32.gmra.mxu0 %vm317_vm2, %v20416_v57  ;;  %15964 = vmatmul.mubr.msk.f32.gmra.mxu1 %vm317_vm2, %v11686_v16  ;;  %v12087_v16 = vld [vmem:[#allocation3 + $0x4b] sm:$0xff] }
 0x510   : > { %v20608_v20 = vadd.f32 %v10178_v15, %v9903_v21  ;;  %v9906_v54 = vadd.f32 %v15619_v43, %v20409_v33  ;;  %15904 = vmatprep.mubr.msk.f32.mxu0 %vm317_vm2, %v11257_v30  ;;  %15966 = vmatprep.mubr.msk.f32.mxu1 %vm317_vm2, %v11687_v52  ;;  %v12086_v52 = vld [vmem:[#allocation3 + $0x43] sm:$0xff] }
 0x511   : > { %v9758_v17 = vpop.f32.mrf.mxu0  ;;  %v10188_v45 = vpop.f32.mrf.mxu1 }
 0x512   : > { %v20613_v41 = vadd.f32 %v15681_v56, %v9906_v54  ;;  %v9905_v55 = vadd.f32 %v9758_v17, %v20414_v44  ;;  %v12084_v44 = vld [vmem:[#allocation3 + $0x33] sm:$0xff] }
 0x513   : > { %v15622_v51 = vpop.f32.mrf.mxu0  ;;  %v15684_v57 = vpop.f32.mrf.mxu1  ;;  %15905 = vmatmul.mubr.msk.f32.gmra.mxu0 %vm317_vm2, %v11258_v25  ;;  %15967 = vmatmul.mubr.msk.f32.gmra.mxu1 %vm317_vm2, %v11688_v7  ;;  %v12088_v17 = vld [vmem:[#allocation3 + $0x53] sm:$0xff] }
 0x514   : > { %v20618_v33 = vadd.f32 %v10188_v45, %v9905_v55  ;;  %v9908_v31 = vadd.f32 %v15622_v51, %v20421_v46  ;;  %15977 = vmatprep.mubr.msk.f32.mxu0 %vm317_vm2, %v12083_v35  ;;  %v12089_v55 = vld [vmem:[#allocation3 + $0x5b] sm:$0xff] }
 0x515   : > { %v9768_v39 = vpop.f32.mrf.mxu0  ;;  %v10198_v48 = vpop.f32.mrf.mxu1 }
 0x516   : > { %v20622_v9 = vadd.f32 %v15684_v57, %v9908_v31  ;;  %v9907_v11 = vadd.f32 %v9768_v39, %v20426_v47 }
 0x517   : > { %v15625_v23 = vpop.f32.mrf.mxu0  ;;  %v15687_v62 = vpop.f32.mrf.mxu1  ;;  %15978 = vmatmul.mubr.msk.f32.vlgmr.msra.gmra.mxu0 %vm317_vm2, %v12084_v44  ;;  %v12091_v44 = vld [vmem:[#allocation3 + $0x6b] sm:$0xff] }
 0x518   : > { %v20626_v28 = vadd.f32 %v10198_v48, %v9907_v11  ;;  %v9910_v3 = vadd.f32 %v15625_v23, %v20434_v63  ;;  %15980 = vmatprep.mubr.msk.f32.mxu0 %vm317_vm2, %v12085_v34  ;;  %v12090_v48 = vld [vmem:[#allocation3 + $0x63] sm:$0xff] }
 0x519   : > { %v9778_v46 = vpop.f32.mrf.mxu0  ;;  %v10208_v38 = vpop.f32.mrf.mxu1 }
 0x51a   : > { %v20630_v15 = vadd.f32 %v15687_v62, %v9910_v3  ;;  %v9909_v30 = vadd.f32 %v9778_v46, %v20440_v10 }
 0x51b   : > { %v15628_v47 = vpop.f32.mrf.mxu0  ;;  %v15690_v21 = vpop.f32.mrf.mxu1  ;;  %15981 = vmatmul.mubr.msk.f32.gmra.mxu0 %vm317_vm2, %v12086_v52  ;;  %v12093_v52 = vld [vmem:[#allocation3 + $0x7b] sm:$0xff] }
 0x51c   : > { %v20634_v43 = vadd.f32 %v10208_v38, %v9909_v30  ;;  %v9912_v56 = vadd.f32 %v15628_v47, %v20448_v24  ;;  %15983 = vmatprep.mubr.msk.f32.mxu0 %vm317_vm2, %v12087_v16  ;;  %v12092_v38 = vld [vmem:[#allocation3 + $0x73] sm:$0xff] }
 0x51d   : > { %v9788_v63 = vpop.f32.mrf.mxu0  ;;  %v10218_v54 = vpop.f32.mrf.mxu1 }
 0x51e   : > { %v20638_v25 = vadd.f32 %v15690_v21, %v9912_v56  ;;  %v9911_v7 = vadd.f32 %v9788_v63, %v20453_v49 }
 0x51f   : > { %v15631_v10 = vpop.f32.mrf.mxu0  ;;  %v15693_v45 = vpop.f32.mrf.mxu1  ;;  %15984 = vmatmul.mubr.msk.f32.gmra.mxu0 %vm317_vm2, %v12088_v17  ;;  %v12095_v17 = vld [vmem:[#allocation3 + $0x8b] sm:$0xff] }
 0x520   : > { %v20642_v51 = vadd.f32 %v10218_v54, %v9911_v7  ;;  %v9914_v57 = vadd.f32 %v15631_v10, %v20461_v22  ;;  %15986 = vmatprep.mubr.msk.f32.mxu0 %vm317_vm2, %v12089_v55  ;;  %v12094_v54 = vld [vmem:[#allocation3 + $0x83] sm:$0xff] }
 0x521   : > { %v9798_v24 = vpop.f32.mrf.mxu0  ;;  %v10228_v35 = vpop.f32.mrf.mxu1 }
 0x522   : > { %v20646_v31 = vadd.f32 %v15693_v45, %v9914_v57  ;;  %v9913_v39 = vadd.f32 %v9798_v24, %v20466_v14 }
 0x523   : > { %v15634_v49 = vpop.f32.mrf.mxu0  ;;  %v15696_v11 = vpop.f32.mrf.mxu1  ;;  %15987 = vmatmul.mubr.msk.f32.gmra.mxu0 %vm317_vm2, %v12090_v48  ;;  %v12097_v48 = vld [vmem:[#allocation3 + $0x9b] sm:$0xff] }
 0x524   : > { %v20650_v23 = vadd.f32 %v10228_v35, %v9913_v39  ;;  %v9916_v62 = vadd.f32 %v15634_v49, %v20471_v42  ;;  %15989 = vmatprep.mubr.msk.f32.mxu0 %vm317_vm2, %v12091_v44  ;;  %v12096_v35 = vld [vmem:[#allocation3 + $0x93] sm:$0xff] }
 0x525   : > { %v9808_v22 = vpop.f32.mrf.mxu0  ;;  %v10238_v34 = vpop.f32.mrf.mxu1 }
 0x526   : > { %v20654_v3 = vadd.f32 %v15696_v11, %v9916_v62  ;;  %v9915_v46 = vadd.f32 %v9808_v22, %v20476_v58 }
 0x527   : > { %v15637_v14 = vpop.f32.mrf.mxu0  ;;  %v15699_v30 = vpop.f32.mrf.mxu1  ;;  %15990 = vmatmul.mubr.msk.f32.gmra.mxu0 %vm317_vm2, %v12092_v38  ;;  %v12099_v38 = vld [vmem:[#allocation3 + $0xab] sm:$0xff] }
 0x528   : > { %v20658_v47 = vadd.f32 %v10238_v34, %v9915_v46  ;;  %v9918_v21 = vadd.f32 %v15637_v14, %v20481_v12  ;;  %15992 = vmatprep.mubr.msk.f32.mxu0 %vm317_vm2, %v12093_v52  ;;  %v12098_v34 = vld [vmem:[#allocation3 + $0xa3] sm:$0xff] }
 0x529   : > { %v9818_v42 = vpop.f32.mrf.mxu0  ;;  %v10248_v16 = vpop.f32.mrf.mxu1 }
 0x52a   : > { %v20662_v56 = vadd.f32 %v15699_v30, %v9918_v21  ;;  %v9917_v63 = vadd.f32 %v9818_v42, %v20486_v50 }
 0x52b   : > { %v15640_v58 = vpop.f32.mrf.mxu0  ;;  %v15702_v7 = vpop.f32.mrf.mxu1  ;;  %15993 = vmatmul.mubr.msk.f32.gmra.mxu0 %vm317_vm2, %v12094_v54  ;;  %v12101_v54 = vld [vmem:[#allocation3 + $0xbb] sm:$0xff] }
 0x52c   : > { %v20666_v10 = vadd.f32 %v10248_v16, %v9917_v63  ;;  %v9920_v45 = vadd.f32 %v15640_v58, %v20491_v29  ;;  %15995 = vmatprep.mubr.msk.f32.mxu0 %vm317_vm2, %v12095_v17  ;;  %v12100_v16 = vld [vmem:[#allocation3 + $0xb3] sm:$0xff] }
 0x52d   : > { %v9828_v12 = vpop.f32.mrf.mxu0  ;;  %v10258_v55 = vpop.f32.mrf.mxu1 }
 0x52e   : > { %v20670_v57 = vadd.f32 %v15702_v7, %v9920_v45  ;;  %v9919_v24 = vadd.f32 %v9828_v12, %v20496_v27 }
 0x52f   : > { %v15643_v50 = vpop.f32.mrf.mxu0  ;;  %v15705_v39 = vpop.f32.mrf.mxu1  ;;  %15996 = vmatmul.mubr.msk.f32.gmra.mxu0 %vm317_vm2, %v12096_v35  ;;  %v12103_v35 = vld [vmem:[#allocation3 + $0xcb] sm:$0xff] }
 0x530   : > { %v20674_v49 = vadd.f32 %v10258_v55, %v9919_v24  ;;  %v9922_v11 = vadd.f32 %v15643_v50, %v20501_v5  ;;  %15998 = vmatprep.mubr.msk.f32.mxu0 %vm317_vm2, %v12097_v48  ;;  %v12102_v55 = vld [vmem:[#allocation3 + $0xc3] sm:$0xff] }
 0x531   : > { %v9838_v29 = vpop.f32.mrf.mxu0  ;;  %v10268_v44 = vpop.f32.mrf.mxu1 }
 0x532   : > { %v20678_v62 = vadd.f32 %v15705_v39, %v9922_v11  ;;  %v9921_v22 = vadd.f32 %v9838_v29, %v20506_v53 }
 0x533   : > { %v15646_v27 = vpop.f32.mrf.mxu0  ;;  %v15708_v46 = vpop.f32.mrf.mxu1  ;;  %15999 = vmatmul.mubr.msk.f32.gmra.mxu0 %vm317_vm2, %v12098_v34  ;;  %v12105_v34 = vld [vmem:[#allocation3 + $0xdb] sm:$0xff] }
 0x534   : > { %v20682_v14 = vadd.f32 %v10268_v44, %v9921_v22  ;;  %v9924_v30 = vadd.f32 %v15646_v27, %v20511_v40  ;;  %16001 = vmatprep.mubr.msk.f32.mxu0 %vm317_vm2, %v12099_v38  ;;  %v12104_v44 = vld [vmem:[#allocation3 + $0xd3] sm:$0xff] }
 0x535   : > { %v9848_v5 = vpop.f32.mrf.mxu0  ;;  %v10278_v52 = vpop.f32.mrf.mxu1 }
 0x536   : > { %v20686_v21 = vadd.f32 %v15708_v46, %v9924_v30  ;;  %v9923_v42 = vadd.f32 %v9848_v5, %v20516_v18 }
 0x537   : > { %v15649_v53 = vpop.f32.mrf.mxu0  ;;  %v15711_v63 = vpop.f32.mrf.mxu1  ;;  %16002 = vmatmul.mubr.msk.f32.gmra.mxu0 %vm317_vm2, %v12100_v16  ;;  %v12107_v16 = vld [vmem:[#allocation3 + $0xeb] sm:$0xff] }
 0x538   : > { %v20690_v58 = vadd.f32 %v10278_v52, %v9923_v42  ;;  %v9926_v7 = vadd.f32 %v15649_v53, %v20521_v26  ;;  %16004 = vmatprep.mubr.msk.f32.mxu0 %vm317_vm2, %v12101_v54  ;;  %v12106_v52 = vld [vmem:[#allocation3 + $0xe3] sm:$0xff] }
 0x539   : > { %v9858_v40 = vpop.f32.mrf.mxu0  ;;  %v10288_v17 = vpop.f32.mrf.mxu1 }
 0x53a   : > { %v20694_v45 = vadd.f32 %v15711_v63, %v9926_v7  ;;  %v9925_v12 = vadd.f32 %v9858_v40, %v20526_v37 }
 0x53b   : > { %v15652_v18 = vpop.f32.mrf.mxu0  ;;  %v15714_v24 = vpop.f32.mrf.mxu1  ;;  %16005 = vmatmul.mubr.msk.f32.gmra.mxu0 %vm317_vm2, %v12102_v55  ;;  %v12109_v55 = vld [vmem:[#allocation3 + $0xfb] sm:$0xff] }
 0x53c   : > { %v20698_v50 = vadd.f32 %v10288_v17, %v9925_v12  ;;  %v9928_v39 = vadd.f32 %v15652_v18, %v20531_v32  ;;  %16007 = vmatprep.mubr.msk.f32.mxu0 %vm317_vm2, %v12103_v35  ;;  %v12108_v17 = vld [vmem:[#allocation3 + $0xf3] sm:$0xff] }
 0x53d   : > { %v9868_v26 = vpop.f32.mrf.mxu0  ;;  %v10298_v48 = vpop.f32.mrf.mxu1 }
 0x53e   : > { %v20702_v11 = vadd.f32 %v15714_v24, %v9928_v39  ;;  %v9927_v29 = vadd.f32 %v9868_v26, %v20536_v0 }
 0x53f   : > { %v15655_v37 = vpop.f32.mrf.mxu0  ;;  %v15717_v22 = vpop.f32.mrf.mxu1  ;;  %16008 = vmatmul.mubr.msk.f32.gmra.mxu0 %vm317_vm2, %v12104_v44  ;;  %v12111_v44 = vld [vmem:[#allocation3 + $0x10b] sm:$0xff] }
 0x540   : > { %v20706_v27 = vadd.f32 %v10298_v48, %v9927_v29  ;;  %v9930_v46 = vadd.f32 %v15655_v37, %v20541_v2  ;;  %16010 = vmatprep.mubr.msk.f32.mxu0 %vm317_vm2, %v12105_v34  ;;  %v12110_v48 = vld [vmem:[#allocation3 + $0x103] sm:$0xff] }
 0x541   : > { %v9878_v32 = vpop.f32.mrf.mxu0  ;;  %v10308_v38 = vpop.f32.mrf.mxu1 }
 0x542   : > { %v20710_v30 = vadd.f32 %v15717_v22, %v9930_v46  ;;  %v9929_v5 = vadd.f32 %v9878_v32, %v20546_v6 }
 0x543   : > { %v15658_v0 = vpop.f32.mrf.mxu0  ;;  %v15720_v42 = vpop.f32.mrf.mxu1  ;;  %16011 = vmatmul.mubr.msk.f32.gmra.mxu0 %vm317_vm2, %v12106_v52  ;;  %v12113_v52 = vld [vmem:[#allocation3 + $0x11b] sm:$0xff] }
 0x544   : > { %v20714_v53 = vadd.f32 %v10308_v38, %v9929_v5  ;;  %v9932_v63 = vadd.f32 %v15658_v0, %v20551_v8  ;;  %16013 = vmatprep.mubr.msk.f32.mxu0 %vm317_vm2, %v12107_v16  ;;  %v12112_v38 = vld [vmem:[#allocation3 + $0x113] sm:$0xff] }
 0x545   : > { %v9888_v2 = vpop.f32.mrf.mxu0  ;;  %v10318_v54 = vpop.f32.mrf.mxu1 }
 0x546   : > { %v20718_v7 = vadd.f32 %v15720_v42, %v9932_v63  ;;  %v9931_v40 = vadd.f32 %v9888_v2, %v20556_v61 }
 0x547   : > { %v15731_v6 = vpop.f32.mrf.mxu0  ;;  %v15793_v12 = vpop.f32.mrf.mxu1  ;;  %16014 = vmatmul.mubr.msk.f32.gmra.mxu0 %vm317_vm2, %v12108_v17  ;;  %v12115_v17 = vld [vmem:[#allocation3 + $0x12b] sm:$0xff] }
 0x548   : > { %v20722_v18 = vadd.f32 %v10318_v54, %v9931_v40  ;;  %v10758_v24 = vadd.f32 %v15731_v6, %v20567_v4  ;;  %16016 = vmatprep.mubr.msk.f32.mxu0 %vm317_vm2, %v12109_v55  ;;  %v12114_v54 = vld [vmem:[#allocation3 + $0x123] sm:$0xff] }
 0x549   : > { %v10578_v8 = vpop.f32.mrf.mxu0  ;;  %v11008_v35 = vpop.f32.mrf.mxu1 }
 0x54a   : > { %v20726_v39 = vadd.f32 %v15793_v12, %v10758_v24  ;;  %v10757_v26 = vadd.f32 %v10578_v8, %v20572_v36  ;;  %v12117_v24 = vld [vmem:[#allocation3 + $0x13b] sm:$0xff] }
 0x54b   : > { %v15734_v61 = vpop.f32.mrf.mxu0  ;;  %v15796_v29 = vpop.f32.mrf.mxu1  ;;  %16017 = vmatmul.mubr.msk.f32.gmra.mxu0 %vm317_vm2, %v12110_v48 }
 0x54c   : > { %v20730_v37 = vadd.f32 %v11008_v35, %v10757_v26  ;;  %v10760_v22 = vadd.f32 %v15734_v61, %v20578_v13  ;;  %16019 = vmatprep.mubr.msk.f32.mxu0 %vm317_vm2, %v12111_v44 }
 0x54d   : > { %v10588_v4 = vpop.f32.mrf.mxu0  ;;  %v11018_v34 = vpop.f32.mrf.mxu1 }
 0x54e   : > { %v20734_v46 = vadd.f32 %v15796_v29, %v10760_v22  ;;  %v10759_v32 = vadd.f32 %v10588_v4, %v20584_v1 }
 0x54f   : > { %v15737_v36 = vpop.f32.mrf.mxu0  ;;  %v15799_v5 = vpop.f32.mrf.mxu1  ;;  %16020 = vmatmul.mubr.msk.f32.gmra.mxu0 %vm317_vm2, %v12112_v38 }
 0x550   : > { %v20738_v0 = vadd.f32 %v11018_v34, %v10759_v32  ;;  %v10762_v42 = vadd.f32 %v15737_v36, %v20590_v60  ;;  %16022 = vmatprep.mubr.msk.f32.mxu0 %vm317_vm2, %v12113_v52 }
 0x551   : > { %v10598_v13 = vpop.f32.mrf.mxu0  ;;  %v11028_v16 = vpop.f32.mrf.mxu1 }
 0x552   : > { %v20742_v63 = vadd.f32 %v15799_v5, %v10762_v42  ;;  %v10761_v2 = vadd.f32 %v10598_v13, %v20596_v19  ;;  %v12116_v19 = vld [vmem:[#allocation3 + $0x133] sm:$0xff] }
 0x553   : > { %v15740_v1 = vpop.f32.mrf.mxu0  ;;  %v15802_v40 = vpop.f32.mrf.mxu1  ;;  %16023 = vmatmul.mubr.msk.f32.gmra.mxu0 %vm317_vm2, %v12114_v54 }
 0x554   : > { %v20746_v6 = vadd.f32 %v11028_v16, %v10761_v2  ;;  %v10764_v12 = vadd.f32 %v15740_v1, %v20602_v59  ;;  %16025 = vmatprep.mubr.msk.f32.mxu0 %vm317_vm2, %v12115_v17  ;;  %v12118_v59 = vld [vmem:[#allocation3 + $0x143] sm:$0xff] }
 0x555   : > { %v10608_v60 = vpop.f32.mrf.mxu0  ;;  %v11038_v55 = vpop.f32.mrf.mxu1 }
 0x556   : > { %v20750_v8 = vadd.f32 %v15802_v40, %v10764_v12  ;;  %v10763_v35 = vadd.f32 %v10608_v60, %v20608_v20 }
 0x557   : > { %v15743_v26 = vpop.f32.mrf.mxu0  ;;  %v15805_v48 = vpop.f32.mrf.mxu1  ;;  %16026 = vmatmul.mubr.msk.f32.gmra.mxu0 %vm317_vm2, %v12116_v19 }
 0x558   : > { %v20754_v61 = vadd.f32 %v11038_v55, %v10763_v35  ;;  %v10766_v29 = vadd.f32 %v15743_v26, %v20613_v41  ;;  %16028 = vmatprep.mubr.msk.f32.mxu0 %vm317_vm2, %v12117_v24 }
 0x559   : > { %v10618_v44 = vpop.f32.mrf.mxu0  ;;  %v11048_v22 = vpop.f32.mrf.mxu1 }
 0x55a   : > { %v20758_v4 = vadd.f32 %v15805_v48, %v10766_v29  ;;  %v10765_v34 = vadd.f32 %v10618_v44, %v20618_v33 }
 0x55b   : > { %v15746_v32 = vpop.f32.mrf.mxu0  ;;  %v15808_v20 = vpop.f32.mrf.mxu1  ;;  %16029 = vmatmul.mubr.msk.f32.gmra.mxu0 %vm317_vm2, %v12118_v59 }
 0x55c   : > { %v20762_v38 = vadd.f32 %v11048_v22, %v10765_v34  ;;  %v10768_v36 = vadd.f32 %v15746_v32, %v20622_v9 }
 0x55d   : > { %v10628_v5 = vpop.f32.mrf.mxu0  ;;  %v11058_v52 = vpop.f32.mrf.mxu1 }
 0x55e   : > { %v20765_v41 = vadd.f32 %v15808_v20, %v10768_v36  ;;  %v10767_v42 = vadd.f32 %v10628_v5, %v20626_v28 }
 0x55f   : > { %v15749_v13 = vpop.f32.mrf.mxu0  ;;  %v15811_v16 = vpop.f32.mrf.mxu1 }
 0x560   : > { %v20768_v2 = vadd.f32 %v11058_v52, %v10767_v42  ;;  %v10770_v33 = vadd.f32 %v15749_v13, %v20630_v15 }
 0x561   : > { %v10638_v54 = vpop.f32.mrf.mxu0  ;;  %v11068_v1 = vpop.f32.mrf.mxu1 }
 0x562   : > { %v20771_v40 = vadd.f32 %v15811_v16, %v10770_v33  ;;  %v10769_v17 = vadd.f32 %v10638_v54, %v20634_v43 }
 0x563   : > { %v15752_v12 = vpop.f32.mrf.mxu0  ;;  %v15814_v9 = vpop.f32.mrf.mxu1 }
 0x564   : > { %v20774_v60 = vadd.f32 %v11068_v1, %v10769_v17  ;;  %v10772_v55 = vadd.f32 %v15752_v12, %v20638_v25 }
 0x565   : > { %v10648_v24 = vpop.f32.mrf.mxu0  ;;  %v11078_v28 = vpop.f32.mrf.mxu1 }
 0x566   : > { %v20777_v35 = vadd.f32 %v15814_v9, %v10772_v55  ;;  %v10771_v19 = vadd.f32 %v10648_v24, %v20642_v51 }
 0x567   : > { %v15755_v26 = vpop.f32.mrf.mxu0  ;;  %v15817_v15 = vpop.f32.mrf.mxu1 }
 0x568   : > { %v20780_v48 = vadd.f32 %v11078_v28, %v10771_v19  ;;  %v10774_v29 = vadd.f32 %v15755_v26, %v20646_v31 }
 0x569   : > { %v10658_v59 = vpop.f32.mrf.mxu0  ;;  %v11088_v43 = vpop.f32.mrf.mxu1 }
 0x56a   : > { %v20783_v44 = vadd.f32 %v15817_v15, %v10774_v29  ;;  %v10773_v22 = vadd.f32 %v10658_v59, %v20650_v23 }
 0x56b   : > { %v15758_v34 = vpop.f32.mrf.mxu0  ;;  %v15820_v25 = vpop.f32.mrf.mxu1 }
 0x56c   : > { %v20786_v32 = vadd.f32 %v11088_v43, %v10773_v22  ;;  %v10776_v20 = vadd.f32 %v15758_v34, %v20654_v3 }
 0x56d   : > { %v10668_v36 = vpop.f32.mrf.mxu0  ;;  %v11098_v51 = vpop.f32.mrf.mxu1 }
 0x56e   : > { %v20789_v5 = vadd.f32 %v15820_v25, %v10776_v20  ;;  %v10775_v52 = vadd.f32 %v10668_v36, %v20658_v47 }
 0x56f   : > { %v15761_v42 = vpop.f32.mrf.mxu0  ;;  %v15823_v31 = vpop.f32.mrf.mxu1 }
 0x570   : > { %v20792_v13 = vadd.f32 %v11098_v51, %v10775_v52  ;;  %v10778_v16 = vadd.f32 %v15761_v42, %v20662_v56 }
 0x571   : > { %v10678_v33 = vpop.f32.mrf.mxu0  ;;  %v11108_v23 = vpop.f32.mrf.mxu1 }
 0x572   : > { %v20795_v54 = vadd.f32 %v15823_v31, %v10778_v16  ;;  %v10777_v1 = vadd.f32 %v10678_v33, %v20666_v10 }
 0x573   : > { %v15764_v17 = vpop.f32.mrf.mxu0  ;;  %v15826_v3 = vpop.f32.mrf.mxu1 }
 0x574   : > { %v20798_v12 = vadd.f32 %v11108_v23, %v10777_v1  ;;  %v10780_v9 = vadd.f32 %v15764_v17, %v20670_v57 }
 0x575   : > { %v10688_v55 = vpop.f32.mrf.mxu0  ;;  %v11118_v47 = vpop.f32.mrf.mxu1 }
 0x576   : > { %v20801_v24 = vadd.f32 %v15826_v3, %v10780_v9  ;;  %v10779_v28 = vadd.f32 %v10688_v55, %v20674_v49 }
 0x577   : > { %v15767_v19 = vpop.f32.mrf.mxu0  ;;  %v15829_v56 = vpop.f32.mrf.mxu1 }
 0x578   : > { %v20804_v26 = vadd.f32 %v11118_v47, %v10779_v28  ;;  %v10782_v15 = vadd.f32 %v15767_v19, %v20678_v62 }
 0x579   : > { %v10698_v29 = vpop.f32.mrf.mxu0  ;;  %v11128_v10 = vpop.f32.mrf.mxu1 }
 0x57a   : > { %v20807_v59 = vadd.f32 %v15829_v56, %v10782_v15  ;;  %v10781_v43 = vadd.f32 %v10698_v29, %v20682_v14 }
 0x57b   : > { %v15770_v22 = vpop.f32.mrf.mxu0  ;;  %v15832_v57 = vpop.f32.mrf.mxu1 }
 0x57c   : > { %v20810_v34 = vadd.f32 %v11128_v10, %v10781_v43  ;;  %v10784_v25 = vadd.f32 %v15770_v22, %v20686_v21 }
 0x57d   : > { %v10708_v20 = vpop.f32.mrf.mxu0  ;;  %v11138_v49 = vpop.f32.mrf.mxu1 }
 0x57e   : > { %v20813_v36 = vadd.f32 %v15832_v57, %v10784_v25  ;;  %v10783_v51 = vadd.f32 %v10708_v20, %v20690_v58 }
 0x57f   : > { %v15773_v52 = vpop.f32.mrf.mxu0  ;;  %v15835_v62 = vpop.f32.mrf.mxu1 }
 0x580   : > { %v20816_v42 = vadd.f32 %v11138_v49, %v10783_v51  ;;  %v10786_v31 = vadd.f32 %v15773_v52, %v20694_v45 }
 0x581   : > { %v10718_v16 = vpop.f32.mrf.mxu0  ;;  %v11148_v14 = vpop.f32.mrf.mxu1 }
 0x582   : > { %v20819_v33 = vadd.f32 %v15835_v62, %v10786_v31  ;;  %v10785_v23 = vadd.f32 %v10718_v16, %v20698_v50 }
 0x583   : > { %v15776_v1 = vpop.f32.mrf.mxu0  ;;  %v15838_v21 = vpop.f32.mrf.mxu1 }
 0x584   : > { %v20822_v17 = vadd.f32 %v11148_v14, %v10785_v23  ;;  %v10788_v3 = vadd.f32 %v15776_v1, %v20702_v11 }
 0x585   : > { %v10728_v9 = vpop.f32.mrf.mxu0  ;;  %v11158_v58 = vpop.f32.mrf.mxu1 }
 0x586   : > { %v20825_v55 = vadd.f32 %v15838_v21, %v10788_v3  ;;  %v10787_v47 = vadd.f32 %v10728_v9, %v20706_v27 }
 0x587   : > { %v15779_v28 = vpop.f32.mrf.mxu0  ;;  %v15841_v45 = vpop.f32.mrf.mxu1 }
 0x588   : > { %v20828_v19 = vadd.f32 %v11158_v58, %v10787_v47  ;;  %v10790_v56 = vadd.f32 %v15779_v28, %v20710_v30 }
 0x589   : > { %v10738_v15 = vpop.f32.mrf.mxu0  ;;  %v11168_v50 = vpop.f32.mrf.mxu1 }
 0x58a   : > { %v20831_v29 = vadd.f32 %v15841_v45, %v10790_v56  ;;  %v10789_v10 = vadd.f32 %v10738_v15, %v20714_v53 }
 0x58b   : > { %v15782_v43 = vpop.f32.mrf.mxu0  ;;  %v15844_v11 = vpop.f32.mrf.mxu1 }
 0x58c   : > { %v20834_v22 = vadd.f32 %v11168_v50, %v10789_v10  ;;  %v10792_v57 = vadd.f32 %v15782_v43, %v20718_v7 }
 0x58d   : > { %v10748_v25 = vpop.f32.mrf.mxu0  ;;  %v11178_v27 = vpop.f32.mrf.mxu1 }
 0x58e   : > { %v20837_v20 = vadd.f32 %v15844_v11, %v10792_v57  ;;  %v10791_v49 = vadd.f32 %v10748_v25, %v20722_v18 }
 0x58f   : > { %v15855_v51 = vpop.f32.mrf.mxu0  ;;  %v20840_v30 = vpop.f32.mrf.mxu1 }
 0x590   : > { %v20842_v52 = vadd.f32 %v11178_v27, %v10791_v49  ;;  %v20845_v62 = vadd.f32 %v15855_v51, %v20726_v39 }
 0x591   : > { %v11438_v53 = vpop.f32.mrf.mxu0  ;;  %v20850_v16 = vpop.f32.mrf.mxu1 }
 0x592   : > { %v20848_v31 = vadd.f32 %v11438_v53, %v20730_v37 }
 0x593   : > { %v15858_v7 = vpop.f32.mrf.mxu0  ;;  %v20858_v1 = vpop.f32.mrf.mxu1 }
 0x594   : > { %v20853_v14 = vadd.f32 %v15858_v7, %v20734_v46 }
 0x595   : > { %v11448_v23 = vpop.f32.mrf.mxu0  ;;  %v20866_v9 = vpop.f32.mrf.mxu1 }
 0x596   : > { %v20856_v18 = vadd.f32 %v11448_v23, %v20738_v0 }
 0x597   : > { %v15861_v21 = vpop.f32.mrf.mxu0  ;;  %v20874_v28 = vpop.f32.mrf.mxu1 }
 0x598   : > { %v20861_v39 = vadd.f32 %v15861_v21, %v20742_v63 }
 0x599   : > { %v11458_v3 = vpop.f32.mrf.mxu0  ;;  %v20882_v15 = vpop.f32.mrf.mxu1 }
 0x59a   : > { %v20864_v37 = vadd.f32 %v11458_v3, %v20746_v6 }
 0x59b   : > { %v15864_v58 = vpop.f32.mrf.mxu0  ;;  %v20890_v43 = vpop.f32.mrf.mxu1 }
 0x59c   : > { %v20869_v46 = vadd.f32 %v15864_v58, %v20750_v8 }
 0x59d   : > { %v11468_v47 = vpop.f32.mrf.mxu0  ;;  %v20898_v25 = vpop.f32.mrf.mxu1 }
 0x59e   : > { %v20872_v0 = vadd.f32 %v11468_v47, %v20754_v61 }
 0x59f   : > { %v15867_v45 = vpop.f32.mrf.mxu0  ;;  %v20906_v51 = vpop.f32.mrf.mxu1 }
 0x5a0   : > { %v20877_v63 = vadd.f32 %v15867_v45, %v20758_v4 }
 0x5a1   : > { %v11478_v56 = vpop.f32.mrf.mxu0  ;;  %v20914_v23 = vpop.f32.mrf.mxu1 }
 0x5a2   : > { %v20880_v6 = vadd.f32 %v11478_v56, %v20762_v38 }
 0x5a3   : > { %v15870_v50 = vpop.f32.mrf.mxu0  ;;  %v20922_v58 = vpop.f32.mrf.mxu1 }
 0x5a4   : > { %v20885_v8 = vadd.f32 %v15870_v50, %v20765_v41 }
 0x5a5   : > { %v11488_v10 = vpop.f32.mrf.mxu0  ;;  %v20930_v56 = vpop.f32.mrf.mxu1 }
 0x5a6   : > { %v20888_v61 = vadd.f32 %v11488_v10, %v20768_v2 }
 0x5a7   : > { %v15873_v11 = vpop.f32.mrf.mxu0 }
 0x5a8   : > { %v20893_v4 = vadd.f32 %v15873_v11, %v20771_v40  ;;  %v20938_v11 = vpop.f32.mrf.mxu1 }
 0x5a9   : > { %v11498_v57 = vpop.f32.mrf.mxu0 }
 0x5aa   : > { %v20896_v38 = vadd.f32 %v11498_v57, %v20774_v60 }
 0x5ab   : > { %v15876_v27 = vpop.f32.mrf.mxu0 }
 0x5ac   : > { %v20901_v41 = vadd.f32 %v15876_v27, %v20777_v35 }
 0x5ad   : > { %v11508_v49 = vpop.f32.mrf.mxu0 }
 0x5ae   : > { %v20904_v2 = vadd.f32 %v11508_v49, %v20780_v48  ;;  %v20946_v49 = vpop.f32.mrf.mxu1 }
 0x5af   : > { %v15879_v53 = vpop.f32.mrf.mxu0 }
 0x5b0   : > { %v20909_v40 = vadd.f32 %v15879_v53, %v20783_v44 }
 0x5b1   : > { %v11518_v7 = vpop.f32.mrf.mxu0 }
 0x5b2   : > { %v20912_v60 = vadd.f32 %v11518_v7, %v20786_v32 }
 0x5b3   : > { %v15882_v21 = vpop.f32.mrf.mxu0 }
 0x5b4   : > { %v20917_v35 = vadd.f32 %v15882_v21, %v20789_v5  ;;  %v20954_v21 = vpop.f32.mrf.mxu1 }
 0x5b5   : > { %v11528_v3 = vpop.f32.mrf.mxu0 }
 0x5b6   : > { %v20920_v48 = vadd.f32 %v11528_v3, %v20792_v13 }
 0x5b7   : > { %v15885_v47 = vpop.f32.mrf.mxu0 }
 0x5b8   : > { %v20925_v44 = vadd.f32 %v15885_v47, %v20795_v54 }
 0x5b9   : > { %v11538_v45 = vpop.f32.mrf.mxu0 }
 0x5ba   : > { %v20928_v32 = vadd.f32 %v11538_v45, %v20798_v12  ;;  %v20962_v45 = vpop.f32.mrf.mxu1 }
 0x5bb   : > { %v15888_v50 = vpop.f32.mrf.mxu0 }
 0x5bc   : > { %v20933_v5 = vadd.f32 %v15888_v50, %v20801_v24 }
 0x5bd   : > { %v11548_v10 = vpop.f32.mrf.mxu0 }
 0x5be   : > { %v20936_v13 = vadd.f32 %v11548_v10, %v20804_v26 }
 0x5bf   : > { %v15891_v57 = vpop.f32.mrf.mxu0 }
 0x5c0   : > { %v20941_v54 = vadd.f32 %v15891_v57, %v20807_v59  ;;  %v20970_v57 = vpop.f32.mrf.mxu1 }
 0x5c1   : > { %v11558_v27 = vpop.f32.mrf.mxu0 }
 0x5c2   : > { %v20944_v12 = vadd.f32 %v11558_v27, %v20810_v34 }
 0x5c3   : > { %v15894_v53 = vpop.f32.mrf.mxu0 }
 0x5c4   : > { %v20949_v24 = vadd.f32 %v15894_v53, %v20813_v36 }
 0x5c5   : > { %v11568_v7 = vpop.f32.mrf.mxu0 }
 0x5c6   : > { %v20952_v26 = vadd.f32 %v11568_v7, %v20816_v42  ;;  %v20978_v7 = vpop.f32.mrf.mxu1 }
 0x5c7   : > { %v15897_v3 = vpop.f32.mrf.mxu0 }
 0x5c8   : > { %v20957_v59 = vadd.f32 %v15897_v3, %v20819_v33 }
 0x5c9   : > { %v11578_v47 = vpop.f32.mrf.mxu0 }
 0x5ca   : > { %v20960_v34 = vadd.f32 %v11578_v47, %v20822_v17 }
 0x5cb   : > { %v15900_v50 = vpop.f32.mrf.mxu0 }
 0x5cc   : > { %v20965_v36 = vadd.f32 %v15900_v50, %v20825_v55 }
 0x5cd   : > { %v11588_v10 = vpop.f32.mrf.mxu0 }
 0x5ce   : > { %v20968_v42 = vadd.f32 %v11588_v10, %v20828_v19  ;;  %v12048_v19 = vadd.f32 %v20840_v30, %v20845_v62  ;;  %v12050_v30 = vadd.f32 %v20858_v1, %v20853_v14  ;;  %v12052_v14 = vadd.f32 %v20874_v28, %v20861_v39 }
 0x5cf   : > { %v15903_v27 = vpop.f32.mrf.mxu0  ;;  %v12054_v39 = vadd.f32 %v20890_v43, %v20869_v46  ;;  %v12056_v46 = vadd.f32 %v20906_v51, %v20877_v63  ;;  %v12058_v63 = vadd.f32 %v20922_v58, %v20885_v8  ;;  %v12060_v8 = vadd.f32 %v20938_v11, %v20893_v4 }
 0x5d0   : > { %v20973_v33 = vadd.f32 %v15903_v27, %v20831_v29  ;;  %v20988_v29 = vpop.f32.mrf.mxu1  ;;  %v12062_v4 = vadd.f32 %v20954_v21, %v20901_v41  ;;  %v12064_v41 = vadd.f32 %v20970_v57, %v20909_v40 }
 0x5d1   : > { %v11598_v53 = vpop.f32.mrf.mxu0  ;;  %v12066_v40 = vadd.f32 %v20988_v29, %v20917_v35 }
 0x5d2   : > { %v20976_v17 = vadd.f32 %v11598_v53, %v20834_v22  ;;  %v20993_v22 = vld [vmem:[%s21180_s6] ss:$0 sm:$0xff] }
 0x5d3   : > { %v15906_v3 = vpop.f32.mrf.mxu0 }
 0x5d4   : > { %v20981_v55 = vadd.f32 %v15906_v3, %v20837_v20  ;;  %v12047_v20 = vadd.f32 %v20850_v16, %v20848_v31  ;;  %v21000_v3 = vpop.f32.mrf.mxu1 }
 0x5d5   : > { %v11608_v47 = vpop.f32.mrf.mxu0 }
 0x5d6   : > { %v20986_v50 = vadd.f32 %v11608_v47, %v20842_v52 }
 0x5d7   : > { %v15979_v10 = vpop.f32.mrf.mxu0 }
 0x5d8   : > { %21755 = vst [vmem:[#allocation54_spill] sm:$0xff] %v20986_v50  ;;  %v12478_v27 = vadd.f32 %v15979_v10, %v12048_v19  ;;  %v12049_v50 = vadd.f32 %v20866_v9, %v20856_v18  ;;  %v12051_v18 = vadd.f32 %v20882_v15, %v20864_v37  ;;  %v12053_v37 = vadd.f32 %v20898_v25, %v20872_v0 }
 0x5d9   : > { %v12298_v53 = vpop.f32.mrf.mxu0  ;;  %v12055_v0 = vadd.f32 %v20914_v23, %v20880_v6  ;;  %v12057_v6 = vadd.f32 %v20930_v56, %v20888_v61  ;;  %v12059_v61 = vadd.f32 %v20946_v49, %v20896_v38  ;;  %v12061_v38 = vadd.f32 %v20962_v45, %v20904_v2 }
 0x5da   : > { %v12521_v52 = vadd.f32 %v20993_v22, %v12478_v27  ;;  %v12477_v62 = vadd.f32 %v12298_v53, %v12047_v20  ;;  %v21012_v20 = vpop.f32.mrf.mxu1  ;;  %v12063_v2 = vadd.f32 %v20978_v7, %v20912_v60  ;;  %v12065_v60 = vadd.f32 %v21000_v3, %v20920_v48 }
 0x5db   : > { %v15982_v47 = vpop.f32.mrf.mxu0  ;;  %v12068_v35 = vadd.f32 %v21012_v20, %v20925_v44 }
 0x5dc   : > { %12560 = vst.msk [vmem:[%s19454_s13 + $0x20] sm:$0xff] %vm471_vm0, %v12521_v52  ;;  %v12520_v31 = vadd.f32 %v20993_v22, %v12477_v62  ;;  %v12480_v16 = vadd.f32 %v15982_v47, %v12050_v30  ;;  %v21024_v52 = vpop.f32.mrf.mxu1 }
 0x5dd   : > { %v12308_v19 = vpop.f32.mrf.mxu0  ;;  %v12067_v48 = vadd.f32 %v21024_v52, %v20928_v32 }
 0x5de   : > { %12559 = vst.msk [vmem:[%s19454_s13 + $0x18] sm:$0xff] %vm471_vm0, %v12520_v31  ;;  %v12523_v1 = vadd.f32 %v20993_v22, %v12480_v16  ;;  %v12479_v10 = vadd.f32 %v12308_v19, %v12049_v50  ;;  %v21036_v19 = vpop.f32.mrf.mxu1 }
 0x5df   : > { %v15985_v27 = vpop.f32.mrf.mxu0  ;;  %v12070_v44 = vadd.f32 %v21036_v19, %v20933_v5 }
 0x5e0   : > { %12562 = vst.msk [vmem:[%s19454_s13 + $0x30] sm:$0xff] %vm471_vm0, %v12523_v1  ;;  %v12522_v9 = vadd.f32 %v20993_v22, %v12479_v10  ;;  %v12482_v53 = vadd.f32 %v15985_v27, %v12052_v14 }
 0x5e1   : > { %v12318_v30 = vpop.f32.mrf.mxu0 }
 0x5e2   : > { %12561 = vst.msk [vmem:[%s19454_s13 + $0x28] sm:$0xff] %vm471_vm0, %v12522_v9  ;;  %v12525_v28 = vadd.f32 %v20993_v22, %v12482_v53  ;;  %v12481_v50 = vadd.f32 %v12318_v30, %v12051_v18  ;;  %v21048_v18 = vpop.f32.mrf.mxu1 }
 0x5e3   : > { %v15988_v62 = vpop.f32.mrf.mxu0  ;;  %v12069_v32 = vadd.f32 %v21048_v18, %v20936_v13 }
 0x5e4   : > { %12564 = vst.msk [vmem:[%s19454_s13 + $0x40] sm:$0xff] %vm471_vm0, %v12525_v28  ;;  %v12524_v15 = vadd.f32 %v20993_v22, %v12481_v50  ;;  %v12484_v47 = vadd.f32 %v15988_v62, %v12054_v39  ;;  %v15953_v28 = vpop.f32.mrf.mxu1 }
 0x5e5   : > { %v12328_v31 = vpop.f32.mrf.mxu0  ;;  %v12072_v5 = vadd.f32 %v15953_v28, %v20941_v54 }
 0x5e6   : > { %12563 = vst.msk [vmem:[%s19454_s13 + $0x38] sm:$0xff] %vm471_vm0, %v12524_v15  ;;  %v12527_v43 = vadd.f32 %v20993_v22, %v12484_v47  ;;  %v12483_v16 = vadd.f32 %v12328_v31, %v12053_v37  ;;  %v11988_v47 = vpop.f32.mrf.mxu1 }
 0x5e7   : > { %v15991_v14 = vpop.f32.mrf.mxu0 }
 0x5e8   : > { %12566 = vst.msk [vmem:[%s19454_s13 + $0x50] sm:$0xff] %vm471_vm0, %v12527_v43  ;;  %v12526_v25 = vadd.f32 %v20993_v22, %v12483_v16  ;;  %v12486_v1 = vadd.f32 %v15991_v14, %v12056_v46  ;;  %v15956_v14 = vpop.f32.mrf.mxu1 }
 0x5e9   : > { %v12338_v10 = vpop.f32.mrf.mxu0 }
 0x5ea   : > { %12565 = vst.msk [vmem:[%s19454_s13 + $0x48] sm:$0xff] %vm471_vm0, %v12526_v25  ;;  %v12529_v51 = vadd.f32 %v20993_v22, %v12486_v1  ;;  %v12485_v27 = vadd.f32 %v12338_v10, %v12055_v0 }
 0x5eb   : > { %v15994_v9 = vpop.f32.mrf.mxu0 }
 0x5ec   : > { %12568 = vst.msk [vmem:[%s19454_s13 + $0x60] sm:$0xff] %vm471_vm0, %v12529_v51  ;;  %v12528_v23 = vadd.f32 %v20993_v22, %v12485_v27  ;;  %v12488_v53 = vadd.f32 %v15994_v9, %v12058_v63  ;;  %v11998_v63 = vpop.f32.mrf.mxu1 }
 0x5ed   : > { %v12348_v30 = vpop.f32.mrf.mxu0 }
 0x5ee   : > { %12567 = vst.msk [vmem:[%s19454_s13 + $0x58] sm:$0xff] %vm471_vm0, %v12528_v23  ;;  %v12531_v58 = vadd.f32 %v20993_v22, %v12488_v53  ;;  %v12487_v39 = vadd.f32 %v12348_v30, %v12057_v6  ;;  %v15959_v23 = vpop.f32.mrf.mxu1 }
 0x5ef   : > { %v15997_v50 = vpop.f32.mrf.mxu0 }
 0x5f0   : > { %12570 = vst.msk [vmem:[%s19454_s13 + $0x70] sm:$0xff] %vm471_vm0, %v12531_v58  ;;  %v12530_v56 = vadd.f32 %v20993_v22, %v12487_v39  ;;  %v12490_v62 = vadd.f32 %v15997_v50, %v12060_v8  ;;  %v12008_v39 = vpop.f32.mrf.mxu1 }
 0x5f1   : > { %v12358_v37 = vpop.f32.mrf.mxu0 }
 0x5f2   : > { %12569 = vst.msk [vmem:[%s19454_s13 + $0x68] sm:$0xff] %vm471_vm0, %v12530_v56  ;;  %v12533_v11 = vadd.f32 %v20993_v22, %v12490_v62  ;;  %v12489_v15 = vadd.f32 %v12358_v37, %v12059_v61  ;;  %v15962_v37 = vpop.f32.mrf.mxu1 }
 0x5f3   : > { %v16000_v31 = vpop.f32.mrf.mxu0 }
 0x5f4   : > { %12572 = vst.msk [vmem:[%s19454_s13 + $0x80] sm:$0xff] %vm471_vm0, %v12533_v11  ;;  %v12532_v49 = vadd.f32 %v20993_v22, %v12489_v15  ;;  %v12492_v46 = vadd.f32 %v16000_v31, %v12062_v4  ;;  %v12071_v11 = vadd.f32 %v11988_v47, %v20944_v12  ;;  %v12074_v31 = vadd.f32 %v15956_v14, %v20949_v24 }
 0x5f5   : > { %v12368_v43 = vpop.f32.mrf.mxu0 }
 0x5f6   : > { %12571 = vst.msk [vmem:[%s19454_s13 + $0x78] sm:$0xff] %vm471_vm0, %v12532_v49  ;;  %v12535_v21 = vadd.f32 %v20993_v22, %v12492_v46  ;;  %v12491_v16 = vadd.f32 %v12368_v43, %v12061_v38  ;;  %v12018_v38 = vpop.f32.mrf.mxu1  ;;  %v12073_v46 = vadd.f32 %v11998_v63, %v20952_v26 }
 0x5f7   : > { %v16003_v0 = vpop.f32.mrf.mxu0 }
 0x5f8   : > { %12574 = vst.msk [vmem:[%s19454_s13 + $0x90] sm:$0xff] %vm471_vm0, %v12535_v21  ;;  %v12534_v45 = vadd.f32 %v20993_v22, %v12491_v16  ;;  %v12494_v25 = vadd.f32 %v16003_v0, %v12064_v41  ;;  %v12076_v41 = vadd.f32 %v15959_v23, %v20957_v59  ;;  %v15965_v16 = vpop.f32.mrf.mxu1  ;;  %v12075_v0 = vadd.f32 %v12008_v39, %v20960_v34 }
 0x5f9   : > { %v12378_v1 = vpop.f32.mrf.mxu0 }
 0x5fa   : > { %12573 = vst.msk [vmem:[%s19454_s13 + $0x88] sm:$0xff] %vm471_vm0, %v12534_v45  ;;  %v12537_v57 = vadd.f32 %v20993_v22, %v12494_v25  ;;  %v12493_v10 = vadd.f32 %v12378_v1, %v12063_v2  ;;  %v12078_v25 = vadd.f32 %v15962_v37, %v20965_v36  ;;  %v12080_v36 = vadd.f32 %v15965_v16, %v20973_v33 }
 0x5fb   : > { %v16006_v51 = vpop.f32.mrf.mxu0 }
 0x5fc   : > { %12576 = vst.msk [vmem:[%s19454_s13 + $0xa0] sm:$0xff] %vm471_vm0, %v12537_v57  ;;  %v12536_v7 = vadd.f32 %v20993_v22, %v12493_v10  ;;  %v12496_v27 = vadd.f32 %v16006_v51, %v12066_v40  ;;  %v12028_v40 = vpop.f32.mrf.mxu1  ;;  %v12077_v10 = vadd.f32 %v12018_v38, %v20968_v42 }
 0x5fd   : > { %v12388_v9 = vpop.f32.mrf.mxu0 }
 0x5fe   : > { %12575 = vst.msk [vmem:[%s19454_s13 + $0x98] sm:$0xff] %vm471_vm0, %v12536_v7  ;;  %v12539_v29 = vadd.f32 %v20993_v22, %v12496_v27  ;;  %v12495_v6 = vadd.f32 %v12388_v9, %v12065_v60  ;;  %v15968_v51 = vpop.f32.mrf.mxu1 }
 0x5ff   : > { %v16009_v53 = vpop.f32.mrf.mxu0  ;;  %v12082_v33 = vadd.f32 %v15968_v51, %v20981_v55 }
 0x600   : > { %12578 = vst.msk [vmem:[%s19454_s13 + $0xb0] sm:$0xff] %vm471_vm0, %v12539_v29  ;;  %v12538_v3 = vadd.f32 %v20993_v22, %v12495_v6  ;;  %v12498_v30 = vadd.f32 %v16009_v53, %v12068_v35  ;;  %v12079_v35 = vadd.f32 %v12028_v40, %v20976_v17  ;;  %v12038_v6 = vpop.f32.mrf.mxu1 }
 0x601   : > { %v12398_v8 = vpop.f32.mrf.mxu0 }
 0x602   : > { %12577 = vst.msk [vmem:[%s19454_s13 + $0xa8] sm:$0xff] %vm471_vm0, %v12538_v3  ;;  %v12541_v20 = vadd.f32 %v20993_v22, %v12498_v30  ;;  %v12497_v58 = vadd.f32 %v12398_v8, %v12067_v48  ;;  %v21756_v30 = vld [vmem:[#allocation54_spill] sm:$0xff] }
 0x603   : > { %v16012_v50 = vpop.f32.mrf.mxu0  ;;  %v12081_v17 = vadd.f32 %v12038_v6, %v21756_v30 }
 0x604   : > { %12580 = vst.msk [vmem:[%s19454_s13 + $0xc0] sm:$0xff] %vm471_vm0, %v12541_v20  ;;  %v12540_v52 = vadd.f32 %v20993_v22, %v12497_v58  ;;  %v12500_v61 = vadd.f32 %v16012_v50, %v12070_v44 }
 0x605   : > { %v12408_v56 = vpop.f32.mrf.mxu0 }
 0x606   : > { %12579 = vst.msk [vmem:[%s19454_s13 + $0xb8] sm:$0xff] %vm471_vm0, %v12540_v52  ;;  %v12543_v19 = vadd.f32 %v20993_v22, %v12500_v61  ;;  %v12499_v62 = vadd.f32 %v12408_v56, %v12069_v32 }
 0x607   : > { %v16015_v4 = vpop.f32.mrf.mxu0 }
 0x608   : > { %12582 = vst.msk [vmem:[%s19454_s13 + $0xd0] sm:$0xff] %vm471_vm0, %v12543_v19  ;;  %v12542_v13 = vadd.f32 %v20993_v22, %v12499_v62  ;;  %v12502_v18 = vadd.f32 %v16015_v4, %v12072_v5 }
 0x609   : > { %v12418_v15 = vpop.f32.mrf.mxu0 }
 0x60a   : > { %12581 = vst.msk [vmem:[%s19454_s13 + $0xc8] sm:$0xff] %vm471_vm0, %v12542_v13  ;;  %v12545_v54 = vadd.f32 %v20993_v22, %v12502_v18  ;;  %v12501_v28 = vadd.f32 %v12418_v15, %v12071_v11 }
 0x60b   : > { %v16018_v49 = vpop.f32.mrf.mxu0 }
 0x60c   : > { %12584 = vst.msk [vmem:[%s19454_s13 + $0xe0] sm:$0xff] %vm471_vm0, %v12545_v54  ;;  %v12544_v12 = vadd.f32 %v20993_v22, %v12501_v28  ;;  %v12504_v47 = vadd.f32 %v16018_v49, %v12074_v31 }
 0x60d   : > { %v12428_v43 = vpop.f32.mrf.mxu0 }
 0x60e   : > { %12583 = vst.msk [vmem:[%s19454_s13 + $0xd8] sm:$0xff] %vm471_vm0, %v12544_v12  ;;  %v12547_v24 = vadd.f32 %v20993_v22, %v12504_v47  ;;  %v12503_v21 = vadd.f32 %v12428_v43, %v12073_v46 }
 0x60f   : > { %v16021_v14 = vpop.f32.mrf.mxu0 }
 0x610   : > { %12586 = vst.msk [vmem:[%s19454_s13 + $0xf0] sm:$0xff] %vm471_vm0, %v12547_v24  ;;  %v12546_v26 = vadd.f32 %v20993_v22, %v12503_v21  ;;  %v12506_v2 = vadd.f32 %v16021_v14, %v12076_v41 }
 0x611   : > { %v12438_v45 = vpop.f32.mrf.mxu0 }
 0x612   : > { %12585 = vst.msk [vmem:[%s19454_s13 + $0xe8] sm:$0xff] %vm471_vm0, %v12546_v26  ;;  %v12549_v59 = vadd.f32 %v20993_v22, %v12506_v2  ;;  %v12505_v1 = vadd.f32 %v12438_v45, %v12075_v0 }
 0x613   : > { %v16024_v57 = vpop.f32.mrf.mxu0 }
 0x614   : > { %12588 = vst.msk [vmem:[%s19454_s13 + $0x100] sm:$0xff] %vm471_vm0, %v12549_v59  ;;  %v12548_v34 = vadd.f32 %v20993_v22, %v12505_v1  ;;  %v12508_v63 = vadd.f32 %v16024_v57, %v12078_v25 }
 0x615   : > { %v12448_v60 = vpop.f32.mrf.mxu0 }
 0x616   : > { %12587 = vst.msk [vmem:[%s19454_s13 + $0xf8] sm:$0xff] %vm471_vm0, %v12548_v34  ;;  %v12551_v7 = vadd.f32 %v20993_v22, %v12508_v63  ;;  %v12507_v27 = vadd.f32 %v12448_v60, %v12077_v10 }
 0x617   : > { %v16027_v9 = vpop.f32.mrf.mxu0 }
 0x618   : > { %12590 = vst.msk [vmem:[%s19454_s13 + $0x110] sm:$0xff] %vm471_vm0, %v12551_v7  ;;  %v12550_v42 = vadd.f32 %v20993_v22, %v12507_v27  ;;  %v12510_v29 = vadd.f32 %v16027_v9, %v12080_v36 }
 0x619   : > { %v12458_v23 = vpop.f32.mrf.mxu0 }
 0x61a   : > { %12589 = vst.msk [vmem:[%s19454_s13 + $0x108] sm:$0xff] %vm471_vm0, %v12550_v42  ;;  %v12553_v53 = vadd.f32 %v20993_v22, %v12510_v29  ;;  %v12509_v48 = vadd.f32 %v12458_v23, %v12079_v35 }
 0x61b   : > { %v16030_v3 = vpop.f32.mrf.mxu0 }
 0x61c   : > { %12592 = vst.msk [vmem:[%s19454_s13 + $0x120] sm:$0xff] %vm471_vm0, %v12553_v53  ;;  %v12552_v8 = vadd.f32 %v20993_v22, %v12509_v48  ;;  %v12512_v44 = vadd.f32 %v16030_v3, %v12082_v33 }
 0x61d   : > { %v12468_v20 = vpop.f32.mrf.mxu0 }
 0x61e   : > { %12591 = vst.msk [vmem:[%s19454_s13 + $0x118] sm:$0xff] %vm471_vm0, %v12552_v8  ;;  %v12555_v58 = vadd.f32 %v20993_v22, %v12512_v44  ;;  %v12511_v39 = vadd.f32 %v12468_v20, %v12081_v17 }
 0x620   : > { %12594 = vst.msk [vmem:[%s19454_s13 + $0x130] sm:$0xff] %vm471_vm0, %v12555_v58  ;;  %v12554_v55 = vadd.f32 %v20993_v22, %v12511_v39 }
 0x622   : > { %12593 = vst.msk [vmem:[%s19454_s13 + $0x128] sm:$0xff] %vm471_vm0, %v12554_v55 }
 0x623 PF: > { %s18_s27 = sadd.s32 1, %s16169_s27  }
 0x624   : > { %p15_p4 = scmp.ge.s32.totalorder %s18_s27, 4  }
 0x626   :  { %17 = sbr.rel (!%p15_p4) target bundleno = 1 (0x1), region = 106 }

</bundles_post_ra>
